<compile_context>
chip_gen: v5e
topology: v5e:2x2
jax: 0.10.0
libtpu: 0.0.40
codegen_flags: <defaults>
</compile_context>

<pallas_src>
import functools

import jax
import jax.numpy as jnp
from jax.experimental import pallas as pl
from jax.experimental.pallas import tpu as pltpu

# problem sizes (small but TPU-friendly)
B, P, H, F, DD, S = 8, 128, 32, 5, 2, 128   # spots, pixels/spot, hidden, feat, dxy-dim, mc_samples
F_PAD, DD_PAD = 8, 8                        # pad tiny contraction dims for clean MXU tiles


def _vmem():
    return pl.BlockSpec(memory_space=pltpu.MemorySpace.VMEM)


def _softplus(x):
    return jnp.maximum(x, 0.0) + jnp.log(1.0 + jnp.exp(-jnp.abs(x)))


# --------------------------- fused forward kernel ---------------------------
def fused_integrator_kernel(feat_ref, dxyT_ref, counts_ref, maskf_ref, norm_ref,
                            pool_ref, lfact_ref, eps_ref,
                            w1_ref, b1_ref, w2_ref, b2_ref,
                            wdT_ref, bdc_ref, whead_ref, bhead_ref,
                            loss_ref):
    nb = counts_ref.shape[0]

    # ---- encoder: per-pixel 2-layer MLP -> masked mean pool -> heads -------
    h1 = jnp.maximum(jnp.dot(feat_ref[...], w1_ref[...],
                             preferred_element_type=jnp.float32) + b1_ref[...], 0.0)
    h2 = jnp.maximum(jnp.dot(h1, w2_ref[...],
                             preferred_element_type=jnp.float32) + b2_ref[...], 0.0)
    rep = jnp.dot(pool_ref[...], h2, preferred_element_type=jnp.float32)     # (B, H)
    heads = jnp.dot(rep, whead_ref[...],
                    preferred_element_type=jnp.float32) + bhead_ref[...]     # (B, 3)

    norm = norm_ref[...]                        # (B, 1)  per-spot normalization
    mu = heads[:, 0:1]                          # (B, 1)
    sigma = _softplus(heads[:, 1:2]) + 1e-4     # (B, 1)
    bg = _softplus(heads[:, 2:3]) * norm        # (B, 1)  forward(): bg * norm_factor

    counts = counts_ref[...]
    maskf = maskf_ref[...]
    lfact = lfact_ref[...]
    wdT = wdT_ref[...]                          # (H, DD_PAD)
    bdc = bdc_ref[...]                          # (H, 1)

    ll_sum = jnp.zeros((1, 1), jnp.float32)
    msk_sum = jnp.zeros((1, 1), jnp.float32)
    kl_sum = jnp.zeros((1, 1), jnp.float32)

    # per-spot loop, unrolled (nb = 8): everything stays in vregs/VMEM,
    # pixels on lanes, MC samples on sublanes.
    for b in range(nb):
        # ---- profile: lane-dense logits + masked softmax --------------------
        embT_b = jnp.maximum(
            jnp.dot(wdT, dxyT_ref[b], preferred_element_type=jnp.float32) + bdc, 0.0)  # (H, P)
        logits = jnp.dot(rep[b:b + 1, :], embT_b,
                         preferred_element_type=jnp.float32)                           # (1, P)
        maskf_b = maskf[b:b + 1, :]
        lm = jnp.where(maskf_b > 0.0, logits, -1e30)
        ex = jnp.exp(lm - jnp.max(lm, axis=-1, keepdims=True)) * maskf_b
        q_b = ex * pl.reciprocal(jnp.sum(ex, axis=-1, keepdims=True), approx=True)     # (1, P)

        # ---- likelihood: MC Poisson (samples on sublanes, pixels on lanes) --
        mu_b, sg_b = mu[b:b + 1, :], sigma[b:b + 1, :]
        bg_b, nf_b = bg[b:b + 1, :], norm[b:b + 1, :]
        i_s = _softplus(mu_b + sg_b * eps_ref[b]) * nf_b                                # (S, 1)
        mean_i = jnp.mean(i_s, axis=0, keepdims=True)                                   # (1, 1)
        rate = jnp.maximum(i_s * q_b + bg_b, 1e-30)                                     # (S, P)
        mean_log = jnp.mean(jnp.log(rate), axis=0, keepdims=True)                       # (1, P)
        ll_b = (counts[b:b + 1, :] * mean_log
                - (mean_i * q_b + bg_b)
                - lfact[b:b + 1, :])                                                    # (1, P)
        ll_sum = ll_sum + jnp.sum(jnp.where(maskf_b > 0.0, ll_b, 0.0),
                                  axis=-1, keepdims=True)
        msk_sum = msk_sum + jnp.sum(maskf_b, axis=-1, keepdims=True)

        # ---- KL( N(mu, sigma) || N(0, 1) ), analytic -------------------------
        kl_sum = kl_sum + 0.5 * (sg_b * sg_b + mu_b * mu_b - 1.0) - jnp.log(sg_b)

    nll = -ll_sum / jnp.maximum(msk_sum, 1.0)
    loss_ref[...] = nll + kl_sum * (1.0 / nb)


# ------------------------------ wrapper --------------------------------------
@functools.partial(jax.jit, static_argnames=("mc_samples",))
def integrator_forward(xy, dxy, counts, mask, params, sample_key, mc_samples=S):
    nb, npix = counts.shape
    maskf = mask.astype(jnp.float32)
    mask_sum = jnp.maximum(maskf.sum(-1, keepdims=True), 1.0)   # guard all-masked spots

    # Integrator.get_per_spot_normalization (mask provided)
    norm = counts.sum(-1, keepdims=True) / mask_sum              # (B, 1)
    counts_n = counts / norm

    # per-pixel features [xy, dxy, counts/norm], zero-padded to F_PAD lanes
    feat = jnp.concatenate([xy, dxy, counts_n[..., None]], axis=-1)          # (B, P, F)
    feat8 = jnp.pad(feat, ((0, 0), (0, 0), (0, F_PAD - F))).reshape(nb * npix, F_PAD)

    # dxy transposed per spot so the profile path is computed lane-dense (P on lanes)
    dxyT = jnp.transpose(jnp.pad(dxy, ((0, 0), (0, 0), (0, DD_PAD - DD))), (0, 2, 1))

    # block-diagonal masked-mean pooling matrix (B, B*P)
    pool_w = (jnp.eye(nb, dtype=jnp.float32)[:, :, None]
              * (maskf / mask_sum)[None, :, :]).reshape(nb, nb * npix)

    log_fact = jax.lax.lgamma(counts + 1.0)                      # constant Poisson term
    # column-oriented eps so (S,1)*(1,P) broadcasting needs no in-kernel relayout
    eps = jax.random.normal(sample_key, (nb, mc_samples, 1), dtype=jnp.float32)

    loss = pl.pallas_call(
        fused_integrator_kernel,
        out_shape=jax.ShapeDtypeStruct((1, 1), jnp.float32),
        in_specs=[_vmem()] * 16,
        out_specs=_vmem(),
    )(feat8, dxyT, counts, maskf, norm, pool_w, log_fact, eps,
      params["w1"], params["b1"], params["w2"], params["b2"],
      params["wdT"], params["bd_col"], params["w_head"], params["b_head"])
    return loss[0, 0]


def init_params(key):
    ks = jax.random.split(key, 5)

    def lin(k, fan_in, fan_out):
        return jax.random.normal(k, (fan_in, fan_out), jnp.float32) / jnp.sqrt(float(fan_in))

    w1 = jnp.pad(lin(ks[0], F, H), ((0, F_PAD - F), (0, 0)))     # (F_PAD, H)
    w2 = lin(ks[1], H, H)
    wh = lin(ks[2], H, 2)                                        # [mu, sigma_raw] heads
    wd = lin(ks[3], DD, H)                                       # dxy-embedding weight
    wbg = lin(ks[4], H, 1)                                       # background head

    return {
        "w1": w1, "b1": jnp.zeros((1, H), jnp.float32),
        "w2": w2, "b2": jnp.zeros((1, H), jnp.float32),
        # transposed + padded so emb is computed lane-dense (pixels on lanes)
        "wdT": jnp.pad(wd, ((0, DD_PAD - DD), (0, 0))).T,        # (H, DD_PAD)
        "bd_col": jnp.zeros((H, 1), jnp.float32),
        # merged posterior + background heads: cols = [mu, sigma_raw, bg_raw]
        "w_head": jnp.concatenate([wh, wbg], axis=1),            # (H, 3)
        "b_head": jnp.zeros((1, 3), jnp.float32),
    }


# TODO(synk): get_intensity_sigma / grad_norm / set_counts_std are host-side
# utilities (numpy batching loop, torch autograd, parameter registration) with
# no kernel equivalent; only forward() is implemented.

if __name__ == "__main__":
    key = jax.random.PRNGKey(0)
    kp, kx, kd, kc, km, ksamp = jax.random.split(key, 6)
    params = init_params(kp)

    xy = jax.random.normal(kx, (B, P, 2), dtype=jnp.float32)
    dxy = jax.random.normal(kd, (B, P, DD), dtype=jnp.float32)
    counts = jax.random.poisson(kc, 5.0, (B, P)).astype(jnp.float32)
    mask = jax.random.bernoulli(km, 0.9, (B, P))
    mask = mask.at[:, 0].set(True)   # ensure every spot has at least one valid pixel

    loss = integrator_forward(xy, dxy, counts, mask, params, ksamp)
    loss = jax.block_until_ready(loss)
    assert bool(jnp.isfinite(loss))
    print("KERNEL_OK")
</pallas_src>

<mosaic_0001>
module attributes {stable_mosaic.version = 11 : i64} {
  func.func @fused_integrator_kernel(%arg0: memref<1024x8xf32, #tpu.memory_space<vmem>>, %arg1: memref<8x8x128xf32, #tpu.memory_space<vmem>>, %arg2: memref<8x128xf32, #tpu.memory_space<vmem>>, %arg3: memref<8x128xf32, #tpu.memory_space<vmem>>, %arg4: memref<8x1xf32, #tpu.memory_space<vmem>>, %arg5: memref<8x1024xf32, #tpu.memory_space<vmem>>, %arg6: memref<8x128xf32, #tpu.memory_space<vmem>>, %arg7: memref<8x128x1xf32, #tpu.memory_space<vmem>>, %arg8: memref<8x32xf32, #tpu.memory_space<vmem>>, %arg9: memref<1x32xf32, #tpu.memory_space<vmem>>, %arg10: memref<32x32xf32, #tpu.memory_space<vmem>>, %arg11: memref<1x32xf32, #tpu.memory_space<vmem>>, %arg12: memref<32x8xf32, #tpu.memory_space<vmem>>, %arg13: memref<32x1xf32, #tpu.memory_space<vmem>>, %arg14: memref<32x3xf32, #tpu.memory_space<vmem>>, %arg15: memref<1x3xf32, #tpu.memory_space<vmem>>, %arg16: memref<1x1xf32, #tpu.memory_space<vmem>>) attributes {dimension_semantics = [], scalar_prefetch = 0 : i64, scratch_operands = 0 : i64, tpu.core_type = #tpu.core_type<tc>} {
    %c0 = arith.constant 0 : index
    %c0_0 = arith.constant 0 : index
    %0 = vector.load %arg0[%c0, %c0_0] : memref<1024x8xf32, #tpu.memory_space<vmem>>, vector<1024x8xf32>
    %c0_1 = arith.constant 0 : index
    %c0_2 = arith.constant 0 : index
    %1 = vector.load %arg8[%c0_1, %c0_2] : memref<8x32xf32, #tpu.memory_space<vmem>>, vector<8x32xf32>
    %cst = arith.constant dense<0.000000e+00> : vector<1024x32xf32>
    %2 = tpu.matmul %0, %1, %cst {dimension_numbers = #tpu.dot_dimension_numbers<[1], [0], [0], [1], [0, 0, 1, 1], [], []>} : vector<1024x8xf32>, vector<8x32xf32>, vector<1024x32xf32> -> vector<1024x32xf32>
    %c0_3 = arith.constant 0 : index
    %c0_4 = arith.constant 0 : index
    %3 = vector.load %arg9[%c0_3, %c0_4] : memref<1x32xf32, #tpu.memory_space<vmem>>, vector<1x32xf32>
    %4 = vector.broadcast %3 : vector<1x32xf32> to vector<1024x32xf32>
    %5 = arith.addf %2, %4 : vector<1024x32xf32>
    %cst_5 = arith.constant 0.000000e+00 : f32
    %6 = vector.broadcast %cst_5 : f32 to vector<1024x32xf32>
    %7 = arith.maximumf %5, %6 : vector<1024x32xf32>
    %c0_6 = arith.constant 0 : index
    %c0_7 = arith.constant 0 : index
    %8 = vector.load %arg10[%c0_6, %c0_7] : memref<32x32xf32, #tpu.memory_space<vmem>>, vector<32x32xf32>
    %cst_8 = arith.constant dense<0.000000e+00> : vector<1024x32xf32>
    %9 = tpu.matmul %7, %8, %cst_8 {dimension_numbers = #tpu.dot_dimension_numbers<[1], [0], [0], [1], [0, 0, 1, 1], [], []>} : vector<1024x32xf32>, vector<32x32xf32>, vector<1024x32xf32> -> vector<1024x32xf32>
    %c0_9 = arith.constant 0 : index
    %c0_10 = arith.constant 0 : index
    %10 = vector.load %arg11[%c0_9, %c0_10] : memref<1x32xf32, #tpu.memory_space<vmem>>, vector<1x32xf32>
    %11 = vector.broadcast %10 : vector<1x32xf32> to vector<1024x32xf32>
    %12 = arith.addf %9, %11 : vector<1024x32xf32>
    %cst_11 = arith.constant 0.000000e+00 : f32
    %13 = vector.broadcast %cst_11 : f32 to vector<1024x32xf32>
    %14 = arith.maximumf %12, %13 : vector<1024x32xf32>
    %c0_12 = arith.constant 0 : index
    %c0_13 = arith.constant 0 : index
    %15 = vector.load %arg5[%c0_12, %c0_13] : memref<8x1024xf32, #tpu.memory_space<vmem>>, vector<8x1024xf32>
    %cst_14 = arith.constant dense<0.000000e+00> : vector<8x32xf32>
    %16 = tpu.matmul %15, %14, %cst_14 {dimension_numbers = #tpu.dot_dimension_numbers<[1], [0], [0], [1], [0, 0, 1, 1], [], []>} : vector<8x1024xf32>, vector<1024x32xf32>, vector<8x32xf32> -> vector<8x32xf32>
    %c0_15 = arith.constant 0 : index
    %c0_16 = arith.constant 0 : index
    %17 = vector.load %arg14[%c0_15, %c0_16] : memref<32x3xf32, #tpu.memory_space<vmem>>, vector<32x3xf32>
    %cst_17 = arith.constant dense<0.000000e+00> : vector<8x3xf32>
    %18 = tpu.matmul %16, %17, %cst_17 {dimension_numbers = #tpu.dot_dimension_numbers<[1], [0], [0], [1], [0, 0, 1, 1], [], []>} : vector<8x32xf32>, vector<32x3xf32>, vector<8x3xf32> -> vector<8x3xf32>
    %c0_18 = arith.constant 0 : index
    %c0_19 = arith.constant 0 : index
    %19 = vector.load %arg15[%c0_18, %c0_19] : memref<1x3xf32, #tpu.memory_space<vmem>>, vector<1x3xf32>
    %20 = vector.broadcast %19 : vector<1x3xf32> to vector<8x3xf32>
    %21 = arith.addf %18, %20 : vector<8x3xf32>
    %c0_20 = arith.constant 0 : index
    %c0_21 = arith.constant 0 : index
    %22 = vector.load %arg4[%c0_20, %c0_21] : memref<8x1xf32, #tpu.memory_space<vmem>>, vector<8x1xf32>
    %23 = vector.extract_strided_slice %21 {offsets = [0, 0], sizes = [8, 1], strides = [1, 1]} : vector<8x3xf32> to vector<8x1xf32>
    %24 = vector.extract_strided_slice %21 {offsets = [0, 1], sizes = [8, 1], strides = [1, 1]} : vector<8x3xf32> to vector<8x1xf32>
    %cst_22 = arith.constant 0.000000e+00 : f32
    %25 = vector.broadcast %cst_22 : f32 to vector<8x1xf32>
    %26 = arith.maximumf %24, %25 : vector<8x1xf32>
    %27 = math.absf %24 : vector<8x1xf32>
    %cst_23 = arith.constant 0.000000e+00 : f32
    %28 = vector.broadcast %cst_23 : f32 to vector<8x1xf32>
    %29 = arith.subf %28, %27 : vector<8x1xf32>
    %30 = math.exp %29 : vector<8x1xf32>
    %cst_24 = arith.constant 1.000000e+00 : f32
    %31 = vector.broadcast %cst_24 : f32 to vector<8x1xf32>
    %32 = arith.addf %31, %30 : vector<8x1xf32>
    %33 = math.log %32 : vector<8x1xf32>
    %34 = arith.addf %26, %33 : vector<8x1xf32>
    %cst_25 = arith.constant 9.99999974E-5 : f32
    %35 = vector.broadcast %cst_25 : f32 to vector<8x1xf32>
    %36 = arith.addf %34, %35 : vector<8x1xf32>
    %37 = vector.extract_strided_slice %21 {offsets = [0, 2], sizes = [8, 1], strides = [1, 1]} : vector<8x3xf32> to vector<8x1xf32>
    %cst_26 = arith.constant 0.000000e+00 : f32
    %38 = vector.broadcast %cst_26 : f32 to vector<8x1xf32>
    %39 = arith.maximumf %37, %38 : vector<8x1xf32>
    %40 = math.absf %37 : vector<8x1xf32>
    %cst_27 = arith.constant 0.000000e+00 : f32
    %41 = vector.broadcast %cst_27 : f32 to vector<8x1xf32>
    %42 = arith.subf %41, %40 : vector<8x1xf32>
    %43 = math.exp %42 : vector<8x1xf32>
    %cst_28 = arith.constant 1.000000e+00 : f32
    %44 = vector.broadcast %cst_28 : f32 to vector<8x1xf32>
    %45 = arith.addf %44, %43 : vector<8x1xf32>
    %46 = math.log %45 : vector<8x1xf32>
    %47 = arith.addf %39, %46 : vector<8x1xf32>
    %48 = arith.mulf %47, %22 : vector<8x1xf32>
    %c0_29 = arith.constant 0 : index
    %c0_30 = arith.constant 0 : index
    %49 = vector.load %arg2[%c0_29, %c0_30] : memref<8x128xf32, #tpu.memory_space<vmem>>, vector<8x128xf32>
    %c0_31 = arith.constant 0 : index
    %c0_32 = arith.constant 0 : index
    %50 = vector.load %arg3[%c0_31, %c0_32] : memref<8x128xf32, #tpu.memory_space<vmem>>, vector<8x128xf32>
    %c0_33 = arith.constant 0 : index
    %c0_34 = arith.constant 0 : index
    %51 = vector.load %arg6[%c0_33, %c0_34] : memref<8x128xf32, #tpu.memory_space<vmem>>, vector<8x128xf32>
    %c0_35 = arith.constant 0 : index
    %c0_36 = arith.constant 0 : index
    %52 = vector.load %arg12[%c0_35, %c0_36] : memref<32x8xf32, #tpu.memory_space<vmem>>, vector<32x8xf32>
    %c0_37 = arith.constant 0 : index
    %c0_38 = arith.constant 0 : index
    %53 = vector.load %arg13[%c0_37, %c0_38] : memref<32x1xf32, #tpu.memory_space<vmem>>, vector<32x1xf32>
    %cst_39 = arith.constant 0.000000e+00 : f32
    %54 = vector.broadcast %cst_39 : f32 to vector<1x1xf32>
    %cst_40 = arith.constant 0.000000e+00 : f32
    %55 = vector.broadcast %cst_40 : f32 to vector<1x1xf32>
    %cst_41 = arith.constant 0.000000e+00 : f32
    %56 = vector.broadcast %cst_41 : f32 to vector<1x1xf32>
    %c0_42 = arith.constant 0 : index
    %c0_43 = arith.constant 0 : index
    %c0_44 = arith.constant 0 : index
    %57 = vector.load %arg1[%c0_42, %c0_43, %c0_44] : memref<8x8x128xf32, #tpu.memory_space<vmem>>, vector<1x8x128xf32>
    %58 = vector.shape_cast %57 : vector<1x8x128xf32> to vector<8x128xf32>
    %cst_45 = arith.constant dense<0.000000e+00> : vector<32x128xf32>
    %59 = tpu.matmul %52, %58, %cst_45 {dimension_numbers = #tpu.dot_dimension_numbers<[1], [0], [0], [1], [0, 0, 1, 1], [], []>} : vector<32x8xf32>, vector<8x128xf32>, vector<32x128xf32> -> vector<32x128xf32>
    %60 = vector.broadcast %53 : vector<32x1xf32> to vector<32x128xf32>
    %61 = arith.addf %59, %60 : vector<32x128xf32>
    %cst_46 = arith.constant 0.000000e+00 : f32
    %62 = vector.broadcast %cst_46 : f32 to vector<32x128xf32>
    %63 = arith.maximumf %61, %62 : vector<32x128xf32>
    %64 = vector.extract_strided_slice %16 {offsets = [0, 0], sizes = [1, 32], strides = [1, 1]} : vector<8x32xf32> to vector<1x32xf32>
    %cst_47 = arith.constant dense<0.000000e+00> : vector<1x128xf32>
    %65 = tpu.matmul %64, %63, %cst_47 {dimension_numbers = #tpu.dot_dimension_numbers<[1], [0], [0], [1], [0, 0, 1, 1], [], []>} : vector<1x32xf32>, vector<32x128xf32>, vector<1x128xf32> -> vector<1x128xf32>
    %66 = vector.extract_strided_slice %50 {offsets = [0, 0], sizes = [1, 128], strides = [1, 1]} : vector<8x128xf32> to vector<1x128xf32>
    %cst_48 = arith.constant 0.000000e+00 : f32
    %67 = vector.broadcast %cst_48 : f32 to vector<1x128xf32>
    %68 = arith.cmpf ogt, %66, %67 : vector<1x128xf32>
    %cst_49 = arith.constant -1.000000e+30 : f32
    %69 = vector.broadcast %cst_49 : f32 to vector<1x128xf32>
    %70 = arith.select %68, %65, %69 : vector<1x128xi1>, vector<1x128xf32>
    %cst_50 = arith.constant dense<0xFF800000> : vector<1xf32>
    %71 = vector.multi_reduction <maximumf>, %70, %cst_50 [1] : vector<1x128xf32> to vector<1xf32>
    %72 = vector.shape_cast %71 : vector<1xf32> to vector<1x1xf32>
    %73 = vector.broadcast %72 : vector<1x1xf32> to vector<1x128xf32>
    %74 = arith.subf %70, %73 : vector<1x128xf32>
    %75 = math.exp %74 : vector<1x128xf32>
    %76 = arith.mulf %75, %66 : vector<1x128xf32>
    %cst_51 = arith.constant dense<0.000000e+00> : vector<1xf32>
    %77 = vector.multi_reduction <add>, %76, %cst_51 [1] : vector<1x128xf32> to vector<1xf32>
    %78 = vector.shape_cast %77 : vector<1xf32> to vector<1x1xf32>
    %79 = tpu.reciprocal %78 {approx = true} : vector<1x1xf32> -> vector<1x1xf32>
    %80 = vector.broadcast %79 : vector<1x1xf32> to vector<1x128xf32>
    %81 = arith.mulf %76, %80 : vector<1x128xf32>
    %82 = vector.extract_strided_slice %23 {offsets = [0, 0], sizes = [1, 1], strides = [1, 1]} : vector<8x1xf32> to vector<1x1xf32>
    %83 = vector.extract_strided_slice %36 {offsets = [0, 0], sizes = [1, 1], strides = [1, 1]} : vector<8x1xf32> to vector<1x1xf32>
    %84 = vector.extract_strided_slice %48 {offsets = [0, 0], sizes = [1, 1], strides = [1, 1]} : vector<8x1xf32> to vector<1x1xf32>
    %85 = vector.extract_strided_slice %22 {offsets = [0, 0], sizes = [1, 1], strides = [1, 1]} : vector<8x1xf32> to vector<1x1xf32>
    %c0_52 = arith.constant 0 : index
    %c0_53 = arith.constant 0 : index
    %c0_54 = arith.constant 0 : index
    %86 = vector.load %arg7[%c0_52, %c0_53, %c0_54] : memref<8x128x1xf32, #tpu.memory_space<vmem>>, vector<1x128x1xf32>
    %87 = vector.shape_cast %86 : vector<1x128x1xf32> to vector<128x1xf32>
    %88 = vector.broadcast %83 : vector<1x1xf32> to vector<128x1xf32>
    %89 = arith.mulf %88, %87 : vector<128x1xf32>
    %90 = vector.broadcast %82 : vector<1x1xf32> to vector<128x1xf32>
    %91 = arith.addf %90, %89 : vector<128x1xf32>
    %cst_55 = arith.constant 0.000000e+00 : f32
    %92 = vector.broadcast %cst_55 : f32 to vector<128x1xf32>
    %93 = arith.maximumf %91, %92 : vector<128x1xf32>
    %94 = math.absf %91 : vector<128x1xf32>
    %cst_56 = arith.constant 0.000000e+00 : f32
    %95 = vector.broadcast %cst_56 : f32 to vector<128x1xf32>
    %96 = arith.subf %95, %94 : vector<128x1xf32>
    %97 = math.exp %96 : vector<128x1xf32>
    %cst_57 = arith.constant 1.000000e+00 : f32
    %98 = vector.broadcast %cst_57 : f32 to vector<128x1xf32>
    %99 = arith.addf %98, %97 : vector<128x1xf32>
    %100 = math.log %99 : vector<128x1xf32>
    %101 = arith.addf %93, %100 : vector<128x1xf32>
    %102 = vector.broadcast %85 : vector<1x1xf32> to vector<128x1xf32>
    %103 = arith.mulf %101, %102 : vector<128x1xf32>
    %cst_58 = arith.constant dense<0.000000e+00> : vector<1xf32>
    %104 = vector.multi_reduction <add>, %103, %cst_58 [0] : vector<128x1xf32> to vector<1xf32>
    %105 = vector.shape_cast %104 : vector<1xf32> to vector<1x1xf32>
    %cst_59 = arith.constant 1.280000e+02 : f32
    %106 = vector.broadcast %cst_59 : f32 to vector<1x1xf32>
    %107 = arith.divf %105, %106 : vector<1x1xf32>
    %108 = vector.broadcast %103 : vector<128x1xf32> to vector<128x128xf32>
    %109 = vector.broadcast %81 : vector<1x128xf32> to vector<128x128xf32>
    %110 = arith.mulf %108, %109 : vector<128x128xf32>
    %111 = vector.broadcast %84 : vector<1x1xf32> to vector<128x128xf32>
    %112 = arith.addf %110, %111 : vector<128x128xf32>
    %cst_60 = arith.constant 1.000000e-30 : f32
    %113 = vector.broadcast %cst_60 : f32 to vector<128x128xf32>
    %114 = arith.maximumf %112, %113 : vector<128x128xf32>
    %115 = math.log %114 : vector<128x128xf32>
    %cst_61 = arith.constant dense<0.000000e+00> : vector<128xf32>
    %116 = vector.multi_reduction <add>, %115, %cst_61 [0] : vector<128x128xf32> to vector<128xf32>
    %117 = vector.shape_cast %116 : vector<128xf32> to vector<1x128xf32>
    %cst_62 = arith.constant 1.280000e+02 : f32
    %118 = vector.broadcast %cst_62 : f32 to vector<1x128xf32>
    %119 = arith.divf %117, %118 : vector<1x128xf32>
    %120 = vector.extract_strided_slice %49 {offsets = [0, 0], sizes = [1, 128], strides = [1, 1]} : vector<8x128xf32> to vector<1x128xf32>
    %121 = arith.mulf %120, %119 : vector<1x128xf32>
    %122 = vector.broadcast %107 : vector<1x1xf32> to vector<1x128xf32>
    %123 = arith.mulf %122, %81 : vector<1x128xf32>
    %124 = vector.broadcast %84 : vector<1x1xf32> to vector<1x128xf32>
    %125 = arith.addf %123, %124 : vector<1x128xf32>
    %126 = arith.subf %121, %125 : vector<1x128xf32>
    %127 = vector.extract_strided_slice %51 {offsets = [0, 0], sizes = [1, 128], strides = [1, 1]} : vector<8x128xf32> to vector<1x128xf32>
    %128 = arith.subf %126, %127 : vector<1x128xf32>
    %cst_63 = arith.constant 0.000000e+00 : f32
    %129 = vector.broadcast %cst_63 : f32 to vector<1x128xf32>
    %130 = arith.cmpf ogt, %66, %129 : vector<1x128xf32>
    %cst_64 = arith.constant 0.000000e+00 : f32
    %131 = vector.broadcast %cst_64 : f32 to vector<1x128xf32>
    %132 = arith.select %130, %128, %131 : vector<1x128xi1>, vector<1x128xf32>
    %cst_65 = arith.constant dense<0.000000e+00> : vector<1xf32>
    %133 = vector.multi_reduction <add>, %132, %cst_65 [1] : vector<1x128xf32> to vector<1xf32>
    %134 = vector.shape_cast %133 : vector<1xf32> to vector<1x1xf32>
    %135 = arith.addf %54, %134 : vector<1x1xf32>
    %cst_66 = arith.constant dense<0.000000e+00> : vector<1xf32>
    %136 = vector.multi_reduction <add>, %66, %cst_66 [1] : vector<1x128xf32> to vector<1xf32>
    %137 = vector.shape_cast %136 : vector<1xf32> to vector<1x1xf32>
    %138 = arith.addf %55, %137 : vector<1x1xf32>
    %139 = arith.mulf %83, %83 : vector<1x1xf32>
    %140 = arith.mulf %82, %82 : vector<1x1xf32>
    %141 = arith.addf %139, %140 : vector<1x1xf32>
    %cst_67 = arith.constant 1.000000e+00 : f32
    %142 = vector.broadcast %cst_67 : f32 to vector<1x1xf32>
    %143 = arith.subf %141, %142 : vector<1x1xf32>
    %cst_68 = arith.constant 5.000000e-01 : f32
    %144 = vector.broadcast %cst_68 : f32 to vector<1x1xf32>
    %145 = arith.mulf %144, %143 : vector<1x1xf32>
    %146 = arith.addf %56, %145 : vector<1x1xf32>
    %147 = math.log %83 : vector<1x1xf32>
    %148 = arith.subf %146, %147 : vector<1x1xf32>
    %c1 = arith.constant 1 : index
    %c0_69 = arith.constant 0 : index
    %c0_70 = arith.constant 0 : index
    %149 = vector.load %arg1[%c1, %c0_69, %c0_70] : memref<8x8x128xf32, #tpu.memory_space<vmem>>, vector<1x8x128xf32>
    %150 = vector.shape_cast %149 : vector<1x8x128xf32> to vector<8x128xf32>
    %cst_71 = arith.constant dense<0.000000e+00> : vector<32x128xf32>
    %151 = tpu.matmul %52, %150, %cst_71 {dimension_numbers = #tpu.dot_dimension_numbers<[1], [0], [0], [1], [0, 0, 1, 1], [], []>} : vector<32x8xf32>, vector<8x128xf32>, vector<32x128xf32> -> vector<32x128xf32>
    %152 = vector.broadcast %53 : vector<32x1xf32> to vector<32x128xf32>
    %153 = arith.addf %151, %152 : vector<32x128xf32>
    %cst_72 = arith.constant 0.000000e+00 : f32
    %154 = vector.broadcast %cst_72 : f32 to vector<32x128xf32>
    %155 = arith.maximumf %153, %154 : vector<32x128xf32>
    %156 = vector.extract_strided_slice %16 {offsets = [1, 0], sizes = [1, 32], strides = [1, 1]} : vector<8x32xf32> to vector<1x32xf32>
    %cst_73 = arith.constant dense<0.000000e+00> : vector<1x128xf32>
    %157 = tpu.matmul %156, %155, %cst_73 {dimension_numbers = #tpu.dot_dimension_numbers<[1], [0], [0], [1], [0, 0, 1, 1], [], []>} : vector<1x32xf32>, vector<32x128xf32>, vector<1x128xf32> -> vector<1x128xf32>
    %158 = vector.extract_strided_slice %50 {offsets = [1, 0], sizes = [1, 128], strides = [1, 1]} : vector<8x128xf32> to vector<1x128xf32>
    %cst_74 = arith.constant 0.000000e+00 : f32
    %159 = vector.broadcast %cst_74 : f32 to vector<1x128xf32>
    %160 = arith.cmpf ogt, %158, %159 : vector<1x128xf32>
    %cst_75 = arith.constant -1.000000e+30 : f32
    %161 = vector.broadcast %cst_75 : f32 to vector<1x128xf32>
    %162 = arith.select %160, %157, %161 : vector<1x128xi1>, vector<1x128xf32>
    %cst_76 = arith.constant dense<0xFF800000> : vector<1xf32>
    %163 = vector.multi_reduction <maximumf>, %162, %cst_76 [1] : vector<1x128xf32> to vector<1xf32>
    %164 = vector.shape_cast %163 : vector<1xf32> to vector<1x1xf32>
    %165 = vector.broadcast %164 : vector<1x1xf32> to vector<1x128xf32>
    %166 = arith.subf %162, %165 : vector<1x128xf32>
    %167 = math.exp %166 : vector<1x128xf32>
    %168 = arith.mulf %167, %158 : vector<1x128xf32>
    %cst_77 = arith.constant dense<0.000000e+00> : vector<1xf32>
    %169 = vector.multi_reduction <add>, %168, %cst_77 [1] : vector<1x128xf32> to vector<1xf32>
    %170 = vector.shape_cast %169 : vector<1xf32> to vector<1x1xf32>
    %171 = tpu.reciprocal %170 {approx = true} : vector<1x1xf32> -> vector<1x1xf32>
    %172 = vector.broadcast %171 : vector<1x1xf32> to vector<1x128xf32>
    %173 = arith.mulf %168, %172 : vector<1x128xf32>
    %174 = vector.extract_strided_slice %23 {offsets = [1, 0], sizes = [1, 1], strides = [1, 1]} : vector<8x1xf32> to vector<1x1xf32>
    %175 = vector.extract_strided_slice %36 {offsets = [1, 0], sizes = [1, 1], strides = [1, 1]} : vector<8x1xf32> to vector<1x1xf32>
    %176 = vector.extract_strided_slice %48 {offsets = [1, 0], sizes = [1, 1], strides = [1, 1]} : vector<8x1xf32> to vector<1x1xf32>
    %177 = vector.extract_strided_slice %22 {offsets = [1, 0], sizes = [1, 1], strides = [1, 1]} : vector<8x1xf32> to vector<1x1xf32>
    %c1_78 = arith.constant 1 : index
    %c0_79 = arith.constant 0 : index
    %c0_80 = arith.constant 0 : index
    %178 = vector.load %arg7[%c1_78, %c0_79, %c0_80] : memref<8x128x1xf32, #tpu.memory_space<vmem>>, vector<1x128x1xf32>
    %179 = vector.shape_cast %178 : vector<1x128x1xf32> to vector<128x1xf32>
    %180 = vector.broadcast %175 : vector<1x1xf32> to vector<128x1xf32>
    %181 = arith.mulf %180, %179 : vector<128x1xf32>
    %182 = vector.broadcast %174 : vector<1x1xf32> to vector<128x1xf32>
    %183 = arith.addf %182, %181 : vector<128x1xf32>
    %cst_81 = arith.constant 0.000000e+00 : f32
    %184 = vector.broadcast %cst_81 : f32 to vector<128x1xf32>
    %185 = arith.maximumf %183, %184 : vector<128x1xf32>
    %186 = math.absf %183 : vector<128x1xf32>
    %cst_82 = arith.constant 0.000000e+00 : f32
    %187 = vector.broadcast %cst_82 : f32 to vector<128x1xf32>
    %188 = arith.subf %187, %186 : vector<128x1xf32>
    %189 = math.exp %188 : vector<128x1xf32>
    %cst_83 = arith.constant 1.000000e+00 : f32
    %190 = vector.broadcast %cst_83 : f32 to vector<128x1xf32>
    %191 = arith.addf %190, %189 : vector<128x1xf32>
    %192 = math.log %191 : vector<128x1xf32>
    %193 = arith.addf %185, %192 : vector<128x1xf32>
    %194 = vector.broadcast %177 : vector<1x1xf32> to vector<128x1xf32>
    %195 = arith.mulf %193, %194 : vector<128x1xf32>
    %cst_84 = arith.constant dense<0.000000e+00> : vector<1xf32>
    %196 = vector.multi_reduction <add>, %195, %cst_84 [0] : vector<128x1xf32> to vector<1xf32>
    %197 = vector.shape_cast %196 : vector<1xf32> to vector<1x1xf32>
    %cst_85 = arith.constant 1.280000e+02 : f32
    %198 = vector.broadcast %cst_85 : f32 to vector<1x1xf32>
    %199 = arith.divf %197, %198 : vector<1x1xf32>
    %200 = vector.broadcast %195 : vector<128x1xf32> to vector<128x128xf32>
    %201 = vector.broadcast %173 : vector<1x128xf32> to vector<128x128xf32>
    %202 = arith.mulf %200, %201 : vector<128x128xf32>
    %203 = vector.broadcast %176 : vector<1x1xf32> to vector<128x128xf32>
    %204 = arith.addf %202, %203 : vector<128x128xf32>
    %cst_86 = arith.constant 1.000000e-30 : f32
    %205 = vector.broadcast %cst_86 : f32 to vector<128x128xf32>
    %206 = arith.maximumf %204, %205 : vector<128x128xf32>
    %207 = math.log %206 : vector<128x128xf32>
    %cst_87 = arith.constant dense<0.000000e+00> : vector<128xf32>
    %208 = vector.multi_reduction <add>, %207, %cst_87 [0] : vector<128x128xf32> to vector<128xf32>
    %209 = vector.shape_cast %208 : vector<128xf32> to vector<1x128xf32>
    %cst_88 = arith.constant 1.280000e+02 : f32
    %210 = vector.broadcast %cst_88 : f32 to vector<1x128xf32>
    %211 = arith.divf %209, %210 : vector<1x128xf32>
    %212 = vector.extract_strided_slice %49 {offsets = [1, 0], sizes = [1, 128], strides = [1, 1]} : vector<8x128xf32> to vector<1x128xf32>
    %213 = arith.mulf %212, %211 : vector<1x128xf32>
    %214 = vector.broadcast %199 : vector<1x1xf32> to vector<1x128xf32>
    %215 = arith.mulf %214, %173 : vector<1x128xf32>
    %216 = vector.broadcast %176 : vector<1x1xf32> to vector<1x128xf32>
    %217 = arith.addf %215, %216 : vector<1x128xf32>
    %218 = arith.subf %213, %217 : vector<1x128xf32>
    %219 = vector.extract_strided_slice %51 {offsets = [1, 0], sizes = [1, 128], strides = [1, 1]} : vector<8x128xf32> to vector<1x128xf32>
    %220 = arith.subf %218, %219 : vector<1x128xf32>
    %cst_89 = arith.constant 0.000000e+00 : f32
    %221 = vector.broadcast %cst_89 : f32 to vector<1x128xf32>
    %222 = arith.cmpf ogt, %158, %221 : vector<1x128xf32>
    %cst_90 = arith.constant 0.000000e+00 : f32
    %223 = vector.broadcast %cst_90 : f32 to vector<1x128xf32>
    %224 = arith.select %222, %220, %223 : vector<1x128xi1>, vector<1x128xf32>
    %cst_91 = arith.constant dense<0.000000e+00> : vector<1xf32>
    %225 = vector.multi_reduction <add>, %224, %cst_91 [1] : vector<1x128xf32> to vector<1xf32>
    %226 = vector.shape_cast %225 : vector<1xf32> to vector<1x1xf32>
    %227 = arith.addf %135, %226 : vector<1x1xf32>
    %cst_92 = arith.constant dense<0.000000e+00> : vector<1xf32>
    %228 = vector.multi_reduction <add>, %158, %cst_92 [1] : vector<1x128xf32> to vector<1xf32>
    %229 = vector.shape_cast %228 : vector<1xf32> to vector<1x1xf32>
    %230 = arith.addf %138, %229 : vector<1x1xf32>
    %231 = arith.mulf %175, %175 : vector<1x1xf32>
    %232 = arith.mulf %174, %174 : vector<1x1xf32>
    %233 = arith.addf %231, %232 : vector<1x1xf32>
    %cst_93 = arith.constant 1.000000e+00 : f32
    %234 = vector.broadcast %cst_93 : f32 to vector<1x1xf32>
    %235 = arith.subf %233, %234 : vector<1x1xf32>
    %cst_94 = arith.constant 5.000000e-01 : f32
    %236 = vector.broadcast %cst_94 : f32 to vector<1x1xf32>
    %237 = arith.mulf %236, %235 : vector<1x1xf32>
    %238 = arith.addf %148, %237 : vector<1x1xf32>
    %239 = math.log %175 : vector<1x1xf32>
    %240 = arith.subf %238, %239 : vector<1x1xf32>
    %c2 = arith.constant 2 : index
    %c0_95 = arith.constant 0 : index
    %c0_96 = arith.constant 0 : index
    %241 = vector.load %arg1[%c2, %c0_95, %c0_96] : memref<8x8x128xf32, #tpu.memory_space<vmem>>, vector<1x8x128xf32>
    %242 = vector.shape_cast %241 : vector<1x8x128xf32> to vector<8x128xf32>
    %cst_97 = arith.constant dense<0.000000e+00> : vector<32x128xf32>
    %243 = tpu.matmul %52, %242, %cst_97 {dimension_numbers = #tpu.dot_dimension_numbers<[1], [0], [0], [1], [0, 0, 1, 1], [], []>} : vector<32x8xf32>, vector<8x128xf32>, vector<32x128xf32> -> vector<32x128xf32>
    %244 = vector.broadcast %53 : vector<32x1xf32> to vector<32x128xf32>
    %245 = arith.addf %243, %244 : vector<32x128xf32>
    %cst_98 = arith.constant 0.000000e+00 : f32
    %246 = vector.broadcast %cst_98 : f32 to vector<32x128xf32>
    %247 = arith.maximumf %245, %246 : vector<32x128xf32>
    %248 = vector.extract_strided_slice %16 {offsets = [2, 0], sizes = [1, 32], strides = [1, 1]} : vector<8x32xf32> to vector<1x32xf32>
    %cst_99 = arith.constant dense<0.000000e+00> : vector<1x128xf32>
    %249 = tpu.matmul %248, %247, %cst_99 {dimension_numbers = #tpu.dot_dimension_numbers<[1], [0], [0], [1], [0, 0, 1, 1], [], []>} : vector<1x32xf32>, vector<32x128xf32>, vector<1x128xf32> -> vector<1x128xf32>
    %250 = vector.extract_strided_slice %50 {offsets = [2, 0], sizes = [1, 128], strides = [1, 1]} : vector<8x128xf32> to vector<1x128xf32>
    %cst_100 = arith.constant 0.000000e+00 : f32
    %251 = vector.broadcast %cst_100 : f32 to vector<1x128xf32>
    %252 = arith.cmpf ogt, %250, %251 : vector<1x128xf32>
    %cst_101 = arith.constant -1.000000e+30 : f32
    %253 = vector.broadcast %cst_101 : f32 to vector<1x128xf32>
    %254 = arith.select %252, %249, %253 : vector<1x128xi1>, vector<1x128xf32>
    %cst_102 = arith.constant dense<0xFF800000> : vector<1xf32>
    %255 = vector.multi_reduction <maximumf>, %254, %cst_102 [1] : vector<1x128xf32> to vector<1xf32>
    %256 = vector.shape_cast %255 : vector<1xf32> to vector<1x1xf32>
    %257 = vector.broadcast %256 : vector<1x1xf32> to vector<1x128xf32>
    %258 = arith.subf %254, %257 : vector<1x128xf32>
    %259 = math.exp %258 : vector<1x128xf32>
    %260 = arith.mulf %259, %250 : vector<1x128xf32>
    %cst_103 = arith.constant dense<0.000000e+00> : vector<1xf32>
    %261 = vector.multi_reduction <add>, %260, %cst_103 [1] : vector<1x128xf32> to vector<1xf32>
    %262 = vector.shape_cast %261 : vector<1xf32> to vector<1x1xf32>
    %263 = tpu.reciprocal %262 {approx = true} : vector<1x1xf32> -> vector<1x1xf32>
    %264 = vector.broadcast %263 : vector<1x1xf32> to vector<1x128xf32>
    %265 = arith.mulf %260, %264 : vector<1x128xf32>
    %266 = vector.extract_strided_slice %23 {offsets = [2, 0], sizes = [1, 1], strides = [1, 1]} : vector<8x1xf32> to vector<1x1xf32>
    %267 = vector.extract_strided_slice %36 {offsets = [2, 0], sizes = [1, 1], strides = [1, 1]} : vector<8x1xf32> to vector<1x1xf32>
    %268 = vector.extract_strided_slice %48 {offsets = [2, 0], sizes = [1, 1], strides = [1, 1]} : vector<8x1xf32> to vector<1x1xf32>
    %269 = vector.extract_strided_slice %22 {offsets = [2, 0], sizes = [1, 1], strides = [1, 1]} : vector<8x1xf32> to vector<1x1xf32>
    %c2_104 = arith.constant 2 : index
    %c0_105 = arith.constant 0 : index
    %c0_106 = arith.constant 0 : index
    %270 = vector.load %arg7[%c2_104, %c0_105, %c0_106] : memref<8x128x1xf32, #tpu.memory_space<vmem>>, vector<1x128x1xf32>
    %271 = vector.shape_cast %270 : vector<1x128x1xf32> to vector<128x1xf32>
    %272 = vector.broadcast %267 : vector<1x1xf32> to vector<128x1xf32>
    %273 = arith.mulf %272, %271 : vector<128x1xf32>
    %274 = vector.broadcast %266 : vector<1x1xf32> to vector<128x1xf32>
    %275 = arith.addf %274, %273 : vector<128x1xf32>
    %cst_107 = arith.constant 0.000000e+00 : f32
    %276 = vector.broadcast %cst_107 : f32 to vector<128x1xf32>
    %277 = arith.maximumf %275, %276 : vector<128x1xf32>
    %278 = math.absf %275 : vector<128x1xf32>
    %cst_108 = arith.constant 0.000000e+00 : f32
    %279 = vector.broadcast %cst_108 : f32 to vector<128x1xf32>
    %280 = arith.subf %279, %278 : vector<128x1xf32>
    %281 = math.exp %280 : vector<128x1xf32>
    %cst_109 = arith.constant 1.000000e+00 : f32
    %282 = vector.broadcast %cst_109 : f32 to vector<128x1xf32>
    %283 = arith.addf %282, %281 : vector<128x1xf32>
    %284 = math.log %283 : vector<128x1xf32>
    %285 = arith.addf %277, %284 : vector<128x1xf32>
    %286 = vector.broadcast %269 : vector<1x1xf32> to vector<128x1xf32>
    %287 = arith.mulf %285, %286 : vector<128x1xf32>
    %cst_110 = arith.constant dense<0.000000e+00> : vector<1xf32>
    %288 = vector.multi_reduction <add>, %287, %cst_110 [0] : vector<128x1xf32> to vector<1xf32>
    %289 = vector.shape_cast %288 : vector<1xf32> to vector<1x1xf32>
    %cst_111 = arith.constant 1.280000e+02 : f32
    %290 = vector.broadcast %cst_111 : f32 to vector<1x1xf32>
    %291 = arith.divf %289, %290 : vector<1x1xf32>
    %292 = vector.broadcast %287 : vector<128x1xf32> to vector<128x128xf32>
    %293 = vector.broadcast %265 : vector<1x128xf32> to vector<128x128xf32>
    %294 = arith.mulf %292, %293 : vector<128x128xf32>
    %295 = vector.broadcast %268 : vector<1x1xf32> to vector<128x128xf32>
    %296 = arith.addf %294, %295 : vector<128x128xf32>
    %cst_112 = arith.constant 1.000000e-30 : f32
    %297 = vector.broadcast %cst_112 : f32 to vector<128x128xf32>
    %298 = arith.maximumf %296, %297 : vector<128x128xf32>
    %299 = math.log %298 : vector<128x128xf32>
    %cst_113 = arith.constant dense<0.000000e+00> : vector<128xf32>
    %300 = vector.multi_reduction <add>, %299, %cst_113 [0] : vector<128x128xf32> to vector<128xf32>
    %301 = vector.shape_cast %300 : vector<128xf32> to vector<1x128xf32>
    %cst_114 = arith.constant 1.280000e+02 : f32
    %302 = vector.broadcast %cst_114 : f32 to vector<1x128xf32>
    %303 = arith.divf %301, %302 : vector<1x128xf32>
    %304 = vector.extract_strided_slice %49 {offsets = [2, 0], sizes = [1, 128], strides = [1, 1]} : vector<8x128xf32> to vector<1x128xf32>
    %305 = arith.mulf %304, %303 : vector<1x128xf32>
    %306 = vector.broadcast %291 : vector<1x1xf32> to vector<1x128xf32>
    %307 = arith.mulf %306, %265 : vector<1x128xf32>
    %308 = vector.broadcast %268 : vector<1x1xf32> to vector<1x128xf32>
    %309 = arith.addf %307, %308 : vector<1x128xf32>
    %310 = arith.subf %305, %309 : vector<1x128xf32>
    %311 = vector.extract_strided_slice %51 {offsets = [2, 0], sizes = [1, 128], strides = [1, 1]} : vector<8x128xf32> to vector<1x128xf32>
    %312 = arith.subf %310, %311 : vector<1x128xf32>
    %cst_115 = arith.constant 0.000000e+00 : f32
    %313 = vector.broadcast %cst_115 : f32 to vector<1x128xf32>
    %314 = arith.cmpf ogt, %250, %313 : vector<1x128xf32>
    %cst_116 = arith.constant 0.000000e+00 : f32
    %315 = vector.broadcast %cst_116 : f32 to vector<1x128xf32>
    %316 = arith.select %314, %312, %315 : vector<1x128xi1>, vector<1x128xf32>
    %cst_117 = arith.constant dense<0.000000e+00> : vector<1xf32>
    %317 = vector.multi_reduction <add>, %316, %cst_117 [1] : vector<1x128xf32> to vector<1xf32>
    %318 = vector.shape_cast %317 : vector<1xf32> to vector<1x1xf32>
    %319 = arith.addf %227, %318 : vector<1x1xf32>
    %cst_118 = arith.constant dense<0.000000e+00> : vector<1xf32>
    %320 = vector.multi_reduction <add>, %250, %cst_118 [1] : vector<1x128xf32> to vector<1xf32>
    %321 = vector.shape_cast %320 : vector<1xf32> to vector<1x1xf32>
    %322 = arith.addf %230, %321 : vector<1x1xf32>
    %323 = arith.mulf %267, %267 : vector<1x1xf32>
    %324 = arith.mulf %266, %266 : vector<1x1xf32>
    %325 = arith.addf %323, %324 : vector<1x1xf32>
    %cst_119 = arith.constant 1.000000e+00 : f32
    %326 = vector.broadcast %cst_119 : f32 to vector<1x1xf32>
    %327 = arith.subf %325, %326 : vector<1x1xf32>
    %cst_120 = arith.constant 5.000000e-01 : f32
    %328 = vector.broadcast %cst_120 : f32 to vector<1x1xf32>
    %329 = arith.mulf %328, %327 : vector<1x1xf32>
    %330 = arith.addf %240, %329 : vector<1x1xf32>
    %331 = math.log %267 : vector<1x1xf32>
    %332 = arith.subf %330, %331 : vector<1x1xf32>
    %c3 = arith.constant 3 : index
    %c0_121 = arith.constant 0 : index
    %c0_122 = arith.constant 0 : index
    %333 = vector.load %arg1[%c3, %c0_121, %c0_122] : memref<8x8x128xf32, #tpu.memory_space<vmem>>, vector<1x8x128xf32>
    %334 = vector.shape_cast %333 : vector<1x8x128xf32> to vector<8x128xf32>
    %cst_123 = arith.constant dense<0.000000e+00> : vector<32x128xf32>
    %335 = tpu.matmul %52, %334, %cst_123 {dimension_numbers = #tpu.dot_dimension_numbers<[1], [0], [0], [1], [0, 0, 1, 1], [], []>} : vector<32x8xf32>, vector<8x128xf32>, vector<32x128xf32> -> vector<32x128xf32>
    %336 = vector.broadcast %53 : vector<32x1xf32> to vector<32x128xf32>
    %337 = arith.addf %335, %336 : vector<32x128xf32>
    %cst_124 = arith.constant 0.000000e+00 : f32
    %338 = vector.broadcast %cst_124 : f32 to vector<32x128xf32>
    %339 = arith.maximumf %337, %338 : vector<32x128xf32>
    %340 = vector.extract_strided_slice %16 {offsets = [3, 0], sizes = [1, 32], strides = [1, 1]} : vector<8x32xf32> to vector<1x32xf32>
    %cst_125 = arith.constant dense<0.000000e+00> : vector<1x128xf32>
    %341 = tpu.matmul %340, %339, %cst_125 {dimension_numbers = #tpu.dot_dimension_numbers<[1], [0], [0], [1], [0, 0, 1, 1], [], []>} : vector<1x32xf32>, vector<32x128xf32>, vector<1x128xf32> -> vector<1x128xf32>
    %342 = vector.extract_strided_slice %50 {offsets = [3, 0], sizes = [1, 128], strides = [1, 1]} : vector<8x128xf32> to vector<1x128xf32>
    %cst_126 = arith.constant 0.000000e+00 : f32
    %343 = vector.broadcast %cst_126 : f32 to vector<1x128xf32>
    %344 = arith.cmpf ogt, %342, %343 : vector<1x128xf32>
    %cst_127 = arith.constant -1.000000e+30 : f32
    %345 = vector.broadcast %cst_127 : f32 to vector<1x128xf32>
    %346 = arith.select %344, %341, %345 : vector<1x128xi1>, vector<1x128xf32>
    %cst_128 = arith.constant dense<0xFF800000> : vector<1xf32>
    %347 = vector.multi_reduction <maximumf>, %346, %cst_128 [1] : vector<1x128xf32> to vector<1xf32>
    %348 = vector.shape_cast %347 : vector<1xf32> to vector<1x1xf32>
    %349 = vector.broadcast %348 : vector<1x1xf32> to vector<1x128xf32>
    %350 = arith.subf %346, %349 : vector<1x128xf32>
    %351 = math.exp %350 : vector<1x128xf32>
    %352 = arith.mulf %351, %342 : vector<1x128xf32>
    %cst_129 = arith.constant dense<0.000000e+00> : vector<1xf32>
    %353 = vector.multi_reduction <add>, %352, %cst_129 [1] : vector<1x128xf32> to vector<1xf32>
    %354 = vector.shape_cast %353 : vector<1xf32> to vector<1x1xf32>
    %355 = tpu.reciprocal %354 {approx = true} : vector<1x1xf32> -> vector<1x1xf32>
    %356 = vector.broadcast %355 : vector<1x1xf32> to vector<1x128xf32>
    %357 = arith.mulf %352, %356 : vector<1x128xf32>
    %358 = vector.extract_strided_slice %23 {offsets = [3, 0], sizes = [1, 1], strides = [1, 1]} : vector<8x1xf32> to vector<1x1xf32>
    %359 = vector.extract_strided_slice %36 {offsets = [3, 0], sizes = [1, 1], strides = [1, 1]} : vector<8x1xf32> to vector<1x1xf32>
    %360 = vector.extract_strided_slice %48 {offsets = [3, 0], sizes = [1, 1], strides = [1, 1]} : vector<8x1xf32> to vector<1x1xf32>
    %361 = vector.extract_strided_slice %22 {offsets = [3, 0], sizes = [1, 1], strides = [1, 1]} : vector<8x1xf32> to vector<1x1xf32>
    %c3_130 = arith.constant 3 : index
    %c0_131 = arith.constant 0 : index
    %c0_132 = arith.constant 0 : index
    %362 = vector.load %arg7[%c3_130, %c0_131, %c0_132] : memref<8x128x1xf32, #tpu.memory_space<vmem>>, vector<1x128x1xf32>
    %363 = vector.shape_cast %362 : vector<1x128x1xf32> to vector<128x1xf32>
    %364 = vector.broadcast %359 : vector<1x1xf32> to vector<128x1xf32>
    %365 = arith.mulf %364, %363 : vector<128x1xf32>
    %366 = vector.broadcast %358 : vector<1x1xf32> to vector<128x1xf32>
    %367 = arith.addf %366, %365 : vector<128x1xf32>
    %cst_133 = arith.constant 0.000000e+00 : f32
    %368 = vector.broadcast %cst_133 : f32 to vector<128x1xf32>
    %369 = arith.maximumf %367, %368 : vector<128x1xf32>
    %370 = math.absf %367 : vector<128x1xf32>
    %cst_134 = arith.constant 0.000000e+00 : f32
    %371 = vector.broadcast %cst_134 : f32 to vector<128x1xf32>
    %372 = arith.subf %371, %370 : vector<128x1xf32>
    %373 = math.exp %372 : vector<128x1xf32>
    %cst_135 = arith.constant 1.000000e+00 : f32
    %374 = vector.broadcast %cst_135 : f32 to vector<128x1xf32>
    %375 = arith.addf %374, %373 : vector<128x1xf32>
    %376 = math.log %375 : vector<128x1xf32>
    %377 = arith.addf %369, %376 : vector<128x1xf32>
    %378 = vector.broadcast %361 : vector<1x1xf32> to vector<128x1xf32>
    %379 = arith.mulf %377, %378 : vector<128x1xf32>
    %cst_136 = arith.constant dense<0.000000e+00> : vector<1xf32>
    %380 = vector.multi_reduction <add>, %379, %cst_136 [0] : vector<128x1xf32> to vector<1xf32>
    %381 = vector.shape_cast %380 : vector<1xf32> to vector<1x1xf32>
    %cst_137 = arith.constant 1.280000e+02 : f32
    %382 = vector.broadcast %cst_137 : f32 to vector<1x1xf32>
    %383 = arith.divf %381, %382 : vector<1x1xf32>
    %384 = vector.broadcast %379 : vector<128x1xf32> to vector<128x128xf32>
    %385 = vector.broadcast %357 : vector<1x128xf32> to vector<128x128xf32>
    %386 = arith.mulf %384, %385 : vector<128x128xf32>
    %387 = vector.broadcast %360 : vector<1x1xf32> to vector<128x128xf32>
    %388 = arith.addf %386, %387 : vector<128x128xf32>
    %cst_138 = arith.constant 1.000000e-30 : f32
    %389 = vector.broadcast %cst_138 : f32 to vector<128x128xf32>
    %390 = arith.maximumf %388, %389 : vector<128x128xf32>
    %391 = math.log %390 : vector<128x128xf32>
    %cst_139 = arith.constant dense<0.000000e+00> : vector<128xf32>
    %392 = vector.multi_reduction <add>, %391, %cst_139 [0] : vector<128x128xf32> to vector<128xf32>
    %393 = vector.shape_cast %392 : vector<128xf32> to vector<1x128xf32>
    %cst_140 = arith.constant 1.280000e+02 : f32
    %394 = vector.broadcast %cst_140 : f32 to vector<1x128xf32>
    %395 = arith.divf %393, %394 : vector<1x128xf32>
    %396 = vector.extract_strided_slice %49 {offsets = [3, 0], sizes = [1, 128], strides = [1, 1]} : vector<8x128xf32> to vector<1x128xf32>
    %397 = arith.mulf %396, %395 : vector<1x128xf32>
    %398 = vector.broadcast %383 : vector<1x1xf32> to vector<1x128xf32>
    %399 = arith.mulf %398, %357 : vector<1x128xf32>
    %400 = vector.broadcast %360 : vector<1x1xf32> to vector<1x128xf32>
    %401 = arith.addf %399, %400 : vector<1x128xf32>
    %402 = arith.subf %397, %401 : vector<1x128xf32>
    %403 = vector.extract_strided_slice %51 {offsets = [3, 0], sizes = [1, 128], strides = [1, 1]} : vector<8x128xf32> to vector<1x128xf32>
    %404 = arith.subf %402, %403 : vector<1x128xf32>
    %cst_141 = arith.constant 0.000000e+00 : f32
    %405 = vector.broadcast %cst_141 : f32 to vector<1x128xf32>
    %406 = arith.cmpf ogt, %342, %405 : vector<1x128xf32>
    %cst_142 = arith.constant 0.000000e+00 : f32
    %407 = vector.broadcast %cst_142 : f32 to vector<1x128xf32>
    %408 = arith.select %406, %404, %407 : vector<1x128xi1>, vector<1x128xf32>
    %cst_143 = arith.constant dense<0.000000e+00> : vector<1xf32>
    %409 = vector.multi_reduction <add>, %408, %cst_143 [1] : vector<1x128xf32> to vector<1xf32>
    %410 = vector.shape_cast %409 : vector<1xf32> to vector<1x1xf32>
    %411 = arith.addf %319, %410 : vector<1x1xf32>
    %cst_144 = arith.constant dense<0.000000e+00> : vector<1xf32>
    %412 = vector.multi_reduction <add>, %342, %cst_144 [1] : vector<1x128xf32> to vector<1xf32>
    %413 = vector.shape_cast %412 : vector<1xf32> to vector<1x1xf32>
    %414 = arith.addf %322, %413 : vector<1x1xf32>
    %415 = arith.mulf %359, %359 : vector<1x1xf32>
    %416 = arith.mulf %358, %358 : vector<1x1xf32>
    %417 = arith.addf %415, %416 : vector<1x1xf32>
    %cst_145 = arith.constant 1.000000e+00 : f32
    %418 = vector.broadcast %cst_145 : f32 to vector<1x1xf32>
    %419 = arith.subf %417, %418 : vector<1x1xf32>
    %cst_146 = arith.constant 5.000000e-01 : f32
    %420 = vector.broadcast %cst_146 : f32 to vector<1x1xf32>
    %421 = arith.mulf %420, %419 : vector<1x1xf32>
    %422 = arith.addf %332, %421 : vector<1x1xf32>
    %423 = math.log %359 : vector<1x1xf32>
    %424 = arith.subf %422, %423 : vector<1x1xf32>
    %c4 = arith.constant 4 : index
    %c0_147 = arith.constant 0 : index
    %c0_148 = arith.constant 0 : index
    %425 = vector.load %arg1[%c4, %c0_147, %c0_148] : memref<8x8x128xf32, #tpu.memory_space<vmem>>, vector<1x8x128xf32>
    %426 = vector.shape_cast %425 : vector<1x8x128xf32> to vector<8x128xf32>
    %cst_149 = arith.constant dense<0.000000e+00> : vector<32x128xf32>
    %427 = tpu.matmul %52, %426, %cst_149 {dimension_numbers = #tpu.dot_dimension_numbers<[1], [0], [0], [1], [0, 0, 1, 1], [], []>} : vector<32x8xf32>, vector<8x128xf32>, vector<32x128xf32> -> vector<32x128xf32>
    %428 = vector.broadcast %53 : vector<32x1xf32> to vector<32x128xf32>
    %429 = arith.addf %427, %428 : vector<32x128xf32>
    %cst_150 = arith.constant 0.000000e+00 : f32
    %430 = vector.broadcast %cst_150 : f32 to vector<32x128xf32>
    %431 = arith.maximumf %429, %430 : vector<32x128xf32>
    %432 = vector.extract_strided_slice %16 {offsets = [4, 0], sizes = [1, 32], strides = [1, 1]} : vector<8x32xf32> to vector<1x32xf32>
    %cst_151 = arith.constant dense<0.000000e+00> : vector<1x128xf32>
    %433 = tpu.matmul %432, %431, %cst_151 {dimension_numbers = #tpu.dot_dimension_numbers<[1], [0], [0], [1], [0, 0, 1, 1], [], []>} : vector<1x32xf32>, vector<32x128xf32>, vector<1x128xf32> -> vector<1x128xf32>
    %434 = vector.extract_strided_slice %50 {offsets = [4, 0], sizes = [1, 128], strides = [1, 1]} : vector<8x128xf32> to vector<1x128xf32>
    %cst_152 = arith.constant 0.000000e+00 : f32
    %435 = vector.broadcast %cst_152 : f32 to vector<1x128xf32>
    %436 = arith.cmpf ogt, %434, %435 : vector<1x128xf32>
    %cst_153 = arith.constant -1.000000e+30 : f32
    %437 = vector.broadcast %cst_153 : f32 to vector<1x128xf32>
    %438 = arith.select %436, %433, %437 : vector<1x128xi1>, vector<1x128xf32>
    %cst_154 = arith.constant dense<0xFF800000> : vector<1xf32>
    %439 = vector.multi_reduction <maximumf>, %438, %cst_154 [1] : vector<1x128xf32> to vector<1xf32>
    %440 = vector.shape_cast %439 : vector<1xf32> to vector<1x1xf32>
    %441 = vector.broadcast %440 : vector<1x1xf32> to vector<1x128xf32>
    %442 = arith.subf %438, %441 : vector<1x128xf32>
    %443 = math.exp %442 : vector<1x128xf32>
    %444 = arith.mulf %443, %434 : vector<1x128xf32>
    %cst_155 = arith.constant dense<0.000000e+00> : vector<1xf32>
    %445 = vector.multi_reduction <add>, %444, %cst_155 [1] : vector<1x128xf32> to vector<1xf32>
    %446 = vector.shape_cast %445 : vector<1xf32> to vector<1x1xf32>
    %447 = tpu.reciprocal %446 {approx = true} : vector<1x1xf32> -> vector<1x1xf32>
    %448 = vector.broadcast %447 : vector<1x1xf32> to vector<1x128xf32>
    %449 = arith.mulf %444, %448 : vector<1x128xf32>
    %450 = vector.extract_strided_slice %23 {offsets = [4, 0], sizes = [1, 1], strides = [1, 1]} : vector<8x1xf32> to vector<1x1xf32>
    %451 = vector.extract_strided_slice %36 {offsets = [4, 0], sizes = [1, 1], strides = [1, 1]} : vector<8x1xf32> to vector<1x1xf32>
    %452 = vector.extract_strided_slice %48 {offsets = [4, 0], sizes = [1, 1], strides = [1, 1]} : vector<8x1xf32> to vector<1x1xf32>
    %453 = vector.extract_strided_slice %22 {offsets = [4, 0], sizes = [1, 1], strides = [1, 1]} : vector<8x1xf32> to vector<1x1xf32>
    %c4_156 = arith.constant 4 : index
    %c0_157 = arith.constant 0 : index
    %c0_158 = arith.constant 0 : index
    %454 = vector.load %arg7[%c4_156, %c0_157, %c0_158] : memref<8x128x1xf32, #tpu.memory_space<vmem>>, vector<1x128x1xf32>
    %455 = vector.shape_cast %454 : vector<1x128x1xf32> to vector<128x1xf32>
    %456 = vector.broadcast %451 : vector<1x1xf32> to vector<128x1xf32>
    %457 = arith.mulf %456, %455 : vector<128x1xf32>
    %458 = vector.broadcast %450 : vector<1x1xf32> to vector<128x1xf32>
    %459 = arith.addf %458, %457 : vector<128x1xf32>
    %cst_159 = arith.constant 0.000000e+00 : f32
    %460 = vector.broadcast %cst_159 : f32 to vector<128x1xf32>
    %461 = arith.maximumf %459, %460 : vector<128x1xf32>
    %462 = math.absf %459 : vector<128x1xf32>
    %cst_160 = arith.constant 0.000000e+00 : f32
    %463 = vector.broadcast %cst_160 : f32 to vector<128x1xf32>
    %464 = arith.subf %463, %462 : vector<128x1xf32>
    %465 = math.exp %464 : vector<128x1xf32>
    %cst_161 = arith.constant 1.000000e+00 : f32
    %466 = vector.broadcast %cst_161 : f32 to vector<128x1xf32>
    %467 = arith.addf %466, %465 : vector<128x1xf32>
    %468 = math.log %467 : vector<128x1xf32>
    %469 = arith.addf %461, %468 : vector<128x1xf32>
    %470 = vector.broadcast %453 : vector<1x1xf32> to vector<128x1xf32>
    %471 = arith.mulf %469, %470 : vector<128x1xf32>
    %cst_162 = arith.constant dense<0.000000e+00> : vector<1xf32>
    %472 = vector.multi_reduction <add>, %471, %cst_162 [0] : vector<128x1xf32> to vector<1xf32>
    %473 = vector.shape_cast %472 : vector<1xf32> to vector<1x1xf32>
    %cst_163 = arith.constant 1.280000e+02 : f32
    %474 = vector.broadcast %cst_163 : f32 to vector<1x1xf32>
    %475 = arith.divf %473, %474 : vector<1x1xf32>
    %476 = vector.broadcast %471 : vector<128x1xf32> to vector<128x128xf32>
    %477 = vector.broadcast %449 : vector<1x128xf32> to vector<128x128xf32>
    %478 = arith.mulf %476, %477 : vector<128x128xf32>
    %479 = vector.broadcast %452 : vector<1x1xf32> to vector<128x128xf32>
    %480 = arith.addf %478, %479 : vector<128x128xf32>
    %cst_164 = arith.constant 1.000000e-30 : f32
    %481 = vector.broadcast %cst_164 : f32 to vector<128x128xf32>
    %482 = arith.maximumf %480, %481 : vector<128x128xf32>
    %483 = math.log %482 : vector<128x128xf32>
    %cst_165 = arith.constant dense<0.000000e+00> : vector<128xf32>
    %484 = vector.multi_reduction <add>, %483, %cst_165 [0] : vector<128x128xf32> to vector<128xf32>
    %485 = vector.shape_cast %484 : vector<128xf32> to vector<1x128xf32>
    %cst_166 = arith.constant 1.280000e+02 : f32
    %486 = vector.broadcast %cst_166 : f32 to vector<1x128xf32>
    %487 = arith.divf %485, %486 : vector<1x128xf32>
    %488 = vector.extract_strided_slice %49 {offsets = [4, 0], sizes = [1, 128], strides = [1, 1]} : vector<8x128xf32> to vector<1x128xf32>
    %489 = arith.mulf %488, %487 : vector<1x128xf32>
    %490 = vector.broadcast %475 : vector<1x1xf32> to vector<1x128xf32>
    %491 = arith.mulf %490, %449 : vector<1x128xf32>
    %492 = vector.broadcast %452 : vector<1x1xf32> to vector<1x128xf32>
    %493 = arith.addf %491, %492 : vector<1x128xf32>
    %494 = arith.subf %489, %493 : vector<1x128xf32>
    %495 = vector.extract_strided_slice %51 {offsets = [4, 0], sizes = [1, 128], strides = [1, 1]} : vector<8x128xf32> to vector<1x128xf32>
    %496 = arith.subf %494, %495 : vector<1x128xf32>
    %cst_167 = arith.constant 0.000000e+00 : f32
    %497 = vector.broadcast %cst_167 : f32 to vector<1x128xf32>
    %498 = arith.cmpf ogt, %434, %497 : vector<1x128xf32>
    %cst_168 = arith.constant 0.000000e+00 : f32
    %499 = vector.broadcast %cst_168 : f32 to vector<1x128xf32>
    %500 = arith.select %498, %496, %499 : vector<1x128xi1>, vector<1x128xf32>
    %cst_169 = arith.constant dense<0.000000e+00> : vector<1xf32>
    %501 = vector.multi_reduction <add>, %500, %cst_169 [1] : vector<1x128xf32> to vector<1xf32>
    %502 = vector.shape_cast %501 : vector<1xf32> to vector<1x1xf32>
    %503 = arith.addf %411, %502 : vector<1x1xf32>
    %cst_170 = arith.constant dense<0.000000e+00> : vector<1xf32>
    %504 = vector.multi_reduction <add>, %434, %cst_170 [1] : vector<1x128xf32> to vector<1xf32>
    %505 = vector.shape_cast %504 : vector<1xf32> to vector<1x1xf32>
    %506 = arith.addf %414, %505 : vector<1x1xf32>
    %507 = arith.mulf %451, %451 : vector<1x1xf32>
    %508 = arith.mulf %450, %450 : vector<1x1xf32>
    %509 = arith.addf %507, %508 : vector<1x1xf32>
    %cst_171 = arith.constant 1.000000e+00 : f32
    %510 = vector.broadcast %cst_171 : f32 to vector<1x1xf32>
    %511 = arith.subf %509, %510 : vector<1x1xf32>
    %cst_172 = arith.constant 5.000000e-01 : f32
    %512 = vector.broadcast %cst_172 : f32 to vector<1x1xf32>
    %513 = arith.mulf %512, %511 : vector<1x1xf32>
    %514 = arith.addf %424, %513 : vector<1x1xf32>
    %515 = math.log %451 : vector<1x1xf32>
    %516 = arith.subf %514, %515 : vector<1x1xf32>
    %c5 = arith.constant 5 : index
    %c0_173 = arith.constant 0 : index
    %c0_174 = arith.constant 0 : index
    %517 = vector.load %arg1[%c5, %c0_173, %c0_174] : memref<8x8x128xf32, #tpu.memory_space<vmem>>, vector<1x8x128xf32>
    %518 = vector.shape_cast %517 : vector<1x8x128xf32> to vector<8x128xf32>
    %cst_175 = arith.constant dense<0.000000e+00> : vector<32x128xf32>
    %519 = tpu.matmul %52, %518, %cst_175 {dimension_numbers = #tpu.dot_dimension_numbers<[1], [0], [0], [1], [0, 0, 1, 1], [], []>} : vector<32x8xf32>, vector<8x128xf32>, vector<32x128xf32> -> vector<32x128xf32>
    %520 = vector.broadcast %53 : vector<32x1xf32> to vector<32x128xf32>
    %521 = arith.addf %519, %520 : vector<32x128xf32>
    %cst_176 = arith.constant 0.000000e+00 : f32
    %522 = vector.broadcast %cst_176 : f32 to vector<32x128xf32>
    %523 = arith.maximumf %521, %522 : vector<32x128xf32>
    %524 = vector.extract_strided_slice %16 {offsets = [5, 0], sizes = [1, 32], strides = [1, 1]} : vector<8x32xf32> to vector<1x32xf32>
    %cst_177 = arith.constant dense<0.000000e+00> : vector<1x128xf32>
    %525 = tpu.matmul %524, %523, %cst_177 {dimension_numbers = #tpu.dot_dimension_numbers<[1], [0], [0], [1], [0, 0, 1, 1], [], []>} : vector<1x32xf32>, vector<32x128xf32>, vector<1x128xf32> -> vector<1x128xf32>
    %526 = vector.extract_strided_slice %50 {offsets = [5, 0], sizes = [1, 128], strides = [1, 1]} : vector<8x128xf32> to vector<1x128xf32>
    %cst_178 = arith.constant 0.000000e+00 : f32
    %527 = vector.broadcast %cst_178 : f32 to vector<1x128xf32>
    %528 = arith.cmpf ogt, %526, %527 : vector<1x128xf32>
    %cst_179 = arith.constant -1.000000e+30 : f32
    %529 = vector.broadcast %cst_179 : f32 to vector<1x128xf32>
    %530 = arith.select %528, %525, %529 : vector<1x128xi1>, vector<1x128xf32>
    %cst_180 = arith.constant dense<0xFF800000> : vector<1xf32>
    %531 = vector.multi_reduction <maximumf>, %530, %cst_180 [1] : vector<1x128xf32> to vector<1xf32>
    %532 = vector.shape_cast %531 : vector<1xf32> to vector<1x1xf32>
    %533 = vector.broadcast %532 : vector<1x1xf32> to vector<1x128xf32>
    %534 = arith.subf %530, %533 : vector<1x128xf32>
    %535 = math.exp %534 : vector<1x128xf32>
    %536 = arith.mulf %535, %526 : vector<1x128xf32>
    %cst_181 = arith.constant dense<0.000000e+00> : vector<1xf32>
    %537 = vector.multi_reduction <add>, %536, %cst_181 [1] : vector<1x128xf32> to vector<1xf32>
    %538 = vector.shape_cast %537 : vector<1xf32> to vector<1x1xf32>
    %539 = tpu.reciprocal %538 {approx = true} : vector<1x1xf32> -> vector<1x1xf32>
    %540 = vector.broadcast %539 : vector<1x1xf32> to vector<1x128xf32>
    %541 = arith.mulf %536, %540 : vector<1x128xf32>
    %542 = vector.extract_strided_slice %23 {offsets = [5, 0], sizes = [1, 1], strides = [1, 1]} : vector<8x1xf32> to vector<1x1xf32>
    %543 = vector.extract_strided_slice %36 {offsets = [5, 0], sizes = [1, 1], strides = [1, 1]} : vector<8x1xf32> to vector<1x1xf32>
    %544 = vector.extract_strided_slice %48 {offsets = [5, 0], sizes = [1, 1], strides = [1, 1]} : vector<8x1xf32> to vector<1x1xf32>
    %545 = vector.extract_strided_slice %22 {offsets = [5, 0], sizes = [1, 1], strides = [1, 1]} : vector<8x1xf32> to vector<1x1xf32>
    %c5_182 = arith.constant 5 : index
    %c0_183 = arith.constant 0 : index
    %c0_184 = arith.constant 0 : index
    %546 = vector.load %arg7[%c5_182, %c0_183, %c0_184] : memref<8x128x1xf32, #tpu.memory_space<vmem>>, vector<1x128x1xf32>
    %547 = vector.shape_cast %546 : vector<1x128x1xf32> to vector<128x1xf32>
    %548 = vector.broadcast %543 : vector<1x1xf32> to vector<128x1xf32>
    %549 = arith.mulf %548, %547 : vector<128x1xf32>
    %550 = vector.broadcast %542 : vector<1x1xf32> to vector<128x1xf32>
    %551 = arith.addf %550, %549 : vector<128x1xf32>
    %cst_185 = arith.constant 0.000000e+00 : f32
    %552 = vector.broadcast %cst_185 : f32 to vector<128x1xf32>
    %553 = arith.maximumf %551, %552 : vector<128x1xf32>
    %554 = math.absf %551 : vector<128x1xf32>
    %cst_186 = arith.constant 0.000000e+00 : f32
    %555 = vector.broadcast %cst_186 : f32 to vector<128x1xf32>
    %556 = arith.subf %555, %554 : vector<128x1xf32>
    %557 = math.exp %556 : vector<128x1xf32>
    %cst_187 = arith.constant 1.000000e+00 : f32
    %558 = vector.broadcast %cst_187 : f32 to vector<128x1xf32>
    %559 = arith.addf %558, %557 : vector<128x1xf32>
    %560 = math.log %559 : vector<128x1xf32>
    %561 = arith.addf %553, %560 : vector<128x1xf32>
    %562 = vector.broadcast %545 : vector<1x1xf32> to vector<128x1xf32>
    %563 = arith.mulf %561, %562 : vector<128x1xf32>
    %cst_188 = arith.constant dense<0.000000e+00> : vector<1xf32>
    %564 = vector.multi_reduction <add>, %563, %cst_188 [0] : vector<128x1xf32> to vector<1xf32>
    %565 = vector.shape_cast %564 : vector<1xf32> to vector<1x1xf32>
    %cst_189 = arith.constant 1.280000e+02 : f32
    %566 = vector.broadcast %cst_189 : f32 to vector<1x1xf32>
    %567 = arith.divf %565, %566 : vector<1x1xf32>
    %568 = vector.broadcast %563 : vector<128x1xf32> to vector<128x128xf32>
    %569 = vector.broadcast %541 : vector<1x128xf32> to vector<128x128xf32>
    %570 = arith.mulf %568, %569 : vector<128x128xf32>
    %571 = vector.broadcast %544 : vector<1x1xf32> to vector<128x128xf32>
    %572 = arith.addf %570, %571 : vector<128x128xf32>
    %cst_190 = arith.constant 1.000000e-30 : f32
    %573 = vector.broadcast %cst_190 : f32 to vector<128x128xf32>
    %574 = arith.maximumf %572, %573 : vector<128x128xf32>
    %575 = math.log %574 : vector<128x128xf32>
    %cst_191 = arith.constant dense<0.000000e+00> : vector<128xf32>
    %576 = vector.multi_reduction <add>, %575, %cst_191 [0] : vector<128x128xf32> to vector<128xf32>
    %577 = vector.shape_cast %576 : vector<128xf32> to vector<1x128xf32>
    %cst_192 = arith.constant 1.280000e+02 : f32
    %578 = vector.broadcast %cst_192 : f32 to vector<1x128xf32>
    %579 = arith.divf %577, %578 : vector<1x128xf32>
    %580 = vector.extract_strided_slice %49 {offsets = [5, 0], sizes = [1, 128], strides = [1, 1]} : vector<8x128xf32> to vector<1x128xf32>
    %581 = arith.mulf %580, %579 : vector<1x128xf32>
    %582 = vector.broadcast %567 : vector<1x1xf32> to vector<1x128xf32>
    %583 = arith.mulf %582, %541 : vector<1x128xf32>
    %584 = vector.broadcast %544 : vector<1x1xf32> to vector<1x128xf32>
    %585 = arith.addf %583, %584 : vector<1x128xf32>
    %586 = arith.subf %581, %585 : vector<1x128xf32>
    %587 = vector.extract_strided_slice %51 {offsets = [5, 0], sizes = [1, 128], strides = [1, 1]} : vector<8x128xf32> to vector<1x128xf32>
    %588 = arith.subf %586, %587 : vector<1x128xf32>
    %cst_193 = arith.constant 0.000000e+00 : f32
    %589 = vector.broadcast %cst_193 : f32 to vector<1x128xf32>
    %590 = arith.cmpf ogt, %526, %589 : vector<1x128xf32>
    %cst_194 = arith.constant 0.000000e+00 : f32
    %591 = vector.broadcast %cst_194 : f32 to vector<1x128xf32>
    %592 = arith.select %590, %588, %591 : vector<1x128xi1>, vector<1x128xf32>
    %cst_195 = arith.constant dense<0.000000e+00> : vector<1xf32>
    %593 = vector.multi_reduction <add>, %592, %cst_195 [1] : vector<1x128xf32> to vector<1xf32>
    %594 = vector.shape_cast %593 : vector<1xf32> to vector<1x1xf32>
    %595 = arith.addf %503, %594 : vector<1x1xf32>
    %cst_196 = arith.constant dense<0.000000e+00> : vector<1xf32>
    %596 = vector.multi_reduction <add>, %526, %cst_196 [1] : vector<1x128xf32> to vector<1xf32>
    %597 = vector.shape_cast %596 : vector<1xf32> to vector<1x1xf32>
    %598 = arith.addf %506, %597 : vector<1x1xf32>
    %599 = arith.mulf %543, %543 : vector<1x1xf32>
    %600 = arith.mulf %542, %542 : vector<1x1xf32>
    %601 = arith.addf %599, %600 : vector<1x1xf32>
    %cst_197 = arith.constant 1.000000e+00 : f32
    %602 = vector.broadcast %cst_197 : f32 to vector<1x1xf32>
    %603 = arith.subf %601, %602 : vector<1x1xf32>
    %cst_198 = arith.constant 5.000000e-01 : f32
    %604 = vector.broadcast %cst_198 : f32 to vector<1x1xf32>
    %605 = arith.mulf %604, %603 : vector<1x1xf32>
    %606 = arith.addf %516, %605 : vector<1x1xf32>
    %607 = math.log %543 : vector<1x1xf32>
    %608 = arith.subf %606, %607 : vector<1x1xf32>
    %c6 = arith.constant 6 : index
    %c0_199 = arith.constant 0 : index
    %c0_200 = arith.constant 0 : index
    %609 = vector.load %arg1[%c6, %c0_199, %c0_200] : memref<8x8x128xf32, #tpu.memory_space<vmem>>, vector<1x8x128xf32>
    %610 = vector.shape_cast %609 : vector<1x8x128xf32> to vector<8x128xf32>
    %cst_201 = arith.constant dense<0.000000e+00> : vector<32x128xf32>
    %611 = tpu.matmul %52, %610, %cst_201 {dimension_numbers = #tpu.dot_dimension_numbers<[1], [0], [0], [1], [0, 0, 1, 1], [], []>} : vector<32x8xf32>, vector<8x128xf32>, vector<32x128xf32> -> vector<32x128xf32>
    %612 = vector.broadcast %53 : vector<32x1xf32> to vector<32x128xf32>
    %613 = arith.addf %611, %612 : vector<32x128xf32>
    %cst_202 = arith.constant 0.000000e+00 : f32
    %614 = vector.broadcast %cst_202 : f32 to vector<32x128xf32>
    %615 = arith.maximumf %613, %614 : vector<32x128xf32>
    %616 = vector.extract_strided_slice %16 {offsets = [6, 0], sizes = [1, 32], strides = [1, 1]} : vector<8x32xf32> to vector<1x32xf32>
    %cst_203 = arith.constant dense<0.000000e+00> : vector<1x128xf32>
    %617 = tpu.matmul %616, %615, %cst_203 {dimension_numbers = #tpu.dot_dimension_numbers<[1], [0], [0], [1], [0, 0, 1, 1], [], []>} : vector<1x32xf32>, vector<32x128xf32>, vector<1x128xf32> -> vector<1x128xf32>
    %618 = vector.extract_strided_slice %50 {offsets = [6, 0], sizes = [1, 128], strides = [1, 1]} : vector<8x128xf32> to vector<1x128xf32>
    %cst_204 = arith.constant 0.000000e+00 : f32
    %619 = vector.broadcast %cst_204 : f32 to vector<1x128xf32>
    %620 = arith.cmpf ogt, %618, %619 : vector<1x128xf32>
    %cst_205 = arith.constant -1.000000e+30 : f32
    %621 = vector.broadcast %cst_205 : f32 to vector<1x128xf32>
    %622 = arith.select %620, %617, %621 : vector<1x128xi1>, vector<1x128xf32>
    %cst_206 = arith.constant dense<0xFF800000> : vector<1xf32>
    %623 = vector.multi_reduction <maximumf>, %622, %cst_206 [1] : vector<1x128xf32> to vector<1xf32>
    %624 = vector.shape_cast %623 : vector<1xf32> to vector<1x1xf32>
    %625 = vector.broadcast %624 : vector<1x1xf32> to vector<1x128xf32>
    %626 = arith.subf %622, %625 : vector<1x128xf32>
    %627 = math.exp %626 : vector<1x128xf32>
    %628 = arith.mulf %627, %618 : vector<1x128xf32>
    %cst_207 = arith.constant dense<0.000000e+00> : vector<1xf32>
    %629 = vector.multi_reduction <add>, %628, %cst_207 [1] : vector<1x128xf32> to vector<1xf32>
    %630 = vector.shape_cast %629 : vector<1xf32> to vector<1x1xf32>
    %631 = tpu.reciprocal %630 {approx = true} : vector<1x1xf32> -> vector<1x1xf32>
    %632 = vector.broadcast %631 : vector<1x1xf32> to vector<1x128xf32>
    %633 = arith.mulf %628, %632 : vector<1x128xf32>
    %634 = vector.extract_strided_slice %23 {offsets = [6, 0], sizes = [1, 1], strides = [1, 1]} : vector<8x1xf32> to vector<1x1xf32>
    %635 = vector.extract_strided_slice %36 {offsets = [6, 0], sizes = [1, 1], strides = [1, 1]} : vector<8x1xf32> to vector<1x1xf32>
    %636 = vector.extract_strided_slice %48 {offsets = [6, 0], sizes = [1, 1], strides = [1, 1]} : vector<8x1xf32> to vector<1x1xf32>
    %637 = vector.extract_strided_slice %22 {offsets = [6, 0], sizes = [1, 1], strides = [1, 1]} : vector<8x1xf32> to vector<1x1xf32>
    %c6_208 = arith.constant 6 : index
    %c0_209 = arith.constant 0 : index
    %c0_210 = arith.constant 0 : index
    %638 = vector.load %arg7[%c6_208, %c0_209, %c0_210] : memref<8x128x1xf32, #tpu.memory_space<vmem>>, vector<1x128x1xf32>
    %639 = vector.shape_cast %638 : vector<1x128x1xf32> to vector<128x1xf32>
    %640 = vector.broadcast %635 : vector<1x1xf32> to vector<128x1xf32>
    %641 = arith.mulf %640, %639 : vector<128x1xf32>
    %642 = vector.broadcast %634 : vector<1x1xf32> to vector<128x1xf32>
    %643 = arith.addf %642, %641 : vector<128x1xf32>
    %cst_211 = arith.constant 0.000000e+00 : f32
    %644 = vector.broadcast %cst_211 : f32 to vector<128x1xf32>
    %645 = arith.maximumf %643, %644 : vector<128x1xf32>
    %646 = math.absf %643 : vector<128x1xf32>
    %cst_212 = arith.constant 0.000000e+00 : f32
    %647 = vector.broadcast %cst_212 : f32 to vector<128x1xf32>
    %648 = arith.subf %647, %646 : vector<128x1xf32>
    %649 = math.exp %648 : vector<128x1xf32>
    %cst_213 = arith.constant 1.000000e+00 : f32
    %650 = vector.broadcast %cst_213 : f32 to vector<128x1xf32>
    %651 = arith.addf %650, %649 : vector<128x1xf32>
    %652 = math.log %651 : vector<128x1xf32>
    %653 = arith.addf %645, %652 : vector<128x1xf32>
    %654 = vector.broadcast %637 : vector<1x1xf32> to vector<128x1xf32>
    %655 = arith.mulf %653, %654 : vector<128x1xf32>
    %cst_214 = arith.constant dense<0.000000e+00> : vector<1xf32>
    %656 = vector.multi_reduction <add>, %655, %cst_214 [0] : vector<128x1xf32> to vector<1xf32>
    %657 = vector.shape_cast %656 : vector<1xf32> to vector<1x1xf32>
    %cst_215 = arith.constant 1.280000e+02 : f32
    %658 = vector.broadcast %cst_215 : f32 to vector<1x1xf32>
    %659 = arith.divf %657, %658 : vector<1x1xf32>
    %660 = vector.broadcast %655 : vector<128x1xf32> to vector<128x128xf32>
    %661 = vector.broadcast %633 : vector<1x128xf32> to vector<128x128xf32>
    %662 = arith.mulf %660, %661 : vector<128x128xf32>
    %663 = vector.broadcast %636 : vector<1x1xf32> to vector<128x128xf32>
    %664 = arith.addf %662, %663 : vector<128x128xf32>
    %cst_216 = arith.constant 1.000000e-30 : f32
    %665 = vector.broadcast %cst_216 : f32 to vector<128x128xf32>
    %666 = arith.maximumf %664, %665 : vector<128x128xf32>
    %667 = math.log %666 : vector<128x128xf32>
    %cst_217 = arith.constant dense<0.000000e+00> : vector<128xf32>
    %668 = vector.multi_reduction <add>, %667, %cst_217 [0] : vector<128x128xf32> to vector<128xf32>
    %669 = vector.shape_cast %668 : vector<128xf32> to vector<1x128xf32>
    %cst_218 = arith.constant 1.280000e+02 : f32
    %670 = vector.broadcast %cst_218 : f32 to vector<1x128xf32>
    %671 = arith.divf %669, %670 : vector<1x128xf32>
    %672 = vector.extract_strided_slice %49 {offsets = [6, 0], sizes = [1, 128], strides = [1, 1]} : vector<8x128xf32> to vector<1x128xf32>
    %673 = arith.mulf %672, %671 : vector<1x128xf32>
    %674 = vector.broadcast %659 : vector<1x1xf32> to vector<1x128xf32>
    %675 = arith.mulf %674, %633 : vector<1x128xf32>
    %676 = vector.broadcast %636 : vector<1x1xf32> to vector<1x128xf32>
    %677 = arith.addf %675, %676 : vector<1x128xf32>
    %678 = arith.subf %673, %677 : vector<1x128xf32>
    %679 = vector.extract_strided_slice %51 {offsets = [6, 0], sizes = [1, 128], strides = [1, 1]} : vector<8x128xf32> to vector<1x128xf32>
    %680 = arith.subf %678, %679 : vector<1x128xf32>
    %cst_219 = arith.constant 0.000000e+00 : f32
    %681 = vector.broadcast %cst_219 : f32 to vector<1x128xf32>
    %682 = arith.cmpf ogt, %618, %681 : vector<1x128xf32>
    %cst_220 = arith.constant 0.000000e+00 : f32
    %683 = vector.broadcast %cst_220 : f32 to vector<1x128xf32>
    %684 = arith.select %682, %680, %683 : vector<1x128xi1>, vector<1x128xf32>
    %cst_221 = arith.constant dense<0.000000e+00> : vector<1xf32>
    %685 = vector.multi_reduction <add>, %684, %cst_221 [1] : vector<1x128xf32> to vector<1xf32>
    %686 = vector.shape_cast %685 : vector<1xf32> to vector<1x1xf32>
    %687 = arith.addf %595, %686 : vector<1x1xf32>
    %cst_222 = arith.constant dense<0.000000e+00> : vector<1xf32>
    %688 = vector.multi_reduction <add>, %618, %cst_222 [1] : vector<1x128xf32> to vector<1xf32>
    %689 = vector.shape_cast %688 : vector<1xf32> to vector<1x1xf32>
    %690 = arith.addf %598, %689 : vector<1x1xf32>
    %691 = arith.mulf %635, %635 : vector<1x1xf32>
    %692 = arith.mulf %634, %634 : vector<1x1xf32>
    %693 = arith.addf %691, %692 : vector<1x1xf32>
    %cst_223 = arith.constant 1.000000e+00 : f32
    %694 = vector.broadcast %cst_223 : f32 to vector<1x1xf32>
    %695 = arith.subf %693, %694 : vector<1x1xf32>
    %cst_224 = arith.constant 5.000000e-01 : f32
    %696 = vector.broadcast %cst_224 : f32 to vector<1x1xf32>
    %697 = arith.mulf %696, %695 : vector<1x1xf32>
    %698 = arith.addf %608, %697 : vector<1x1xf32>
    %699 = math.log %635 : vector<1x1xf32>
    %700 = arith.subf %698, %699 : vector<1x1xf32>
    %c7 = arith.constant 7 : index
    %c0_225 = arith.constant 0 : index
    %c0_226 = arith.constant 0 : index
    %701 = vector.load %arg1[%c7, %c0_225, %c0_226] : memref<8x8x128xf32, #tpu.memory_space<vmem>>, vector<1x8x128xf32>
    %702 = vector.shape_cast %701 : vector<1x8x128xf32> to vector<8x128xf32>
    %cst_227 = arith.constant dense<0.000000e+00> : vector<32x128xf32>
    %703 = tpu.matmul %52, %702, %cst_227 {dimension_numbers = #tpu.dot_dimension_numbers<[1], [0], [0], [1], [0, 0, 1, 1], [], []>} : vector<32x8xf32>, vector<8x128xf32>, vector<32x128xf32> -> vector<32x128xf32>
    %704 = vector.broadcast %53 : vector<32x1xf32> to vector<32x128xf32>
    %705 = arith.addf %703, %704 : vector<32x128xf32>
    %cst_228 = arith.constant 0.000000e+00 : f32
    %706 = vector.broadcast %cst_228 : f32 to vector<32x128xf32>
    %707 = arith.maximumf %705, %706 : vector<32x128xf32>
    %708 = vector.extract_strided_slice %16 {offsets = [7, 0], sizes = [1, 32], strides = [1, 1]} : vector<8x32xf32> to vector<1x32xf32>
    %cst_229 = arith.constant dense<0.000000e+00> : vector<1x128xf32>
    %709 = tpu.matmul %708, %707, %cst_229 {dimension_numbers = #tpu.dot_dimension_numbers<[1], [0], [0], [1], [0, 0, 1, 1], [], []>} : vector<1x32xf32>, vector<32x128xf32>, vector<1x128xf32> -> vector<1x128xf32>
    %710 = vector.extract_strided_slice %50 {offsets = [7, 0], sizes = [1, 128], strides = [1, 1]} : vector<8x128xf32> to vector<1x128xf32>
    %cst_230 = arith.constant 0.000000e+00 : f32
    %711 = vector.broadcast %cst_230 : f32 to vector<1x128xf32>
    %712 = arith.cmpf ogt, %710, %711 : vector<1x128xf32>
    %cst_231 = arith.constant -1.000000e+30 : f32
    %713 = vector.broadcast %cst_231 : f32 to vector<1x128xf32>
    %714 = arith.select %712, %709, %713 : vector<1x128xi1>, vector<1x128xf32>
    %cst_232 = arith.constant dense<0xFF800000> : vector<1xf32>
    %715 = vector.multi_reduction <maximumf>, %714, %cst_232 [1] : vector<1x128xf32> to vector<1xf32>
    %716 = vector.shape_cast %715 : vector<1xf32> to vector<1x1xf32>
    %717 = vector.broadcast %716 : vector<1x1xf32> to vector<1x128xf32>
    %718 = arith.subf %714, %717 : vector<1x128xf32>
    %719 = math.exp %718 : vector<1x128xf32>
    %720 = arith.mulf %719, %710 : vector<1x128xf32>
    %cst_233 = arith.constant dense<0.000000e+00> : vector<1xf32>
    %721 = vector.multi_reduction <add>, %720, %cst_233 [1] : vector<1x128xf32> to vector<1xf32>
    %722 = vector.shape_cast %721 : vector<1xf32> to vector<1x1xf32>
    %723 = tpu.reciprocal %722 {approx = true} : vector<1x1xf32> -> vector<1x1xf32>
    %724 = vector.broadcast %723 : vector<1x1xf32> to vector<1x128xf32>
    %725 = arith.mulf %720, %724 : vector<1x128xf32>
    %726 = vector.extract_strided_slice %23 {offsets = [7, 0], sizes = [1, 1], strides = [1, 1]} : vector<8x1xf32> to vector<1x1xf32>
    %727 = vector.extract_strided_slice %36 {offsets = [7, 0], sizes = [1, 1], strides = [1, 1]} : vector<8x1xf32> to vector<1x1xf32>
    %728 = vector.extract_strided_slice %48 {offsets = [7, 0], sizes = [1, 1], strides = [1, 1]} : vector<8x1xf32> to vector<1x1xf32>
    %729 = vector.extract_strided_slice %22 {offsets = [7, 0], sizes = [1, 1], strides = [1, 1]} : vector<8x1xf32> to vector<1x1xf32>
    %c7_234 = arith.constant 7 : index
    %c0_235 = arith.constant 0 : index
    %c0_236 = arith.constant 0 : index
    %730 = vector.load %arg7[%c7_234, %c0_235, %c0_236] : memref<8x128x1xf32, #tpu.memory_space<vmem>>, vector<1x128x1xf32>
    %731 = vector.shape_cast %730 : vector<1x128x1xf32> to vector<128x1xf32>
    %732 = vector.broadcast %727 : vector<1x1xf32> to vector<128x1xf32>
    %733 = arith.mulf %732, %731 : vector<128x1xf32>
    %734 = vector.broadcast %726 : vector<1x1xf32> to vector<128x1xf32>
    %735 = arith.addf %734, %733 : vector<128x1xf32>
    %cst_237 = arith.constant 0.000000e+00 : f32
    %736 = vector.broadcast %cst_237 : f32 to vector<128x1xf32>
    %737 = arith.maximumf %735, %736 : vector<128x1xf32>
    %738 = math.absf %735 : vector<128x1xf32>
    %cst_238 = arith.constant 0.000000e+00 : f32
    %739 = vector.broadcast %cst_238 : f32 to vector<128x1xf32>
    %740 = arith.subf %739, %738 : vector<128x1xf32>
    %741 = math.exp %740 : vector<128x1xf32>
    %cst_239 = arith.constant 1.000000e+00 : f32
    %742 = vector.broadcast %cst_239 : f32 to vector<128x1xf32>
    %743 = arith.addf %742, %741 : vector<128x1xf32>
    %744 = math.log %743 : vector<128x1xf32>
    %745 = arith.addf %737, %744 : vector<128x1xf32>
    %746 = vector.broadcast %729 : vector<1x1xf32> to vector<128x1xf32>
    %747 = arith.mulf %745, %746 : vector<128x1xf32>
    %cst_240 = arith.constant dense<0.000000e+00> : vector<1xf32>
    %748 = vector.multi_reduction <add>, %747, %cst_240 [0] : vector<128x1xf32> to vector<1xf32>
    %749 = vector.shape_cast %748 : vector<1xf32> to vector<1x1xf32>
    %cst_241 = arith.constant 1.280000e+02 : f32
    %750 = vector.broadcast %cst_241 : f32 to vector<1x1xf32>
    %751 = arith.divf %749, %750 : vector<1x1xf32>
    %752 = vector.broadcast %747 : vector<128x1xf32> to vector<128x128xf32>
    %753 = vector.broadcast %725 : vector<1x128xf32> to vector<128x128xf32>
    %754 = arith.mulf %752, %753 : vector<128x128xf32>
    %755 = vector.broadcast %728 : vector<1x1xf32> to vector<128x128xf32>
    %756 = arith.addf %754, %755 : vector<128x128xf32>
    %cst_242 = arith.constant 1.000000e-30 : f32
    %757 = vector.broadcast %cst_242 : f32 to vector<128x128xf32>
    %758 = arith.maximumf %756, %757 : vector<128x128xf32>
    %759 = math.log %758 : vector<128x128xf32>
    %cst_243 = arith.constant dense<0.000000e+00> : vector<128xf32>
    %760 = vector.multi_reduction <add>, %759, %cst_243 [0] : vector<128x128xf32> to vector<128xf32>
    %761 = vector.shape_cast %760 : vector<128xf32> to vector<1x128xf32>
    %cst_244 = arith.constant 1.280000e+02 : f32
    %762 = vector.broadcast %cst_244 : f32 to vector<1x128xf32>
    %763 = arith.divf %761, %762 : vector<1x128xf32>
    %764 = vector.extract_strided_slice %49 {offsets = [7, 0], sizes = [1, 128], strides = [1, 1]} : vector<8x128xf32> to vector<1x128xf32>
    %765 = arith.mulf %764, %763 : vector<1x128xf32>
    %766 = vector.broadcast %751 : vector<1x1xf32> to vector<1x128xf32>
    %767 = arith.mulf %766, %725 : vector<1x128xf32>
    %768 = vector.broadcast %728 : vector<1x1xf32> to vector<1x128xf32>
    %769 = arith.addf %767, %768 : vector<1x128xf32>
    %770 = arith.subf %765, %769 : vector<1x128xf32>
    %771 = vector.extract_strided_slice %51 {offsets = [7, 0], sizes = [1, 128], strides = [1, 1]} : vector<8x128xf32> to vector<1x128xf32>
    %772 = arith.subf %770, %771 : vector<1x128xf32>
    %cst_245 = arith.constant 0.000000e+00 : f32
    %773 = vector.broadcast %cst_245 : f32 to vector<1x128xf32>
    %774 = arith.cmpf ogt, %710, %773 : vector<1x128xf32>
    %cst_246 = arith.constant 0.000000e+00 : f32
    %775 = vector.broadcast %cst_246 : f32 to vector<1x128xf32>
    %776 = arith.select %774, %772, %775 : vector<1x128xi1>, vector<1x128xf32>
    %cst_247 = arith.constant dense<0.000000e+00> : vector<1xf32>
    %777 = vector.multi_reduction <add>, %776, %cst_247 [1] : vector<1x128xf32> to vector<1xf32>
    %778 = vector.shape_cast %777 : vector<1xf32> to vector<1x1xf32>
    %779 = arith.addf %687, %778 : vector<1x1xf32>
    %cst_248 = arith.constant dense<0.000000e+00> : vector<1xf32>
    %780 = vector.multi_reduction <add>, %710, %cst_248 [1] : vector<1x128xf32> to vector<1xf32>
    %781 = vector.shape_cast %780 : vector<1xf32> to vector<1x1xf32>
    %782 = arith.addf %690, %781 : vector<1x1xf32>
    %783 = arith.mulf %727, %727 : vector<1x1xf32>
    %784 = arith.mulf %726, %726 : vector<1x1xf32>
    %785 = arith.addf %783, %784 : vector<1x1xf32>
    %cst_249 = arith.constant 1.000000e+00 : f32
    %786 = vector.broadcast %cst_249 : f32 to vector<1x1xf32>
    %787 = arith.subf %785, %786 : vector<1x1xf32>
    %cst_250 = arith.constant 5.000000e-01 : f32
    %788 = vector.broadcast %cst_250 : f32 to vector<1x1xf32>
    %789 = arith.mulf %788, %787 : vector<1x1xf32>
    %790 = arith.addf %700, %789 : vector<1x1xf32>
    %791 = math.log %727 : vector<1x1xf32>
    %792 = arith.subf %790, %791 : vector<1x1xf32>
    %cst_251 = arith.constant 0.000000e+00 : f32
    %793 = vector.broadcast %cst_251 : f32 to vector<1x1xf32>
    %794 = arith.subf %793, %779 : vector<1x1xf32>
    %cst_252 = arith.constant 1.000000e+00 : f32
    %795 = vector.broadcast %cst_252 : f32 to vector<1x1xf32>
    %796 = arith.maximumf %782, %795 : vector<1x1xf32>
    %797 = arith.divf %794, %796 : vector<1x1xf32>
    %cst_253 = arith.constant 1.250000e-01 : f32
    %798 = vector.broadcast %cst_253 : f32 to vector<1x1xf32>
    %799 = arith.mulf %792, %798 : vector<1x1xf32>
    %800 = arith.addf %797, %799 : vector<1x1xf32>
    %c0_254 = arith.constant 0 : index
    %c0_255 = arith.constant 0 : index
    %801 = vector.load %arg16[%c0_254, %c0_255] : memref<1x1xf32, #tpu.memory_space<vmem>>, vector<1x1xf32>
    tpu.vector_store %arg16[%c0_254, %c0_255], %800 {strides = array<i32>} : memref<1x1xf32, #tpu.memory_space<vmem>>, vector<1x1xf32>,
    return
  }
}

</mosaic_0001>

<bundles_post_ra>
// kernel: integrator_forward.1
= control target key start
LH: loop header
LB: loop body
LE: loop exit
PB: predicated region body
PF: predicated region fallthrough
CT: control target
= control target key end

     0   :  { %s15205_s0 = inlined_call_operand.vmem [shape: f32[1024,8], index: 0, kind: input, shape index: {}]   ;;  %s15206_s1 = inlined_call_operand.vmem [shape: f32[8,8,128], index: 1, kind: input, shape index: {}]   ;;  %s15207_s2 = inlined_call_operand.vmem [shape: f32[8,128], index: 2, kind: input, shape index: {}]   ;;  %s15208_s3 = inlined_call_operand.vmem [shape: f32[8,128], index: 3, kind: input, shape index: {}]   ;;  %s15209_s4 = inlined_call_operand.vmem [shape: f32[8,1], index: 4, kind: input, shape index: {}]   ;;  %s15210_s5 = inlined_call_operand.vmem [shape: f32[8,1024], index: 5, kind: input, shape index: {}]   ;;  %s15211_s6 = inlined_call_operand.vmem [shape: f32[8,128], index: 6, kind: input, shape index: {}]   ;;  %s15212_s7 = inlined_call_operand.vmem [shape: f32[8,128,1], index: 7, kind: input, shape index: {}]   ;;  %s15213_s8 = inlined_call_operand.vmem [shape: f32[8,32], index: 8, kind: input, shape index: {}]   ;;  %s15214_s9 = inlined_call_operand.vmem [shape: f32[1,32], index: 9, kind: input, shape index: {}]   ;;  %s15215_s10 = inlined_call_operand.vmem [shape: f32[32,32], index: 10, kind: input, shape index: {}]   ;;  %s15216_s11 = inlined_call_operand.vmem [shape: f32[1,32], index: 11, kind: input, shape index: {}]   ;;  %s15217_s12 = inlined_call_operand.vmem [shape: f32[32,8], index: 12, kind: input, shape index: {}]   ;;  %s15218_s13 = inlined_call_operand.vmem [shape: f32[32,1], index: 13, kind: input, shape index: {}]   ;;  %s15219_s14 = inlined_call_operand.vmem [shape: f32[32,3], index: 14, kind: input, shape index: {}]   ;;  %s15220_s15 = inlined_call_operand.vmem [shape: f32[1,3], index: 15, kind: input, shape index: {}]   ;;  %s15221_s16 = inlined_call_operand.hbm [shape: f32[1,1], index: 16, kind: output, shape index: {}]  }
   0x1   :  { %15278 = sst [smem:[#allocation113_spill]] %s15205_s0 }
   0x2   :  { %v182_v0 = vld [vmem:[%s15213_s8] sm:$0xff]  ;;  %s15279_s25 = sld [smem:[#allocation113_spill]]  ;;  %vm187_vm0 = vcmask 64512  }
   0x3   :  { %587 = vmatpush.msra.mxu0 %v182_v0  ;;  %8131 = vmatpush.msra.mxu2 %v182_v0 }
   0x8   :  { %v54_v1 = vld [vmem:[%s15279_s25] sm:$0xff] }
   0x9   :  { %7714 = vmatmul.msk.f32.vlgmr.msra.gmra.mxu0 %vm187_vm0, %v54_v1 }
   0xa   :  { %21 = vsyncpa [#allocation3], 0  ;;  %v55_v2 = vld [vmem:[%s15279_s25 + $0x8] sm:$0xff]  ;;  %v56_v3 = vld [vmem:[%s15279_s25 + $0x10] sm:$0xff]  ;;  %vm1109_vm1 = vcmask 261120   ;;  %s9035_s26 = smov 2  }
   0xb   :  { %v57_v4 = vld [vmem:[%s15279_s25 + $0x18] sm:$0xff]  ;;  %v58_v5 = vld [vmem:[%s15279_s25 + $0x20] sm:$0xff]  ;;  %v59_v6 = vld [vmem:[%s15279_s25 + $0x28] sm:$0xff]  ;;  %s9037_s22 = smov 1   ;;  %vm2337_vm2 = vcmask 1040384   ;;  %vm3022_vm3 = vcmask 1041409  }
   0xc   :  { %v60_v7 = vld [vmem:[%s15279_s25 + $0x30] sm:$0xff]  ;;  %v61_v8 = vld [vmem:[%s15279_s25 + $0x38] sm:$0xff]  ;;  %v62_v9 = vld [vmem:[%s15279_s25 + $0x40] sm:$0xff]  ;;  %vm3697_vm4 = vcmask 1042434   ;;  %vm4370_vm5 = vcmask 1043459   ;;  %vm5043_vm6 = vcmask 1044484  }
   0xd   :  { %v63_v10 = vld [vmem:[%s15279_s25 + $0x48] sm:$0xff]  ;;  %v64_v11 = vld [vmem:[%s15279_s25 + $0x50] sm:$0xff]  ;;  %v65_v12 = vld [vmem:[%s15279_s25 + $0x58] sm:$0xff]  ;;  %vm5716_vm7 = vcmask 1045509   ;;  %vm2689_vm9 = vcmask 7168   ;;  %vm6389_vm11 = vcmask 1046534  }
   0xe   :  { %v1104_v13 = vld [vmem:[%s15215_s10 + $0x18] sm:$0xff]  ;;  %v1103_v14 = vld [vmem:[%s15215_s10 + $0x10] sm:$0xff]  ;;  %v66_v15 = vld [vmem:[%s15279_s25 + $0x60] sm:$0xff]  ;;  %vm7062_vm12 = vcmask 1047559   ;;  %s7705_s28 = sshll.u32 %s15221_s16, 4  ;;  %s7706_s28 = int_to_ptr.hbm [resolvable:$true] %s7705_s28 }
   0xf   :  { %1506 = vmatpush.msra.mxu1 %v1104_v13  ;;  %8132 = vmatpush.msra.mxu3 %v1104_v13  ;;  %v1102_v16 = vld [vmem:[%s15215_s10 + $0x8] sm:$0xff]  ;;  %v1101_v17 = vld [vmem:[%s15215_s10] sm:$0xff]  ;;  %v68_v19 = vld [vmem:[%s15279_s25 + $0x70] sm:$0xff] }
  0x10   :  { %v67_v18 = vld [vmem:[%s15279_s25 + $0x68] sm:$0xff]  ;;  %v69_v20 = vld [vmem:[%s15279_s25 + $0x78] sm:$0xff]  ;;  %v9210_v21 = vld [vmem:[%s15214_s9] ss:$0 sm:$0xff] }
  0x11   :  { %7715 = vmatmul.msk.f32.gmra.mxu0 %vm187_vm0, %v55_v2  ;;  %1507 = vmatpush.msra.mxu1 %v1103_v14  ;;  %v70_v23 = vld [vmem:[%s15279_s25 + $0x80] sm:$0xff]  ;;  %v71_v27 = vld [vmem:[%s15279_s25 + $0x88] sm:$0xff]  ;;  %v72_v31 = vld [vmem:[%s15279_s25 + $0x90] sm:$0xff] }
  0x12   :  { %8133 = vmatpush.msra.mxu3 %v1103_v14  ;;  %v73_v35 = vld [vmem:[%s15279_s25 + $0x98] sm:$0xff]  ;;  %v74_v39 = vld [vmem:[%s15279_s25 + $0xa0] sm:$0xff]  ;;  %v75_v43 = vld [vmem:[%s15279_s25 + $0xa8] sm:$0xff] }
  0x13   :  { %1508 = vmatpush.msra.mxu1 %v1102_v16  ;;  %v76_v47 = vld [vmem:[%s15279_s25 + $0xb0] sm:$0xff]  ;;  %v77_v51 = vld [vmem:[%s15279_s25 + $0xb8] sm:$0xff]  ;;  %v78_v55 = vld [vmem:[%s15279_s25 + $0xc0] sm:$0xff] }
  0x14   :  { %8134 = vmatpush.msra.mxu3 %v1102_v16  ;;  %v79_v59 = vld [vmem:[%s15279_s25 + $0xc8] sm:$0xff]  ;;  %v80_v63 = vld [vmem:[%s15279_s25 + $0xd0] sm:$0xff] }
  0x15   :  { %1509 = vmatpush.msra.mxu1 %v1101_v17 }
  0x16   :  { %8135 = vmatpush.msra.mxu3 %v1101_v17 }
  0x19   :  { %7716 = vmatmul.msk.f32.gmra.mxu0 %vm187_vm0, %v56_v3  ;;  %v81_v3 = vld [vmem:[%s15279_s25 + $0xd8] sm:$0xff] }
  0x21   :  { %7717 = vmatmul.msk.f32.gmra.mxu0 %vm187_vm0, %v57_v4 }
  0x29   :  { %7718 = vmatmul.msk.f32.gmra.mxu0 %vm187_vm0, %v58_v5 }
  0x31   :  { %7719 = vmatmul.msk.f32.gmra.mxu0 %vm187_vm0, %v59_v6 }
  0x39   :  { %7720 = vmatmul.msk.f32.gmra.mxu0 %vm187_vm0, %v60_v7  ;;  %v82_v7 = vld [vmem:[%s15279_s25 + $0xe0] sm:$0xff] }
  0x41   :  { %7721 = vmatmul.msk.f32.gmra.mxu0 %vm187_vm0, %v61_v8 }
  0x49   :  { %7722 = vmatmul.msk.f32.gmra.mxu0 %vm187_vm0, %v62_v9 }
  0x51   :  { %7723 = vmatmul.msk.f32.gmra.mxu0 %vm187_vm0, %v63_v10 }
  0x59   :  { %7724 = vmatmul.msk.f32.gmra.mxu0 %vm187_vm0, %v64_v11  ;;  %v83_v11 = vld [vmem:[%s15279_s25 + $0xe8] sm:$0xff] }
  0x61   :  { %7725 = vmatmul.msk.f32.gmra.mxu0 %vm187_vm0, %v65_v12 }
  0x69   :  { %7726 = vmatmul.msk.f32.gmra.mxu0 %vm187_vm0, %v66_v15  ;;  %v84_v15 = vld [vmem:[%s15279_s25 + $0xf0] sm:$0xff] }
  0x71   :  { %7727 = vmatmul.msk.f32.gmra.mxu0 %vm187_vm0, %v67_v18 }
  0x79   :  { %7728 = vmatmul.msk.f32.gmra.mxu0 %vm187_vm0, %v68_v19  ;;  %v85_v19 = vld [vmem:[%s15279_s25 + $0xf8] sm:$0xff] }
  0x81   :  { %7729 = vmatmul.msk.f32.gmra.mxu0 %vm187_vm0, %v69_v20 }
  0x86   :  { %v589_v22 = vpop.f32.mrf.mxu0 }
  0x87   :  { %v590_v24 = vadd.f32 %v9210_v21, %v589_v22  ;;  %v136_v22 = vld [vmem:[%s15279_s25 + $0x290] sm:$0xff] }
  0x88   :  { %7796 = vmatmul.msk.f32.vlgmr.msra.gmra.mxu2 %vm187_vm0, %v136_v22  ;;  %v96_v22 = vld [vmem:[%s15279_s25 + $0x150] sm:$0xff] }
  0x89   :  { %v973_v25 = vmax.f32 %v590_v24, 0.0  ;;  %7730 = vmatmul.msk.f32.gmra.mxu0 %vm187_vm0, %v70_v23 }
  0x8b   :  { %7842 = vmatmul.msk.f32.vlgmr.msra.gmra.mxu1 %vm1109_vm1, %v973_v25  ;;  %v86_v25 = vld [vmem:[%s15279_s25 + $0x100] sm:$0xff] }
  0x8e   :  { %v592_v26 = vpop.f32.mrf.mxu0 }
  0x8f   :  { %v593_v28 = vadd.f32 %v9210_v21, %v592_v26 }
  0x91   :  { %v974_v29 = vmax.f32 %v593_v28, 0.0  ;;  %7731 = vmatmul.msk.f32.gmra.mxu0 %vm187_vm0, %v71_v27  ;;  %v137_v27 = vld [vmem:[%s15279_s25 + $0x298] sm:$0xff] }
  0x92   :  { %7797 = vmatmul.msk.f32.gmra.mxu2 %vm187_vm0, %v137_v27 }
  0x93   :  { %7843 = vmatmul.msk.f32.gmra.mxu1 %vm1109_vm1, %v974_v29 }
  0x96   :  { %v595_v30 = vpop.f32.mrf.mxu0 }
  0x97   :  { %v596_v32 = vadd.f32 %v9210_v21, %v595_v30 }
  0x99   :  { %v975_v33 = vmax.f32 %v596_v32, 0.0  ;;  %7732 = vmatmul.msk.f32.gmra.mxu0 %vm187_vm0, %v72_v31  ;;  %v87_v31 = vld [vmem:[%s15279_s25 + $0x108] sm:$0xff] }
  0x9b   :  { %7844 = vmatmul.msk.f32.gmra.mxu1 %vm1109_vm1, %v975_v33  ;;  %v138_v33 = vld [vmem:[%s15279_s25 + $0x2a0] sm:$0xff] }
  0x9c   :  { %7798 = vmatmul.msk.f32.gmra.mxu2 %vm187_vm0, %v138_v33 }
  0x9e   :  { %v598_v34 = vpop.f32.mrf.mxu0 }
  0x9f   :  { %v599_v36 = vadd.f32 %v9210_v21, %v598_v34 }
  0xa1   :  { %v976_v37 = vmax.f32 %v599_v36, 0.0  ;;  %7733 = vmatmul.msk.f32.gmra.mxu0 %vm187_vm0, %v73_v35 }
  0xa3   :  { %7845 = vmatmul.msk.f32.gmra.mxu1 %vm1109_vm1, %v976_v37  ;;  %v88_v37 = vld [vmem:[%s15279_s25 + $0x110] sm:$0xff] }
  0xa6   :  { %v601_v38 = vpop.f32.mrf.mxu0 }
  0xa7   :  { %v602_v40 = vadd.f32 %v9210_v21, %v601_v38 }
  0xa9   :  { %v977_v41 = vmax.f32 %v602_v40, 0.0  ;;  %7734 = vmatmul.msk.f32.gmra.mxu0 %vm187_vm0, %v74_v39  ;;  %v139_v39 = vld [vmem:[%s15279_s25 + $0x2a8] sm:$0xff] }
  0xaa   :  { %7799 = vmatmul.msk.f32.gmra.mxu2 %vm187_vm0, %v139_v39 }
  0xab   :  { %7846 = vmatmul.msk.f32.gmra.mxu1 %vm1109_vm1, %v977_v41 }
  0xae   :  { %v604_v42 = vpop.f32.mrf.mxu0 }
  0xaf   :  { %v605_v44 = vadd.f32 %v9210_v21, %v604_v42 }
  0xb1   :  { %v978_v45 = vmax.f32 %v605_v44, 0.0  ;;  %7735 = vmatmul.msk.f32.gmra.mxu0 %vm187_vm0, %v75_v43  ;;  %v89_v43 = vld [vmem:[%s15279_s25 + $0x118] sm:$0xff] }
  0xb3   :  { %7847 = vmatmul.msk.f32.gmra.mxu1 %vm1109_vm1, %v978_v45  ;;  %v140_v45 = vld [vmem:[%s15279_s25 + $0x2b0] sm:$0xff] }
  0xb4   :  { %7800 = vmatmul.msk.f32.gmra.mxu2 %vm187_vm0, %v140_v45  ;;  %v150_v45 = vld [vmem:[%s15279_s25 + $0x300] sm:$0xff] }
  0xb6   :  { %v607_v46 = vpop.f32.mrf.mxu0 }
  0xb7   :  { %v608_v48 = vadd.f32 %v9210_v21, %v607_v46 }
  0xb9   :  { %v979_v49 = vmax.f32 %v608_v48, 0.0  ;;  %7736 = vmatmul.msk.f32.gmra.mxu0 %vm187_vm0, %v76_v47 }
  0xbb   :  { %7848 = vmatmul.msk.f32.gmra.mxu1 %vm1109_vm1, %v979_v49  ;;  %v90_v49 = vld [vmem:[%s15279_s25 + $0x120] sm:$0xff] }
  0xbe   :  { %v610_v50 = vpop.f32.mrf.mxu0 }
  0xbf   :  { %v611_v52 = vadd.f32 %v9210_v21, %v610_v50 }
  0xc1   :  { %v980_v53 = vmax.f32 %v611_v52, 0.0  ;;  %7737 = vmatmul.msk.f32.gmra.mxu0 %vm187_vm0, %v77_v51  ;;  %v141_v51 = vld [vmem:[%s15279_s25 + $0x2b8] sm:$0xff] }
  0xc2   :  { %7801 = vmatmul.msk.f32.gmra.mxu2 %vm187_vm0, %v141_v51 }
  0xc3   :  { %7849 = vmatmul.msk.f32.gmra.mxu1 %vm1109_vm1, %v980_v53 }
  0xc6   :  { %v613_v54 = vpop.f32.mrf.mxu0 }
  0xc7   :  { %v614_v56 = vadd.f32 %v9210_v21, %v613_v54 }
  0xc9   :  { %v981_v57 = vmax.f32 %v614_v56, 0.0  ;;  %7738 = vmatmul.msk.f32.gmra.mxu0 %vm187_vm0, %v78_v55  ;;  %v91_v55 = vld [vmem:[%s15279_s25 + $0x128] sm:$0xff] }
  0xcb   :  { %7850 = vmatmul.msk.f32.gmra.mxu1 %vm1109_vm1, %v981_v57  ;;  %v142_v57 = vld [vmem:[%s15279_s25 + $0x2c0] sm:$0xff] }
  0xcc   :  { %7802 = vmatmul.msk.f32.gmra.mxu2 %vm187_vm0, %v142_v57  ;;  %v101_v57 = vld [vmem:[%s15279_s25 + $0x178] sm:$0xff] }
  0xce   :  { %v616_v58 = vpop.f32.mrf.mxu0 }
  0xcf   :  { %v617_v60 = vadd.f32 %v9210_v21, %v616_v58 }
  0xd1   :  { %v982_v61 = vmax.f32 %v617_v60, 0.0  ;;  %7739 = vmatmul.msk.f32.gmra.mxu0 %vm187_vm0, %v79_v59 }
  0xd3   :  { %7851 = vmatmul.msk.f32.gmra.mxu1 %vm1109_vm1, %v982_v61  ;;  %v92_v61 = vld [vmem:[%s15279_s25 + $0x130] sm:$0xff] }
  0xd6   :  { %v619_v62 = vpop.f32.mrf.mxu0 }
  0xd7   :  { %v620_v0 = vadd.f32 %v9210_v21, %v619_v62 }
  0xd9   :  { %v983_v1 = vmax.f32 %v620_v0, 0.0  ;;  %7740 = vmatmul.msk.f32.gmra.mxu0 %vm187_vm0, %v80_v63  ;;  %v143_v63 = vld [vmem:[%s15279_s25 + $0x2c8] sm:$0xff] }
  0xda   :  { %7803 = vmatmul.msk.f32.gmra.mxu2 %vm187_vm0, %v143_v63 }
  0xdb   :  { %7852 = vmatmul.msk.f32.gmra.mxu1 %vm1109_vm1, %v983_v1 }
  0xde   :  { %v622_v2 = vpop.f32.mrf.mxu0 }
  0xdf   :  { %v623_v4 = vadd.f32 %v9210_v21, %v622_v2 }
  0xe1   :  { %v984_v5 = vmax.f32 %v623_v4, 0.0  ;;  %7741 = vmatmul.msk.f32.gmra.mxu0 %vm187_vm0, %v81_v3  ;;  %v93_v3 = vld [vmem:[%s15279_s25 + $0x138] sm:$0xff] }
  0xe3   :  { %7853 = vmatmul.msk.f32.gmra.mxu1 %vm1109_vm1, %v984_v5  ;;  %v144_v5 = vld [vmem:[%s15279_s25 + $0x2d0] sm:$0xff] }
  0xe4   :  { %7804 = vmatmul.msk.f32.gmra.mxu2 %vm187_vm0, %v144_v5 }
  0xe6   :  { %v625_v6 = vpop.f32.mrf.mxu0 }
  0xe7   :  { %v626_v8 = vadd.f32 %v9210_v21, %v625_v6 }
  0xe9   :  { %v985_v9 = vmax.f32 %v626_v8, 0.0  ;;  %7742 = vmatmul.msk.f32.gmra.mxu0 %vm187_vm0, %v82_v7 }
  0xeb   :  { %7854 = vmatmul.msk.f32.gmra.mxu1 %vm1109_vm1, %v985_v9  ;;  %v94_v9 = vld [vmem:[%s15279_s25 + $0x140] sm:$0xff] }
  0xee   :  { %v628_v10 = vpop.f32.mrf.mxu0 }
  0xef   :  { %v629_v12 = vadd.f32 %v9210_v21, %v628_v10 }
  0xf1   :  { %v986_v13 = vmax.f32 %v629_v12, 0.0  ;;  %7743 = vmatmul.msk.f32.gmra.mxu0 %vm187_vm0, %v83_v11  ;;  %v145_v11 = vld [vmem:[%s15279_s25 + $0x2d8] sm:$0xff] }
  0xf2   :  { %7805 = vmatmul.msk.f32.gmra.mxu2 %vm187_vm0, %v145_v11  ;;  %v102_v11 = vld [vmem:[%s15279_s25 + $0x180] sm:$0xff] }
  0xf3   :  { %7855 = vmatmul.msk.f32.gmra.mxu1 %vm1109_vm1, %v986_v13 }
  0xf6   :  { %v631_v14 = vpop.f32.mrf.mxu0 }
  0xf7   :  { %v632_v16 = vadd.f32 %v9210_v21, %v631_v14 }
  0xf9   :  { %v987_v17 = vmax.f32 %v632_v16, 0.0  ;;  %7744 = vmatmul.msk.f32.gmra.mxu0 %vm187_vm0, %v84_v15  ;;  %v95_v15 = vld [vmem:[%s15279_s25 + $0x148] sm:$0xff] }
  0xfb   :  { %7856 = vmatmul.msk.f32.gmra.mxu1 %vm1109_vm1, %v987_v17  ;;  %v146_v17 = vld [vmem:[%s15279_s25 + $0x2e0] sm:$0xff] }
  0xfc   :  { %7806 = vmatmul.msk.f32.gmra.mxu2 %vm187_vm0, %v146_v17  ;;  %v153_v17 = vld [vmem:[%s15279_s25 + $0x318] sm:$0xff] }
  0xfe   :  { %v634_v18 = vpop.f32.mrf.mxu0 }
  0xff   :  { %v635_v20 = vadd.f32 %v9210_v21, %v634_v18 }
 0x101   :  { %v988_v23 = vmax.f32 %v635_v20, 0.0  ;;  %7745 = vmatmul.msk.f32.gmra.mxu0 %vm187_vm0, %v85_v19 }
 0x103   :  { %7857 = vmatmul.msk.f32.gmra.mxu1 %vm1109_vm1, %v988_v23 }
 0x106   :  { %v637_v24 = vpop.f32.mrf.mxu0 }
 0x107   :  { %v638_v26 = vadd.f32 %v9210_v21, %v637_v24  ;;  %v147_v24 = vld [vmem:[%s15279_s25 + $0x2e8] sm:$0xff] }
 0x108   :  { %v9319_v28 = vpop.f32.mrf.mxu1  ;;  %7807 = vmatmul.msk.f32.gmra.mxu2 %vm187_vm0, %v147_v24 }
 0x109   :  { %v989_v29 = vmax.f32 %v638_v26, 0.0  ;;  %7746 = vmatmul.msk.f32.gmra.mxu0 %vm187_vm0, %v86_v25 }
 0x10b   :  { %7858 = vmatmul.msk.f32.gmra.mxu1 %vm1109_vm1, %v989_v29  ;;  %v97_v29 = vld [vmem:[%s15279_s25 + $0x158] sm:$0xff]  ;;  %v835_v5 = vpop.f32.mrf.mxu2 }
 0x10e   :  { %v640_v30 = vpop.f32.mrf.mxu0 }
 0x10f   :  { %v641_v32 = vadd.f32 %v9210_v21, %v640_v30 }
 0x110   :  { %v9331_v34 = vpop.f32.mrf.mxu1 }
 0x111   :  { %v990_v35 = vmax.f32 %v641_v32, 0.0  ;;  %7747 = vmatmul.msk.f32.gmra.mxu0 %vm187_vm0, %v87_v31  ;;  %v148_v31 = vld [vmem:[%s15279_s25 + $0x2f0] sm:$0xff] }
 0x112   :  { %7808 = vmatmul.msk.f32.gmra.mxu2 %vm187_vm0, %v148_v31 }
 0x113   :  { %7859 = vmatmul.msk.f32.gmra.mxu1 %vm1109_vm1, %v990_v35 }
 0x116   :  { %v643_v36 = vpop.f32.mrf.mxu0 }
 0x117   :  { %v644_v38 = vadd.f32 %v9210_v21, %v643_v36  ;;  %v98_v36 = vld [vmem:[%s15279_s25 + $0x160] sm:$0xff] }
 0x118   :  { %v9343_v40 = vpop.f32.mrf.mxu1 }
 0x119   :  { %v991_v41 = vmax.f32 %v644_v38, 0.0  ;;  %7748 = vmatmul.msk.f32.gmra.mxu0 %vm187_vm0, %v88_v37  ;;  %v149_v38 = vld [vmem:[%s15279_s25 + $0x2f8] sm:$0xff] }
 0x11a   :  { %7809 = vmatmul.msk.f32.gmra.mxu2 %vm187_vm0, %v149_v38 }
 0x11b   :  { %7860 = vmatmul.msk.f32.gmra.mxu1 %vm1109_vm1, %v991_v41 }
 0x11e   :  { %v646_v42 = vpop.f32.mrf.mxu0 }
 0x11f   :  { %v647_v44 = vadd.f32 %v9210_v21, %v646_v42 }
 0x120   :  { %v9355_v46 = vpop.f32.mrf.mxu1 }
 0x121   :  { %v992_v47 = vmax.f32 %v647_v44, 0.0  ;;  %7749 = vmatmul.msk.f32.gmra.mxu0 %vm187_vm0, %v89_v43  ;;  %v99_v43 = vld [vmem:[%s15279_s25 + $0x168] sm:$0xff] }
 0x122   :  { %7810 = vmatmul.msk.f32.gmra.mxu2 %vm187_vm0, %v150_v45 }
 0x123   :  { %7861 = vmatmul.msk.f32.gmra.mxu1 %vm1109_vm1, %v992_v47 }
 0x126   :  { %v649_v48 = vpop.f32.mrf.mxu0 }
 0x127   :  { %v650_v50 = vadd.f32 %v9210_v21, %v649_v48 }
 0x128   :  { %v9367_v52 = vpop.f32.mrf.mxu1 }
 0x129   :  { %v993_v53 = vmax.f32 %v650_v50, 0.0  ;;  %7750 = vmatmul.msk.f32.gmra.mxu0 %vm187_vm0, %v90_v49  ;;  %v100_v50 = vld [vmem:[%s15279_s25 + $0x170] sm:$0xff] }
 0x12b   :  { %7862 = vmatmul.msk.f32.gmra.mxu1 %vm1109_vm1, %v993_v53  ;;  %v151_v53 = vld [vmem:[%s15279_s25 + $0x308] sm:$0xff] }
 0x12c   :  { %7811 = vmatmul.msk.f32.gmra.mxu2 %vm187_vm0, %v151_v53  ;;  %v155_v53 = vld [vmem:[%s15279_s25 + $0x328] sm:$0xff] }
 0x12e   :  { %v652_v54 = vpop.f32.mrf.mxu0 }
 0x12f   :  { %v653_v56 = vadd.f32 %v9210_v21, %v652_v54 }
 0x130   :  { %v9379_v58 = vpop.f32.mrf.mxu1 }
 0x131   :  { %v994_v59 = vmax.f32 %v653_v56, 0.0  ;;  %7751 = vmatmul.msk.f32.gmra.mxu0 %vm187_vm0, %v91_v55 }
 0x133   :  { %7863 = vmatmul.msk.f32.gmra.mxu1 %vm1109_vm1, %v994_v59  ;;  %v9490_v59 = vld [vmem:[%s15216_s11] ss:$0 sm:$0xff] }
 0x134   :  { %v1524_v45 = vadd.f32 %v9490_v59, %v9367_v52 }
 0x136   :  { %v655_v60 = vpop.f32.mrf.mxu0 }
 0x137   :  { %v656_v62 = vadd.f32 %v9210_v21, %v655_v60 }
 0x138   :  { %v9391_v0 = vpop.f32.mrf.mxu1 }
 0x139   :  { %v995_v1 = vmax.f32 %v656_v62, 0.0  ;;  %7752 = vmatmul.msk.f32.gmra.mxu0 %vm187_vm0, %v92_v61  ;;  %v152_v61 = vld [vmem:[%s15279_s25 + $0x310] sm:$0xff]  ;;  %v1530_v38 = vadd.f32 %v9490_v59, %v9391_v0 }
 0x13a   :  { %7812 = vmatmul.msk.f32.gmra.mxu2 %vm187_vm0, %v152_v61 }
 0x13b   :  { %7864 = vmatmul.msk.f32.gmra.mxu1 %vm1109_vm1, %v995_v1  ;;  %v1901_v0 = vmax.f32 %v1530_v38, 0.0  ;;  %v108_v38 = vld [vmem:[%s15279_s25 + $0x1b0] sm:$0xff] }
 0x13e   :  { %v658_v2 = vpop.f32.mrf.mxu0 }
 0x13f   :  { %v659_v4 = vadd.f32 %v9210_v21, %v658_v2 }
 0x140   :  { %v9403_v6 = vpop.f32.mrf.mxu1 }
 0x141   :  { %v996_v7 = vmax.f32 %v659_v4, 0.0  ;;  %7753 = vmatmul.msk.f32.gmra.mxu0 %vm187_vm0, %v93_v3 }
 0x142   :  { %7813 = vmatmul.msk.f32.gmra.mxu2 %vm187_vm0, %v153_v17 }
 0x143   :  { %7865 = vmatmul.msk.f32.gmra.mxu1 %vm1109_vm1, %v996_v7  ;;  %v836_v7 = vadd.f32 %v9210_v21, %v835_v5 }
 0x146   :  { %v661_v8 = vpop.f32.mrf.mxu0 }
 0x147   :  { %v662_v10 = vadd.f32 %v9210_v21, %v661_v8 }
 0x148   :  { %v9415_v12 = vpop.f32.mrf.mxu1 }
 0x149   :  { %v997_v13 = vmax.f32 %v662_v10, 0.0  ;;  %7754 = vmatmul.msk.f32.gmra.mxu0 %vm187_vm0, %v94_v9 }
 0x14b   :  { %7866 = vmatmul.msk.f32.gmra.mxu1 %vm1109_vm1, %v997_v13  ;;  %v1055_v13 = vmax.f32 %v836_v7, 0.0 }
 0x14d   :  { %7924 = vmatmul.msk.f32.vlgmr.msra.gmra.mxu3 %vm1109_vm1, %v1055_v13  ;;  %v106_v13 = vld [vmem:[%s15279_s25 + $0x1a0] sm:$0xff] }
 0x14e   :  { %v664_v14 = vpop.f32.mrf.mxu0 }
 0x14f   :  { %v665_v16 = vadd.f32 %v9210_v21, %v664_v14 }
 0x150   :  { %v9427_v18 = vpop.f32.mrf.mxu1 }
 0x151   :  { %v998_v19 = vmax.f32 %v665_v16, 0.0  ;;  %7755 = vmatmul.msk.f32.gmra.mxu0 %vm187_vm0, %v95_v15  ;;  %v1539_v24 = vadd.f32 %v9490_v59, %v9427_v18  ;;  %v1533_v18 = vadd.f32 %v9490_v59, %v9403_v6 }
 0x153   :  { %7867 = vmatmul.msk.f32.gmra.mxu1 %vm1109_vm1, %v998_v19 }
 0x156   :  { %v667_v20 = vpop.f32.mrf.mxu0 }
 0x157   :  { %v668_v23 = vadd.f32 %v9210_v21, %v667_v20 }
 0x158   :  { %v9439_v25 = vpop.f32.mrf.mxu1 }
 0x159   :  { %v999_v26 = vmax.f32 %v668_v23, 0.0  ;;  %7756 = vmatmul.msk.f32.gmra.mxu0 %vm187_vm0, %v96_v22  ;;  %v1542_v20 = vadd.f32 %v9490_v59, %v9439_v25 }
 0x15b   :  { %7868 = vmatmul.msk.f32.gmra.mxu1 %vm1109_vm1, %v999_v26  ;;  %v1905_v25 = vmax.f32 %v1542_v20, 0.0  ;;  %v15223_v20 = vmov 0  }
 0x15c   :  { %8160 = vset.pattern.permute.xlu0 %v15223_v20  ;;  %8162 = vset.pattern.permute.xlu2 %v15223_v20 }
 0x15d   :  { %8161 = vset.pattern.permute.xlu1 %v15223_v20 }
 0x15e   :  { %v670_v27 = vpop.f32.mrf.mxu0 }
 0x15f   :  { %v671_v30 = vadd.f32 %v9210_v21, %v670_v27  ;;  %v838_v27 = vpop.f32.mrf.mxu2 }
 0x160   :  { %v1544_v32 = vpop.f32.mrf.mxu1 }
 0x161   :  { %v1000_v33 = vmax.f32 %v671_v30, 0.0  ;;  %7757 = vmatmul.msk.f32.gmra.mxu0 %vm187_vm0, %v97_v29  ;;  %v1545_v14 = vadd.f32 %v9490_v59, %v1544_v32  ;;  %v839_v29 = vadd.f32 %v9210_v21, %v838_v27  ;;  %v1536_v30 = vadd.f32 %v9490_v59, %v9415_v12  ;;  %v103_v32 = vld [vmem:[%s15279_s25 + $0x188] sm:$0xff] }
 0x163   :  { %7869 = vmatmul.msk.f32.gmra.mxu1 %vm1109_vm1, %v1000_v33  ;;  %v1906_v26 = vmax.f32 %v1545_v14, 0.0  ;;  %v1056_v33 = vmax.f32 %v839_v29, 0.0  ;;  %v1903_v6 = vmax.f32 %v1536_v30, 0.0  ;;  %v107_v29 = vld [vmem:[%s15279_s25 + $0x1a8] sm:$0xff] }
 0x165   :  { %7925 = vmatmul.msk.f32.gmra.mxu3 %vm1109_vm1, %v1056_v33  ;;  %v2350_v33 = vld [vmem:[%s15212_s7] sm:$0xff] }
 0x166   :  { %v673_v35 = vpop.f32.mrf.mxu0 }
 0x167   :  { %v674_v37 = vadd.f32 %v9210_v21, %v673_v35 }
 0x168   :  { %v1547_v39 = vpop.f32.mrf.mxu1 }
 0x169   :  { %v1001_v41 = vmax.f32 %v674_v37, 0.0  ;;  %7758 = vmatmul.msk.f32.gmra.mxu0 %vm187_vm0, %v98_v36  ;;  %v1548_v8 = vadd.f32 %v9490_v59, %v1547_v39  ;;  %v1904_v36 = vmax.f32 %v1539_v24, 0.0  ;;  %v154_v37 = vld [vmem:[%s15279_s25 + $0x320] sm:$0xff] }
 0x16a   :  { %7814 = vmatmul.msk.f32.gmra.mxu2 %vm187_vm0, %v154_v37 }
 0x16b   :  { %7870 = vmatmul.msk.f32.gmra.mxu1 %vm1109_vm1, %v1001_v41  ;;  %v1907_v23 = vmax.f32 %v1548_v8, 0.0  ;;  %v1527_v41 = vadd.f32 %v9490_v59, %v9379_v58  ;;  %v1521_v58 = vadd.f32 %v9490_v59, %v9355_v46  ;;  %v1899_v46 = vmax.f32 %v1524_v45, 0.0 }
 0x16e   :  { %v676_v42 = vpop.f32.mrf.mxu0 }
 0x16f   :  { %v677_v44 = vadd.f32 %v9210_v21, %v676_v42  ;;  %v1902_v42 = vmax.f32 %v1533_v18, 0.0 }
 0x170   :  { %v1550_v47 = vpop.f32.mrf.mxu1 }
 0x171   :  { %v1002_v48 = vmax.f32 %v677_v44, 0.0  ;;  %7759 = vmatmul.msk.f32.gmra.mxu0 %vm187_vm0, %v99_v43  ;;  %v1551_v3 = vadd.f32 %v9490_v59, %v1550_v47  ;;  %v841_v43 = vpop.f32.mrf.mxu2 }
 0x172   :  { %v842_v44 = vadd.f32 %v9210_v21, %v841_v43  ;;  %7815 = vmatmul.msk.f32.gmra.mxu2 %vm187_vm0, %v155_v53  ;;  %v2351_v43 = vld [vmem:[%s15212_s7 + $0x8] sm:$0xff]  ;;  %v2352_v53 = vld [vmem:[%s15212_s7 + $0x10] sm:$0xff] }
 0x173   :  { %7871 = vmatmul.msk.f32.gmra.mxu1 %vm1109_vm1, %v1002_v48  ;;  %v1908_v16 = vmax.f32 %v1551_v3, 0.0  ;;  %v104_v48 = vld [vmem:[%s15279_s25 + $0x190] sm:$0xff] }
 0x176   :  { %v679_v49 = vpop.f32.mrf.mxu0 }
 0x177   :  { %v680_v51 = vadd.f32 %v9210_v21, %v679_v49  ;;  %v1057_v49 = vmax.f32 %v842_v44, 0.0 }
 0x178   :  { %v1553_v54 = vpop.f32.mrf.mxu1 }
 0x179   :  { %v1003_v55 = vmax.f32 %v680_v51, 0.0  ;;  %7760 = vmatmul.msk.f32.gmra.mxu0 %vm187_vm0, %v100_v50  ;;  %v1554_v63 = vadd.f32 %v9490_v59, %v1553_v54  ;;  %v1900_v51 = vmax.f32 %v1527_v41, 0.0  ;;  %7926 = vmatmul.msk.f32.gmra.mxu3 %vm1109_vm1, %v1057_v49  ;;  %v1518_v54 = vadd.f32 %v9490_v59, %v9343_v40  ;;  %v159_v41 = vld [vmem:[%s15279_s25 + $0x348] sm:$0xff] }
 0x17b   :  { %7872 = vmatmul.msk.f32.gmra.mxu1 %vm1109_vm1, %v1003_v55  ;;  %v1909_v9 = vmax.f32 %v1554_v63, 0.0  ;;  %v1897_v40 = vmax.f32 %v1518_v54, 0.0 }
 0x17e   :  { %v682_v56 = vpop.f32.mrf.mxu0 }
 0x17f   :  { %v683_v60 = vadd.f32 %v9210_v21, %v682_v56  ;;  %v1515_v56 = vadd.f32 %v9490_v59, %v9331_v34 }
 0x180   :  { %v1556_v62 = vpop.f32.mrf.mxu1 }
 0x181   :  { %v1004_v1 = vmax.f32 %v683_v60, 0.0  ;;  %v1557_v2 = vadd.f32 %v9490_v59, %v1556_v62  ;;  %7761 = vmatmul.msk.f32.gmra.mxu0 %vm187_vm0, %v101_v57  ;;  %v1898_v57 = vmax.f32 %v1521_v58, 0.0  ;;  %v844_v60 = vpop.f32.mrf.mxu2  ;;  %v1512_v62 = vadd.f32 %v9490_v59, %v9319_v28  ;;  %v2222_v28 = vld [vmem:[%s15209_s4] sm:$0xff] }
 0x182   :  { %v845_v61 = vadd.f32 %v9210_v21, %v844_v60  ;;  %v1896_v3 = vmax.f32 %v1515_v56, 0.0  ;;  %2234 = vrot.lane.b32.xlu0 %v2222_v28, %s9035_s26  ;;  %v110_v60 = vld [vmem:[%s15279_s25 + $0x1c0] sm:$0xff] }
 0x183   :  { %7873 = vmatmul.msk.f32.gmra.mxu1 %vm1109_vm1, %v1004_v1  ;;  %v1910_v4 = vmax.f32 %v1557_v2, 0.0  ;;  %v105_v1 = vld [vmem:[%s15279_s25 + $0x198] sm:$0xff]  ;;  %v1895_v8 = vmax.f32 %v1512_v62, 0.0 }
 0x184   :  { %v1058_v2 = vmax.f32 %v845_v61, 0.0 }
 0x185   :  { %2031 = vmatpush.msrb.mxu2 %v1910_v4  ;;  %v156_v4 = vld [vmem:[%s15279_s25 + $0x330] sm:$0xff] }
 0x186   :  { %v685_v10 = vpop.f32.mrf.mxu0  ;;  %7816 = vmatmul.msk.f32.gmra.mxu2 %vm187_vm0, %v156_v4  ;;  %7927 = vmatmul.msk.f32.gmra.mxu3 %vm1109_vm1, %v1058_v2 }
 0x187   :  { %v686_v15 = vadd.f32 %v9210_v21, %v685_v10  ;;  %2032 = vmatpush.msrb.mxu2 %v1909_v9 }
 0x188   :  { %v9512_v19 = vpop.f32.mrf.mxu1 }
 0x189   :  { %v1005_v22 = vmax.f32 %v686_v15, 0.0  ;;  %7762 = vmatmul.msk.f32.gmra.mxu0 %vm187_vm0, %v102_v11  ;;  %2033 = vmatpush.msrb.mxu2 %v1908_v16  ;;  %v847_v9 = vpop.f32.mrf.mxu2  ;;  %v157_v16 = vld [vmem:[%s15279_s25 + $0x338] sm:$0xff] }
 0x18a   :  { %v848_v10 = vadd.f32 %v9210_v21, %v847_v9 }
 0x18b   :  { %7874 = vmatmul.msk.f32.gmra.mxu1 %vm1109_vm1, %v1005_v22  ;;  %2034 = vmatpush.msrb.mxu2 %v1907_v23  ;;  %v2245_v22 = vld [vmem:[%s15218_s13] sm:$0xff] }
 0x18c   :  { %v1059_v14 = vmax.f32 %v848_v10, 0.0  ;;  %2252 = vperm.xlu0 %8160, %v2245_v22   ;;  %v162_v10 = vld [vmem:[%s15279_s25 + $0x360] sm:$0xff] }
 0x18d   :  { %2035 = vmatpush.msrb.mxu2 %v1906_v26 }
 0x18e   :  { %v688_v31 = vpop.f32.mrf.mxu0  ;;  %7817 = vmatmul.msk.f32.gmra.mxu2 %vm187_vm0, %v157_v16  ;;  %7928 = vmatmul.msk.f32.gmra.mxu3 %vm1109_vm1, %v1059_v14  ;;  %v2359_v16 = vld [vmem:[%s15212_s7 + $0x48] sm:$0xff] }
 0x18f   :  { %v689_v35 = vadd.f32 %v9210_v21, %v688_v31  ;;  %2036 = vmatpush.msrb.mxu2 %v1905_v25  ;;  %v158_v31 = vld [vmem:[%s15279_s25 + $0x340] sm:$0xff] }
 0x190   :  { %v9534_v12 = vpop.f32.mrf.mxu1 }
 0x191   :  { %v1006_v39 = vmax.f32 %v689_v35, 0.0  ;;  %7763 = vmatmul.msk.f32.gmra.mxu0 %vm187_vm0, %v103_v32  ;;  %2037 = vmatpush.msrb.mxu2 %v1904_v36  ;;  %v850_v24 = vpop.f32.mrf.mxu2 }
 0x192   :  { %v851_v26 = vadd.f32 %v9210_v21, %v850_v24  ;;  %v112_v24 = vld [vmem:[%s15279_s25 + $0x1d0] sm:$0xff] }
 0x193   :  { %7875 = vmatmul.msk.f32.gmra.mxu1 %vm1109_vm1, %v1006_v39  ;;  %2038 = vmatpush.msrb.mxu2 %v1903_v6 }
 0x194   :  { %v1060_v30 = vmax.f32 %v851_v26, 0.0  ;;  %2383 = vrot.lane.b32.xlu0 %v2350_v33, %s9037_s22 }
 0x195   :  { %2039 = vmatpush.msrb.mxu2 %v1902_v42 }
 0x196   :  { %v691_v47 = vpop.f32.mrf.mxu0  ;;  %7818 = vmatmul.msk.f32.gmra.mxu2 %vm187_vm0, %v158_v31  ;;  %7929 = vmatmul.msk.f32.gmra.mxu3 %vm1109_vm1, %v1060_v30 }
 0x197   :  { %v692_v50 = vadd.f32 %v9210_v21, %v691_v47  ;;  %2040 = vmatpush.msrb.mxu2 %v1901_v0 }
 0x198   :  { %v9556_v52 = vpop.f32.mrf.mxu1 }
 0x199   :  { %v1007_v55 = vmax.f32 %v692_v50, 0.0  ;;  %7764 = vmatmul.msk.f32.gmra.mxu0 %vm187_vm0, %v104_v48  ;;  %2041 = vmatpush.msrb.mxu2 %v1900_v51  ;;  %v853_v35 = vpop.f32.mrf.mxu2  ;;  %v109_v48 = vld [vmem:[%s15279_s25 + $0x1b8] sm:$0xff]  ;;  %v160_v50 = vld [vmem:[%s15279_s25 + $0x350] sm:$0xff] }
 0x19a   :  { %v854_v36 = vadd.f32 %v9210_v21, %v853_v35 }
 0x19b   :  { %7876 = vmatmul.msk.f32.gmra.mxu1 %vm1109_vm1, %v1007_v55  ;;  %2042 = vmatpush.msrb.mxu2 %v1899_v46  ;;  %v2248_v46 = vld [vmem:[%s15218_s13 + $0x18] sm:$0xff] }
 0x19c   :  { %v1061_v39 = vmax.f32 %v854_v36, 0.0  ;;  %2385 = vrot.lane.b32.xlu0 %v2351_v43, %s9037_s22  ;;  %2267 = vperm.xlu2 %8162, %v2248_v46   ;;  %v2358_v43 = vld [vmem:[%s15212_s7 + $0x40] sm:$0xff] }
 0x19d   :  { %2043 = vmatpush.msrb.mxu2 %v1898_v57 }
 0x19e   :  { %v694_v63 = vpop.f32.mrf.mxu0  ;;  %7819 = vmatmul.msk.f32.gmra.mxu2 %vm187_vm0, %v159_v41  ;;  %7930 = vmatmul.msk.f32.gmra.mxu3 %vm1109_vm1, %v1061_v39 }
 0x19f   :  { %v695_v34 = vadd.f32 %v9210_v21, %v694_v63  ;;  %2044 = vmatpush.msrb.mxu2 %v1897_v40  ;;  %v161_v40 = vld [vmem:[%s15279_s25 + $0x358] sm:$0xff] }
 0x1a0   :  { %v9576_v5 = vpop.f32.mrf.mxu1 }
 0x1a1   :  { %v1008_v7 = vmax.f32 %v695_v34, 0.0  ;;  %7765 = vmatmul.msk.f32.gmra.mxu0 %vm187_vm0, %v105_v1  ;;  %2045 = vmatpush.msrb.mxu2 %v1896_v3  ;;  %v856_v45 = vpop.f32.mrf.mxu2  ;;  %v2353_v1 = vld [vmem:[%s15212_s7 + $0x18] sm:$0xff]  ;;  %v2354_v3 = vld [vmem:[%s15212_s7 + $0x20] sm:$0xff] }
 0x1a2   :  { %v857_v0 = vadd.f32 %v9210_v21, %v856_v45 }
 0x1a3   :  { %7877 = vmatmul.msk.f32.gmra.mxu1 %vm1109_vm1, %v1008_v7  ;;  %2046 = vmatpush.msrb.mxu2 %v1895_v8  ;;  %v111_v7 = vld [vmem:[%s15279_s25 + $0x1c8] sm:$0xff] }
 0x1a4   :  { %v1062_v49 = vmax.f32 %v857_v0, 0.0  ;;  %2387 = vrot.lane.b32.xlu0 %v2352_v53, %s9037_s22  ;;  %2391 = vrot.lane.b32.xlu2 %v2354_v3, %s9037_s22  ;;  %v2364_v0 = vld [vmem:[%s15212_s7 + $0x70] sm:$0xff]  ;;  %v165_v53 = vld [vmem:[%s15279_s25 + $0x378] sm:$0xff] }
 0x1a5   :  { %v2363_v3 = vld [vmem:[%s15212_s7 + $0x68] sm:$0xff] }
 0x1a6   :  { %v697_v11 = vpop.f32.mrf.mxu0  ;;  %7820 = vmatmul.msk.f32.gmra.mxu2 %vm187_vm0, %v160_v50  ;;  %7931 = vmatmul.msk.f32.gmra.mxu3 %vm1109_vm1, %v1062_v49  ;;  %v114_v49 = vld [vmem:[%s15279_s25 + $0x1e0] sm:$0xff] }
 0x1a7   :  { %v698_v15 = vadd.f32 %v9210_v21, %v697_v11 }
 0x1a8   :  { %v9593_v17 = vpop.f32.mrf.mxu1 }
 0x1a9   :  { %v1009_v23 = vmax.f32 %v698_v15, 0.0  ;;  %7766 = vmatmul.msk.f32.gmra.mxu0 %vm187_vm0, %v106_v13  ;;  %v859_v55 = vpop.f32.mrf.mxu2  ;;  %v2355_v13 = vld [vmem:[%s15212_s7 + $0x28] sm:$0xff] }
 0x1aa   :  { %v860_v56 = vadd.f32 %v9210_v21, %v859_v55  ;;  %v2360_v55 = vld [vmem:[%s15212_s7 + $0x50] sm:$0xff] }
 0x1ab   :  { %7878 = vmatmul.msk.f32.gmra.mxu1 %vm1109_vm1, %v1009_v23 }
 0x1ac   :  { %v1063_v61 = vmax.f32 %v860_v56, 0.0  ;;  %2389 = vrot.lane.b32.xlu0 %v2353_v1, %s9037_s22  ;;  %2401 = vrot.lane.b32.xlu2 %v2359_v16, %s9037_s22 }
 0x1ae   :  { %v700_v27 = vpop.f32.mrf.mxu0  ;;  %7821 = vmatmul.msk.f32.gmra.mxu2 %vm187_vm0, %v161_v40  ;;  %7932 = vmatmul.msk.f32.gmra.mxu3 %vm1109_vm1, %v1063_v61 }
 0x1af   :  { %v701_v25 = vadd.f32 %v9210_v21, %v700_v27 }
 0x1b0   :  { %v9613_v32 = vpop.f32.mrf.mxu1 }
 0x1b1   :  { %v1010_v18 = vmax.f32 %v701_v25, 0.0  ;;  %7767 = vmatmul.msk.f32.gmra.mxu0 %vm187_vm0, %v107_v29  ;;  %v862_v34 = vpop.f32.mrf.mxu2  ;;  %v163_v29 = vld [vmem:[%s15279_s25 + $0x368] sm:$0xff]  ;;  %v2357_v25 = vld [vmem:[%s15212_s7 + $0x38] sm:$0xff] }
 0x1b2   :  { %v863_v4 = vadd.f32 %v9210_v21, %v862_v34 }
 0x1b3   :  { %7879 = vmatmul.msk.f32.gmra.mxu1 %vm1109_vm1, %v1010_v18  ;;  %v2361_v18 = vld [vmem:[%s15212_s7 + $0x58] sm:$0xff] }
 0x1b4   :  { %v1064_v8 = vmax.f32 %v863_v4, 0.0  ;;  %2393 = vrot.lane.b32.xlu0 %v2355_v13, %s9037_s22  ;;  %2405 = vrot.lane.b32.xlu2 %v2361_v18, %s9037_s22 }
 0x1b6   :  { %v703_v37 = vpop.f32.mrf.mxu0  ;;  %7822 = vmatmul.msk.f32.gmra.mxu2 %vm187_vm0, %v162_v10  ;;  %7933 = vmatmul.msk.f32.gmra.mxu3 %vm1109_vm1, %v1064_v8  ;;  %v116_v10 = vld [vmem:[%s15279_s25 + $0x1f0] sm:$0xff] }
 0x1b7   :  { %v704_v6 = vadd.f32 %v9210_v21, %v703_v37  ;;  %v113_v37 = vld [vmem:[%s15279_s25 + $0x1d8] sm:$0xff] }
 0x1b8   :  { %v9631_v42 = vpop.f32.mrf.mxu1 }
 0x1b9   :  { %v1011_v44 = vmax.f32 %v704_v6, 0.0  ;;  %7768 = vmatmul.msk.f32.gmra.mxu0 %vm187_vm0, %v108_v38  ;;  %v865_v15 = vpop.f32.mrf.mxu2  ;;  %v164_v6 = vld [vmem:[%s15279_s25 + $0x370] sm:$0xff] }
 0x1ba   :  { %v866_v22 = vadd.f32 %v9210_v21, %v865_v15  ;;  %v167_v15 = vld [vmem:[%s15279_s25 + $0x388] sm:$0xff] }
 0x1bb   :  { %7880 = vmatmul.msk.f32.gmra.mxu1 %vm1109_vm1, %v1011_v44 }
 0x1bc   :  { %v1065_v26 = vmax.f32 %v866_v22, 0.0  ;;  %2397 = vrot.lane.b32.xlu0 %v2357_v25, %s9037_s22  ;;  %2411 = vrot.lane.b32.xlu2 %v2364_v0, %s9037_s22 }
 0x1be   :  { %v706_v47 = vpop.f32.mrf.mxu0  ;;  %7823 = vmatmul.msk.f32.gmra.mxu2 %vm187_vm0, %v163_v29  ;;  %7934 = vmatmul.msk.f32.gmra.mxu3 %vm1109_vm1, %v1065_v26  ;;  %v117_v29 = vld [vmem:[%s15279_s25 + $0x1f8] sm:$0xff] }
 0x1bf   :  { %v707_v58 = vadd.f32 %v9210_v21, %v706_v47 }
 0x1c0   :  { %v9649_v51 = vpop.f32.mrf.mxu1 }
 0x1c1   :  { %v1012_v54 = vmax.f32 %v707_v58, 0.0  ;;  %7769 = vmatmul.msk.f32.gmra.mxu0 %vm187_vm0, %v109_v48  ;;  %v868_v33 = vpop.f32.mrf.mxu2 }
 0x1c2   :  { %v869_v35 = vadd.f32 %v9210_v21, %v868_v33  ;;  %v168_v33 = vld [vmem:[%s15279_s25 + $0x390] sm:$0xff] }
 0x1c3   :  { %7881 = vmatmul.msk.f32.gmra.mxu1 %vm1109_vm1, %v1012_v54 }
 0x1c4   :  { %v1066_v38 = vmax.f32 %v869_v35, 0.0  ;;  %2399 = vrot.lane.b32.xlu0 %v2358_v43, %s9037_s22  ;;  %v7995_v43 = vld [vmem:[%s15212_s7 + $0xe0] sm:$0xff] }
 0x1c6   :  { %v709_v57 = vpop.f32.mrf.mxu0  ;;  %7824 = vmatmul.msk.f32.gmra.mxu2 %vm187_vm0, %v164_v6  ;;  %7935 = vmatmul.msk.f32.gmra.mxu3 %vm1109_vm1, %v1066_v38 }
 0x1c7   :  { %v710_v62 = vadd.f32 %v9210_v21, %v709_v57  ;;  %v7985_v57 = vld [vmem:[%s15212_s7 + $0x90] sm:$0xff] }
 0x1c8   :  { %v9670_v63 = vpop.f32.mrf.mxu1  ;;  %3073 = vrot.lane.b32.xlu2 %v7985_v57, %s9037_s22 }
 0x1c9   :  { %v1013_v2 = vmax.f32 %v710_v62, 0.0  ;;  %7770 = vmatmul.msk.f32.gmra.mxu0 %vm187_vm0, %v110_v60  ;;  %v871_v45 = vpop.f32.mrf.mxu2  ;;  %v115_v62 = vld [vmem:[%s15279_s25 + $0x1e8] sm:$0xff] }
 0x1ca   :  { %v872_v47 = vadd.f32 %v9210_v21, %v871_v45 }
 0x1cb   :  { %7882 = vmatmul.msk.f32.gmra.mxu1 %vm1109_vm1, %v1013_v2  ;;  %v166_v2 = vld [vmem:[%s15279_s25 + $0x380] sm:$0xff] }
 0x1cc   :  { %v1067_v58 = vmax.f32 %v872_v47, 0.0  ;;  %2403 = vrot.lane.b32.xlu0 %v2360_v55, %s9037_s22  ;;  %v169_v55 = vld [vmem:[%s15279_s25 + $0x398] sm:$0xff] }
 0x1ce   :  { %v712_v28 = vpop.f32.mrf.mxu0  ;;  %7825 = vmatmul.msk.f32.gmra.mxu2 %vm187_vm0, %v165_v53  ;;  %7936 = vmatmul.msk.f32.gmra.mxu3 %vm1109_vm1, %v1067_v58 }
 0x1cf   :  { %v713_v9 = vadd.f32 %v9210_v21, %v712_v28  ;;  %v7989_v28 = vld [vmem:[%s15212_s7 + $0xb0] sm:$0xff] }
 0x1d0   :  { %v9692_v11 = vpop.f32.mrf.mxu1  ;;  %3081 = vrot.lane.b32.xlu2 %v7989_v28, %s9037_s22 }
 0x1d1   :  { %v1014_v14 = vmax.f32 %v713_v9, 0.0  ;;  %7771 = vmatmul.msk.f32.gmra.mxu0 %vm187_vm0, %v111_v7  ;;  %v874_v56 = vpop.f32.mrf.mxu2  ;;  %v9794_v7 = vld [vmem:[%s15214_s9] ss:$0 sm:$0xff]  ;;  %v1587_v57 = vadd.f32 %v9490_v59, %v9692_v11 }
 0x1d2   :  { %v875_v60 = vadd.f32 %v9210_v21, %v874_v56 }
 0x1d3   :  { %7883 = vmatmul.msk.f32.gmra.mxu1 %vm1109_vm1, %v1014_v14  ;;  %v1920_v28 = vmax.f32 %v1587_v57, 0.0 }
 0x1d4   :  { %v1068_v40 = vmax.f32 %v875_v60, 0.0  ;;  %2409 = vrot.lane.b32.xlu0 %v2363_v3, %s9037_s22 }
 0x1d6   :  { %v715_v23 = vpop.f32.mrf.mxu0  ;;  %7826 = vmatmul.msk.f32.gmra.mxu2 %vm187_vm0, %v166_v2  ;;  %7937 = vmatmul.msk.f32.gmra.mxu3 %vm1109_vm1, %v1068_v40 }
 0x1d7   :  { %v716_v27 = vadd.f32 %v9210_v21, %v715_v23 }
 0x1d8   :  { %v9714_v30 = vpop.f32.mrf.mxu1 }
 0x1d9   :  { %v1015_v31 = vmax.f32 %v716_v27, 0.0  ;;  %7772 = vmatmul.msk.f32.gmra.mxu0 %vm187_vm0, %v112_v24  ;;  %v7992_v24 = vld [vmem:[%s15212_s7 + $0xc8] sm:$0xff] }
 0x1da   :  { %3087 = vrot.lane.b32.xlu2 %v7992_v24, %s9037_s22 }
 0x1db   :  { %7884 = vmatmul.msk.f32.gmra.mxu1 %vm1109_vm1, %v1015_v31 }
 0x1de   :  { %v718_v36 = vpop.f32.mrf.mxu0  ;;  %7827 = vmatmul.msk.f32.gmra.mxu2 %vm187_vm0, %v167_v15 }
 0x1df   :  { %v719_v39 = vadd.f32 %v9210_v21, %v718_v36 }
 0x1e0   :  { %v9736_v41 = vpop.f32.mrf.mxu1 }
 0x1e1   :  { %v1016_v44 = vmax.f32 %v719_v39, 0.0  ;;  %7773 = vmatmul.msk.f32.gmra.mxu0 %vm187_vm0, %v113_v37  ;;  %v1593_v58 = vadd.f32 %v9490_v59, %v9736_v41 }
 0x1e2   :  { %3093 = vrot.lane.b32.xlu2 %v7995_v43, %s9037_s22  ;;  %v1560_v43 = vadd.f32 %v9490_v59, %v9512_v19 }
 0x1e3   :  { %7885 = vmatmul.msk.f32.gmra.mxu1 %vm1109_vm1, %v1016_v44  ;;  %v1922_v60 = vmax.f32 %v1593_v58, 0.0 }
 0x1e4   :  { %v1911_v19 = vmax.f32 %v1560_v43, 0.0 }
 0x1e6   :  { %v721_v48 = vpop.f32.mrf.mxu0  ;;  %7828 = vmatmul.msk.f32.gmra.mxu2 %vm187_vm0, %v168_v33  ;;  %v1566_v33 = vadd.f32 %v9490_v59, %v9556_v52 }
 0x1e7   :  { %v722_v50 = vadd.f32 %v9210_v21, %v721_v48  ;;  %v118_v48 = vld [vmem:[%s15279_s25 + $0x200] sm:$0xff] }
 0x1e8   :  { %v9758_v54 = vpop.f32.mrf.mxu1 }
 0x1e9   :  { %v1017_v46 = vmax.f32 %v722_v50, 0.0  ;;  %7774 = vmatmul.msk.f32.gmra.mxu0 %vm187_vm0, %v114_v49  ;;  %v1596_v45 = vadd.f32 %v9490_v59, %v9758_v54 }
 0x1eb   :  { %7886 = vmatmul.msk.f32.gmra.mxu1 %vm1109_vm1, %v1017_v46  ;;  %v1590_v46 = vadd.f32 %v9490_v59, %v9714_v30  ;;  %v1923_v41 = vmax.f32 %v1596_v45, 0.0  ;;  %v7998_v30 = vld [vmem:[%s15212_s7 + $0xf8] sm:$0xff] }
 0x1ec   :  { %3099 = vrot.lane.b32.xlu2 %v7998_v30, %s9037_s22 }
 0x1ed   :  { %v1921_v11 = vmax.f32 %v1590_v46, 0.0 }
 0x1ee   :  { %v724_v61 = vpop.f32.mrf.mxu0  ;;  %7829 = vmatmul.msk.f32.gmra.mxu2 %vm187_vm0, %v169_v55 }
 0x1ef   :  { %v725_v1 = vadd.f32 %v9210_v21, %v724_v61  ;;  %v877_v21 = vpop.f32.mrf.mxu2 }
 0x1f0   :  { %v1598_v34 = vpop.f32.mrf.mxu1  ;;  %v878_v8 = vadd.f32 %v9794_v7, %v877_v21 }
 0x1f1   :  { %v1018_v4 = vmax.f32 %v725_v1, 0.0  ;;  %7775 = vmatmul.msk.f32.gmra.mxu0 %vm187_vm0, %v115_v62  ;;  %v1599_v38 = vadd.f32 %v9490_v59, %v1598_v34  ;;  %v9854_v62 = vpop.f32.mrf.mxu3  ;;  %v1584_v1 = vadd.f32 %v9490_v59, %v9670_v63  ;;  %v119_v34 = vld [vmem:[%s15279_s25 + $0x208] sm:$0xff] }
 0x1f2   :  { %v1069_v13 = vmax.f32 %v878_v8, 0.0  ;;  %v170_v8 = vld [vmem:[%s15279_s25 + $0x3a0] sm:$0xff] }
 0x1f3   :  { %7887 = vmatmul.msk.f32.gmra.mxu1 %vm1109_vm1, %v1018_v4  ;;  %v1924_v53 = vmax.f32 %v1599_v38, 0.0  ;;  %v1581_v4 = vadd.f32 %v9490_v59, %v9649_v51  ;;  %v1919_v51 = vmax.f32 %v1584_v1, 0.0 }
 0x1f4   :  { %7938 = vmatmul.msk.f32.gmra.mxu3 %vm1109_vm1, %v1069_v13  ;;  %v1575_v13 = vadd.f32 %v9490_v59, %v9613_v32 }
 0x1f6   :  { %v727_v9 = vpop.f32.mrf.mxu0  ;;  %7830 = vmatmul.msk.f32.gmra.mxu2 %vm187_vm0, %v170_v8 }
 0x1f7   :  { %v728_v14 = vadd.f32 %v9794_v7, %v727_v9  ;;  %v880_v23 = vpop.f32.mrf.mxu2  ;;  %v1578_v9 = vadd.f32 %v9490_v59, %v9631_v42  ;;  %v1572_v42 = vadd.f32 %v9490_v59, %v9593_v17 }
 0x1f8   :  { %v1601_v16 = vpop.f32.mrf.mxu1  ;;  %v881_v26 = vadd.f32 %v9794_v7, %v880_v23 }
 0x1f9   :  { %v1019_v22 = vmax.f32 %v728_v14, 0.0  ;;  %7776 = vmatmul.msk.f32.gmra.mxu0 %vm187_vm0, %v116_v10  ;;  %v1602_v35 = vadd.f32 %v9490_v59, %v1601_v16  ;;  %v1918_v14 = vmax.f32 %v1581_v4, 0.0  ;;  %v9882_v16 = vpop.f32.mrf.mxu3  ;;  %v1917_v23 = vmax.f32 %v1578_v9, 0.0  ;;  %v7983_v4 = vld [vmem:[%s15212_s7 + $0x80] sm:$0xff] }
 0x1fa   :  { %v1070_v25 = vmax.f32 %v881_v26, 0.0  ;;  %v120_v26 = vld [vmem:[%s15279_s25 + $0x210] sm:$0xff] }
 0x1fb   :  { %7888 = vmatmul.msk.f32.gmra.mxu1 %vm1109_vm1, %v1019_v22  ;;  %v1925_v0 = vmax.f32 %v1602_v35, 0.0  ;;  %v9905_v35 = vld [vmem:[%s15208_s3] sm:$0xff] }
 0x1fc   :  { %7939 = vmatmul.msk.f32.gmra.mxu3 %vm1109_vm1, %v1070_v25  ;;  %v1916_v25 = vmax.f32 %v1575_v13, 0.0 }
 0x1fe   :  { %v730_v27 = vpop.f32.mrf.mxu0 }
 0x1ff   :  { %v731_v31 = vadd.f32 %v9794_v7, %v730_v27  ;;  %v883_v6 = vpop.f32.mrf.mxu2  ;;  %v1569_v27 = vadd.f32 %v9490_v59, %v9576_v5  ;;  %v1915_v5 = vmax.f32 %v1572_v42, 0.0 }
 0x200   :  { %v1604_v18 = vpop.f32.mrf.mxu1  ;;  %v884_v44 = vadd.f32 %v9794_v7, %v883_v6 }
 0x201   :  { %v1020_v36 = vmax.f32 %v731_v31, 0.0  ;;  %v1605_v37 = vadd.f32 %v9490_v59, %v1604_v18  ;;  %7777 = vmatmul.msk.f32.gmra.mxu0 %vm187_vm0, %v117_v29  ;;  %v171_v31 = vld [vmem:[%s15279_s25 + $0x3a8] sm:$0xff]  ;;  %v1914_v52 = vmax.f32 %v1569_v27, 0.0 }
 0x202   :  { %v1071_v49 = vmax.f32 %v884_v44, 0.0  ;;  %7831 = vmatmul.msk.f32.gmra.mxu2 %vm187_vm0, %v171_v31  ;;  %v1913_v44 = vmax.f32 %v1566_v33, 0.0 }
 0x203   :  { %7889 = vmatmul.msk.f32.gmra.mxu1 %vm1109_vm1, %v1020_v36  ;;  %v1926_v39 = vmax.f32 %v1605_v37, 0.0  ;;  %v2943_v36 = vsel %vm2337_vm2, %v9905_v35, 0.0  ;;  %v1563_v37 = vadd.f32 %v9490_v59, %v9534_v12  ;;  %v121_v12 = vld [vmem:[%s15279_s25 + $0x218] sm:$0xff] }
 0x204   :  { %7940 = vmatmul.msk.f32.gmra.mxu3 %vm1109_vm1, %v1071_v49  ;;  %2944 = vadd.xlane.f32.xlu0 %v2943_v36  ;;  %v172_v49 = vld [vmem:[%s15279_s25 + $0x3b0] sm:$0xff]  ;;  %v7987_v36 = vld [vmem:[%s15212_s7 + $0xa0] sm:$0xff] }
 0x205   :  { %2051 = vmatpush.msrb.mxu3 %v1926_v39  ;;  %v9913_v39 = vpop.f32.mrf.mxu3 }
 0x206   :  { %v733_v47 = vpop.f32.mrf.mxu0 }
 0x207   :  { %v734_v50 = vadd.f32 %v9794_v7, %v733_v47  ;;  %2052 = vmatpush.msrb.mxu3 %v1925_v0  ;;  %v886_v61 = vpop.f32.mrf.mxu2 }
 0x208   :  { %v9844_v54 = vpop.f32.mrf.mxu1  ;;  %v887_v40 = vadd.f32 %v9794_v7, %v886_v61 }
 0x209   :  { %v1021_v56 = vmax.f32 %v734_v50, 0.0  ;;  %7778 = vmatmul.msk.f32.gmra.mxu0 %vm187_vm0, %v118_v48  ;;  %2053 = vmatpush.msrb.mxu3 %v1924_v53  ;;  %v1912_v48 = vmax.f32 %v1563_v37, 0.0 }
 0x20a   :  { %v1072_v3 = vmax.f32 %v887_v40, 0.0  ;;  %7832 = vmatmul.msk.f32.gmra.mxu2 %vm187_vm0, %v172_v49 }
 0x20b   :  { %7890 = vmatmul.msk.f32.gmra.mxu1 %vm1109_vm1, %v1021_v56  ;;  %2054 = vmatpush.msrb.mxu3 %v1923_v41  ;;  %v122_v56 = vld [vmem:[%s15279_s25 + $0x220] sm:$0xff] }
 0x20c   :  { %7941 = vmatmul.msk.f32.gmra.mxu3 %vm1109_vm1, %v1072_v3 }
 0x20d   :  { %2055 = vmatpush.msrb.mxu3 %v1922_v60  ;;  %v9931_v53 = vpop.f32.mrf.mxu3  ;;  %v173_v60 = vld [vmem:[%s15279_s25 + $0x3b8] sm:$0xff] }
 0x20e   :  { %v736_v2 = vpop.f32.mrf.mxu0 }
 0x20f   :  { %v737_v21 = vadd.f32 %v9794_v7, %v736_v2  ;;  %2056 = vmatpush.msrb.mxu3 %v1921_v11  ;;  %v889_v15 = vpop.f32.mrf.mxu2 }
 0x210   :  { %v9872_v63 = vpop.f32.mrf.mxu1  ;;  %v890_v22 = vadd.f32 %v9794_v7, %v889_v15 }
 0x211   :  { %v1022_v10 = vmax.f32 %v737_v21, 0.0  ;;  %7779 = vmatmul.msk.f32.gmra.mxu0 %vm187_vm0, %v119_v34  ;;  %2057 = vmatpush.msrb.mxu3 %v1920_v28  ;;  %v123_v34 = vld [vmem:[%s15279_s25 + $0x228] sm:$0xff]  ;;  %v174_v28 = vld [vmem:[%s15279_s25 + $0x3c0] sm:$0xff] }
 0x212   :  { %v1073_v32 = vmax.f32 %v890_v22, 0.0  ;;  %7833 = vmatmul.msk.f32.gmra.mxu2 %vm187_vm0, %v173_v60  ;;  %v124_v22 = vld [vmem:[%s15279_s25 + $0x230] sm:$0xff]  ;;  %v127_v60 = vld [vmem:[%s15279_s25 + $0x248] sm:$0xff] }
 0x213   :  { %7891 = vmatmul.msk.f32.gmra.mxu1 %vm1109_vm1, %v1022_v10  ;;  %2058 = vmatpush.msrb.mxu3 %v1919_v51 }
 0x214   :  { %7942 = vmatmul.msk.f32.gmra.mxu3 %vm1109_vm1, %v1073_v32 }
 0x215   :  { %2059 = vmatpush.msrb.mxu3 %v1918_v14  ;;  %v9948_v11 = vpop.f32.mrf.mxu3  ;;  %v3620_v14 = vsel %vm3022_vm3, %v9905_v35, 0.0 }
 0x216   :  { %v739_v24 = vpop.f32.mrf.mxu0  ;;  %3621 = vadd.xlane.f32.xlu2 %v3620_v14 }
 0x217   :  { %v740_v29 = vadd.f32 %v9794_v7, %v739_v24  ;;  %2060 = vmatpush.msrb.mxu3 %v1917_v23  ;;  %v892_v38 = vpop.f32.mrf.mxu2  ;;  %v7986_v23 = vld [vmem:[%s15212_s7 + $0x98] sm:$0xff] }
 0x218   :  { %v9896_v17 = vpop.f32.mrf.mxu1  ;;  %v893_v6 = vadd.f32 %v9794_v7, %v892_v38  ;;  %3069 = vrot.lane.b32.xlu0 %v7983_v4, %s9037_s22 }
 0x219   :  { %v1023_v18 = vmax.f32 %v740_v29, 0.0  ;;  %7780 = vmatmul.msk.f32.gmra.mxu0 %vm187_vm0, %v120_v26  ;;  %2061 = vmatpush.msrb.mxu3 %v1916_v25  ;;  %v175_v26 = vld [vmem:[%s15279_s25 + $0x3c8] sm:$0xff] }
 0x21a   :  { %v1074_v0 = vmax.f32 %v893_v6, 0.0  ;;  %7834 = vmatmul.msk.f32.gmra.mxu2 %vm187_vm0, %v174_v28 }
 0x21b   :  { %7892 = vmatmul.msk.f32.gmra.mxu1 %vm1109_vm1, %v1023_v18  ;;  %2062 = vmatpush.msrb.mxu3 %v1915_v5  ;;  %v125_v18 = vld [vmem:[%s15279_s25 + $0x238] sm:$0xff] }
 0x21c   :  { %7943 = vmatmul.msk.f32.gmra.mxu3 %vm1109_vm1, %v1074_v0  ;;  %v126_v0 = vld [vmem:[%s15279_s25 + $0x240] sm:$0xff] }
 0x21d   :  { %2063 = vmatpush.msrb.mxu3 %v1914_v52  ;;  %v9968_v13 = vpop.f32.mrf.mxu3  ;;  %v176_v52 = vld [vmem:[%s15279_s25 + $0x3d0] sm:$0xff] }
 0x21e   :  { %v742_v45 = vpop.f32.mrf.mxu0 }
 0x21f   :  { %v743_v47 = vadd.f32 %v9794_v7, %v742_v45  ;;  %2064 = vmatpush.msrb.mxu3 %v1913_v44  ;;  %v895_v50 = vpop.f32.mrf.mxu2 }
 0x220   :  { %v9925_v58 = vpop.f32.mrf.mxu1  ;;  %v896_v55 = vadd.f32 %v9794_v7, %v895_v50  ;;  %3075 = vrot.lane.b32.xlu0 %v7986_v23, %s9037_s22 }
 0x221   :  { %v1024_v59 = vmax.f32 %v743_v47, 0.0  ;;  %7781 = vmatmul.msk.f32.gmra.mxu0 %vm187_vm0, %v121_v12  ;;  %2065 = vmatpush.msrb.mxu3 %v1912_v48  ;;  %v7990_v48 = vld [vmem:[%s15212_s7 + $0xb8] sm:$0xff] }
 0x222   :  { %v1075_v41 = vmax.f32 %v896_v55, 0.0  ;;  %7835 = vmatmul.msk.f32.gmra.mxu2 %vm187_vm0, %v175_v26 }
 0x223   :  { %7893 = vmatmul.msk.f32.gmra.mxu1 %vm1109_vm1, %v1024_v59  ;;  %2066 = vmatpush.msrb.mxu3 %v1911_v19  ;;  %v177_v59 = vld [vmem:[%s15279_s25 + $0x3d8] sm:$0xff] }
 0x224   :  { %7944 = vmatmul.msk.f32.gmra.mxu3 %vm1109_vm1, %v1075_v41 }
 0x225   :  { %v9990_v31 = vpop.f32.mrf.mxu3 }
 0x226   :  { %v745_v46 = vpop.f32.mrf.mxu0 }
 0x227   :  { %v746_v57 = vadd.f32 %v9794_v7, %v745_v46  ;;  %v898_v40 = vpop.f32.mrf.mxu2  ;;  %v8005_v46 = vld [vmem:[%s15212_s7 + $0x100] sm:$0xff] }
 0x228   :  { %v9941_v61 = vpop.f32.mrf.mxu1  ;;  %v899_v1 = vadd.f32 %v9794_v7, %v898_v40  ;;  %3077 = vrot.lane.b32.xlu0 %v7987_v36, %s9037_s22  ;;  %v7993_v40 = vld [vmem:[%s15212_s7 + $0xd0] sm:$0xff]  ;;  %v8006_v36 = vld [vmem:[%s15212_s7 + $0x108] sm:$0xff] }
 0x229   :  { %v1025_v30 = vmax.f32 %v746_v57, 0.0  ;;  %7782 = vmatmul.msk.f32.gmra.mxu0 %vm187_vm0, %v122_v56 }
 0x22a   :  { %v1076_v3 = vmax.f32 %v899_v1, 0.0  ;;  %7836 = vmatmul.msk.f32.gmra.mxu2 %vm187_vm0, %v176_v52  ;;  %v180_v52 = vld [vmem:[%s15279_s25 + $0x3f0] sm:$0xff] }
 0x22b   :  { %7894 = vmatmul.msk.f32.gmra.mxu1 %vm1109_vm1, %v1025_v30 }
 0x22c   :  { %7945 = vmatmul.msk.f32.gmra.mxu3 %vm1109_vm1, %v1076_v3 }
 0x22d   :  { %v10010_v45 = vpop.f32.mrf.mxu3 }
 0x22e   :  { %v748_v2 = vpop.f32.mrf.mxu0  ;;  %3744 = vrot.lane.b32.xlu2 %v8005_v46, %s9037_s22  ;;  %v181_v46 = vld [vmem:[%s15279_s25 + $0x3f8] sm:$0xff] }
 0x22f   :  { %v749_v21 = vadd.f32 %v9794_v7, %v748_v2  ;;  %v901_v10 = vpop.f32.mrf.mxu2  ;;  %v178_v2 = vld [vmem:[%s15279_s25 + $0x3e0] sm:$0xff] }
 0x230   :  { %v9960_v8 = vpop.f32.mrf.mxu1  ;;  %v902_v51 = vadd.f32 %v9794_v7, %v901_v10  ;;  %3083 = vrot.lane.b32.xlu0 %v7990_v48, %s9037_s22 }
 0x231   :  { %v1026_v9 = vmax.f32 %v749_v21, 0.0  ;;  %7783 = vmatmul.msk.f32.gmra.mxu0 %vm187_vm0, %v123_v34  ;;  %v8008_v21 = vld [vmem:[%s15212_s7 + $0x118] sm:$0xff] }
 0x232   :  { %v1077_v42 = vmax.f32 %v902_v51, 0.0  ;;  %7837 = vmatmul.msk.f32.gmra.mxu2 %vm187_vm0, %v177_v59  ;;  %v128_v51 = vld [vmem:[%s15279_s25 + $0x250] sm:$0xff] }
 0x233   :  { %7895 = vmatmul.msk.f32.gmra.mxu1 %vm1109_vm1, %v1026_v9 }
 0x234   :  { %7946 = vmatmul.msk.f32.gmra.mxu3 %vm1109_vm1, %v1077_v42  ;;  %v179_v42 = vld [vmem:[%s15279_s25 + $0x3e8] sm:$0xff] }
 0x235   :  { %v10033_v41 = vpop.f32.mrf.mxu3 }
 0x236   :  { %v751_v15 = vpop.f32.mrf.mxu0  ;;  %3750 = vrot.lane.b32.xlu2 %v8008_v21, %s9037_s22 }
 0x237   :  { %v752_v24 = vadd.f32 %v9794_v7, %v751_v15  ;;  %v904_v29 = vpop.f32.mrf.mxu2  ;;  %v7996_v15 = vld [vmem:[%s15212_s7 + $0xe8] sm:$0xff] }
 0x238   :  { %v9982_v32 = vpop.f32.mrf.mxu1  ;;  %v905_v25 = vadd.f32 %v9794_v7, %v904_v29  ;;  %3089 = vrot.lane.b32.xlu0 %v7993_v40, %s9037_s22  ;;  %v8017_v40 = vld [vmem:[%s15212_s7 + $0x160] sm:$0xff] }
 0x239   :  { %v1027_v27 = vmax.f32 %v752_v24, 0.0  ;;  %7784 = vmatmul.msk.f32.gmra.mxu0 %vm187_vm0, %v124_v22 }
 0x23a   :  { %v1078_v5 = vmax.f32 %v905_v25, 0.0  ;;  %7838 = vmatmul.msk.f32.gmra.mxu2 %vm187_vm0, %v178_v2 }
 0x23b   :  { %7896 = vmatmul.msk.f32.gmra.mxu1 %vm1109_vm1, %v1027_v27  ;;  %v8011_v27 = vld [vmem:[%s15212_s7 + $0x130] sm:$0xff] }
 0x23c   :  { %7947 = vmatmul.msk.f32.gmra.mxu3 %vm1109_vm1, %v1078_v5 }
 0x23d   :  { %v10057_v9 = vpop.f32.mrf.mxu3 }
 0x23e   :  { %v754_v33 = vpop.f32.mrf.mxu0  ;;  %3756 = vrot.lane.b32.xlu2 %v8011_v27, %s9037_s22 }
 0x23f   :  { %v755_v37 = vadd.f32 %v9794_v7, %v754_v33  ;;  %v907_v43 = vpop.f32.mrf.mxu2 }
 0x240   :  { %v10002_v38 = vpop.f32.mrf.mxu1  ;;  %v908_v44 = vadd.f32 %v9794_v7, %v907_v43  ;;  %3095 = vrot.lane.b32.xlu0 %v7996_v15, %s9037_s22  ;;  %v2247_v15 = vld [vmem:[%s15218_s13 + $0x10] sm:$0xff] }
 0x241   :  { %v1028_v6 = vmax.f32 %v755_v37, 0.0  ;;  %7785 = vmatmul.msk.f32.gmra.mxu0 %vm187_vm0, %v125_v18  ;;  %v129_v18 = vld [vmem:[%s15279_s25 + $0x258] sm:$0xff] }
 0x242   :  { %v1079_v47 = vmax.f32 %v908_v44, 0.0  ;;  %7839 = vmatmul.msk.f32.gmra.mxu2 %vm187_vm0, %v179_v42  ;;  %v8020_v42 = vld [vmem:[%s15212_s7 + $0x178] sm:$0xff] }
 0x243   :  { %7897 = vmatmul.msk.f32.gmra.mxu1 %vm1109_vm1, %v1028_v6 }
 0x244   :  { %7948 = vmatmul.msk.f32.gmra.mxu3 %vm1109_vm1, %v1079_v47 }
 0x245   :  { %v10081_v25 = vpop.f32.mrf.mxu3 }
 0x246   :  { %v757_v12 = vpop.f32.mrf.mxu0 }
 0x247   :  { %v758_v49 = vadd.f32 %v9794_v7, %v757_v12  ;;  %v910_v55 = vpop.f32.mrf.mxu2  ;;  %v8014_v12 = vld [vmem:[%s15212_s7 + $0x148] sm:$0xff] }
 0x248   :  { %v10022_v19 = vpop.f32.mrf.mxu1  ;;  %v911_v56 = vadd.f32 %v9794_v7, %v910_v55  ;;  %3746 = vrot.lane.b32.xlu0 %v8006_v36, %s9037_s22  ;;  %3762 = vrot.lane.b32.xlu2 %v8014_v12, %s9037_s22 }
 0x249   :  { %v1029_v50 = vmax.f32 %v758_v49, 0.0  ;;  %7786 = vmatmul.msk.f32.gmra.mxu0 %vm187_vm0, %v126_v0  ;;  %v130_v49 = vld [vmem:[%s15279_s25 + $0x260] sm:$0xff] }
 0x24a   :  { %v1080_v30 = vmax.f32 %v911_v56, 0.0  ;;  %7840 = vmatmul.msk.f32.gmra.mxu2 %vm187_vm0, %v180_v52  ;;  %v2356_v52 = vld [vmem:[%s15212_s7 + $0x30] sm:$0xff] }
 0x24b   :  { %7898 = vmatmul.msk.f32.gmra.mxu1 %vm1109_vm1, %v1029_v50  ;;  %v8009_v50 = vld [vmem:[%s15212_s7 + $0x120] sm:$0xff] }
 0x24c   :  { %7949 = vmatmul.msk.f32.gmra.mxu3 %vm1109_vm1, %v1080_v30 }
 0x24d   :  { %v10105_v47 = vpop.f32.mrf.mxu3 }
 0x24e   :  { %v760_v57 = vpop.f32.mrf.mxu0 }
 0x24f   :  { %v761_v1 = vadd.f32 %v9794_v7, %v760_v57  ;;  %v913_v4 = vpop.f32.mrf.mxu2 }
 0x250   :  { %v10046_v34 = vpop.f32.mrf.mxu1  ;;  %v914_v28 = vadd.f32 %v9794_v7, %v913_v4  ;;  %3752 = vrot.lane.b32.xlu0 %v8009_v50, %s9037_s22  ;;  %3768 = vrot.lane.b32.xlu2 %v8017_v40, %s9037_s22  ;;  %v131_v4 = vld [vmem:[%s15279_s25 + $0x268] sm:$0xff]  ;;  %v2362_v40 = vld [vmem:[%s15212_s7 + $0x60] sm:$0xff] }
 0x251   :  { %v1030_v3 = vmax.f32 %v761_v1, 0.0  ;;  %7787 = vmatmul.msk.f32.gmra.mxu0 %vm187_vm0, %v127_v60  ;;  %v2246_v60 = vld [vmem:[%s15218_s13 + $0x8] sm:$0xff] }
 0x252   :  { %v1081_v14 = vmax.f32 %v914_v28, 0.0  ;;  %7841 = vmatmul.msk.f32.gmra.mxu2 %vm187_vm0, %v181_v46  ;;  %2257 = vperm.xlu1 %8161, %v2246_v60   ;;  %v8012_v28 = vld [vmem:[%s15212_s7 + $0x138] sm:$0xff]  ;;  %v10185_v46 = vld [vmem:[%s15216_s11] ss:$0 sm:$0xff] }
 0x253   :  { %7899 = vmatmul.msk.f32.gmra.mxu1 %vm1109_vm1, %v1030_v3 }
 0x254   :  { %7950 = vmatmul.msk.f32.gmra.mxu3 %vm1109_vm1, %v1081_v14 }
 0x255   :  { %v10132_v2 = vpop.f32.mrf.mxu3 }
 0x256   :  { %v763_v10 = vpop.f32.mrf.mxu0 }
 0x257   :  { %v764_v22 = vadd.f32 %v9794_v7, %v763_v10  ;;  %v916_v26 = vpop.f32.mrf.mxu2 }
 0x258   :  { %v10070_v23 = vpop.f32.mrf.mxu1  ;;  %v917_v29 = vadd.f32 %v9794_v7, %v916_v26  ;;  %3758 = vrot.lane.b32.xlu0 %v8012_v28, %s9037_s22  ;;  %3774 = vrot.lane.b32.xlu2 %v8020_v42, %s9037_s22  ;;  %v8028_v42 = vld [vmem:[%s15212_s7 + $0x188] sm:$0xff] }
 0x259   :  { %v1031_v24 = vmax.f32 %v764_v22, 0.0  ;;  %7788 = vmatmul.msk.f32.gmra.mxu0 %vm187_vm0, %v128_v51 }
 0x25a   :  { %v1082_v5 = vmax.f32 %v917_v29, 0.0  ;;  %2262 = vperm.xlu1 %8161, %v2247_v15   ;;  %v132_v29 = vld [vmem:[%s15279_s25 + $0x270] sm:$0xff] }
 0x25b   :  { %7900 = vmatmul.msk.f32.gmra.mxu1 %vm1109_vm1, %v1031_v24 }
 0x25c   :  { %7951 = vmatmul.msk.f32.gmra.mxu3 %vm1109_vm1, %v1082_v5 }
 0x25d   :  { %v10153_v26 = vpop.f32.mrf.mxu3 }
 0x25e   :  { %v766_v33 = vpop.f32.mrf.mxu0 }
 0x25f   :  { %v767_v37 = vadd.f32 %v9794_v7, %v766_v33  ;;  %v919_v44 = vpop.f32.mrf.mxu2 }
 0x260   :  { %v10094_v6 = vpop.f32.mrf.mxu1  ;;  %v920_v0 = vadd.f32 %v9794_v7, %v919_v44 }
 0x261   :  { %v1032_v43 = vmax.f32 %v767_v37, 0.0  ;;  %7789 = vmatmul.msk.f32.gmra.mxu0 %vm187_vm0, %v129_v18  ;;  %v8015_v18 = vld [vmem:[%s15212_s7 + $0x150] sm:$0xff] }
 0x262   :  { %v1083_v59 = vmax.f32 %v920_v0, 0.0  ;;  %3764 = vrot.lane.b32.xlu0 %v8015_v18, %s9037_s22  ;;  %2395 = vrot.lane.b32.xlu1 %v2356_v52, %s9037_s22 }
 0x263   :  { %7901 = vmatmul.msk.f32.gmra.mxu1 %vm1109_vm1, %v1032_v43 }
 0x264   :  { %7952 = vmatmul.msk.f32.gmra.mxu3 %vm1109_vm1, %v1083_v59  ;;  %v8018_v59 = vld [vmem:[%s15212_s7 + $0x168] sm:$0xff] }
 0x266   :  { %v769_v48 = vpop.f32.mrf.mxu0 }
 0x267   :  { %v770_v55 = vadd.f32 %v9794_v7, %v769_v48  ;;  %v922_v30 = vpop.f32.mrf.mxu2  ;;  %v133_v48 = vld [vmem:[%s15279_s25 + $0x278] sm:$0xff] }
 0x268   :  { %v10118_v56 = vpop.f32.mrf.mxu1  ;;  %v923_v1 = vadd.f32 %v9794_v7, %v922_v30 }
 0x269   :  { %v1033_v57 = vmax.f32 %v770_v55, 0.0  ;;  %7790 = vmatmul.msk.f32.gmra.mxu0 %vm187_vm0, %v130_v49 }
 0x26a   :  { %v1084_v21 = vmax.f32 %v923_v1, 0.0  ;;  %3770 = vrot.lane.b32.xlu0 %v8018_v59, %s9037_s22  ;;  %2407 = vrot.lane.b32.xlu1 %v2362_v40, %s9037_s22  ;;  %v8030_v59 = vld [vmem:[%s15212_s7 + $0x198] sm:$0xff] }
 0x26b   :  { %7902 = vmatmul.msk.f32.gmra.mxu1 %vm1109_vm1, %v1033_v57 }
 0x26c   :  { %7953 = vmatmul.msk.f32.gmra.mxu3 %vm1109_vm1, %v1084_v21 }
 0x26e   :  { %v772_v3 = vpop.f32.mrf.mxu0 }
 0x26f   :  { %v773_v10 = vadd.f32 %v9794_v7, %v772_v3  ;;  %v925_v22 = vpop.f32.mrf.mxu2 }
 0x270   :  { %v1646_v51 = vpop.f32.mrf.mxu1  ;;  %v926_v24 = vadd.f32 %v9794_v7, %v925_v22 }
 0x271   :  { %v1034_v14 = vmax.f32 %v773_v10, 0.0  ;;  %7791 = vmatmul.msk.f32.gmra.mxu0 %vm187_vm0, %v131_v4  ;;  %v1647_v1 = vadd.f32 %v10185_v46, %v1646_v51  ;;  %v1644_v10 = vadd.f32 %v10185_v46, %v10118_v56  ;;  %v134_v51 = vld [vmem:[%s15279_s25 + $0x280] sm:$0xff] }
 0x272   :  { %v1085_v33 = vmax.f32 %v926_v24, 0.0  ;;  %v1641_v24 = vadd.f32 %v10185_v46, %v10094_v6  ;;  %4419 = vrot.lane.b32.xlu0 %v8028_v42, %s9037_s22  ;;  %v2365_v6 = vld [vmem:[%s15212_s7 + $0x78] sm:$0xff] }
 0x273   :  { %7903 = vmatmul.msk.f32.gmra.mxu1 %vm1109_vm1, %v1034_v14  ;;  %v1939_v18 = vmax.f32 %v1644_v10, 0.0  ;;  %2413 = vrot.lane.b32.xlu1 %v2365_v6, %s9037_s22 }
 0x274   :  { %7954 = vmatmul.msk.f32.gmra.mxu3 %vm1109_vm1, %v1085_v33  ;;  %v1638_v33 = vadd.f32 %v10185_v46, %v10070_v23 }
 0x276   :  { %v775_v27 = vpop.f32.mrf.mxu0 }
 0x277   :  { %v776_v5 = vadd.f32 %v9794_v7, %v775_v27  ;;  %v928_v43 = vpop.f32.mrf.mxu2  ;;  %v10172_v12 = vpop.f32.mrf.mxu3  ;;  %v1940_v27 = vmax.f32 %v1647_v1, 0.0  ;;  %v1623_v1 = vadd.f32 %v10185_v46, %v9960_v8  ;;  %v8032_v8 = vld [vmem:[%s15212_s7 + $0x1a8] sm:$0xff] }
 0x278   :  { %v1649_v36 = vpop.f32.mrf.mxu1  ;;  %v929_v44 = vadd.f32 %v9794_v7, %v928_v43  ;;  %v1632_v43 = vadd.f32 %v10185_v46, %v10022_v19 }
 0x279   :  { %v1035_v37 = vmax.f32 %v776_v5, 0.0  ;;  %7792 = vmatmul.msk.f32.gmra.mxu0 %vm187_vm0, %v132_v29  ;;  %v1650_v57 = vadd.f32 %v10185_v46, %v1649_v36  ;;  %v1635_v36 = vadd.f32 %v10185_v46, %v10046_v34  ;;  %v135_v34 = vld [vmem:[%s15279_s25 + $0x288] sm:$0xff]  ;;  %v1932_v42 = vmax.f32 %v1623_v1, 0.0 }
 0x27a   :  { %v1086_v49 = vmax.f32 %v929_v44, 0.0  ;;  %v1937_v44 = vmax.f32 %v1638_v33, 0.0  ;;  %4423 = vrot.lane.b32.xlu0 %v8030_v59, %s9037_s22  ;;  %v7991_v59 = vld [vmem:[%s15212_s7 + $0xc0] sm:$0xff] }
 0x27b   :  { %7904 = vmatmul.msk.f32.gmra.mxu1 %vm1109_vm1, %v1035_v37  ;;  %v1941_v14 = vmax.f32 %v1650_v57, 0.0  ;;  %v1938_v37 = vmax.f32 %v1641_v24, 0.0 }
 0x27c   :  { %7955 = vmatmul.msk.f32.gmra.mxu3 %vm1109_vm1, %v1086_v49 }
 0x27e   :  { %v778_v0 = vpop.f32.mrf.mxu0 }
 0x27f   :  { %v779_v50 = vadd.f32 %v9794_v7, %v778_v0  ;;  %v931_v4 = vpop.f32.mrf.mxu2  ;;  %v10198_v28 = vpop.f32.mrf.mxu3 }
 0x280   :  { %v1652_v55 = vpop.f32.mrf.mxu1  ;;  %v932_v21 = vadd.f32 %v9794_v7, %v931_v4 }
 0x281   :  { %v1036_v60 = vmax.f32 %v779_v50, 0.0  ;;  %v1653_v30 = vadd.f32 %v10185_v46, %v1652_v55  ;;  %7793 = vmatmul.msk.f32.gmra.mxu0 %vm187_vm0, %v133_v48  ;;  %v1629_v50 = vadd.f32 %v10185_v46, %v10002_v38  ;;  %v1936_v55 = vmax.f32 %v1635_v36, 0.0  ;;  %v7984_v38 = vld [vmem:[%s15212_s7 + $0x88] sm:$0xff] }
 0x282   :  { %v1087_v22 = vmax.f32 %v932_v21, 0.0  ;;  %3071 = vrot.lane.b32.xlu1 %v7984_v38, %s9037_s22  ;;  %v1620_v21 = vadd.f32 %v10185_v46, %v9941_v61  ;;  %4427 = vrot.lane.b32.xlu0 %v8032_v8, %s9037_s22  ;;  %v1614_v61 = vadd.f32 %v10185_v46, %v9896_v17  ;;  %v4295_v36 = vsel %vm3697_vm4, %v9905_v35, 0.0  ;;  %v8041_v8 = vld [vmem:[%s15212_s7 + $0x1f0] sm:$0xff] }
 0x283   :  { %v1942_v3 = vmax.f32 %v1653_v30, 0.0  ;;  %7905 = vmatmul.msk.f32.gmra.mxu1 %vm1109_vm1, %v1036_v60  ;;  %v1626_v60 = vadd.f32 %v10185_v46, %v9982_v32  ;;  %v1935_v30 = vmax.f32 %v1632_v43, 0.0  ;;  %4296 = vadd.xlane.f32.xlu2 %v4295_v36 }
 0x284   :  { %7956 = vmatmul.msk.f32.gmra.mxu3 %vm1109_vm1, %v1087_v22  ;;  %v1617_v22 = vadd.f32 %v10185_v46, %v9925_v58  ;;  %v7988_v58 = vld [vmem:[%s15212_s7 + $0xa8] sm:$0xff] }
 0x285   :  { %2071 = vmatpush.msra.mxu2 %v1942_v3  ;;  %v1934_v3 = vmax.f32 %v1629_v50, 0.0  ;;  %v1933_v10 = vmax.f32 %v1626_v60, 0.0 }
 0x286   :  { %v781_v15 = vpop.f32.mrf.mxu0 }
 0x287   :  { %v782_v29 = vadd.f32 %v9794_v7, %v781_v15  ;;  %2072 = vmatpush.msra.mxu2 %v1941_v14  ;;  %v934_v52 = vpop.f32.mrf.mxu2  ;;  %v10228_v0 = vpop.f32.mrf.mxu3 }
 0x288   :  { %v10211_v56 = vpop.f32.mrf.mxu1  ;;  %v935_v23 = vadd.f32 %v9794_v7, %v934_v52  ;;  %v1929_v52 = vmax.f32 %v1614_v61, 0.0  ;;  %v7997_v61 = vld [vmem:[%s15212_s7 + $0xf0] sm:$0xff] }
 0x289   :  { %v1037_v5 = vmax.f32 %v782_v29, 0.0  ;;  %7794 = vmatmul.msk.f32.gmra.mxu0 %vm187_vm0, %v134_v51  ;;  %2073 = vmatpush.msra.mxu2 %v1940_v27  ;;  %v1931_v29 = vmax.f32 %v1620_v21, 0.0 }
 0x28a   :  { %v1088_v49 = vmax.f32 %v935_v23, 0.0  ;;  %3079 = vrot.lane.b32.xlu1 %v7988_v58, %s9037_s22 }
 0x28b   :  { %7906 = vmatmul.msk.f32.gmra.mxu1 %vm1109_vm1, %v1037_v5  ;;  %2074 = vmatpush.msra.mxu2 %v1939_v18  ;;  %v1611_v18 = vadd.f32 %v10185_v46, %v9872_v63  ;;  %v1930_v5 = vmax.f32 %v1617_v22, 0.0 }
 0x28c   :  { %7957 = vmatmul.msk.f32.gmra.mxu3 %vm1109_vm1, %v1088_v49 }
 0x28d   :  { %2075 = vmatpush.msra.mxu2 %v1938_v37  ;;  %v1608_v37 = vadd.f32 %v10185_v46, %v9844_v54 }
 0x28e   :  { %v784_v48 = vpop.f32.mrf.mxu0 }
 0x28f   :  { %v785_v19 = vadd.f32 %v9794_v7, %v784_v48  ;;  %2076 = vmatpush.msra.mxu2 %v1937_v44  ;;  %v937_v4 = vpop.f32.mrf.mxu2  ;;  %v10256_v14 = vpop.f32.mrf.mxu3  ;;  %v8035_v44 = vld [vmem:[%s15212_s7 + $0x1c0] sm:$0xff]  ;;  %v1928_v48 = vmax.f32 %v1611_v18, 0.0  ;;  %v1927_v54 = vmax.f32 %v1608_v37, 0.0 }
 0x290   :  { %v10239_v57 = vpop.f32.mrf.mxu1  ;;  %v938_v32 = vadd.f32 %v9794_v7, %v937_v4  ;;  %4433 = vrot.lane.b32.xlu0 %v8035_v44, %s9037_s22  ;;  %v7994_v4 = vld [vmem:[%s15212_s7 + $0xd8] sm:$0xff]  ;;  %v8031_v44 = vld [vmem:[%s15212_s7 + $0x1a0] sm:$0xff] }
 0x291   :  { %v1038_v40 = vmax.f32 %v785_v19, 0.0  ;;  %7795 = vmatmul.msk.f32.gmra.mxu0 %vm187_vm0, %v135_v34  ;;  %2077 = vmatpush.msra.mxu2 %v1936_v55 }
 0x292   :  { %v1089_v51 = vmax.f32 %v938_v32, 0.0  ;;  %3085 = vrot.lane.b32.xlu1 %v7991_v59, %s9037_s22  ;;  %v8054_v59 = vld [vmem:[%s15212_s7 + $0x228] sm:$0xff] }
 0x293   :  { %7907 = vmatmul.msk.f32.gmra.mxu1 %vm1109_vm1, %v1038_v40  ;;  %2078 = vmatpush.msra.mxu2 %v1935_v30  ;;  %v8038_v40 = vld [vmem:[%s15212_s7 + $0x1d8] sm:$0xff] }
 0x294   :  { %7958 = vmatmul.msk.f32.gmra.mxu3 %vm1109_vm1, %v1089_v51 }
 0x295   :  { %2079 = vmatpush.msra.mxu2 %v1934_v3 }
 0x296   :  { %v787_v15 = vpop.f32.mrf.mxu0 }
 0x297   :  { %v788_v24 = vadd.f32 %v9794_v7, %v787_v15  ;;  %2080 = vmatpush.msra.mxu2 %v1933_v10  ;;  %v940_v6 = vpop.f32.mrf.mxu2  ;;  %v10282_v23 = vpop.f32.mrf.mxu3 }
 0x298   :  { %v10264_v27 = vpop.f32.mrf.mxu1  ;;  %v941_v17 = vadd.f32 %v9794_v7, %v940_v6  ;;  %4439 = vrot.lane.b32.xlu0 %v8038_v40, %s9037_s22 }
 0x299   :  { %v1039_v33 = vmax.f32 %v788_v24, 0.0  ;;  %2081 = vmatpush.msra.mxu2 %v1932_v42 }
 0x29a   :  { %v1090_v43 = vmax.f32 %v941_v17, 0.0  ;;  %3091 = vrot.lane.b32.xlu1 %v7994_v4, %s9037_s22  ;;  %v8051_v17 = vld [vmem:[%s15212_s7 + $0x210] sm:$0xff] }
 0x29b   :  { %7908 = vmatmul.msk.f32.gmra.mxu1 %vm1109_vm1, %v1039_v33  ;;  %2082 = vmatpush.msra.mxu2 %v1931_v29  ;;  %v8027_v33 = vld [vmem:[%s15212_s7 + $0x180] sm:$0xff] }
 0x29c   :  { %7959 = vmatmul.msk.f32.gmra.mxu3 %vm1109_vm1, %v1090_v43  ;;  %4417 = vrot.lane.b32.xlu2 %v8027_v33, %s9037_s22 }
 0x29d   :  { %2083 = vmatpush.msra.mxu2 %v1930_v5 }
 0x29e   :  { %v790_v63 = vpop.f32.mrf.mxu0 }
 0x29f   :  { %v791_v34 = vadd.f32 %v9794_v7, %v790_v63  ;;  %2084 = vmatpush.msra.mxu2 %v1929_v52  ;;  %v943_v50 = vpop.f32.mrf.mxu2  ;;  %v10298_v19 = vpop.f32.mrf.mxu3  ;;  %v8007_v63 = vld [vmem:[%s15212_s7 + $0x110] sm:$0xff] }
 0x2a0   :  { %v10288_v49 = vpop.f32.mrf.mxu1  ;;  %v944_v55 = vadd.f32 %v9794_v7, %v943_v50  ;;  %4445 = vrot.lane.b32.xlu0 %v8041_v8, %s9037_s22 }
 0x2a1   :  { %v1040_v35 = vmax.f32 %v791_v34, 0.0  ;;  %2085 = vmatpush.msra.mxu2 %v1928_v48 }
 0x2a2   :  { %v1091_v30 = vmax.f32 %v944_v55, 0.0  ;;  %3097 = vrot.lane.b32.xlu1 %v7997_v61, %s9037_s22 }
 0x2a3   :  { %7909 = vmatmul.msk.f32.gmra.mxu1 %vm1109_vm1, %v1040_v35  ;;  %2086 = vmatpush.msra.mxu2 %v1927_v54 }
 0x2a4   :  { %7960 = vmatmul.msk.f32.gmra.mxu3 %vm1109_vm1, %v1091_v30  ;;  %4425 = vrot.lane.b32.xlu2 %v8031_v44, %s9037_s22  ;;  %v8010_v30 = vld [vmem:[%s15212_s7 + $0x128] sm:$0xff] }
 0x2a6   :  { %v793_v60 = vpop.f32.mrf.mxu0 }
 0x2a7   :  { %v794_v38 = vadd.f32 %v9794_v7, %v793_v60  ;;  %v946_v32 = vpop.f32.mrf.mxu2  ;;  %v10314_v10 = vpop.f32.mrf.mxu3 }
 0x2a8   :  { %v10304_v1 = vpop.f32.mrf.mxu1  ;;  %v947_v21 = vadd.f32 %v9794_v7, %v946_v32  ;;  %5094 = vrot.lane.b32.xlu0 %v8051_v17, %s9037_s22  ;;  %v8060_v17 = vld [vmem:[%s15212_s7 + $0x258] sm:$0xff] }
 0x2a9   :  { %v1041_v3 = vmax.f32 %v794_v38, 0.0  ;;  %v8034_v38 = vld [vmem:[%s15212_s7 + $0x1b8] sm:$0xff] }
 0x2aa   :  { %v1092_v51 = vmax.f32 %v947_v21, 0.0  ;;  %3748 = vrot.lane.b32.xlu1 %v8007_v63, %s9037_s22 }
 0x2ab   :  { %7910 = vmatmul.msk.f32.gmra.mxu1 %vm1109_vm1, %v1041_v3 }
 0x2ac   :  { %7961 = vmatmul.msk.f32.gmra.mxu3 %vm1109_vm1, %v1092_v51  ;;  %4431 = vrot.lane.b32.xlu2 %v8034_v38, %s9037_s22 }
 0x2ae   :  { %v796_v15 = vpop.f32.mrf.mxu0 }
 0x2af   :  { %v797_v22 = vadd.f32 %v9794_v7, %v796_v15  ;;  %v949_v29 = vpop.f32.mrf.mxu2  ;;  %v10333_v18 = vpop.f32.mrf.mxu3  ;;  %v8057_v15 = vld [vmem:[%s15212_s7 + $0x240] sm:$0xff] }
 0x2b0   :  { %v10320_v42 = vpop.f32.mrf.mxu1  ;;  %v950_v58 = vadd.f32 %v9794_v7, %v949_v29  ;;  %5100 = vrot.lane.b32.xlu0 %v8054_v59, %s9037_s22  ;;  %v8037_v29 = vld [vmem:[%s15212_s7 + $0x1d0] sm:$0xff] }
 0x2b1   :  { %v1042_v24 = vmax.f32 %v797_v22, 0.0 }
 0x2b2   :  { %v1093_v6 = vmax.f32 %v950_v58, 0.0  ;;  %3754 = vrot.lane.b32.xlu1 %v8010_v30, %s9037_s22 }
 0x2b3   :  { %7911 = vmatmul.msk.f32.gmra.mxu1 %vm1109_vm1, %v1042_v24  ;;  %v8013_v24 = vld [vmem:[%s15212_s7 + $0x140] sm:$0xff] }
 0x2b4   :  { %7962 = vmatmul.msk.f32.gmra.mxu3 %vm1109_vm1, %v1093_v6  ;;  %4437 = vrot.lane.b32.xlu2 %v8037_v29, %s9037_s22 }
 0x2b6   :  { %v799_v5 = vpop.f32.mrf.mxu0 }
 0x2b7   :  { %v800_v36 = vadd.f32 %v9794_v7, %v799_v5  ;;  %v952_v43 = vpop.f32.mrf.mxu2  ;;  %v10353_v34 = vpop.f32.mrf.mxu3 }
 0x2b8   :  { %v10340_v37 = vpop.f32.mrf.mxu1  ;;  %v953_v48 = vadd.f32 %v9794_v7, %v952_v43  ;;  %5106 = vrot.lane.b32.xlu0 %v8057_v15, %s9037_s22  ;;  %v8016_v43 = vld [vmem:[%s15212_s7 + $0x158] sm:$0xff] }
 0x2b9   :  { %v1043_v52 = vmax.f32 %v800_v36, 0.0 }
 0x2ba   :  { %v1094_v35 = vmax.f32 %v953_v48, 0.0  ;;  %3760 = vrot.lane.b32.xlu1 %v8013_v24, %s9037_s22  ;;  %v8040_v48 = vld [vmem:[%s15212_s7 + $0x1e8] sm:$0xff] }
 0x2bb   :  { %7912 = vmatmul.msk.f32.gmra.mxu1 %vm1109_vm1, %v1043_v52 }
 0x2bc   :  { %7963 = vmatmul.msk.f32.gmra.mxu3 %vm1109_vm1, %v1094_v35  ;;  %4443 = vrot.lane.b32.xlu2 %v8040_v48, %s9037_s22 }
 0x2be   :  { %v802_v54 = vpop.f32.mrf.mxu0 }
 0x2bf   :  { %v803_v50 = vadd.f32 %v9794_v7, %v802_v54  ;;  %v955_v40 = vpop.f32.mrf.mxu2  ;;  %v10375_v7 = vld [vmem:[%s15214_s9] ss:$0 sm:$0xff]  ;;  %v10378_v4 = vpop.f32.mrf.mxu3 }
 0x2c0   :  { %v10360_v55 = vpop.f32.mrf.mxu1  ;;  %v956_v3 = vadd.f32 %v10375_v7, %v955_v40  ;;  %5112 = vrot.lane.b32.xlu0 %v8060_v17, %s9037_s22 }
 0x2c1   :  { %v1044_v60 = vmax.f32 %v803_v50, 0.0 }
 0x2c2   :  { %v1095_v21 = vmax.f32 %v956_v3, 0.0  ;;  %3766 = vrot.lane.b32.xlu1 %v8016_v43, %s9037_s22  ;;  %v8019_v3 = vld [vmem:[%s15212_s7 + $0x170] sm:$0xff]  ;;  %v8052_v43 = vld [vmem:[%s15212_s7 + $0x218] sm:$0xff] }
 0x2c3   :  { %7913 = vmatmul.msk.f32.gmra.mxu1 %vm1109_vm1, %v1044_v60  ;;  %v8063_v60 = vld [vmem:[%s15212_s7 + $0x270] sm:$0xff] }
 0x2c4   :  { %7964 = vmatmul.msk.f32.gmra.mxu3 %vm1109_vm1, %v1095_v21  ;;  %v8049_v21 = vld [vmem:[%s15212_s7 + $0x200] sm:$0xff] }
 0x2c5   :  { %5090 = vrot.lane.b32.xlu2 %v8049_v21, %s9037_s22  ;;  %v8055_v21 = vld [vmem:[%s15212_s7 + $0x230] sm:$0xff] }
 0x2c6   :  { %v805_v32 = vpop.f32.mrf.mxu0 }
 0x2c7   :  { %v806_v51 = vadd.f32 %v10375_v7, %v805_v32  ;;  %v958_v61 = vpop.f32.mrf.mxu2  ;;  %v10398_v58 = vpop.f32.mrf.mxu3 }
 0x2c8   :  { %v10385_v8 = vpop.f32.mrf.mxu1  ;;  %v959_v33 = vadd.f32 %v10375_v7, %v958_v61  ;;  %5118 = vrot.lane.b32.xlu0 %v8063_v60, %s9037_s22  ;;  %v8073_v61 = vld [vmem:[%s15212_s7 + $0x290] sm:$0xff] }
 0x2c9   :  { %v1045_v22 = vmax.f32 %v806_v51, 0.0 }
 0x2ca   :  { %v1096_v6 = vmax.f32 %v959_v33, 0.0  ;;  %3772 = vrot.lane.b32.xlu1 %v8019_v3, %s9037_s22 }
 0x2cb   :  { %7914 = vmatmul.msk.f32.gmra.mxu1 %vm1109_vm1, %v1045_v22 }
 0x2cc   :  { %7965 = vmatmul.msk.f32.gmra.mxu3 %vm1109_vm1, %v1096_v6  ;;  %v8029_v6 = vld [vmem:[%s15212_s7 + $0x190] sm:$0xff] }
 0x2cd   :  { %5096 = vrot.lane.b32.xlu2 %v8052_v43, %s9037_s22  ;;  %v8080_v43 = vld [vmem:[%s15212_s7 + $0x2c8] sm:$0xff] }
 0x2ce   :  { %v808_v5 = vpop.f32.mrf.mxu0 }
 0x2cf   :  { %v809_v36 = vadd.f32 %v10375_v7, %v808_v5  ;;  %v961_v44 = vpop.f32.mrf.mxu2  ;;  %v10418_v35 = vpop.f32.mrf.mxu3 }
 0x2d0   :  { %v10405_v52 = vpop.f32.mrf.mxu1  ;;  %v962_v54 = vadd.f32 %v10375_v7, %v961_v44  ;;  %5767 = vrot.lane.b32.xlu0 %v8073_v61, %s9037_s22 }
 0x2d1   :  { %v1046_v63 = vmax.f32 %v809_v36, 0.0 }
 0x2d2   :  { %v1097_v50 = vmax.f32 %v962_v54, 0.0  ;;  %4421 = vrot.lane.b32.xlu1 %v8029_v6, %s9037_s22  ;;  %v8074_v54 = vld [vmem:[%s15212_s7 + $0x298] sm:$0xff]  ;;  %v8036_v6 = vld [vmem:[%s15212_s7 + $0x1c8] sm:$0xff] }
 0x2d3   :  { %7915 = vmatmul.msk.f32.gmra.mxu1 %vm1109_vm1, %v1046_v63 }
 0x2d4   :  { %7966 = vmatmul.msk.f32.gmra.mxu3 %vm1109_vm1, %v1097_v50 }
 0x2d5   :  { %5102 = vrot.lane.b32.xlu2 %v8055_v21, %s9037_s22 }
 0x2d6   :  { %v811_v59 = vpop.f32.mrf.mxu0 }
 0x2d7   :  { %v812_v30 = vadd.f32 %v10375_v7, %v811_v59  ;;  %v964_v32 = vpop.f32.mrf.mxu2  ;;  %v10438_v51 = vpop.f32.mrf.mxu3 }
 0x2d8   :  { %v10425_v40 = vpop.f32.mrf.mxu1  ;;  %v965_v15 = vadd.f32 %v10375_v7, %v964_v32  ;;  %5769 = vrot.lane.b32.xlu0 %v8074_v54, %s9037_s22 }
 0x2d9   :  { %v1047_v38 = vmax.f32 %v812_v30, 0.0  ;;  %v8033_v30 = vld [vmem:[%s15212_s7 + $0x1b0] sm:$0xff] }
 0x2da   :  { %v1098_v24 = vmax.f32 %v965_v15, 0.0  ;;  %4429 = vrot.lane.b32.xlu1 %v8033_v30, %s9037_s22 }
 0x2db   :  { %7916 = vmatmul.msk.f32.gmra.mxu1 %vm1109_vm1, %v1047_v38 }
 0x2dc   :  { %7967 = vmatmul.msk.f32.gmra.mxu3 %vm1109_vm1, %v1098_v24  ;;  %v8077_v24 = vld [vmem:[%s15212_s7 + $0x2b0] sm:$0xff] }
 0x2de   :  { %v814_v22 = vpop.f32.mrf.mxu0 }
 0x2df   :  { %v815_v29 = vadd.f32 %v10375_v7, %v814_v22  ;;  %v967_v17 = vpop.f32.mrf.mxu2  ;;  %v10455_v63 = vpop.f32.mrf.mxu3 }
 0x2e0   :  { %v10445_v33 = vpop.f32.mrf.mxu1  ;;  %v968_v36 = vadd.f32 %v10375_v7, %v967_v17  ;;  %5775 = vrot.lane.b32.xlu0 %v8077_v24, %s9037_s22 }
 0x2e1   :  { %v1048_v5 = vmax.f32 %v815_v29, 0.0 }
 0x2e2   :  { %v1099_v48 = vmax.f32 %v968_v36, 0.0  ;;  %4435 = vrot.lane.b32.xlu1 %v8036_v6, %s9037_s22  ;;  %v8058_v36 = vld [vmem:[%s15212_s7 + $0x248] sm:$0xff]  ;;  %v8042_v6 = vld [vmem:[%s15212_s7 + $0x1f8] sm:$0xff] }
 0x2e3   :  { %7917 = vmatmul.msk.f32.gmra.mxu1 %vm1109_vm1, %v1048_v5  ;;  %5108 = vrot.lane.b32.xlu2 %v8058_v36, %s9037_s22 }
 0x2e4   :  { %7968 = vmatmul.msk.f32.gmra.mxu3 %vm1109_vm1, %v1099_v48 }
 0x2e6   :  { %v817_v44 = vpop.f32.mrf.mxu0 }
 0x2e7   :  { %v818_v59 = vadd.f32 %v10375_v7, %v817_v44  ;;  %v970_v38 = vpop.f32.mrf.mxu2  ;;  %v10473_v32 = vpop.f32.mrf.mxu3 }
 0x2e8   :  { %v1691_v50 = vpop.f32.mrf.mxu1  ;;  %v971_v3 = vadd.f32 %v10375_v7, %v970_v38  ;;  %5781 = vrot.lane.b32.xlu0 %v8080_v43, %s9037_s22  ;;  %v8061_v38 = vld [vmem:[%s15212_s7 + $0x260] sm:$0xff] }
 0x2e9   :  { %v1049_v60 = vmax.f32 %v818_v59, 0.0 }
 0x2ea   :  { %v1100_v22 = vmax.f32 %v971_v3, 0.0  ;;  %v8083_v3 = vld [vmem:[%s15212_s7 + $0x2e0] sm:$0xff] }
 0x2eb   :  { %7918 = vmatmul.msk.f32.gmra.mxu1 %vm1109_vm1, %v1049_v60  ;;  %v8039_v60 = vld [vmem:[%s15212_s7 + $0x1e0] sm:$0xff]  ;;  %5114 = vrot.lane.b32.xlu2 %v8061_v38, %s9037_s22  ;;  %v8086_v38 = vld [vmem:[%s15212_s7 + $0x2f8] sm:$0xff] }
 0x2ec   :  { %7969 = vmatmul.msk.f32.gmra.mxu3 %vm1109_vm1, %v1100_v22  ;;  %4441 = vrot.lane.b32.xlu1 %v8039_v60, %s9037_s22 }
 0x2ee   :  { %v820_v15 = vpop.f32.mrf.mxu0 }
 0x2ef   :  { %v821_v61 = vadd.f32 %v10375_v7, %v820_v15  ;;  %v10490_v17 = vpop.f32.mrf.mxu3 }
 0x2f0   :  { %v1694_v29 = vpop.f32.mrf.mxu1  ;;  %5787 = vrot.lane.b32.xlu0 %v8083_v3, %s9037_s22  ;;  %v1689_v3 = vadd.f32 %v10185_v46, %v10445_v33  ;;  %v1680_v33 = vadd.f32 %v10185_v46, %v10385_v8  ;;  %v1671_v8 = vadd.f32 %v10185_v46, %v10320_v42  ;;  %v1662_v42 = vadd.f32 %v10185_v46, %v10264_v27 }
 0x2f1   :  { %v1050_v5 = vmax.f32 %v821_v61, 0.0  ;;  %v1695_v36 = vadd.f32 %v10185_v46, %v1694_v29  ;;  %v1794_v27 = vadd.f32 %v10185_v46, %v10132_v2  ;;  %v1782_v2 = vadd.f32 %v10185_v46, %v10033_v41  ;;  %v10604_v41 = vld [vmem:[%s15208_s3] sm:$0xff] }
 0x2f2   :  { %15280 = vst [vmem:[#allocation5_spill] sm:$0xff] %v10604_v41  ;;  %vm2335_vm8 = vcmp.gt.f32.partialorder %v10604_v41, 0.0 }
 0x2f3   :  { %7919 = vmatmul.msk.f32.gmra.mxu1 %vm1109_vm1, %v1050_v5 }
 0x2f4   :  { %4447 = vrot.lane.b32.xlu1 %v8042_v6, %s9037_s22  ;;  %v1954_v6 = vmax.f32 %v1689_v3, 0.0 }
 0x2f6   :  { %v823_v44 = vpop.f32.mrf.mxu0 }
 0x2f7   :  { %v824_v48 = vadd.f32 %v10375_v7, %v823_v44  ;;  %v10506_v30 = vpop.f32.mrf.mxu3  ;;  %v2024_v44 = vld [vmem:[%s15210_s5 + $0x8] sm:$0xff] }
 0x2f8   :  { %v1697_v54 = vpop.f32.mrf.mxu1  ;;  %2067 = vmatmul.f32.vlgmr.msrb.gmra.mxu3 %v2024_v44  ;;  %5793 = vrot.lane.b32.xlu0 %v8086_v38, %s9037_s22 }
 0x2f9   :  { %v1051_v59 = vmax.f32 %v824_v48, 0.0  ;;  %v1698_v24 = vadd.f32 %v10185_v46, %v1697_v54  ;;  %v8064_v48 = vld [vmem:[%s15212_s7 + $0x278] sm:$0xff]  ;;  %v1692_v54 = vadd.f32 %v10185_v46, %v1691_v50  ;;  %v1686_v50 = vadd.f32 %v10185_v46, %v10425_v40 }
 0x2fa   :  { %5120 = vrot.lane.b32.xlu2 %v8064_v48, %s9037_s22  ;;  %v1677_v40 = vadd.f32 %v10185_v46, %v10360_v55  ;;  %v1668_v55 = vadd.f32 %v10185_v46, %v10304_v1 }
 0x2fb   :  { %7920 = vmatmul.msk.f32.gmra.mxu1 %vm1109_vm1, %v1051_v59  ;;  %v1957_v59 = vmax.f32 %v1698_v24, 0.0  ;;  %v1955_v24 = vmax.f32 %v1692_v54, 0.0 }
 0x2fc   :  { %v1950_v3 = vmax.f32 %v1677_v40, 0.0  ;;  %v1791_v40 = vadd.f32 %v10185_v46, %v10105_v47 }
 0x2fe   :  { %v826_v21 = vpop.f32.mrf.mxu0 }
 0x2ff   :  { %v827_v15 = vadd.f32 %v10375_v7, %v826_v21  ;;  %v10532_v60 = vpop.f32.mrf.mxu3  ;;  %v1956_v21 = vmax.f32 %v1695_v36, 0.0  ;;  %v1953_v36 = vmax.f32 %v1686_v50, 0.0 }
 0x300   :  { %v1700_v22 = vpop.f32.mrf.mxu1 }
 0x301   :  { %v1052_v61 = vmax.f32 %v827_v15, 0.0  ;;  %v1701_v5 = vadd.f32 %v10185_v46, %v1700_v22 }
 0x303   :  { %v1958_v43 = vmax.f32 %v1701_v5, 0.0  ;;  %7921 = vmatmul.msk.f32.gmra.mxu1 %vm1109_vm1, %v1052_v61  ;;  %v1683_v5 = vadd.f32 %v10185_v46, %v10405_v52 }
 0x305   :  { %2091 = vmatpush.msra.mxu3 %v1958_v43  ;;  %v1952_v48 = vmax.f32 %v1683_v5, 0.0  ;;  %v1656_v5 = vadd.f32 %v10185_v46, %v10211_v56 }
 0x306   :  { %v829_v29 = vpop.f32.mrf.mxu0 }
 0x307   :  { %v830_v15 = vadd.f32 %v10375_v7, %v829_v29  ;;  %2092 = vmatpush.msra.mxu3 %v1957_v59  ;;  %v10551_v43 = vpop.f32.mrf.mxu3  ;;  %v1674_v59 = vadd.f32 %v10185_v46, %v10340_v37  ;;  %v1951_v29 = vmax.f32 %v1680_v33, 0.0  ;;  %v1665_v37 = vadd.f32 %v10185_v46, %v10288_v49 }
 0x308   :  { %v10541_v22 = vpop.f32.mrf.mxu1  ;;  %v1797_v49 = vadd.f32 %v10185_v46, %v10153_v26  ;;  %v1989_v26 = vmax.f32 %v1794_v27, 0.0 }
 0x309   :  { %v1053_v61 = vmax.f32 %v830_v15, 0.0  ;;  %2093 = vmatpush.msra.mxu3 %v1956_v21  ;;  %v1948_v15 = vmax.f32 %v1671_v8, 0.0  ;;  %v1946_v1 = vmax.f32 %v1665_v37, 0.0  ;;  %v1779_v8 = vadd.f32 %v10185_v46, %v10010_v45 }
 0x30a   :  { %v1990_v56 = vmax.f32 %v1797_v49, 0.0  ;;  %v5641_v45 = vsel %vm5043_vm6, %v10604_v41, 0.0 }
 0x30b   :  { %7922 = vmatmul.msk.f32.gmra.mxu1 %vm1109_vm1, %v1053_v61  ;;  %2094 = vmatpush.msra.mxu3 %v1955_v24  ;;  %v1947_v24 = vmax.f32 %v1668_v55, 0.0  ;;  %v1659_v61 = vadd.f32 %v10185_v46, %v10239_v57  ;;  %v1943_v57 = vmax.f32 %v1656_v5, 0.0  ;;  %v4968_v55 = vsel %vm4370_vm5, %v10604_v41, 0.0 }
 0x30c   :  { %v1984_v37 = vmax.f32 %v1779_v8, 0.0  ;;  %v1764_v5 = vadd.f32 %v10185_v46, %v9913_v39 }
 0x30d   :  { %2095 = vmatpush.msra.mxu3 %v1954_v6  ;;  %v1945_v6 = vmax.f32 %v1662_v42, 0.0  ;;  %v1944_v33 = vmax.f32 %v1659_v61, 0.0  ;;  %v1767_v61 = vadd.f32 %v10185_v46, %v9931_v53 }
 0x30e   :  { %v832_v44 = vpop.f32.mrf.mxu0  ;;  %v1979_v27 = vmax.f32 %v1764_v5, 0.0 }
 0x30f   :  { %v833_v54 = vadd.f32 %v10375_v7, %v832_v44  ;;  %2096 = vmatpush.msra.mxu3 %v1953_v36  ;;  %v1949_v7 = vmax.f32 %v1674_v59, 0.0  ;;  %v10565_v21 = vpop.f32.mrf.mxu3  ;;  %v1988_v59 = vmax.f32 %v1791_v40, 0.0  ;;  %v1980_v49 = vmax.f32 %v1767_v61, 0.0 }
 0x310   :  { %v10556_v52 = vpop.f32.mrf.mxu1 }
 0x311   :  { %v1054_v38 = vmax.f32 %v833_v54, 0.0  ;;  %2097 = vmatpush.msra.mxu3 %v1952_v48  ;;  %v1788_v48 = vadd.f32 %v10185_v46, %v10081_v25  ;;  %v1785_v54 = vadd.f32 %v10185_v46, %v10057_v9  ;;  %v1776_v9 = vadd.f32 %v10185_v46, %v9990_v31 }
 0x312   :  { %v1770_v31 = vadd.f32 %v10185_v46, %v9948_v11  ;;  %v1761_v11 = vadd.f32 %v10185_v46, %v9882_v16 }
 0x313   :  { %7923 = vmatmul.msk.f32.gmra.mxu1 %vm1109_vm1, %v1054_v38  ;;  %2098 = vmatpush.msra.mxu3 %v1951_v29  ;;  %v1987_v29 = vmax.f32 %v1788_v48, 0.0  ;;  %v1986_v25 = vmax.f32 %v1785_v54, 0.0 }
 0x315   :  { %2099 = vmatpush.msra.mxu3 %v1950_v3  ;;  %v1985_v3 = vmax.f32 %v1782_v2, 0.0 }
 0x317   :  { %2100 = vmatpush.msra.mxu3 %v1949_v7  ;;  %v10579_v36 = vpop.f32.mrf.mxu3  ;;  %v1773_v7 = vadd.f32 %v10185_v46, %v9968_v13 }
 0x318   :  { %v10569_v50 = vpop.f32.mrf.mxu1 }
 0x319   :  { %2101 = vmatpush.msra.mxu3 %v1948_v15  ;;  %v1983_v15 = vmax.f32 %v1776_v9, 0.0 }
 0x31b   :  { %2102 = vmatpush.msra.mxu3 %v1947_v24  ;;  %v6314_v24 = vsel %vm5716_vm7, %v10604_v41, 0.0 }
 0x31d   :  { %2103 = vmatpush.msra.mxu3 %v1946_v1  ;;  %v1982_v1 = vmax.f32 %v1773_v7, 0.0 }
 0x31e   :  { %4969 = vadd.xlane.f32.xlu1 %v4968_v55 }
 0x31f   :  { %2104 = vmatpush.msra.mxu3 %v1945_v6  ;;  %v10595_v47 = vpop.f32.mrf.mxu3  ;;  %v1981_v6 = vmax.f32 %v1770_v31, 0.0 }
 0x320   :  { %v10583_v44 = vpop.f32.mrf.mxu1 }
 0x321   :  { %2105 = vmatpush.msra.mxu3 %v1944_v33  ;;  %v1758_v33 = vadd.f32 %v10185_v46, %v9854_v62 }
 0x322   :  { %6315 = vadd.xlane.f32.xlu0 %v6314_v24 }
 0x323   :  { %2106 = vmatpush.msra.mxu3 %v1943_v57  ;;  %5642 = vadd.xlane.f32.xlu2 %v5641_v45  ;;  %v1978_v57 = vmax.f32 %v1761_v11, 0.0  ;;  %v1977_v40 = vmax.f32 %v1758_v33, 0.0  ;;  %v2026_v45 = vld [vmem:[%s15210_s5 + $0x18] sm:$0xff] }
 0x324   :  { %2107 = vmatmul.f32.vlgmr.msra.gmra.mxu3 %v2026_v45 }
 0x325   :  { %2131 = vmatpush.msrb.mxu3 %v1990_v56 }
 0x327   :  { %2132 = vmatpush.msrb.mxu3 %v1989_v26  ;;  %v10620_v13 = vpop.f32.mrf.mxu3 }
 0x328   :  { %v10593_v38 = vpop.f32.mrf.mxu1 }
 0x329   :  { %2133 = vmatpush.msrb.mxu3 %v1988_v59  ;;  %v10636_v59 = vpop.permute.xlu0 %2234 }
 0x32b   :  { %2134 = vmatpush.msrb.mxu3 %v1987_v29  ;;  %v2023_v29 = vld [vmem:[%s15210_s5] sm:$0xff] }
 0x32c   :  { %2047 = vmatmul.f32.vlgmr.msrb.gmra.mxu2 %v2023_v29 }
 0x32d   :  { %2135 = vmatpush.msrb.mxu3 %v1986_v25 }
 0x32f   :  { %2136 = vmatpush.msrb.mxu3 %v1985_v3  ;;  %v10630_v56 = vpop.f32.mrf.mxu3  ;;  %v2025_v3 = vld [vmem:[%s15210_s5 + $0x10] sm:$0xff] }
 0x330   :  { %v10614_v42 = vpop.f32.mrf.mxu1 }
 0x331   :  { %2137 = vmatpush.msrb.mxu3 %v1984_v37  ;;  %v10643_v8 = vpop.permute.xlu0 %2252 }
 0x332   :  { %15281 = vst [vmem:[#allocation6_spill] sm:$0xff] %v10643_v8 }
 0x333   :  { %2138 = vmatpush.msrb.mxu3 %v1983_v15 }
 0x334   :  { %2087 = vmatmul.f32.vlgmr.msra.gmra.mxu2 %v2025_v3 }
 0x335   :  { %2139 = vmatpush.msrb.mxu3 %v1982_v1 }
 0x337   :  { %2140 = vmatpush.msrb.mxu3 %v1981_v6  ;;  %v10632_v48 = vpop.f32.mrf.mxu3 }
 0x338   :  { %v10628_v53 = vpop.f32.mrf.mxu1 }
 0x339   :  { %2141 = vmatpush.msrb.mxu3 %v1980_v49  ;;  %v10653_v7 = vpop.permute.xlu0 %2383 }
 0x33b   :  { %2142 = vmatpush.msrb.mxu3 %v1979_v27 }
 0x33d   :  { %2143 = vmatpush.msrb.mxu3 %v1978_v57 }
 0x33f   :  { %2144 = vmatpush.msrb.mxu3 %v1977_v40  ;;  %v10634_v54 = vpop.f32.mrf.mxu3 }
 0x340   :  { %v1724_v39 = vpop.f32.mrf.mxu1 }
 0x341   :  { %v10655_v15 = vpop.permute.xlu0 %2385 }
 0x342   :  { %15282 = vst [vmem:[#allocation7_spill] sm:$0xff] %v10655_v15 }
 0x347   :  { %v10638_v2 = vpop.f32.mrf.mxu3 }
 0x348   :  { %v1727_v16 = vpop.f32.mrf.mxu1 }
 0x349   :  { %v10657_v1 = vpop.permute.xlu0 %2387 }
 0x34f   :  { %v10645_v9 = vpop.f32.mrf.mxu3 }
 0x350   :  { %v1730_v26 = vpop.f32.mrf.mxu1 }
 0x351   :  { %v10664_v45 = vpop.permute.xlu0 %2389 }
 0x357   :  { %v1883_v37 = vpop.f32.mrf.mxu3 }
 0x358   :  { %v1733_v62 = vpop.f32.mrf.mxu1 }
 0x359   :  { %v1734_v15 = vadd.f32 %v10185_v46, %v1733_v62 }
 0x35f   :  { %v1886_v61 = vpop.f32.mrf.mxu3 }
 0x360   :  { %v1736_v25 = vpop.f32.mrf.mxu1 }
 0x361   :  { %v1737_v29 = vadd.f32 %v10185_v46, %v1736_v25  ;;  %v1725_v25 = vadd.f32 %v10185_v46, %v1724_v39  ;;  %v1719_v39 = vadd.f32 %v10185_v46, %v10614_v42  ;;  %v1713_v42 = vadd.f32 %v10185_v46, %v10583_v44 }
 0x362   :  { %v1707_v44 = vadd.f32 %v10185_v46, %v10556_v52 }
 0x367   :  { %v1889_v27 = vpop.f32.mrf.mxu3 }
 0x368   :  { %v1739_v55 = vpop.f32.mrf.mxu1 }
 0x369   :  { %v1740_v57 = vadd.f32 %v10185_v46, %v1739_v55  ;;  %v1969_v55 = vmax.f32 %v1734_v15, 0.0  ;;  %v1890_v15 = vadd.f32 %v10185_v46, %v1889_v27  ;;  %v2028_v27 = vld [vmem:[%s15210_s5 + $0x28] sm:$0xff] }
 0x370   :  { %v1742_v31 = vpop.f32.mrf.mxu1 }
 0x371   :  { %v1743_v49 = vadd.f32 %v10185_v46, %v1742_v31  ;;  %v1970_v31 = vmax.f32 %v1737_v29, 0.0 }
 0x373   :  { %v1972_v3 = vmax.f32 %v1743_v49, 0.0 }
 0x378   :  { %v1745_v24 = vpop.f32.mrf.mxu1 }
 0x379   :  { %v1746_v6 = vadd.f32 %v10185_v46, %v1745_v24  ;;  %v1971_v24 = vmax.f32 %v1740_v57, 0.0  ;;  %v1722_v57 = vadd.f32 %v10185_v46, %v10628_v53 }
 0x37b   :  { %v1973_v40 = vmax.f32 %v1746_v6, 0.0  ;;  %v1892_v6 = vpop.f32.mrf.mxu3  ;;  %v1965_v53 = vmax.f32 %v1722_v57, 0.0 }
 0x37c   :  { %v1893_v62 = vadd.f32 %v10185_v46, %v1892_v6  ;;  %v1964_v6 = vmax.f32 %v1719_v39, 0.0 }
 0x380   :  { %v1748_v5 = vpop.f32.mrf.mxu1 }
 0x381   :  { %v1749_v11 = vadd.f32 %v10185_v46, %v1748_v5  ;;  %v1731_v5 = vadd.f32 %v10185_v46, %v1730_v26 }
 0x383   :  { %v1974_v33 = vmax.f32 %v1749_v11, 0.0  ;;  %v1728_v11 = vadd.f32 %v10185_v46, %v1727_v16  ;;  %v1968_v49 = vmax.f32 %v1731_v5, 0.0  ;;  %v10675_v16 = vpop.permute.xlu0 %2393  ;;  %v2022_v5 = vmax.f32 %v1893_v62, 0.0 }
 0x385   :  { %2111 = vmatpush.msrb.mxu2 %v1974_v33  ;;  %v1967_v26 = vmax.f32 %v1728_v11, 0.0  ;;  %v1887_v11 = vadd.f32 %v10185_v46, %v1886_v61  ;;  %v1881_v61 = vadd.f32 %v10185_v46, %v10645_v9 }
 0x387   :  { %2112 = vmatpush.msrb.mxu2 %v1973_v40  ;;  %v2018_v52 = vmax.f32 %v1881_v61, 0.0 }
 0x388   :  { %v1751_v20 = vpop.f32.mrf.mxu1 }
 0x389   :  { %2113 = vmatpush.msrb.mxu2 %v1972_v3  ;;  %v1752_v33 = vadd.f32 %v10185_v46, %v1751_v20  ;;  %v1966_v3 = vmax.f32 %v1725_v25, 0.0  ;;  %v1884_v25 = vadd.f32 %v10185_v46, %v1883_v37  ;;  %v10700_v37 = vld [vmem:[%s15216_s11] ss:$0 sm:$0xff] }
 0x38a   :  { %v1704_v9 = vadd.f32 %v10700_v37, %v10541_v22  ;;  %v1842_v22 = vadd.f32 %v10700_v37, %v10473_v32  ;;  %v1836_v32 = vadd.f32 %v10700_v37, %v10438_v51  ;;  %v1830_v51 = vadd.f32 %v10700_v37, %v10398_v58 }
 0x38b   :  { %2114 = vmatpush.msrb.mxu2 %v1971_v24  ;;  %v1975_v20 = vmax.f32 %v1752_v33, 0.0  ;;  %v2020_v33 = vmax.f32 %v1887_v11, 0.0  ;;  %v10695_v62 = vpop.permute.xlu0 %2397  ;;  %v2019_v57 = vmax.f32 %v1884_v25, 0.0  ;;  %v1824_v58 = vadd.f32 %v10700_v37, %v10353_v34 }
 0x38c   :  { %v1818_v34 = vadd.f32 %v10700_v37, %v10314_v10 }
 0x38d   :  { %2115 = vmatpush.msrb.mxu2 %v1970_v31  ;;  %v1716_v31 = vadd.f32 %v10185_v46, %v10593_v38  ;;  %v1710_v38 = vadd.f32 %v10185_v46, %v10569_v50  ;;  %v1878_v50 = vadd.f32 %v10700_v37, %v10638_v2  ;;  %v1872_v2 = vadd.f32 %v10700_v37, %v10632_v48 }
 0x38f   :  { %2116 = vmatpush.msrb.mxu2 %v1969_v55  ;;  %v2021_v55 = vmax.f32 %v1890_v15, 0.0  ;;  %v1845_v15 = vadd.f32 %v10700_v37, %v10490_v17  ;;  %v2017_v39 = vmax.f32 %v1878_v50, 0.0  ;;  %v1839_v17 = vadd.f32 %v10700_v37, %v10455_v63 }
 0x390   :  { %v1754_v40 = vpop.f32.mrf.mxu1  ;;  %v1833_v63 = vadd.f32 %v10700_v37, %v10418_v35  ;;  %v1827_v35 = vadd.f32 %v10700_v37, %v10378_v4  ;;  %v1821_v4 = vadd.f32 %v10700_v37, %v10333_v18 }
 0x391   :  { %v1755_v29 = vadd.f32 %v10185_v46, %v1754_v40  ;;  %2117 = vmatpush.msrb.mxu2 %v1968_v49  ;;  %v1963_v49 = vmax.f32 %v1716_v31, 0.0  ;;  %v1962_v40 = vmax.f32 %v1713_v42, 0.0  ;;  %v1875_v46 = vadd.f32 %v10700_v37, %v10634_v54  ;;  %v2027_v54 = vld [vmem:[%s15210_s5 + $0x20] sm:$0xff] }
 0x392   :  { %v2006_v48 = vmax.f32 %v1845_v15, 0.0  ;;  %v2015_v31 = vmax.f32 %v1872_v2, 0.0  ;;  %v1998_v18 = vmax.f32 %v1821_v4, 0.0  ;;  %v2249_v15 = vld [vmem:[%s15206_s1] sm:$0xff] }
 0x393   :  { %v1976_v24 = vmax.f32 %v1755_v29, 0.0  ;;  %2118 = vmatpush.msrb.mxu2 %v1967_v26  ;;  %v1961_v26 = vmax.f32 %v1710_v38, 0.0  ;;  %v1960_v29 = vmax.f32 %v1707_v44, 0.0  ;;  %v10725_v11 = vpop.permute.xlu0 %2399  ;;  %v10737_v38 = vpop.permute.xlu2 %2267 }
 0x394   :  { %15283 = vst [vmem:[#allocation8_spill] sm:$0xff] %v10737_v38 }
 0x395   :  { %2119 = vmatpush.msrb.mxu2 %v1966_v3  ;;  %2145 = vmatpush.msrb.mxu3 %v1976_v24  ;;  %v1959_v3 = vmax.f32 %v1704_v9, 0.0  ;;  %v2016_v24 = vmax.f32 %v1875_v46, 0.0  ;;  %v1999_v9 = vmax.f32 %v1824_v58, 0.0 }
 0x397   :  { %2120 = vmatpush.msrb.mxu2 %v1965_v53  ;;  %2146 = vmatpush.msrb.mxu3 %v1975_v20  ;;  %v1869_v20 = vadd.f32 %v10700_v37, %v10630_v56  ;;  %v2005_v53 = vmax.f32 %v1842_v22, 0.0  ;;  %v1863_v56 = vadd.f32 %v10700_v37, %v10595_v47  ;;  %v1857_v47 = vadd.f32 %v10700_v37, %v10565_v21 }
 0x398   :  { %2147 = vmatmul.f32.vlgmr.msrb.gmra.mxu3 %v2028_v27  ;;  %v2004_v27 = vmax.f32 %v1839_v17, 0.0  ;;  %v1851_v21 = vadd.f32 %v10700_v37, %v10532_v60 }
 0x399   :  { %2171 = vmatpush.msra.mxu3 %v2022_v5  ;;  %2121 = vmatpush.msrb.mxu2 %v1964_v6  ;;  %v1866_v5 = vadd.f32 %v10700_v37, %v10620_v13  ;;  %v1860_v13 = vadd.f32 %v10700_v37, %v10579_v36  ;;  %v2003_v6 = vmax.f32 %v1836_v32, 0.0  ;;  %v2012_v25 = vmax.f32 %v1863_v56, 0.0  ;;  %v8056_v32 = vld [vmem:[%s15212_s7 + $0x238] sm:$0xff]  ;;  %v10812_v56 = vpop.permute.xlu1 %2257 }
 0x39a   :  { %v1854_v36 = vadd.f32 %v10700_v37, %v10551_v43  ;;  %v2010_v44 = vmax.f32 %v1857_v47, 0.0  ;;  %v1848_v43 = vadd.f32 %v10700_v37, %v10506_v30  ;;  %v2008_v60 = vmax.f32 %v1851_v21, 0.0  ;;  %v2030_v30 = vld [vmem:[%s15210_s5 + $0x38] sm:$0xff]  ;;  %15285 = vst [vmem:[#allocation10_spill] sm:$0xff] %v10812_v56 }
 0x39b   :  { %2172 = vmatpush.msra.mxu3 %v2021_v55  ;;  %2122 = vmatpush.msrb.mxu2 %v1963_v49  ;;  %v2014_v55 = vmax.f32 %v1869_v20, 0.0  ;;  %v2013_v42 = vmax.f32 %v1866_v5, 0.0  ;;  %v2002_v49 = vmax.f32 %v1833_v63, 0.0  ;;  %v2011_v61 = vmax.f32 %v1860_v13, 0.0  ;;  %v10749_v50 = vpop.permute.xlu0 %2403  ;;  %v10762_v10 = vpop.permute.xlu2 %2391  ;;  %v10782_v20 = vld [vmem:[%s15217_s12] sm:$0xff]  ;;  %v8059_v63 = vld [vmem:[%s15212_s7 + $0x250] sm:$0xff] }
 0x39c   :  { %v2007_v46 = vmax.f32 %v1848_v43, 0.0 }
 0x39d   :  { %2173 = vmatpush.msra.mxu3 %v2020_v33  ;;  %2123 = vmatpush.msrb.mxu2 %v1962_v40  ;;  %v2001_v33 = vmax.f32 %v1830_v51, 0.0  ;;  %v2000_v40 = vmax.f32 %v1827_v35, 0.0  ;;  %v10834_v51 = vld [vmem:[%s15217_s12 + $0x18] sm:$0xff]  ;;  %v8094_v35 = vld [vmem:[%s15212_s7 + $0x308] sm:$0xff] }
 0x39e   :  { %6438 = vrot.lane.b32.xlu0 %v8094_v35, %s9037_s22  ;;  %v8102_v35 = vld [vmem:[%s15212_s7 + $0x348] sm:$0xff] }
 0x39f   :  { %2174 = vmatpush.msra.mxu3 %v2019_v57  ;;  %2124 = vmatpush.msrb.mxu2 %v1961_v26  ;;  %v2009_v57 = vmax.f32 %v1854_v36, 0.0  ;;  %v1815_v26 = vadd.f32 %v10700_v37, %v10298_v19  ;;  %v1809_v19 = vadd.f32 %v10700_v37, %v10256_v14  ;;  %v1803_v14 = vadd.f32 %v10700_v37, %v10198_v28  ;;  %v8072_v36 = vld [vmem:[%s15212_s7 + $0x288] sm:$0xff] }
 0x3a1   :  { %2175 = vmatpush.msra.mxu3 %v2018_v52  ;;  %2125 = vmatpush.msrb.mxu2 %v1960_v29  ;;  %v1812_v52 = vadd.f32 %v10700_v37, %v10282_v23  ;;  %v1997_v29 = vmax.f32 %v1818_v34, 0.0  ;;  %v1996_v2 = vmax.f32 %v1815_v26, 0.0  ;;  %v1806_v23 = vadd.f32 %v10700_v37, %v10228_v0  ;;  %v8053_v0 = vld [vmem:[%s15212_s7 + $0x220] sm:$0xff]  ;;  %v8082_v34 = vld [vmem:[%s15212_s7 + $0x2d8] sm:$0xff] }
 0x3a3   :  { %2176 = vmatpush.msra.mxu3 %v2017_v39  ;;  %2126 = vmatpush.msrb.mxu2 %v1959_v3  ;;  %v8050_v39 = vld [vmem:[%s15212_s7 + $0x208] sm:$0xff]  ;;  %v1995_v3 = vmax.f32 %v1812_v52, 0.0  ;;  %v10775_v22 = vpop.permute.xlu0 %2409  ;;  %v1993_v17 = vmax.f32 %v1806_v23, 0.0  ;;  %v10789_v5 = vpop.permute.xlu2 %2401  ;;  %v8095_v23 = vld [vmem:[%s15212_s7 + $0x310] sm:$0xff] }
 0x3a4   :  { %2127 = vmatmul.f32.vlgmr.msrb.gmra.mxu2 %v2027_v54  ;;  %5092 = vrot.lane.b32.xlu1 %v8050_v39, %s9037_s22  ;;  %v1994_v54 = vmax.f32 %v1809_v19, 0.0  ;;  %v8096_v19 = vld [vmem:[%s15212_s7 + $0x318] sm:$0xff] }
 0x3a5   :  { %2177 = vmatpush.msra.mxu3 %v2016_v24  ;;  %2151 = vmatpush.msra.mxu2 %v2006_v48  ;;  %v1800_v24 = vadd.f32 %v10700_v37, %v10172_v12  ;;  %v1992_v48 = vmax.f32 %v1803_v14, 0.0  ;;  %v2029_v12 = vld [vmem:[%s15210_s5 + $0x30] sm:$0xff]  ;;  %v8098_v14 = vld [vmem:[%s15212_s7 + $0x328] sm:$0xff] }
 0x3a6   :  { %6442 = vrot.lane.b32.xlu0 %v8096_v19, %s9037_s22  ;;  %v2191_v19 = vld [vmem:[%s15219_s14] sm:$0xff] }
 0x3a7   :  { %2178 = vmatpush.msra.mxu3 %v2015_v31  ;;  %2152 = vmatpush.msra.mxu2 %v2005_v53  ;;  %v1991_v28 = vmax.f32 %v1800_v24, 0.0  ;;  %v10802_v31 = vld [vmem:[%s15217_s12 + $0x8] sm:$0xff] }
 0x3a9   :  { %2179 = vmatpush.msra.mxu3 %v2014_v55  ;;  %2153 = vmatpush.msra.mxu2 %v2004_v27  ;;  %v10817_v55 = vld [vmem:[%s15217_s12 + $0x10] sm:$0xff] }
 0x3ab   :  { %2180 = vmatpush.msra.mxu3 %v2013_v42  ;;  %2154 = vmatpush.msra.mxu2 %v2003_v6  ;;  %v10797_v37 = vpop.xlane.xlu0 %2944  ;;  %v10810_v53 = vpop.permute.xlu2 %2405  ;;  %v8062_v6 = vld [vmem:[%s15212_s7 + $0x268] sm:$0xff] }
 0x3ac   :  { %5098 = vrot.lane.b32.xlu1 %v8053_v0, %s9037_s22  ;;  %15284 = vst [vmem:[#allocation9_spill] sm:$0xff] %v10797_v37  ;;  %v10829_v42 = vpop.permute.xlu1 %2262  ;;  %v8099_v0 = vld [vmem:[%s15212_s7 + $0x330] sm:$0xff] }
 0x3ad   :  { %2181 = vmatpush.msra.mxu3 %v2012_v25  ;;  %2155 = vmatpush.msra.mxu2 %v2002_v49  ;;  %15286 = vst [vmem:[#allocation11_spill] sm:$0xff] %v10829_v42  ;;  %v8071_v25 = vld [vmem:[%s15212_s7 + $0x280] sm:$0xff] }
 0x3ae   :  { %5763 = vrot.lane.b32.xlu2 %v8071_v25, %s9037_s22  ;;  %6446 = vrot.lane.b32.xlu0 %v8098_v14, %s9037_s22  ;;  %v2194_v25 = vld [vmem:[%s15219_s14 + $0x18] sm:$0xff]  ;;  %v8107_v14 = vld [vmem:[%s15212_s7 + $0x370] sm:$0xff] }
 0x3af   :  { %2182 = vmatpush.msra.mxu3 %v2011_v61  ;;  %2156 = vmatpush.msra.mxu2 %v2001_v33  ;;  %v8076_v33 = vld [vmem:[%s15212_s7 + $0x2a8] sm:$0xff] }
 0x3b1   :  { %2183 = vmatpush.msra.mxu3 %v2010_v44  ;;  %2157 = vmatpush.msra.mxu2 %v2000_v40  ;;  %v8079_v40 = vld [vmem:[%s15212_s7 + $0x2c0] sm:$0xff] }
 0x3b3   :  { %2184 = vmatpush.msra.mxu3 %v2009_v57  ;;  %2158 = vmatpush.msra.mxu2 %v1999_v9  ;;  %v10822_v27 = vpop.permute.xlu0 %3069  ;;  %v10827_v13 = vpop.permute.xlu2 %2411 }
 0x3b4   :  { %5104 = vrot.lane.b32.xlu1 %v8056_v32, %s9037_s22  ;;  %v10857_v61 = vpop.permute.xlu1 %2395  ;;  %v2068_v32 = vpop.f32.mrf.mxu3 }
 0x3b5   :  { %2185 = vmatpush.msra.mxu3 %v2008_v60  ;;  %2159 = vmatpush.msra.mxu2 %v1998_v18 }
 0x3b7   :  { %2186 = vmatpush.msra.mxu3 %v2007_v46  ;;  %2160 = vmatpush.msra.mxu2 %v1997_v29  ;;  %v8085_v29 = vld [vmem:[%s15212_s7 + $0x2f0] sm:$0xff] }
 0x3b8   :  { %2187 = vmatmul.f32.vlgmr.msra.gmra.mxu3 %v2030_v30 }
 0x3b9   :  { %2297 = vmatpush.msrb.mxu3 %v2249_v15  ;;  %2161 = vmatpush.msra.mxu2 %v1996_v2  ;;  %v8075_v15 = vld [vmem:[%s15212_s7 + $0x2a0] sm:$0xff] }
 0x3ba   :  { %5771 = vrot.lane.b32.xlu2 %v8075_v15, %s9037_s22 }
 0x3bb   :  { %2162 = vmatpush.msra.mxu2 %v1995_v3  ;;  %v10841_v47 = vpop.permute.xlu0 %3075  ;;  %v10852_v49 = vpop.permute.xlu2 %3073  ;;  %v8078_v3 = vld [vmem:[%s15212_s7 + $0x2b8] sm:$0xff] }
 0x3bc   :  { %5110 = vrot.lane.b32.xlu1 %v8059_v63, %s9037_s22  ;;  %v10867_v44 = vpop.permute.xlu1 %2407  ;;  %v2108_v15 = vpop.f32.mrf.mxu3 }
 0x3bd   :  { %2163 = vmatpush.msra.mxu2 %v1994_v54 }
 0x3bf   :  { %2164 = vmatpush.msra.mxu2 %v1993_v17 }
 0x3c0   :  { %7971 = vmatmul.msk.f32.vlgmr.msrb.gmra.mxu3 %vm187_vm0, %v10782_v20 }
 0x3c1   :  { %2165 = vmatpush.msra.mxu2 %v1992_v48  ;;  %v8081_v48 = vld [vmem:[%s15212_s7 + $0x2d0] sm:$0xff] }
 0x3c2   :  { %5777 = vrot.lane.b32.xlu2 %v8078_v3, %s9037_s22  ;;  %v8093_v3 = vld [vmem:[%s15212_s7 + $0x300] sm:$0xff] }
 0x3c3   :  { %2166 = vmatpush.msra.mxu2 %v1991_v28  ;;  %v10860_v58 = vpop.permute.xlu0 %3077  ;;  %v10865_v21 = vpop.permute.xlu2 %3081  ;;  %v8101_v28 = vld [vmem:[%s15212_s7 + $0x340] sm:$0xff] }
 0x3c4   :  { %2167 = vmatmul.f32.vlgmr.msra.gmra.mxu2 %v2029_v12  ;;  %5116 = vrot.lane.b32.xlu1 %v8062_v6, %s9037_s22  ;;  %v10878_v57 = vpop.permute.xlu1 %2413 }
 0x3c5   :  { %6452 = vrot.lane.b32.xlu0 %v8101_v28, %s9037_s22  ;;  %2214 = vmatpush.msrb.mxu2 %v2194_v25 }
 0x3c8   :  { %7972 = vmatmul.msk.f32.gmra.mxu3 %vm187_vm0, %v10802_v31 }
 0x3ca   :  { %5783 = vrot.lane.b32.xlu2 %v8081_v48, %s9037_s22  ;;  %v2048_v48 = vpop.f32.mrf.mxu2 }
 0x3cb   :  { %v10870_v4 = vpop.permute.xlu0 %3083  ;;  %v10876_v43 = vpop.permute.xlu2 %3087 }
 0x3cc   :  { %5765 = vrot.lane.b32.xlu1 %v8072_v36, %s9037_s22  ;;  %v10888_v26 = vpop.permute.xlu1 %3071  ;;  %v8084_v36 = vld [vmem:[%s15212_s7 + $0x2e8] sm:$0xff] }
 0x3d0   :  { %7973 = vmatmul.msk.f32.gmra.mxu3 %vm187_vm0, %v10817_v55 }
 0x3d2   :  { %5789 = vrot.lane.b32.xlu2 %v8084_v36, %s9037_s22  ;;  %v8108_v36 = vld [vmem:[%s15212_s7 + $0x378] sm:$0xff] }
 0x3d3   :  { %v10883_v9 = vpop.permute.xlu0 %3089  ;;  %v10886_v60 = vpop.permute.xlu2 %3093 }
 0x3d4   :  { %5773 = vrot.lane.b32.xlu1 %v8076_v33, %s9037_s22  ;;  %v10894_v30 = vpop.permute.xlu1 %3079  ;;  %v8104_v33 = vld [vmem:[%s15212_s7 + $0x358] sm:$0xff] }
 0x3d5   :  { %6458 = vrot.lane.b32.xlu0 %v8104_v33, %s9037_s22  ;;  %v8097_v33 = vld [vmem:[%s15212_s7 + $0x320] sm:$0xff] }
 0x3d8   :  { %7974 = vmatmul.msk.f32.gmra.mxu3 %vm187_vm0, %v10834_v51 }
 0x3da   :  { %6436 = vrot.lane.b32.xlu2 %v8093_v3, %s9037_s22  ;;  %v2069_v3 = vadd.f32 %v2068_v32, %v2048_v48 }
 0x3db   :  { %v10890_v18 = vpop.permute.xlu0 %3095  ;;  %v10892_v46 = vpop.permute.xlu2 %3099 }
 0x3dc   :  { %5779 = vrot.lane.b32.xlu1 %v8079_v40, %s9037_s22  ;;  %v10912_v39 = vpop.permute.xlu1 %3085  ;;  %v2193_v40 = vld [vmem:[%s15219_s14 + $0x10] sm:$0xff] }
 0x3dd   :  { %2215 = vmatpush.msrb.mxu2 %v2193_v40  ;;  %6464 = vrot.lane.b32.xlu0 %v8107_v14, %s9037_s22  ;;  %v8115_v40 = vld [vmem:[%s15212_s7 + $0x380] sm:$0xff] }
 0x3e2   :  { %6444 = vrot.lane.b32.xlu2 %v8097_v33, %s9037_s22  ;;  %v8118_v33 = vld [vmem:[%s15212_s7 + $0x398] sm:$0xff] }
 0x3e3   :  { %v10896_v52 = vpop.permute.xlu0 %3746  ;;  %v10910_v2 = vpop.xlane.xlu2 %3621 }
 0x3e4   :  { %5785 = vrot.lane.b32.xlu1 %v8082_v34, %s9037_s22  ;;  %15287 = vst [vmem:[#allocation12_spill] sm:$0xff] %v10910_v2  ;;  %v10930_v17 = vpop.permute.xlu1 %3091 }
 0x3e5   :  { %7109 = vrot.lane.b32.xlu0 %v8115_v40, %s9037_s22 }
 0x3eb   :  { %v10925_v54 = vpop.permute.xlu0 %3752  ;;  %v10928_v24 = vpop.permute.xlu2 %3744 }
 0x3ec   :  { %5791 = vrot.lane.b32.xlu1 %v8085_v29, %s9037_s22  ;;  %v10948_v6 = vpop.permute.xlu1 %3097  ;;  %v2192_v29 = vld [vmem:[%s15219_s14 + $0x8] sm:$0xff] }
 0x3ed   :  { %15288 = vst [vmem:[#allocation13_spill] sm:$0xff] %v10948_v6  ;;  %2216 = vmatpush.msrb.mxu2 %v2192_v29  ;;  %7115 = vrot.lane.b32.xlu0 %v8118_v33, %s9037_s22 }
 0x3ef   :  { %2217 = vmatpush.msrb.mxu2 %v2191_v19  ;;  %v2088_v19 = vpop.f32.mrf.mxu2 }
 0x3f0   :  { %v2089_v2 = vadd.f32 %v2088_v19, %v2069_v3 }
 0x3f2   :  { %v2109_v48 = vadd.f32 %v2108_v15, %v2089_v2 }
 0x3f3   :  { %v10944_v12 = vpop.permute.xlu0 %3758  ;;  %v10946_v63 = vpop.permute.xlu2 %3750 }
 0x3f4   :  { %6440 = vrot.lane.b32.xlu1 %v8095_v23, %s9037_s22  ;;  %v8105_v23 = vld [vmem:[%s15212_s7 + $0x360] sm:$0xff]  ;;  %v10988_v28 = vpop.permute.xlu1 %3748 }
 0x3f5   :  { %15289 = vst [vmem:[#allocation14_spill] sm:$0xff] %v10988_v28  ;;  %v8116_v28 = vld [vmem:[%s15212_s7 + $0x388] sm:$0xff] }
 0x3fb   :  { %v10968_v34 = vpop.permute.xlu0 %3764 }
 0x3fc   :  { %6448 = vrot.lane.b32.xlu1 %v8099_v0, %s9037_s22  ;;  %v10985_v0 = vpop.permute.xlu2 %3756 }
 0x403   :  { %v10992_v25 = vpop.permute.xlu0 %3770 }
 0x404   :  { %6454 = vrot.lane.b32.xlu1 %v8102_v35, %s9037_s22  ;;  %v11006_v29 = vpop.permute.xlu2 %3762 }
 0x405   :  { %15290 = vst [vmem:[#allocation15_spill] sm:$0xff] %v11006_v29 }
 0x40b   :  { %v11010_v37 = vpop.permute.xlu0 %4419 }
 0x40c   :  { %6460 = vrot.lane.b32.xlu1 %v8105_v23, %s9037_s22  ;;  %v11008_v23 = vpop.permute.xlu1 %3754  ;;  %15292 = vst [vmem:[#allocation17_spill] sm:$0xff] %v11010_v37  ;;  %v11024_v40 = vpop.permute.xlu2 %3768 }
 0x40d   :  { %15291 = vst [vmem:[#allocation16_spill] sm:$0xff] %v11008_v23  ;;  %v8119_v23 = vld [vmem:[%s15212_s7 + $0x3a0] sm:$0xff] }
 0x40e   :  { %15293 = vst [vmem:[#allocation18_spill] sm:$0xff] %v11024_v40  ;;  %v8122_v40 = vld [vmem:[%s15212_s7 + $0x3b8] sm:$0xff] }
 0x413   :  { %v11038_v2 = vpop.permute.xlu0 %4423 }
 0x414   :  { %6466 = vrot.lane.b32.xlu1 %v8108_v36, %s9037_s22  ;;  %v8100_v36 = vld [vmem:[%s15212_s7 + $0x338] sm:$0xff]  ;;  %v11026_v19 = vpop.permute.xlu1 %3760  ;;  %15295 = vst [vmem:[#allocation20_spill] sm:$0xff] %v11038_v2 }
 0x415   :  { %6450 = vrot.lane.b32.xlu2 %v8100_v36, %s9037_s22  ;;  %15294 = vst [vmem:[#allocation19_spill] sm:$0xff] %v11026_v19  ;;  %v8121_v36 = vld [vmem:[%s15212_s7 + $0x3b0] sm:$0xff] }
 0x416   :  { %7121 = vrot.lane.b32.xlu0 %v8121_v36, %s9037_s22 }
 0x41b   :  { %v2148_v35 = vpop.f32.mrf.mxu3 }
 0x41c   :  { %7111 = vrot.lane.b32.xlu1 %v8116_v28, %s9037_s22  ;;  %v8103_v28 = vld [vmem:[%s15212_s7 + $0x350] sm:$0xff] }
 0x41d   :  { %6456 = vrot.lane.b32.xlu2 %v8103_v28, %s9037_s22  ;;  %v11055_v28 = vpop.permute.xlu1 %3766 }
 0x41e   :  { %15298 = vst [vmem:[#allocation23_spill] sm:$0xff] %v11055_v28 }
 0x424   :  { %7117 = vrot.lane.b32.xlu1 %v8119_v23, %s9037_s22  ;;  %v8106_v23 = vld [vmem:[%s15212_s7 + $0x368] sm:$0xff] }
 0x425   :  { %6462 = vrot.lane.b32.xlu2 %v8106_v23, %s9037_s22  ;;  %v11076_v23 = vpop.permute.xlu1 %3772 }
 0x426   :  { %15301 = vst [vmem:[#allocation26_spill] sm:$0xff] %v11076_v23 }
 0x427   :  { %v2128_v32 = vpop.f32.mrf.mxu2 }
 0x428   :  { %v2129_v3 = vadd.f32 %v2128_v32, %v2109_v48 }
 0x42a   :  { %v2149_v15 = vadd.f32 %v2148_v35, %v2129_v3  ;;  %v8124_v35 = vld [vmem:[%s15212_s7 + $0x3c8] sm:$0xff]  ;;  %v11053_v3 = vpop.permute.xlu2 %3774 }
 0x42b   :  { %15297 = vst [vmem:[#allocation22_spill] sm:$0xff] %v11053_v3  ;;  %7127 = vrot.lane.b32.xlu0 %v8124_v35, %s9037_s22  ;;  %v8128_v3 = vld [vmem:[%s15212_s7 + $0x3e8] sm:$0xff] }
 0x42c   :  { %7123 = vrot.lane.b32.xlu1 %v8122_v40, %s9037_s22 }
 0x432   :  { %v11074_v40 = vpop.xlane.xlu2 %4296 }
 0x433   :  { %15300 = vst [vmem:[#allocation25_spill] sm:$0xff] %v11074_v40 }
 0x43a   :  { %v11098_v23 = vpop.permute.xlu2 %4417 }
 0x43b   :  { %v2188_v14 = vpop.f32.mrf.mxu3  ;;  %15303 = vst [vmem:[#allocation28_spill] sm:$0xff] %v11098_v23 }
 0x443   :  { %v2299_v37 = vpop.f32.mrf.mxu3 }
 0x447   :  { %v2168_v33 = vpop.f32.mrf.mxu2 }
 0x448   :  { %v2169_v32 = vadd.f32 %v2168_v33, %v2149_v15  ;;  %v8125_v15 = vld [vmem:[%s15212_s7 + $0x3d0] sm:$0xff] }
 0x449   :  { %v8117_v33 = vld [vmem:[%s15212_s7 + $0x390] sm:$0xff]  ;;  %7129 = vrot.lane.b32.xlu1 %v8125_v15, %s9037_s22  ;;  %v8120_v15 = vld [vmem:[%s15212_s7 + $0x3a8] sm:$0xff] }
 0x44a   :  { %v11042_v48 = vadd.f32 %v2188_v14, %v2169_v32  ;;  %v11062_v14 = vpop.permute.xlu0 %4427  ;;  %v8127_v32 = vld [vmem:[%s15212_s7 + $0x3e0] sm:$0xff]  ;;  %7113 = vrot.lane.b32.xlu2 %v8117_v33, %s9037_s22  ;;  %v8130_v33 = vld [vmem:[%s15212_s7 + $0x3f8] sm:$0xff] }
 0x44b   :  { %v2302_v19 = vpop.f32.mrf.mxu3  ;;  %15299 = vst [vmem:[#allocation24_spill] sm:$0xff] %v11062_v14  ;;  %7133 = vrot.lane.b32.xlu0 %v8127_v32, %s9037_s22 }
 0x44c   :  { %15296 = vst [vmem:[#allocation21_spill] sm:$0xff] %v11042_v48  ;;  %7970 = vmatmul.msk.f32.vlgmr.msrb.gmra.mxu2 %vm1109_vm1, %v11042_v48  ;;  %v2303_v32 = vadd.f32 %v2302_v19, %v10812_v56  ;;  %v8123_v19 = vld [vmem:[%s15212_s7 + $0x3c0] sm:$0xff] }
 0x44e   :  { %v2312_v6 = vmax.f32 %v2303_v32, 0.0 }
 0x451   :  { %7135 = vrot.lane.b32.xlu1 %v8128_v3, %s9037_s22 }
 0x452   :  { %v11081_v2 = vpop.permute.xlu0 %4433  ;;  %7119 = vrot.lane.b32.xlu2 %v8120_v15, %s9037_s22 }
 0x453   :  { %v2305_v36 = vpop.f32.mrf.mxu3  ;;  %15302 = vst [vmem:[#allocation27_spill] sm:$0xff] %v11081_v2  ;;  %7139 = vrot.lane.b32.xlu0 %v8130_v33, %s9037_s22  ;;  %v11100_v2 = vpop.permute.xlu1 %4421 }
 0x454   :  { %v2306_v35 = vadd.f32 %v2305_v36, %v10829_v42 }
 0x456   :  { %v2313_v36 = vmax.f32 %v2306_v35, 0.0 }
 0x45a   :  { %v11105_v3 = vpop.permute.xlu0 %4439  ;;  %7125 = vrot.lane.b32.xlu2 %v8123_v19, %s9037_s22 }
 0x45b   :  { %v2308_v28 = vpop.f32.mrf.mxu3  ;;  %15304 = vst [vmem:[#allocation29_spill] sm:$0xff] %v11105_v3 }
 0x45c   :  { %v2309_v14 = vadd.f32 %v2308_v28, %v10737_v38  ;;  %v2300_v28 = vadd.f32 %v2299_v37, %v10643_v8  ;;  %v11113_v37 = vpop.permute.xlu2 %4425 }
 0x45d   :  { %15305 = vst [vmem:[#allocation30_spill] sm:$0xff] %v11113_v37 }
 0x45e   :  { %v2314_v40 = vmax.f32 %v2309_v14, 0.0  ;;  %v2311_v29 = vmax.f32 %v2300_v28, 0.0  ;;  %v7977_v14 = vld [vmem:[%s15206_s1 + $0x8] sm:$0xff] }
 0x460   :  { %2327 = vmatpush.msra.mxu2 %v2314_v40  ;;  %v8126_v40 = vld [vmem:[%s15212_s7 + $0x3d8] sm:$0xff] }
 0x462   :  { %2328 = vmatpush.msra.mxu2 %v2313_v36  ;;  %v11120_v35 = vpop.permute.xlu0 %4445  ;;  %7131 = vrot.lane.b32.xlu2 %v8126_v40, %s9037_s22 }
 0x463   :  { %15307 = vst [vmem:[#allocation32_spill] sm:$0xff] %v11120_v35 }
 0x464   :  { %2329 = vmatpush.msra.mxu2 %v2312_v6  ;;  %v11115_v6 = vpop.permute.xlu1 %4429  ;;  %v11128_v15 = vpop.permute.xlu2 %4431 }
 0x465   :  { %15306 = vst [vmem:[#allocation31_spill] sm:$0xff] %v11115_v6 }
 0x466   :  { %2330 = vmatpush.msra.mxu2 %v2311_v29  ;;  %v8129_v29 = vld [vmem:[%s15212_s7 + $0x3f0] sm:$0xff]  ;;  %15308 = vst [vmem:[#allocation33_spill] sm:$0xff] %v11128_v15 }
 0x467   :  { %7975 = vmatmul.msk.f32.vlgmr.msra.gmra.mxu2 %vm1109_vm1, %v11042_v48 }
 0x468   :  { %2977 = vmatpush.msrb.mxu2 %v7977_v14 }
 0x46a   :  { %7137 = vrot.lane.b32.xlu2 %v8129_v29, %s9037_s22  ;;  %v11135_v32 = vpop.permute.xlu0 %5094 }
 0x46b   :  { %15310 = vst [vmem:[#allocation35_spill] sm:$0xff] %v11135_v32 }
 0x46c   :  { %v11130_v33 = vpop.permute.xlu1 %4435  ;;  %v11137_v36 = vpop.permute.xlu2 %4437 }
 0x46d   :  { %15309 = vst [vmem:[#allocation34_spill] sm:$0xff] %v11130_v33 }
 0x46e   :  { %15311 = vst [vmem:[#allocation36_spill] sm:$0xff] %v11137_v36 }
 0x46f   :  { %7978 = vmatmul.msk.f32.vlgmr.msrb.gmra.mxu2 %vm187_vm0, %v10782_v20 }
 0x472   :  { %v11143_v19 = vpop.permute.xlu0 %5100 }
 0x473   :  { %15313 = vst [vmem:[#allocation38_spill] sm:$0xff] %v11143_v19 }
 0x474   :  { %v11139_v28 = vpop.permute.xlu1 %4441  ;;  %v11147_v14 = vpop.permute.xlu2 %4443 }
 0x475   :  { %15312 = vst [vmem:[#allocation37_spill] sm:$0xff] %v11139_v28 }
 0x476   :  { %15314 = vst [vmem:[#allocation39_spill] sm:$0xff] %v11147_v14 }
 0x477   :  { %7979 = vmatmul.msk.f32.gmra.mxu2 %vm187_vm0, %v10802_v31 }
 0x47a   :  { %v11151_v33 = vpop.permute.xlu0 %5106 }
 0x47b   :  { %15316 = vst [vmem:[#allocation41_spill] sm:$0xff] %v11151_v33 }
 0x47c   :  { %v11149_v40 = vpop.permute.xlu1 %4447  ;;  %v11153_v29 = vpop.permute.xlu2 %5090 }
 0x47d   :  { %15315 = vst [vmem:[#allocation40_spill] sm:$0xff] %v11149_v40 }
 0x47e   :  { %15317 = vst [vmem:[#allocation42_spill] sm:$0xff] %v11153_v29 }
 0x47f   :  { %7980 = vmatmul.msk.f32.gmra.mxu2 %vm187_vm0, %v10817_v55 }
 0x482   :  { %v11157_v6 = vpop.permute.xlu0 %5112 }
 0x483   :  { %15319 = vst [vmem:[#allocation44_spill] sm:$0xff] %v11157_v6 }
 0x484   :  { %v11155_v32 = vpop.xlane.xlu1 %4969  ;;  %v11161_v23 = vpop.permute.xlu2 %5096 }
 0x485   :  { %15318 = vst [vmem:[#allocation43_spill] sm:$0xff] %v11155_v32 }
 0x486   :  { %15321 = vst [vmem:[#allocation46_spill] sm:$0xff] %v11161_v23 }
 0x487   :  { %7981 = vmatmul.msk.f32.gmra.mxu2 %vm187_vm0, %v10834_v51 }
 0x48a   :  { %v11163_v19 = vpop.permute.xlu0 %5118 }
 0x48b   :  { %15322 = vst [vmem:[#allocation47_spill] sm:$0xff] %v11163_v19 }
 0x48c   :  { %v11159_v28 = vpop.permute.xlu1 %5092  ;;  %v11167_v15 = vpop.permute.xlu2 %5102 }
 0x48d   :  { %15320 = vst [vmem:[#allocation45_spill] sm:$0xff] %v11159_v28 }
 0x48e   :  { %15324 = vst [vmem:[#allocation49_spill] sm:$0xff] %v11167_v15 }
 0x492   :  { %v11169_v14 = vpop.permute.xlu0 %5767 }
 0x493   :  { %15325 = vst [vmem:[#allocation50_spill] sm:$0xff] %v11169_v14  ;;  %v8167_v14 = vld [vmem:[%s15220_s15] ss:$0 sm:$0xff]  ;;  %s9038_s15 = smov 126  }
 0x494   :  { %v11165_v36 = vpop.permute.xlu1 %5098  ;;  %v11173_v33 = vpop.permute.xlu2 %5108 }
 0x495   :  { %15323 = vst [vmem:[#allocation48_spill] sm:$0xff] %v11165_v36 }
 0x496   :  { %15327 = vst [vmem:[#allocation52_spill] sm:$0xff] %v11173_v33 }
 0x49a   :  { %v11175_v29 = vpop.permute.xlu0 %5769 }
 0x49b   :  { %15328 = vst [vmem:[#allocation53_spill] sm:$0xff] %v11175_v29 }
 0x49c   :  { %v11171_v40 = vpop.permute.xlu1 %5104  ;;  %v11179_v6 = vpop.permute.xlu2 %5114 }
 0x49d   :  { %15326 = vst [vmem:[#allocation51_spill] sm:$0xff] %v11171_v40 }
 0x49e   :  { %15330 = vst [vmem:[#allocation55_spill] sm:$0xff] %v11179_v6 }
 0x4a2   :  { %v11181_v28 = vpop.permute.xlu0 %5775 }
 0x4a3   :  { %15331 = vst [vmem:[#allocation56_spill] sm:$0xff] %v11181_v28 }
 0x4a4   :  { %v11177_v32 = vpop.permute.xlu1 %5110  ;;  %v11185_v19 = vpop.permute.xlu2 %5120 }
 0x4a5   :  { %15329 = vst [vmem:[#allocation54_spill] sm:$0xff] %v11177_v32 }
 0x4a6   :  { %15333 = vst [vmem:[#allocation58_spill] sm:$0xff] %v11185_v19 }
 0x4aa   :  { %v11187_v36 = vpop.permute.xlu0 %5781 }
 0x4ab   :  { %15334 = vst [vmem:[#allocation59_spill] sm:$0xff] %v11187_v36 }
 0x4ac   :  { %v11183_v23 = vpop.permute.xlu1 %5116  ;;  %v11194_v40 = vpop.xlane.xlu2 %5642 }
 0x4ad   :  { %15332 = vst [vmem:[#allocation57_spill] sm:$0xff] %v11183_v23 }
 0x4ae   :  { %15336 = vst [vmem:[#allocation61_spill] sm:$0xff] %v11194_v40 }
 0x4b2   :  { %v11198_v6 = vpop.permute.xlu0 %5787 }
 0x4b3   :  { %15338 = vst [vmem:[#allocation63_spill] sm:$0xff] %v11198_v6 }
 0x4b4   :  { %v11189_v15 = vpop.permute.xlu1 %5765  ;;  %v11203_v36 = vpop.permute.xlu2 %5763 }
 0x4b5   :  { %15335 = vst [vmem:[#allocation60_spill] sm:$0xff] %v11189_v15 }
 0x4b6   :  { %15339 = vst [vmem:[#allocation64_spill] sm:$0xff] %v11203_v36 }
 0x4ba   :  { %v11208_v40 = vpop.permute.xlu0 %5793 }
 0x4bb   :  { %15341 = vst [vmem:[#allocation66_spill] sm:$0xff] %v11208_v40 }
 0x4bc   :  { %v11205_v15 = vpop.permute.xlu1 %5773  ;;  %v11210_v35 = vpop.permute.xlu2 %5771 }
 0x4bd   :  { %15340 = vst [vmem:[#allocation65_spill] sm:$0xff] %v11205_v15 }
 0x4c4   :  { %v11212_v6 = vpop.permute.xlu1 %5779 }
 0x4c5   :  { %15342 = vst [vmem:[#allocation67_spill] sm:$0xff] %v11212_v6 }
 0x4cf   :  { %v2219_v29 = vpop.f32.mrf.mxu2 }
 0x4d0   :  { %v11196_v32 = vadd.f32 %v8167_v14, %v2219_v29 }
 0x4d2   :  { %15337 = vst [vmem:[#allocation62_spill] sm:$0xff] %v11196_v32  ;;  %v2224_v28 = vand.u32 2147483647, %v11196_v32  ;;  %v2948_v19 = vmul.f32 %v11196_v32, %v11196_v32  ;;  %v2223_v36 = vmax.f32 %v11196_v32, 0.0 }
 0x4d4   :  { %v2225_v23 = vsub.f32 0.0, %v2224_v28  ;;  %2950 = vrot.lane.b32.xlu2 %v2948_v19, %s9037_s22  ;;  %v11214_v28 = vpop.xlane.xlu0 %6315  ;;  %v11219_v19 = vpop.permute.xlu1 %5785  ;;  %s9040_s22 = smov 127  }
 0x4d5   :  { %15343 = vst [vmem:[#allocation68_spill] sm:$0xff] %v11214_v28 }
 0x4d6   :  { %v2226_v33 = vmul.f32 1.442695, %v2225_v23  ;;  %v11217_v23 = vpop.permute.xlu2 %5777  ;;  %15344 = vst [vmem:[#allocation69_spill] sm:$0xff] %v11219_v19 }
 0x4d8   :  { %8168 = vpow2.f32 %v2226_v33 }
 0x4dc   :  { %v11232_v6 = vpop.permute.xlu1 %5791 }
 0x4dd   :  { %15347 = vst [vmem:[#allocation72_spill] sm:$0xff] %v11232_v6 }
 0x4de   :  { %v8169_v14 = vpop.eup %8168 }
 0x4df   :  { %v2228_v29 = vadd.f32 1.0, %v8169_v14  ;;  %v11224_v14 = vpop.permute.xlu0 %6438 }
 0x4e0   :  { %15345 = vst [vmem:[#allocation70_spill] sm:$0xff] %v11224_v14 }
 0x4e1   :  { %8170 = vlog2.f32 %v2228_v29 }
 0x4e7   :  { %v8171_v37 = vpop.eup %8170 }
 0x4e8   :  { %v2230_v3 = vmul.f32 0.6931472, %v8171_v37  ;;  %v11230_v37 = vpop.permute.xlu2 %5783 }
 0x4e9   :  { %15346 = vst [vmem:[#allocation71_spill] sm:$0xff] %v11230_v37 }
 0x4ea   :  { %v2332_v15 = vpop.f32.mrf.mxu2  ;;  %v2231_v33 = vadd.f32 %v2230_v3, %v2223_v36  ;;  %v11236_v36 = vpop.permute.xlu0 %6442 }
 0x4eb   :  { %15348 = vst [vmem:[#allocation73_spill] sm:$0xff] %v11236_v36 }
 0x4ec   :  { %v11222_v40 = vmul.f32 %v10636_v59, %v2231_v33  ;;  %v9039_v59 = vmov 2   ;;  %v11238_v14 = vadd.f32 0.0001, %v2231_v33  ;;  %v11253_v33 = vpop.permute.xlu1 %6440 }
 0x4ed   :  { %8163 = vset.pattern.permute.xlu2 %v9039_v59  ;;  %15352 = vst [vmem:[#allocation77_spill] sm:$0xff] %v11253_v33 }
 0x4ee   :  { %2833 = vrot.lane.b32.xlu1 %v11222_v40, %s9038_s15  ;;  %v6204_v29 = vrot.slane %v11222_v40, 5  ;;  %v4858_v3 = vrot.slane %v11222_v40, 3  ;;  %15349 = vst [vmem:[#allocation74_spill] sm:$0xff] %v11238_v14  ;;  %v6877_v19 = vrot.slane %v11222_v40, 6  ;;  %v11248_v6 = vperm.slane %v11238_v14, 0 }
 0x4f0   :  { %6205 = vrot.lane.b32.xlu0 %v6204_v29, %s9038_s15  ;;  %v11245_v29 = vsel %vm2335_vm8, %v2332_v15, -1e+30  ;;  %v11251_v59 = vpop.permute.xlu2 %5789 }
 0x4f1   :  { %15350 = vst [vmem:[#allocation75_spill] sm:$0xff] %v11245_v29  ;;  %v2338_v36 = vsel %vm2337_vm2, %v11245_v29, -inf }
 0x4f2   :  { %v2979_v28 = vpop.f32.mrf.mxu2  ;;  %15351 = vst [vmem:[#allocation76_spill] sm:$0xff] %v11251_v59  ;;  %v11260_v41 = vpop.permute.xlu0 %6446  ;;  %v2433_v59 = vmul.f32 %v10657_v1, %v11248_v6 }
 0x4f3   :  { %15353 = vst [vmem:[#allocation78_spill] sm:$0xff] %v11260_v41 }
 0x4f4   :  { %v11268_v29 = vpop.permute.xlu1 %6448 }
 0x4f5   :  { %15355 = vst [vmem:[#allocation80_spill] sm:$0xff] %v11268_v29  ;;  %v2980_v29 = vadd.f32 %v2979_v28, %v10643_v8  ;;  %v2439_v28 = vmul.f32 %v10725_v11, %v11248_v6  ;;  %v2442_v11 = vmul.f32 %v10810_v53, %v11248_v6  ;;  %v2445_v53 = vmul.f32 %v10827_v13, %v11248_v6 }
 0x4f6   :  { %4859 = vrot.lane.b32.xlu1 %v4858_v3, %s9038_s15  ;;  %v7550_v3 = vrot.slane %v11222_v40, 7 }
 0x4f8   :  { %6878 = vrot.lane.b32.xlu0 %v6877_v19, %s9038_s15  ;;  %v2431_v19 = vmul.f32 %v10653_v7, %v11248_v6  ;;  %v11266_v33 = vpop.permute.xlu2 %6436 }
 0x4f9   :  { %15354 = vst [vmem:[#allocation79_spill] sm:$0xff] %v11266_v33 }
 0x4fa   :  { %v2982_v32 = vpop.f32.mrf.mxu2 }
 0x4fb   :  { %v2983_v1 = vadd.f32 %v2982_v32, %v10812_v56  ;;  %v2991_v32 = vmax.f32 %v2980_v29, 0.0 }
 0x4fd   :  { %2339 = vmax.xlane.f32.xlu2 %v2338_v36  ;;  %v2434_v36 = vmul.f32 %v10664_v45, %v11248_v6  ;;  %v2992_v45 = vmax.f32 %v2983_v1, 0.0 }
 0x4fe   :  { %7551 = vrot.lane.b32.xlu1 %v7550_v3, %s9038_s15 }
 0x500   :  { %2464 = vrot.lane.b32.xlu0 %v2431_v19, %s9040_s22  ;;  %v11275_v19 = vpop.permute.xlu0 %6452 }
 0x502   :  { %v2985_v15 = vpop.f32.mrf.mxu2 }
 0x503   :  { %v2986_v7 = vadd.f32 %v2985_v15, %v10829_v42  ;;  %v2437_v15 = vmul.f32 %v10857_v61, %v11248_v6 }
 0x505   :  { %v2993_v33 = vmax.f32 %v2986_v7, 0.0  ;;  %v3510_v7 = vrot.slane %v11222_v40, 1 }
 0x506   :  { %2468 = vrot.lane.b32.xlu1 %v2433_v59, %s9040_s22  ;;  %v2436_v59 = vmul.f32 %v10675_v16, %v11248_v6  ;;  %v7999_v16 = vld [vmem:[%s15206_s1 + $0x10] sm:$0xff] }
 0x508   :  { %2470 = vrot.lane.b32.xlu0 %v2434_v36, %s9040_s22  ;;  %v11284_v36 = vpop.permute.xlu2 %6444  ;;  %v11296_v61 = vpop.permute.xlu0 %6458 }
 0x50a   :  { %v2988_v3 = vpop.f32.mrf.mxu2 }
 0x50b   :  { %v2989_v41 = vadd.f32 %v2988_v3, %v10737_v38  ;;  %v11286_v3 = vpop.permute.xlu1 %6454 }
 0x50d   :  { %v2994_v37 = vmax.f32 %v2989_v41, 0.0  ;;  %v2995_v41 = vrot.slane %v11042_v48, 1 }
 0x50e   :  { %2474 = vrot.lane.b32.xlu1 %v2436_v59, %s9040_s22  ;;  %v15356_v59 = vmov 0  }
 0x50f   :  { %3010 = vmatpush.msra.mxu3 %v2994_v37  ;;  %v2440_v37 = vmul.f32 %v10789_v5, %v11248_v6  ;;  %v2443_v5 = vmul.f32 %v10867_v44, %v11248_v6  ;;  %v11332_v44 = vperm.slane %v11238_v14, 1 }
 0x510   :  { %2476 = vrot.lane.b32.xlu0 %v2437_v15, %s9040_s22  ;;  %v11303_v29 = vpop.permute.xlu2 %6450  ;;  %v11314_v1 = vpop.permute.xlu0 %6464 }
 0x511   :  { %3011 = vmatpush.msra.mxu3 %v2993_v33 }
 0x513   :  { %3012 = vmatpush.msra.mxu3 %v2992_v45  ;;  %v11305_v33 = vpop.permute.xlu1 %6460  ;;  %v4185_v45 = vrot.slane %v11222_v40, 2 }
 0x515   :  { %3013 = vmatpush.msra.mxu3 %v2991_v32  ;;  %2932 = vperm.xlu2 %8163, %v11222_v40   ;;  %v2446_v32 = vmul.f32 %v10878_v57, %v11248_v6  ;;  %v3117_v57 = vmul.f32 %v10822_v27, %v11332_v44  ;;  %v3120_v27 = vmul.f32 %v10841_v47, %v11332_v44 }
 0x516   :  { %7982 = vmatmul.msk.f32.vlgmr.msra.gmra.mxu3 %vm1109_vm1, %v2995_v41  ;;  %2480 = vrot.lane.b32.xlu1 %v2439_v28, %s9040_s22  ;;  %v5531_v41 = vrot.slane %v11222_v40, 4  ;;  %v3123_v47 = vmul.f32 %v10865_v21, %v11332_v44  ;;  %v3126_v21 = vmul.f32 %v10876_v43, %v11332_v44  ;;  %v3129_v43 = vmul.f32 %v10886_v60, %v11332_v44 }
 0x517   :  { %3652 = vmatpush.msrb.mxu3 %v7999_v16  ;;  %v3132_v60 = vmul.f32 %v10892_v46, %v11332_v44 }
 0x518   :  { %2482 = vrot.lane.b32.xlu0 %v2440_v37, %s9040_s22  ;;  %v11336_v13 = vpop.permute.xlu0 %7109 }
 0x51b   :  { %v11327_v15 = vpop.permute.xlu1 %6466 }
 0x51d   :  { %3511 = vrot.lane.b32.xlu2 %v3510_v7, %s9038_s15 }
 0x51e   :  { %8000 = vmatmul.msk.f32.vlgmr.msrb.gmra.mxu3 %vm187_vm0, %v10782_v20  ;;  %2486 = vrot.lane.b32.xlu1 %v2442_v11, %s9040_s22  ;;  %v11325_v20 = vpop.permute.xlu2 %6456 }
 0x51f   :  { %8164 = vset.pattern.permute.xlu2 %v15356_v59 }
 0x520   :  { %2488 = vrot.lane.b32.xlu0 %v2443_v5, %s9040_s22  ;;  %v11353_v37 = vpop.permute.xlu0 %7115  ;;  %v2435_v5 = vmul.f32 %v10762_v10, %v11248_v6  ;;  %v2438_v10 = vmul.f32 %v10695_v62, %v11248_v6 }
 0x523   :  { %v11348_v28 = vpop.permute.xlu1 %7111 }
 0x525   :  { %4186 = vrot.lane.b32.xlu2 %v4185_v45, %s9038_s15 }
 0x526   :  { %8001 = vmatmul.msk.f32.gmra.mxu3 %vm187_vm0, %v10802_v31  ;;  %2492 = vrot.lane.b32.xlu1 %v2445_v53, %s9040_s22  ;;  %v3118_v31 = vmul.f32 %v10888_v26, %v11332_v44  ;;  %v11346_v16 = vpop.permute.xlu2 %6462  ;;  %v3121_v26 = vmul.f32 %v10860_v58, %v11332_v44  ;;  %v3124_v58 = vmul.f32 %v10870_v4, %v11332_v44 }
 0x527   :  { %v3127_v4 = vmul.f32 %v10883_v9, %v11332_v44  ;;  %v2441_v9 = vmul.f32 %v10749_v50, %v11248_v6 }
 0x528   :  { %2494 = vrot.lane.b32.xlu0 %v2446_v32, %s9040_s22  ;;  %v3130_v32 = vmul.f32 %v10890_v18, %v11332_v44  ;;  %v2444_v18 = vmul.f32 %v10775_v22, %v11248_v6  ;;  %v3119_v22 = vmul.f32 %v10852_v49, %v11332_v44  ;;  %v3122_v49 = vmul.f32 %v10894_v30, %v11332_v44 }
 0x52b   :  { %v11367_v7 = vpop.permute.xlu1 %7117 }
 0x52d   :  { %5532 = vrot.lane.b32.xlu2 %v5531_v41, %s9038_s15  ;;  %v11407_v41 = vperm.slane %v11238_v14, 2 }
 0x52e   :  { %8002 = vmatmul.msk.f32.gmra.mxu3 %vm187_vm0, %v10817_v55  ;;  %3152 = vrot.lane.b32.xlu1 %v3118_v31, %s9040_s22  ;;  %v15357_v55 = vld [vmem:[#allocation7_spill] sm:$0xff]  ;;  %v11365_v11 = vpop.permute.xlu2 %7113 }
 0x52f   :  { %v2432_v40 = vmul.f32 %v15357_v55, %v11248_v6  ;;  %v3793_v50 = vmul.f32 %v10896_v52, %v11407_v41  ;;  %v3796_v52 = vmul.f32 %v10925_v54, %v11407_v41  ;;  %v3799_v54 = vmul.f32 %v10944_v12, %v11407_v41 }
 0x530   :  { %3150 = vrot.lane.b32.xlu0 %v3117_v57, %s9040_s22  ;;  %v3125_v12 = vmul.f32 %v10912_v39, %v11332_v44  ;;  %v3128_v39 = vmul.f32 %v10930_v17, %v11332_v44 }
 0x533   :  { %v11383_v53 = vpop.permute.xlu1 %7123 }
 0x535   :  { %2466 = vrot.lane.b32.xlu2 %v2432_v40, %s9040_s22 }
 0x536   :  { %8003 = vmatmul.msk.f32.gmra.mxu3 %vm187_vm0, %v10834_v51  ;;  %3158 = vrot.lane.b32.xlu1 %v3121_v26, %s9040_s22  ;;  %v11374_v51 = vpop.permute.xlu0 %7121  ;;  %v11381_v59 = vpop.permute.xlu2 %7119 }
 0x538   :  { %3156 = vrot.lane.b32.xlu0 %v3120_v27, %s9040_s22  ;;  %v3792_v27 = vmul.f32 %v10928_v24, %v11407_v41  ;;  %v3795_v24 = vmul.f32 %v10946_v63, %v11407_v41 }
 0x53b   :  { %v11402_v62 = vpop.permute.xlu1 %7129 }
 0x53d   :  { %2472 = vrot.lane.b32.xlu2 %v2435_v5, %s9040_s22 }
 0x53e   :  { %3164 = vrot.lane.b32.xlu1 %v3124_v58, %s9040_s22  ;;  %v11391_v45 = vpop.permute.xlu0 %7127  ;;  %v11400_v31 = vpop.permute.xlu2 %7125 }
 0x540   :  { %3162 = vrot.lane.b32.xlu0 %v3123_v47, %s9040_s22 }
 0x543   :  { %v11422_v55 = vpop.permute.xlu1 %7135 }
 0x545   :  { %2478 = vrot.lane.b32.xlu2 %v2438_v10, %s9040_s22  ;;  %v3802_v10 = vmul.f32 %v10968_v34, %v11407_v41  ;;  %v3805_v34 = vmul.f32 %v10992_v25, %v11407_v41 }
 0x546   :  { %3170 = vrot.lane.b32.xlu1 %v3127_v4, %s9040_s22  ;;  %v11411_v57 = vpop.permute.xlu0 %7133  ;;  %v11420_v26 = vpop.permute.xlu2 %7131 }
 0x548   :  { %3168 = vrot.lane.b32.xlu0 %v3126_v21, %s9040_s22  ;;  %v3798_v21 = vmul.f32 %v10985_v0, %v11407_v41 }
 0x54d   :  { %2484 = vrot.lane.b32.xlu2 %v2441_v9, %s9040_s22  ;;  %v11471_v9 = vperm.slane %v11238_v14, 3 }
 0x54e   :  { %3176 = vrot.lane.b32.xlu1 %v3130_v32, %s9040_s22  ;;  %v11427_v40 = vpop.permute.xlu0 %7139  ;;  %v11437_v46 = vpop.permute.xlu2 %7137 }
 0x54f   :  { %15358 = vst [vmem:[#allocation7_spill] sm:$0xff] %v11427_v40  ;;  %v4467_v17 = vmul.f32 %v11100_v2, %v11471_v9  ;;  %v15365_v2 = vld [vmem:[#allocation24_spill] sm:$0xff] }
 0x550   :  { %3174 = vrot.lane.b32.xlu0 %v3129_v43, %s9040_s22  ;;  %15359 = vst [vmem:[#allocation81_spill] sm:$0xff] %v11437_v46  ;;  %v15361_v43 = vld [vmem:[#allocation15_spill] sm:$0xff] }
 0x555   :  { %2490 = vrot.lane.b32.xlu2 %v2444_v18, %s9040_s22 }
 0x556   :  { %3827 = vrot.lane.b32.xlu1 %v3793_v50, %s9040_s22  ;;  %v11448_v47 = vpop.permute.xlu2 %2950  ;;  %v3801_v50 = vmul.f32 %v15361_v43, %v11407_v41 }
 0x557   :  { %15360 = vst [vmem:[#allocation82_spill] sm:$0xff] %v11448_v47 }
 0x558   :  { %3180 = vrot.lane.b32.xlu0 %v3132_v60, %s9040_s22  ;;  %v15363_v60 = vld [vmem:[#allocation13_spill] sm:$0xff] }
 0x55d   :  { %3154 = vrot.lane.b32.xlu2 %v3119_v22, %s9040_s22 }
 0x55e   :  { %3833 = vrot.lane.b32.xlu1 %v3796_v52, %s9040_s22  ;;  %v3131_v52 = vmul.f32 %v15363_v60, %v11332_v44  ;;  %v15366_v44 = vld [vmem:[#allocation14_spill] sm:$0xff]  ;;  %v15369_v60 = vld [vmem:[#allocation16_spill] sm:$0xff] }
 0x560   :  { %v2834_v6 = vpop.permute.xlu1 %2833  ;;  %3825 = vrot.lane.b32.xlu0 %v3792_v27, %s9040_s22 }
 0x561   :  { %8136 = vpush %v2834_v6  ;;  %v15364_v6 = vld [vmem:[#allocation18_spill] sm:$0xff] }
 0x562   :  { %v6206_v58 = vpop.permute.xlu0 %6205  ;;  %v3804_v27 = vmul.f32 %v15364_v6, %v11407_v41  ;;  %v15370_v6 = vld [vmem:[#allocation17_spill] sm:$0xff] }
 0x565   :  { %3160 = vrot.lane.b32.xlu2 %v3122_v49, %s9040_s22 }
 0x566   :  { %3839 = vrot.lane.b32.xlu1 %v3799_v54, %s9040_s22 }
 0x568   :  { %v4860_v5 = vpop.permute.xlu1 %4859  ;;  %3831 = vrot.lane.b32.xlu0 %v3795_v24, %s9040_s22  ;;  %v4470_v24 = vmul.f32 %v15365_v2, %v11471_v9 }
 0x56a   :  { %v6879_v4 = vpop.permute.xlu0 %6878 }
 0x56d   :  { %3166 = vrot.lane.b32.xlu2 %v3125_v12, %s9040_s22  ;;  %v15367_v12 = vld [vmem:[#allocation22_spill] sm:$0xff] }
 0x56e   :  { %3845 = vrot.lane.b32.xlu1 %v3802_v10, %s9040_s22  ;;  %v3794_v10 = vmul.f32 %v15366_v44, %v11407_v41 }
 0x570   :  { %v7552_v30 = vpop.permute.xlu1 %7551  ;;  %v11459_v63 = vpop.xlane.xlu2 %2339  ;;  %3837 = vrot.lane.b32.xlu0 %v3798_v21, %s9040_s22  ;;  %v3807_v21 = vmul.f32 %v15367_v12, %v11407_v41 }
 0x572   :  { %v11462_v32 = vpop.permute.xlu0 %2464 }
 0x575   :  { %3172 = vrot.lane.b32.xlu2 %v3128_v39, %s9040_s22 }
 0x576   :  { %3851 = vrot.lane.b32.xlu1 %v3805_v34, %s9040_s22 }
 0x578   :  { %v11473_v0 = vpop.permute.xlu1 %2468  ;;  %v11477_v18 = vpop.permute.xlu2 %2932  ;;  %3843 = vrot.lane.b32.xlu0 %v3801_v50, %s9040_s22  ;;  %v15368_v50 = vld [vmem:[#allocation27_spill] sm:$0xff] }
 0x579   :  { %15362 = vst [vmem:[#allocation15_spill] sm:$0xff] %v11477_v18 }
 0x57a   :  { %v11480_v25 = vpop.permute.xlu0 %2470 }
 0x57d   :  { %3178 = vrot.lane.b32.xlu2 %v3131_v52, %s9040_s22  ;;  %v3797_v52 = vmul.f32 %v15369_v60, %v11407_v41 }
 0x57e   :  { %4502 = vrot.lane.b32.xlu1 %v4467_v17, %s9040_s22  ;;  %v4473_v17 = vmul.f32 %v15368_v50, %v11471_v9 }
 0x580   :  { %v11488_v22 = vpop.permute.xlu1 %2474  ;;  %v3512_v54 = vpop.permute.xlu2 %3511  ;;  %3849 = vrot.lane.b32.xlu0 %v3804_v27, %s9040_s22  ;;  %v4466_v27 = vmul.f32 %v15370_v6, %v11471_v9 }
 0x581   :  { %8138 = vpush %v3512_v54 }
 0x582   :  { %v11493_v49 = vpop.permute.xlu0 %2476 }
 0x585   :  { %3829 = vrot.lane.b32.xlu2 %v3794_v10, %s9040_s22  ;;  %v15372_v10 = vld [vmem:[#allocation19_spill] sm:$0xff] }
 0x586   :  { %4508 = vrot.lane.b32.xlu1 %v4470_v24, %s9040_s22  ;;  %v15371_v24 = vld [vmem:[#allocation29_spill] sm:$0xff]  ;;  %v3800_v12 = vmul.f32 %v15372_v10, %v11407_v41 }
 0x587   :  { %v4476_v44 = vmul.f32 %v15371_v24, %v11471_v9 }
 0x588   :  { %v4187_v34 = vpop.permute.xlu2 %4186  ;;  %v11503_v39 = vpop.permute.xlu1 %2480  ;;  %3855 = vrot.lane.b32.xlu0 %v3807_v21, %s9040_s22  ;;  %v15373_v21 = vld [vmem:[#allocation30_spill] sm:$0xff] }
 0x589   :  { %8140 = vpush %v4187_v34  ;;  %v4469_v34 = vmul.f32 %v15373_v21, %v11471_v9  ;;  %v15380_v21 = vld [vmem:[#allocation42_spill] sm:$0xff] }
 0x58a   :  { %8142 = vpush %v4860_v5  ;;  %v11506_v43 = vpop.permute.xlu0 %2482 }
 0x58d   :  { %3835 = vrot.lane.b32.xlu2 %v3797_v52, %s9040_s22 }
 0x58e   :  { %4514 = vrot.lane.b32.xlu1 %v4473_v17, %s9040_s22 }
 0x590   :  { %v5533_v54 = vpop.permute.xlu2 %5532  ;;  %4500 = vrot.lane.b32.xlu0 %v4466_v27, %s9040_s22  ;;  %v11517_v5 = vpop.permute.xlu1 %2486  ;;  %v11545_v27 = vperm.slane %v11238_v14, 4 }
 0x591   :  { %8144 = vpush %v5533_v54  ;;  %v15377_v54 = vld [vmem:[#allocation33_spill] sm:$0xff] }
 0x592   :  { %8146 = vpush %v6206_v58  ;;  %v11519_v2 = vpop.permute.xlu0 %2488  ;;  %v4472_v24 = vmul.f32 %v15377_v54, %v11471_v9  ;;  %s8137_s20 = spop %8136 }
 0x593   :  { %8148 = vpush %v6879_v4  ;;  %v15375_v4 = vld [vmem:[#allocation32_spill] sm:$0xff] }
 0x594   :  { %8150 = vpush %v7552_v30  ;;  %v4479_v60 = vmul.f32 %v15375_v4, %v11471_v9  ;;  %v15376_v30 = vld [vmem:[#allocation23_spill] sm:$0xff]  ;;  %v15381_v4 = vld [vmem:[#allocation26_spill] sm:$0xff] }
 0x595   :  { %3841 = vrot.lane.b32.xlu2 %v3800_v12, %s9040_s22  ;;  %v3803_v52 = vmul.f32 %v15376_v30, %v11407_v41 }
 0x596   :  { %4520 = vrot.lane.b32.xlu1 %v4476_v44, %s9040_s22 }
 0x598   :  { %v11531_v58 = vpop.permute.xlu2 %2466  ;;  %4506 = vrot.lane.b32.xlu0 %v4469_v34, %s9040_s22  ;;  %v11540_v6 = vpop.permute.xlu1 %2492  ;;  %v5138_v34 = vmul.f32 %v15380_v21, %v11545_v27  ;;  %v15385_v21 = vld [vmem:[#allocation46_spill] sm:$0xff] }
 0x599   :  { %v11529_v50 = vpop.f32.mrf.mxu3  ;;  %v5141_v46 = vmul.f32 %v15385_v21, %v11545_v27  ;;  %v15391_v21 = vld [vmem:[#allocation49_spill] sm:$0xff] }
 0x59a   :  { %15374 = vst [vmem:[#allocation13_spill] sm:$0xff] %v11529_v50  ;;  %v11534_v17 = vpop.permute.xlu0 %2494 }
 0x59d   :  { %3847 = vrot.lane.b32.xlu2 %v3803_v52, %s9040_s22  ;;  %v15382_v52 = vld [vmem:[#allocation36_spill] sm:$0xff] }
 0x59e   :  { %4526 = vrot.lane.b32.xlu1 %v4479_v60, %s9040_s22  ;;  %v3806_v60 = vmul.f32 %v15381_v4, %v11407_v41  ;;  %v4475_v54 = vmul.f32 %v15382_v52, %v11471_v9  ;;  %v15386_v41 = vld [vmem:[#allocation28_spill] sm:$0xff]  ;;  %v15387_v4 = vld [vmem:[#allocation39_spill] sm:$0xff] }
 0x5a0   :  { %v11549_v10 = vpop.permute.xlu2 %2472  ;;  %4512 = vrot.lane.b32.xlu0 %v4472_v24, %s9040_s22  ;;  %v11560_v30 = vpop.permute.xlu1 %3152 }
 0x5a1   :  { %v3654_v44 = vpop.f32.mrf.mxu3  ;;  %15378 = vst [vmem:[#allocation18_spill] sm:$0xff] %v11549_v10 }
 0x5a2   :  { %v11552_v12 = vpop.permute.xlu0 %3150 }
 0x5a3   :  { %15379 = vst [vmem:[#allocation24_spill] sm:$0xff] %v11552_v12 }
 0x5a5   :  { %3853 = vrot.lane.b32.xlu2 %v3806_v60, %s9040_s22  ;;  %v4478_v60 = vmul.f32 %v15387_v4, %v11471_v9 }
 0x5a6   :  { %5171 = vrot.lane.b32.xlu1 %v5138_v34, %s9040_s22  ;;  %v4465_v34 = vmul.f32 %v15386_v41, %v11471_v9  ;;  %v15392_v41 = vld [vmem:[#allocation20_spill] sm:$0xff] }
 0x5a8   :  { %v11564_v40 = vpop.permute.xlu2 %2478  ;;  %4518 = vrot.lane.b32.xlu0 %v4475_v54, %s9040_s22  ;;  %v11577_v18 = vpop.permute.xlu1 %3158 }
 0x5a9   :  { %v3657_v47 = vpop.f32.mrf.mxu3  ;;  %15383 = vst [vmem:[#allocation14_spill] sm:$0xff] %v11564_v40 }
 0x5aa   :  { %v11567_v24 = vpop.permute.xlu0 %3156  ;;  %15388 = vst [vmem:[#allocation27_spill] sm:$0xff] %v11577_v18 }
 0x5ab   :  { %15384 = vst [vmem:[#allocation22_spill] sm:$0xff] %v11567_v24  ;;  %v5144_v24 = vmul.f32 %v15391_v21, %v11545_v27 }
 0x5ad   :  { %4498 = vrot.lane.b32.xlu2 %v4465_v34, %s9040_s22  ;;  %v15393_v34 = vld [vmem:[#allocation45_spill] sm:$0xff] }
 0x5ae   :  { %5177 = vrot.lane.b32.xlu1 %v5141_v46, %s9040_s22  ;;  %v4468_v46 = vmul.f32 %v15392_v41, %v11471_v9  ;;  %v5139_v4 = vmul.f32 %v15393_v34, %v11545_v27  ;;  %v15395_v34 = vld [vmem:[#allocation31_spill] sm:$0xff] }
 0x5af   :  { %v4471_v10 = vmul.f32 %v15395_v34, %v11471_v9 }
 0x5b0   :  { %v11579_v50 = vpop.permute.xlu2 %2484  ;;  %4524 = vrot.lane.b32.xlu0 %v4478_v60, %s9040_s22  ;;  %v11597_v21 = vpop.permute.xlu1 %3164 }
 0x5b1   :  { %v3660_v52 = vpop.f32.mrf.mxu3  ;;  %15389 = vst [vmem:[#allocation16_spill] sm:$0xff] %v11579_v50 }
 0x5b2   :  { %v11582_v54 = vpop.permute.xlu0 %3162  ;;  %v3661_v60 = vadd.f32 %v3660_v52, %v10829_v42  ;;  %v15396_v52 = vld [vmem:[#allocation48_spill] sm:$0xff] }
 0x5b3   :  { %15390 = vst [vmem:[#allocation17_spill] sm:$0xff] %v11582_v54 }
 0x5b5   :  { %4504 = vrot.lane.b32.xlu2 %v4468_v46, %s9040_s22  ;;  %v3658_v46 = vadd.f32 %v3657_v47, %v10812_v56 }
 0x5b6   :  { %5183 = vrot.lane.b32.xlu1 %v5144_v24, %s9040_s22  ;;  %v15394_v24 = vld [vmem:[#allocation52_spill] sm:$0xff] }
 0x5b7   :  { %v5147_v41 = vmul.f32 %v15394_v24, %v11545_v27  ;;  %v3667_v42 = vmax.f32 %v3658_v46, 0.0 }
 0x5b8   :  { %v11593_v18 = vpop.permute.xlu2 %2490  ;;  %5173 = vrot.lane.b32.xlu0 %v5139_v4, %s9040_s22  ;;  %v3668_v4 = vmax.f32 %v3661_v60, 0.0  ;;  %v11624_v34 = vpop.permute.xlu1 %3170 }
 0x5b9   :  { %v3663_v40 = vpop.f32.mrf.mxu3 }
 0x5ba   :  { %v3664_v50 = vadd.f32 %v3663_v40, %v10737_v38  ;;  %v11599_v54 = vpop.permute.xlu0 %3168  ;;  %v3655_v40 = vadd.f32 %v3654_v44, %v10643_v8  ;;  %v5142_v38 = vmul.f32 %v15396_v52, %v11545_v27  ;;  %v15399_v44 = vld [vmem:[#allocation55_spill] sm:$0xff]  ;;  %v15404_v52 = vld [vmem:[#allocation58_spill] sm:$0xff] }
 0x5bb   :  { %v5150_v60 = vmul.f32 %v15399_v44, %v11545_v27  ;;  %v15405_v44 = vld [vmem:[#allocation37_spill] sm:$0xff] }
 0x5bc   :  { %v3669_v12 = vmax.f32 %v3664_v50, 0.0  ;;  %v3666_v47 = vmax.f32 %v3655_v40, 0.0  ;;  %v8984_v8 = vld [vmem:[%s15217_s12 + $0x8] sm:$0xff] }
 0x5bd   :  { %4510 = vrot.lane.b32.xlu2 %v4471_v10, %s9040_s22  ;;  %v8021_v10 = vld [vmem:[%s15206_s1 + $0x18] sm:$0xff] }
 0x5be   :  { %5189 = vrot.lane.b32.xlu1 %v5147_v41, %s9040_s22  ;;  %3685 = vmatpush.msra.mxu2 %v3669_v12  ;;  %v3670_v41 = vrot.slane %v11042_v48, 2  ;;  %v15400_v12 = vld [vmem:[#allocation34_spill] sm:$0xff] }
 0x5bf   :  { %v4474_v46 = vmul.f32 %v15400_v12, %v11471_v9 }
 0x5c0   :  { %3686 = vmatpush.msra.mxu2 %v3668_v4  ;;  %v11611_v24 = vpop.permute.xlu2 %3154  ;;  %5179 = vrot.lane.b32.xlu0 %v5142_v38, %s9040_s22  ;;  %v15401_v38 = vld [vmem:[#allocation51_spill] sm:$0xff]  ;;  %v11649_v12 = vpop.permute.xlu1 %3176 }
 0x5c1   :  { %15397 = vst [vmem:[#allocation29_spill] sm:$0xff] %v11611_v24 }
 0x5c2   :  { %3687 = vmatpush.msra.mxu2 %v3667_v42  ;;  %v11614_v50 = vpop.permute.xlu0 %3174  ;;  %v5145_v42 = vmul.f32 %v15401_v38, %v11545_v27  ;;  %15406 = vst [vmem:[#allocation23_spill] sm:$0xff] %v11649_v12 }
 0x5c3   :  { %15398 = vst [vmem:[#allocation19_spill] sm:$0xff] %v11614_v50 }
 0x5c4   :  { %3688 = vmatpush.msra.mxu2 %v3666_v47  ;;  %v5153_v47 = vmul.f32 %v15404_v52, %v11545_v27 }
 0x5c5   :  { %8004 = vmatmul.msk.f32.vlgmr.msra.gmra.mxu2 %vm1109_vm1, %v3670_v41  ;;  %4516 = vrot.lane.b32.xlu2 %v4474_v46, %s9040_s22  ;;  %v4477_v41 = vmul.f32 %v15405_v44, %v11471_v9  ;;  %v15407_v46 = vld [vmem:[#allocation54_spill] sm:$0xff]  ;;  %v15410_v44 = vld [vmem:[#allocation60_spill] sm:$0xff] }
 0x5c6   :  { %5195 = vrot.lane.b32.xlu1 %v5150_v60, %s9040_s22  ;;  %4325 = vmatpush.msrb.mxu2 %v8021_v10  ;;  %v8983_v60 = vld [vmem:[%s15217_s12] sm:$0xff]  ;;  %v11647_v10 = vperm.slane %v11238_v14, 5  ;;  %v5148_v38 = vmul.f32 %v15407_v46, %v11545_v27 }
 0x5c7   :  { %v15412_v46 = vld [vmem:[#allocation57_spill] sm:$0xff] }
 0x5c8   :  { %v11631_v40 = vpop.permute.xlu2 %3160  ;;  %5185 = vrot.lane.b32.xlu0 %v5145_v42, %s9040_s22  ;;  %v11670_v56 = vpop.permute.xlu1 %3827 }
 0x5c9   :  { %15402 = vst [vmem:[#allocation30_spill] sm:$0xff] %v11631_v40 }
 0x5ca   :  { %v11634_v4 = vpop.permute.xlu0 %3180  ;;  %15413 = vst [vmem:[#allocation26_spill] sm:$0xff] %v11670_v56 }
 0x5cb   :  { %15403 = vst [vmem:[#allocation32_spill] sm:$0xff] %v11634_v4  ;;  %v15433_v4 = vld [vmem:[#allocation76_spill] sm:$0xff] }
 0x5cd   :  { %8022 = vmatmul.msk.f32.vlgmr.msrb.gmra.mxu2 %vm187_vm0, %v8983_v60  ;;  %4522 = vrot.lane.b32.xlu2 %v4477_v41, %s9040_s22  ;;  %v5812_v60 = vmul.f32 %v15410_v44, %v11647_v10  ;;  %v5815_v44 = vmul.f32 %v11210_v35, %v11647_v10 }
 0x5ce   :  { %5201 = vrot.lane.b32.xlu1 %v5153_v47, %s9040_s22  ;;  %v15411_v47 = vld [vmem:[#allocation40_spill] sm:$0xff] }
 0x5cf   :  { %v4480_v41 = vmul.f32 %v15411_v47, %v11471_v9 }
 0x5d0   :  { %v11653_v42 = vpop.permute.xlu2 %3166  ;;  %5191 = vrot.lane.b32.xlu0 %v5148_v38, %s9040_s22  ;;  %v5151_v38 = vmul.f32 %v15412_v46, %v11545_v27  ;;  %v11692_v35 = vpop.permute.xlu1 %3833 }
 0x5d1   :  { %15408 = vst [vmem:[#allocation33_spill] sm:$0xff] %v11653_v42 }
 0x5d2   :  { %v11656_v52 = vpop.permute.xlu0 %3825  ;;  %15419 = vst [vmem:[#allocation39_spill] sm:$0xff] %v11692_v35 }
 0x5d3   :  { %15409 = vst [vmem:[#allocation42_spill] sm:$0xff] %v11656_v52 }
 0x5d5   :  { %8023 = vmatmul.msk.f32.gmra.mxu2 %vm187_vm0, %v8984_v8  ;;  %4528 = vrot.lane.b32.xlu2 %v4480_v41, %s9040_s22  ;;  %v15416_v8 = vld [vmem:[#allocation35_spill] sm:$0xff]  ;;  %v15417_v41 = vld [vmem:[#allocation50_spill] sm:$0xff] }
 0x5d6   :  { %5846 = vrot.lane.b32.xlu1 %v5812_v60, %s9040_s22  ;;  %v5140_v47 = vmul.f32 %v15416_v8, %v11545_v27  ;;  %v8985_v60 = vld [vmem:[%s15217_s12 + $0x10] sm:$0xff]  ;;  %v5813_v46 = vmul.f32 %v15417_v41, %v11647_v10 }
 0x5d8   :  { %v11672_v52 = vpop.permute.xlu2 %3172  ;;  %5197 = vrot.lane.b32.xlu0 %v5151_v38, %s9040_s22  ;;  %v11728_v35 = vpop.permute.xlu1 %3839 }
 0x5d9   :  { %15414 = vst [vmem:[#allocation36_spill] sm:$0xff] %v11672_v52 }
 0x5da   :  { %v11675_v9 = vpop.permute.xlu0 %3831  ;;  %15428 = vst [vmem:[#allocation52_spill] sm:$0xff] %v11728_v35 }
 0x5db   :  { %15415 = vst [vmem:[#allocation46_spill] sm:$0xff] %v11675_v9  ;;  %v5818_v9 = vmul.f32 %v11217_v23, %v11647_v10 }
 0x5dd   :  { %8024 = vmatmul.msk.f32.gmra.mxu2 %vm187_vm0, %v8985_v60  ;;  %5175 = vrot.lane.b32.xlu2 %v5140_v47, %s9040_s22  ;;  %v15421_v60 = vld [vmem:[#allocation38_spill] sm:$0xff]  ;;  %v15422_v47 = vld [vmem:[#allocation65_spill] sm:$0xff] }
 0x5de   :  { %5852 = vrot.lane.b32.xlu1 %v5815_v44, %s9040_s22  ;;  %v5143_v52 = vmul.f32 %v15421_v60, %v11545_v27  ;;  %v8986_v44 = vld [vmem:[%s15217_s12 + $0x18] sm:$0xff]  ;;  %v5816_v41 = vmul.f32 %v15422_v47, %v11647_v10 }
 0x5e0   :  { %v11689_v38 = vpop.permute.xlu2 %3178  ;;  %5848 = vrot.lane.b32.xlu0 %v5813_v46, %s9040_s22  ;;  %v15423_v46 = vld [vmem:[#allocation62_spill] sm:$0xff] }
 0x5e1   :  { %15418 = vst [vmem:[#allocation28_spill] sm:$0xff] %v11689_v38 }
 0x5e2   :  { %v11694_v8 = vpop.permute.xlu0 %3837 }
 0x5e3   :  { %15420 = vst [vmem:[#allocation49_spill] sm:$0xff] %v11694_v8  ;;  %v11709_v8 = vperm.slane %v15423_v46, 0 }
 0x5e5   :  { %8025 = vmatmul.msk.f32.gmra.mxu2 %vm187_vm0, %v8986_v44  ;;  %5181 = vrot.lane.b32.xlu2 %v5143_v52, %s9040_s22  ;;  %v11716_v60 = vadd.f32 %v11462_v32, %v11709_v8  ;;  %v15427_v52 = vld [vmem:[#allocation41_spill] sm:$0xff]  ;;  %v11726_v47 = vadd.f32 %v11473_v0, %v11709_v8  ;;  %v15429_v32 = vld [vmem:[#allocation67_spill] sm:$0xff]  ;;  %v11741_v0 = vadd.f32 %v11480_v25, %v11709_v8  ;;  %v15437_v25 = vld [vmem:[#allocation44_spill] sm:$0xff] }
 0x5e6   :  { %5858 = vrot.lane.b32.xlu1 %v5818_v9, %s9040_s22  ;;  %v15426_v9 = vld [vmem:[#allocation71_spill] sm:$0xff]  ;;  %v5146_v42 = vmul.f32 %v15427_v52, %v11545_v27  ;;  %v5149_v56 = vmul.f32 %v15437_v25, %v11545_v27  ;;  %v11777_v25 = vadd.f32 %v11493_v49, %v11709_v8  ;;  %v11795_v49 = vperm.slane %v15423_v46, 3 }
 0x5e7   :  { %v5821_v44 = vmul.f32 %v15426_v9, %v11647_v10  ;;  %v2546_v9 = vand.u32 2147483647, %v11726_v47 }
 0x5e8   :  { %v11711_v23 = vpop.permute.xlu2 %3829  ;;  %5854 = vrot.lane.b32.xlu0 %v5816_v41, %s9040_s22  ;;  %v2544_v41 = vand.u32 2147483647, %v11716_v60  ;;  %15443 = vst [vmem:[#allocation57_spill] sm:$0xff] %v11795_v49 }
 0x5e9   :  { %15424 = vst [vmem:[#allocation20_spill] sm:$0xff] %v11711_v23  ;;  %v2562_v12 = vsub.f32 0.0, %v2546_v9  ;;  %v11781_v9 = vperm.slane %v15423_v46, 1 }
 0x5ea   :  { %v11718_v38 = vpop.permute.xlu0 %3843  ;;  %v2560_v52 = vsub.f32 0.0, %v2544_v41 }
 0x5eb   :  { %15425 = vst [vmem:[#allocation45_spill] sm:$0xff] %v11718_v38  ;;  %v5819_v38 = vmul.f32 %v15429_v32, %v11647_v10 }
 0x5ed   :  { %5187 = vrot.lane.b32.xlu2 %v5146_v42, %s9040_s22 }
 0x5ee   :  { %5864 = vrot.lane.b32.xlu1 %v5821_v44, %s9040_s22  ;;  %v8987_v44 = vld [vmem:[%s15209_s4] sm:$0xff] }
 0x5ef   :  { %v11746_v35 = vperm.slane %v8987_v44, 0  ;;  %v11748_v42 = vperm.slane %v8987_v44, 1  ;;  %v11754_v40 = vperm.slane %v8987_v44, 2  ;;  %v11758_v41 = vperm.slane %v8987_v44, 4 }
 0x5f0   :  { %v11736_v23 = vpop.permute.xlu2 %3835  ;;  %5860 = vrot.lane.b32.xlu0 %v5819_v38, %s9040_s22  ;;  %v11756_v38 = vperm.slane %v8987_v44, 3  ;;  %v11762_v50 = vperm.slane %v8987_v44, 5  ;;  %v11764_v24 = vperm.slane %v8987_v44, 6  ;;  %v11786_v44 = vpop.permute.xlu1 %3845 }
 0x5f1   :  { %15430 = vst [vmem:[#allocation31_spill] sm:$0xff] %v11736_v23  ;;  %v5824_v23 = vmul.f32 %v15433_v4, %v11647_v10  ;;  %v11772_v4 = vperm.slane %v11238_v14, 7 }
 0x5f2   :  { %15431 = vst [vmem:[#allocation48_spill] sm:$0xff] %v11748_v42  ;;  %v11750_v32 = vpop.permute.xlu0 %3849  ;;  %v11768_v42 = vadd.f32 %v11488_v22, %v11709_v8  ;;  %v11784_v22 = vperm.slane %v11238_v14, 6  ;;  %v11804_v14 = vperm.slane %v15423_v46, 6 }
 0x5f3   :  { %15432 = vst [vmem:[#allocation55_spill] sm:$0xff] %v11750_v32  ;;  %v2580_v32 = vmul.f32 1.442695, %v2562_v12  ;;  %v11821_v12 = vmul.f32 %v11381_v59, %v11772_v4  ;;  %v15452_v59 = vld [vmem:[#allocation75_spill] sm:$0xff] }
 0x5f4   :  { %15434 = vst [vmem:[#allocation34_spill] sm:$0xff] %v11754_v40  ;;  %v11801_v40 = vperm.slane %v15423_v46, 5 }
 0x5f5   :  { %15435 = vst [vmem:[#allocation51_spill] sm:$0xff] %v11756_v38  ;;  %v2576_v38 = vmul.f32 1.442695, %v2560_v52  ;;  %5193 = vrot.lane.b32.xlu2 %v5149_v56, %s9040_s22  ;;  %v11798_v56 = vperm.slane %v15423_v46, 4  ;;  %v11809_v52 = vadd.f32 %v11503_v39, %v11709_v8  ;;  %v11825_v39 = vmul.f32 %v11374_v51, %v11772_v4 }
 0x5f6   :  { %15436 = vst [vmem:[#allocation58_spill] sm:$0xff] %v11758_v41  ;;  %5870 = vrot.lane.b32.xlu1 %v5824_v23, %s9040_s22  ;;  %v2547_v41 = vand.u32 2147483647, %v11741_v0  ;;  %v15442_v23 = vld [vmem:[#allocation69_spill] sm:$0xff]  ;;  %v11843_v51 = vadd.f32 %v11506_v43, %v11709_v8 }
 0x5f7   :  { %15438 = vst [vmem:[#allocation37_spill] sm:$0xff] %v11762_v50  ;;  %v11792_v50 = vperm.slane %v15423_v46, 2  ;;  %8172 = vpow2.f32 %v2576_v38  ;;  %v2550_v46 = vand.u32 2147483647, %v11777_v25 }
 0x5f8   :  { %15439 = vst [vmem:[#allocation54_spill] sm:$0xff] %v11764_v24  ;;  %v5822_v24 = vmul.f32 %v15442_v23, %v11647_v10  ;;  %v2549_v23 = vand.u32 2147483647, %v11768_v42  ;;  %8174 = vpow2.f32 %v2580_v32  ;;  %v11868_v32 = vmul.f32 %v11422_v55, %v11772_v4 }
 0x5f9   :  { %15440 = vst [vmem:[#allocation60_spill] sm:$0xff] %v11772_v4 }
 0x5fa   :  { %15441 = vst [vmem:[#allocation40_spill] sm:$0xff] %v11786_v44  ;;  %v11811_v44 = vpop.permute.xlu2 %3841  ;;  %5866 = vrot.lane.b32.xlu0 %v5822_v24, %s9040_s22  ;;  %v11831_v24 = vpop.permute.xlu0 %3855 }
 0x5fb   :  { %15444 = vst [vmem:[#allocation35_spill] sm:$0xff] %v11798_v56  ;;  %v11816_v56 = vmul.f32 %v11367_v7, %v11772_v4  ;;  %v15451_v7 = vld [vmem:[#allocation77_spill] sm:$0xff] }
 0x5fc   :  { %15445 = vst [vmem:[#allocation50_spill] sm:$0xff] %v11801_v40  ;;  %v2563_v40 = vsub.f32 0.0, %v2547_v41  ;;  %v6486_v38 = vmul.f32 %v15451_v7, %v11784_v22  ;;  %v11837_v41 = vmul.f32 %v11400_v31, %v11772_v4  ;;  %v2565_v7 = vsub.f32 0.0, %v2549_v23  ;;  %v15460_v23 = vld [vmem:[#allocation64_spill] sm:$0xff] }
 0x5fd   :  { %15446 = vst [vmem:[#allocation38_spill] sm:$0xff] %v11804_v14  ;;  %v11829_v14 = vmul.f32 %v11383_v53, %v11772_v4  ;;  %v11855_v31 = vmul.f32 %v11402_v62, %v11772_v4 }
 0x5fe   :  { %15447 = vst [vmem:[#allocation65_spill] sm:$0xff] %v11811_v44  ;;  %v15453_v44 = vld [vmem:[#allocation47_spill] sm:$0xff]  ;;  %6521 = vrot.lane.b32.xlu1 %v6486_v38, %s9040_s22  ;;  %v2582_v43 = vmul.f32 1.442695, %v2563_v40  ;;  %v5811_v38 = vmul.f32 %v15460_v23, %v11647_v10  ;;  %v2553_v40 = vand.u32 2147483647, %v11843_v51 }
 0x5ff   :  { %15448 = vst [vmem:[#allocation71_spill] sm:$0xff] %v11821_v12  ;;  %v2341_v12 = vsub.f32 %v15452_v59, %v11459_v63  ;;  %v5152_v53 = vmul.f32 %v15453_v44, %v11545_v27  ;;  %v11859_v63 = vmul.f32 %v11420_v26, %v11772_v4  ;;  %v2566_v27 = vsub.f32 0.0, %v2550_v46  ;;  %v15459_v44 = vld [vmem:[#allocation72_spill] sm:$0xff]  ;;  %v8173_v26 = vpop.eup %8172  ;;  %v15465_v23 = vld [vmem:[#allocation53_spill] sm:$0xff] }
 0x600   :  { %15449 = vst [vmem:[#allocation41_spill] sm:$0xff] %v11829_v14  ;;  %v11849_v14 = vmul.f32 %v11391_v45, %v11772_v4  ;;  %v11864_v45 = vmul.f32 %v11411_v57, %v11772_v4  ;;  %v5825_v62 = vmul.f32 %v15459_v44, %v11647_v10  ;;  %v11877_v46 = vadd.f32 %v11517_v5, %v11709_v8  ;;  %v15461_v57 = vld [vmem:[#allocation78_spill] sm:$0xff] }
 0x601   :  { %15450 = vst [vmem:[#allocation67_spill] sm:$0xff] %v11831_v24  ;;  %v2552_v24 = vand.u32 2147483647, %v11809_v52  ;;  %5199 = vrot.lane.b32.xlu2 %v5152_v53, %s9040_s22  ;;  %v2342_v59 = vmul.f32 1.442695, %v2341_v12  ;;  %v6489_v53 = vmul.f32 %v15461_v57, %v11784_v22  ;;  %v15464_v44 = vld [vmem:[#allocation70_spill] sm:$0xff]  ;;  %v11890_v49 = vmul.f32 %v15465_v23, %v11647_v10 }
 0x602   :  { %15454 = vst [vmem:[#allocation76_spill] sm:$0xff] %v11849_v14  ;;  %v11883_v14 = vpop.permute.xlu2 %3847  ;;  %5872 = vrot.lane.b32.xlu0 %v5825_v62, %s9040_s22  ;;  %v6485_v12 = vmul.f32 %v15464_v44, %v11784_v22  ;;  %8176 = vpow2.f32 %v2582_v43  ;;  %v2588_v5 = vmul.f32 1.442695, %v2566_v27  ;;  %v6492_v57 = vmul.f32 %v11275_v19, %v11784_v22  ;;  %v15467_v62 = vld [vmem:[#allocation56_spill] sm:$0xff] }
 0x603   :  { %15455 = vst [vmem:[#allocation44_spill] sm:$0xff] %v11855_v31  ;;  %v2568_v55 = vsub.f32 0.0, %v2552_v24  ;;  %v11881_v31 = vpop.permute.xlu1 %3851  ;;  %v11896_v24 = vmul.f32 %v11284_v36, %v11784_v22  ;;  %v11902_v44 = vmul.f32 %v15467_v62, %v11647_v10  ;;  %v11906_v23 = vmul.f32 %v11296_v61, %v11784_v22  ;;  %v15468_v62 = vld [vmem:[#allocation59_spill] sm:$0xff] }
 0x604   :  { %15456 = vst [vmem:[#allocation69_spill] sm:$0xff] %v11859_v63  ;;  %v11910_v43 = vmul.f32 %v11303_v29, %v11784_v22  ;;  %8178 = vpow2.f32 %v2342_v59  ;;  %v2569_v19 = vsub.f32 0.0, %v2553_v40  ;;  %v2555_v36 = vand.u32 2147483647, %v11877_v46 }
 0x605   :  { %15457 = vst [vmem:[#allocation77_spill] sm:$0xff] %v11864_v45  ;;  %v2586_v45 = vmul.f32 1.442695, %v2565_v7  ;;  %v8175_v7 = vpop.eup %8174  ;;  %v11915_v27 = vadd.f32 %v11519_v2, %v11709_v8  ;;  %v11920_v61 = vmul.f32 %v15468_v62, %v11647_v10  ;;  %v11924_v29 = vmul.f32 %v11314_v1, %v11784_v22 }
 0x606   :  { %15458 = vst [vmem:[#allocation75_spill] sm:$0xff] %v11868_v32  ;;  %v11898_v32 = vpop.permute.xlu0 %4500  ;;  %6527 = vrot.lane.b32.xlu1 %v6489_v53, %s9040_s22  ;;  %v2610_v59 = vadd.f32 1.0, %v8175_v7  ;;  %v11929_v2 = vmul.f32 %v11325_v20, %v11784_v22  ;;  %v11937_v53 = vadd.f32 %v11540_v6, %v11709_v8  ;;  %v11941_v1 = vmul.f32 %v11336_v13, %v11772_v4  ;;  %v15471_v13 = vld [vmem:[#allocation66_spill] sm:$0xff] }
 0x607   :  { %15462 = vst [vmem:[#allocation47_spill] sm:$0xff] %v11881_v31  ;;  %8180 = vpow2.f32 %v2586_v45  ;;  %v15469_v45 = vld [vmem:[#allocation63_spill] sm:$0xff]  ;;  %v2594_v20 = vmul.f32 1.442695, %v2569_v19  ;;  %v2556_v7 = vand.u32 2147483647, %v11915_v27  ;;  %v11957_v62 = vmul.f32 %v15471_v13, %v11647_v10 }
 0x608   :  { %15463 = vst [vmem:[#allocation72_spill] sm:$0xff] %v11883_v14  ;;  %v2608_v14 = vadd.f32 1.0, %v8173_v26  ;;  %v2592_v26 = vmul.f32 1.442695, %v2568_v55  ;;  %8182 = vpow2.f32 %v2588_v5  ;;  %v11933_v40 = vmul.f32 %v15469_v45, %v11647_v10  ;;  %v8177_v55 = vpop.eup %8176  ;;  %v15472_v19 = vld [vmem:[#allocation79_spill] sm:$0xff] }
 0x609   :  { %15466 = vst [vmem:[#allocation64_spill] sm:$0xff] %v11898_v32  ;;  %5844 = vrot.lane.b32.xlu2 %v5811_v38, %s9040_s22  ;;  %v11945_v38 = vmul.f32 %v11346_v16, %v11784_v22  ;;  %v2571_v5 = vsub.f32 0.0, %v2555_v36  ;;  %v11961_v16 = vmul.f32 %v11365_v11, %v11772_v4  ;;  %v11965_v36 = vmul.f32 %v15472_v19, %v11784_v22 }
 0x60a   :  { %8184 = vlog2.f32 %v2608_v14  ;;  %v11950_v14 = vadd.f32 %v11531_v58, %v11709_v8  ;;  %v11952_v6 = vpop.permute.xlu2 %3853  ;;  %6519 = vrot.lane.b32.xlu0 %v6485_v12, %s9040_s22  ;;  %v8179_v45 = vpop.eup %8178  ;;  %v15473_v58 = vld [vmem:[#allocation73_spill] sm:$0xff]  ;;  %v15474_v12 = vld [vmem:[#allocation80_spill] sm:$0xff]  ;;  %v11977_v10 = vmul.f32 %v11286_v3, %v11784_v22  ;;  %v2611_v13 = vadd.f32 1.0, %v8177_v55 }
 0x60b   :  { %8186 = vpow2.f32 %v2592_v26  ;;  %15470 = vst [vmem:[#allocation78_spill] sm:$0xff] %v11952_v6  ;;  %v11969_v26 = vmul.f32 %v15473_v58, %v11784_v22  ;;  %v11973_v6 = vmul.f32 %v15474_v12, %v11784_v22  ;;  %v2558_v32 = vand.u32 2147483647, %v11937_v53 }
 0x60c   :  { %8188 = vlog2.f32 %v2610_v59  ;;  %15475 = vst [vmem:[#allocation70_spill] sm:$0xff] %v11977_v10  ;;  %v11982_v19 = vadd.f32 %v11534_v17, %v11709_v8  ;;  %v11984_v59 = vpop.permute.xlu1 %4502  ;;  %v11990_v12 = vmul.f32 %v11305_v33, %v11784_v22  ;;  %v2598_v3 = vmul.f32 1.442695, %v2571_v5  ;;  %v8988_v17 = vld [vmem:[%s15208_s3] sm:$0xff] }
 0x60d   :  { %v8181_v11 = vpop.eup %8180  ;;  %15476 = vst [vmem:[#allocation53_spill] sm:$0xff] %v11984_v59  ;;  %8190 = vpow2.f32 %v2594_v20  ;;  %v2572_v63 = vsub.f32 0.0, %v2556_v7  ;;  %v2545_v55 = vand.u32 2147483647, %v11950_v14  ;;  %v11997_v59 = vmul.f32 %v8988_v17, %v8179_v45 }
 0x60e   :  { %v11986_v58 = vpop.permute.xlu0 %4506  ;;  %v8183_v31 = vpop.eup %8182  ;;  %6533 = vrot.lane.b32.xlu1 %v6492_v57, %s9040_s22  ;;  %v12005_v33 = vmul.f32 %v11348_v28, %v11772_v4  ;;  %v12009_v20 = vmul.f32 %v11353_v37, %v11772_v4  ;;  %v2528_v57 = vmax.f32 %v11716_v60, 0.0  ;;  %v2613_v5 = vadd.f32 1.0, %v8181_v11  ;;  %v15482_v11 = vld [vmem:[#allocation18_spill] sm:$0xff] }
 0x60f   :  { %15477 = vst [vmem:[#allocation56_spill] sm:$0xff] %v11986_v58  ;;  %v12001_v58 = vmul.f32 %v11327_v15, %v11784_v22  ;;  %v12014_v7 = vadd.f32 %v11560_v30, %v11781_v9  ;;  %8192 = vlog2.f32 %v2611_v13  ;;  %v2614_v28 = vadd.f32 1.0, %v8183_v31 }
 0x610   :  { %v8185_v10 = vpop.eup %8184  ;;  %15478 = vst [vmem:[#allocation59_spill] sm:$0xff] %v11997_v59  ;;  %v2574_v45 = vsub.f32 0.0, %v2558_v32  ;;  %v2559_v17 = vand.u32 2147483647, %v11982_v19  ;;  %8194 = vpow2.f32 %v2598_v3  ;;  %v2600_v4 = vmul.f32 1.442695, %v2572_v63 }
 0x611   :  { %15479 = vst [vmem:[#allocation63_spill] sm:$0xff] %v12001_v58  ;;  %5850 = vrot.lane.b32.xlu2 %v11890_v49, %s9040_s22  ;;  %v8187_v22 = vpop.eup %8186  ;;  %v2561_v60 = vsub.f32 0.0, %v2545_v55  ;;  %v2625_v30 = vmul.f32 0.6931472, %v8185_v10  ;;  %v2531_v49 = vmax.f32 %v11741_v0, 0.0  ;;  %v12032_v31 = vsel %vm2337_vm2, %v11997_v59, 0.0 }
 0x612   :  { %15480 = vst [vmem:[#allocation66_spill] sm:$0xff] %v12005_v33  ;;  %v8189_v37 = vpop.eup %8188  ;;  %v2530_v33 = vmax.f32 %v11726_v47, 0.0  ;;  %v12026_v15 = vpop.permute.xlu2 %4498  ;;  %6525 = vrot.lane.b32.xlu0 %v11896_v24, %s9040_s22  ;;  %8196 = vlog2.f32 %v2613_v5  ;;  %v2616_v32 = vadd.f32 1.0, %v8187_v22  ;;  %v3231_v13 = vand.u32 2147483647, %v12014_v7  ;;  %v15484_v10 = vld [vmem:[#allocation24_spill] sm:$0xff] }
 0x613   :  { %15481 = vst [vmem:[#allocation79_spill] sm:$0xff] %v12009_v20  ;;  %v12022_v20 = vadd.f32 %v15482_v11, %v11709_v8  ;;  %v8191_v63 = vpop.eup %8190  ;;  %v12037_v3 = vadd.f32 %v15484_v10, %v11781_v9  ;;  %v2629_v47 = vmul.f32 0.6931472, %v8189_v37  ;;  %8198 = vlog2.f32 %v2614_v28 }
 0x614   :  { %15483 = vst [vmem:[#allocation73_spill] sm:$0xff] %v12026_v15  ;;  %v2604_v0 = vmul.f32 1.442695, %v2574_v45  ;;  %v2575_v55 = vsub.f32 0.0, %v2559_v17  ;;  %v2533_v24 = vmax.f32 %v11768_v42, 0.0  ;;  %8200 = vpow2.f32 %v2600_v4  ;;  %v12047_v37 = vpop.permute.xlu1 %4508  ;;  %v15487_v45 = vld [vmem:[#allocation27_spill] sm:$0xff] }
 0x615   :  { %v2578_v59 = vmul.f32 1.442695, %v2561_v60  ;;  %v2548_v15 = vand.u32 2147483647, %v12022_v20  ;;  %v8193_v5 = vpop.eup %8192  ;;  %v12043_v22 = vadd.f32 %v2625_v30, %v2528_v57  ;;  %v2617_v58 = vadd.f32 1.0, %v8191_v63 }
 0x616   :  { %v12039_v11 = vpop.permute.xlu0 %4512  ;;  %6539 = vrot.lane.b32.xlu1 %v11906_v23, %s9040_s22  ;;  %v8195_v28 = vpop.eup %8194  ;;  %8202 = vlog2.f32 %v2616_v32  ;;  %v3247_v42 = vsub.f32 0.0, %v3231_v13  ;;  %v3230_v4 = vand.u32 2147483647, %v12037_v3  ;;  %v12054_v57 = vadd.f32 %v15487_v45, %v11781_v9  ;;  %v15489_v45 = vld [vmem:[#allocation14_spill] sm:$0xff] }
 0x617   :  { %15485 = vst [vmem:[#allocation80_spill] sm:$0xff] %v12039_v11  ;;  %v2658_v17 = vadd.f32 %v2629_v47, %v2530_v33  ;;  %8204 = vpow2.f32 %v2604_v0  ;;  %v2606_v30 = vmul.f32 1.442695, %v2575_v55  ;;  %v2631_v23 = vmul.f32 0.6931472, %v8193_v5 }
 0x618   :  { %15486 = vst [vmem:[#allocation18_spill] sm:$0xff] %v12043_v22  ;;  %v8197_v63 = vpop.eup %8196  ;;  %8206 = vpow2.f32 %v2578_v59  ;;  %v2564_v13 = vsub.f32 0.0, %v2548_v15  ;;  %v2619_v48 = vadd.f32 1.0, %v8195_v28  ;;  %v12060_v22 = vstv %s8137_s20  ;;  %v15491_v15 = vld [vmem:[#allocation22_spill] sm:$0xff] }
 0x619   :  { %5856 = vrot.lane.b32.xlu2 %v11902_v44, %s9040_s22  ;;  %v8199_v10 = vpop.eup %8198  ;;  %8208 = vlog2.f32 %v2617_v58  ;;  %15488 = vst [vmem:[#allocation24_spill] sm:$0xff] %v12060_v22  ;;  %v12064_v11 = vadd.f32 %v15489_v45, %v11709_v8  ;;  %v3264_v47 = vmul.f32 1.442695, %v3247_v42  ;;  %v3246_v0 = vsub.f32 0.0, %v3230_v4 }
 0x61a   :  { %v12066_v44 = vpop.permute.xlu2 %4504  ;;  %6531 = vrot.lane.b32.xlu0 %v11910_v43, %s9040_s22  ;;  %v8201_v33 = vpop.eup %8200  ;;  %v3234_v59 = vand.u32 2147483647, %v12054_v57  ;;  %v12073_v58 = vadd.f32 %v15491_v15, %v11781_v9  ;;  %v2635_v55 = vmul.f32 0.6931472, %v8197_v63  ;;  %8210 = vpow2.f32 %v2606_v30 }
 0x61b   :  { %15490 = vst [vmem:[#allocation27_spill] sm:$0xff] %v12066_v44  ;;  %v12078_v28 = vmul.f32 %v11746_v35, %v2658_v17  ;;  %v12080_v32 = vadd.f32 %v2631_v23, %v2531_v49  ;;  %v2584_v42 = vmul.f32 1.442695, %v2564_v13  ;;  %v12085_v4 = vadd.f32 %v11597_v21, %v11781_v9 }
 0x61c   :  { %v8203_v45 = vpop.eup %8202  ;;  %v2637_v60 = vmul.f32 0.6931472, %v8199_v10  ;;  %8212 = vlog2.f32 %v2619_v48  ;;  %v2620_v30 = vadd.f32 1.0, %v8201_v33  ;;  %v2551_v63 = vand.u32 2147483647, %v12064_v11  ;;  %v12094_v10 = vpop.permute.xlu1 %4514 }
 0x61d   :  { %15493 = vst [vmem:[#allocation22_spill] sm:$0xff] %v12080_v32  ;;  %v8205_v15 = vpop.eup %8204  ;;  %8214 = vpow2.f32 %v3264_v47  ;;  %v3262_v49 = vmul.f32 1.442695, %v3246_v0  ;;  %v3250_v23 = vsub.f32 0.0, %v3234_v59  ;;  %v3233_v43 = vand.u32 2147483647, %v12073_v58 }
 0x61e   :  { %v12075_v5 = vpop.permute.xlu0 %4518  ;;  %6545 = vrot.lane.b32.xlu1 %v11924_v29, %s9040_s22  ;;  %v8207_v17 = vpop.eup %8206  ;;  %v2661_v13 = vadd.f32 %v2635_v55, %v2533_v24  ;;  %v2641_v22 = vmul.f32 0.6931472, %v8203_v45  ;;  %v12098_v33 = vsel %vm2689_vm9, %v12078_v28, 0.0  ;;  %v2622_v29 = vadd.f32 1.0, %v8205_v15  ;;  %v15495_v24 = vld [vmem:[#allocation16_spill] sm:$0xff] }
 0x61f   :  { %15492 = vst [vmem:[#allocation14_spill] sm:$0xff] %v12075_v5  ;;  %v8209_v21 = vpop.eup %8208  ;;  %8216 = vpow2.f32 %v2584_v42  ;;  %v3237_v0 = vand.u32 2147483647, %v12085_v4  ;;  %v2567_v32 = vsub.f32 0.0, %v2551_v63  ;;  %v12104_v55 = vadd.f32 %v15495_v24, %v11709_v8 }
 0x620   :  { %15494 = vst [vmem:[#allocation83_spill] sm:$0xff] %v12098_v33  ;;  %v8211_v59 = vpop.eup %8210  ;;  %8218 = vlog2.f32 %v2620_v30  ;;  %v15497_v15 = vmax.f32 %v11777_v25, 0.0  ;;  %v3270_v42 = vmul.f32 1.442695, %v3250_v23  ;;  %v3249_v47 = vsub.f32 0.0, %v3233_v43 }
 0x621   :  { %5862 = vrot.lane.b32.xlu2 %v11920_v61, %s9040_s22  ;;  %v2609_v61 = vadd.f32 1.0, %v8207_v17  ;;  %8220 = vpow2.f32 %v3262_v49  ;;  %v15499_v30 = vmax.f32 %v11809_v52, 0.0  ;;  %v2643_v17 = vmul.f32 0.6931472, %v8209_v21  ;;  %v15501_v49 = vld [vmem:[#allocation17_spill] sm:$0xff] }
 0x622   :  { %v12106_v45 = vpop.permute.xlu2 %4510  ;;  %6537 = vrot.lane.b32.xlu0 %v11929_v2, %s9040_s22  ;;  %v12112_v48 = vadd.f32 %v2637_v60, %v15497_v15  ;;  %v8213_v33 = vpop.eup %8212  ;;  %8222 = vlog2.f32 %v2622_v29  ;;  %v2623_v25 = vadd.f32 1.0, %v8211_v59  ;;  %v3253_v60 = vsub.f32 0.0, %v3237_v0 }
 0x623   :  { %15496 = vst [vmem:[#allocation16_spill] sm:$0xff] %v12106_v45  ;;  %v2664_v63 = vadd.f32 %v2641_v22, %v15499_v30  ;;  %v12120_v45 = vmul.f32 %v11746_v35, %v2661_v13  ;;  %v8215_v2 = vpop.eup %8214  ;;  %v12124_v23 = vadd.f32 %v15501_v49, %v11781_v9  ;;  %8224 = vlog2.f32 %v2609_v61 }
 0x624   :  { %15498 = vst [vmem:[#allocation84_spill] sm:$0xff] %v12112_v48  ;;  %v2590_v43 = vmul.f32 1.442695, %v2567_v32  ;;  %v2554_v52 = vand.u32 2147483647, %v12104_v55  ;;  %v12129_v22 = vadd.f32 %v11624_v34, %v11781_v9  ;;  %8226 = vpow2.f32 %v3270_v42 }
 0x625   :  { %v8217_v21 = vpop.eup %8216  ;;  %v3268_v0 = vmul.f32 1.442695, %v3249_v47  ;;  %v15502_v59 = vmax.f32 %v11843_v51, 0.0  ;;  %v2647_v34 = vmul.f32 0.6931472, %v8213_v33  ;;  %v3295_v15 = vadd.f32 1.0, %v8215_v2  ;;  %v12151_v33 = vpop.permute.xlu1 %4520 }
 0x626   :  { %v12117_v5 = vpop.permute.xlu0 %4524  ;;  %7190 = vrot.lane.b32.xlu1 %v11941_v1, %s9040_s22  ;;  %v8219_v32 = vpop.eup %8218  ;;  %v12143_v1 = vsel %vm2689_vm9, %v12120_v45, 0.0  ;;  %8228 = vlog2.f32 %v2623_v25  ;;  %v3276_v49 = vmul.f32 1.442695, %v3253_v60  ;;  %v3236_v42 = vand.u32 2147483647, %v12124_v23 }
 0x627   :  { %15500 = vst [vmem:[#allocation85_spill] sm:$0xff] %v12117_v5  ;;  %v12139_v61 = vadd.f32 %v2643_v17, %v15502_v59  ;;  %v8221_v30 = vpop.eup %8220  ;;  %v12148_v47 = vadd.f32 %v11593_v18, %v11709_v8  ;;  %8230 = vpow2.f32 %v2590_v43  ;;  %v2570_v51 = vsub.f32 0.0, %v2554_v52 }
 0x628   :  { %15504 = vst [vmem:[#allocation86_spill] sm:$0xff] %v12143_v1  ;;  %v3240_v17 = vand.u32 2147483647, %v12129_v22  ;;  %v8223_v25 = vpop.eup %8222  ;;  %v2649_v60 = vmul.f32 0.6931472, %v8219_v32  ;;  %8232 = vpow2.f32 %v3268_v0  ;;  %v12159_v18 = vmul.f32 %v11746_v35, %v2664_v63 }
 0x629   :  { %5868 = vrot.lane.b32.xlu2 %v11933_v40, %s9040_s22  ;;  %15503 = vst [vmem:[#allocation17_spill] sm:$0xff] %v12139_v61  ;;  %v2612_v40 = vadd.f32 1.0, %v8217_v21  ;;  %v8225_v8 = vpop.eup %8224  ;;  %v15506_v43 = vmax.f32 %v11877_v46, 0.0  ;;  %8234 = vlog2.f32 %v3295_v15  ;;  %v3294_v21 = vadd.f32 1.0, %v8221_v30  ;;  %v15508_v46 = vld [vmem:[#allocation23_spill] sm:$0xff] }
 0x62a   :  { %v12153_v2 = vpop.permute.xlu2 %4516  ;;  %6543 = vrot.lane.b32.xlu0 %v11945_v38, %s9040_s22  ;;  %v8227_v24 = vpop.eup %8226  ;;  %8236 = vpow2.f32 %v3276_v49  ;;  %v3252_v38 = vsub.f32 0.0, %v3236_v42  ;;  %v2557_v32 = vand.u32 2147483647, %v12148_v47  ;;  %v12169_v0 = vadd.f32 %v11599_v54, %v11781_v9 }
 0x62b   :  { %15505 = vst [vmem:[#allocation87_spill] sm:$0xff] %v12153_v2  ;;  %v2667_v52 = vadd.f32 %v2647_v34, %v15506_v43  ;;  %8238 = vlog2.f32 %v2612_v40  ;;  %v2596_v63 = vmul.f32 1.442695, %v2570_v51  ;;  %v3256_v59 = vsub.f32 0.0, %v3240_v17  ;;  %v15511_v17 = vld [vmem:[#allocation29_spill] sm:$0xff] }
 0x62c   :  { %v12173_v34 = vadd.f32 %v15508_v46, %v11781_v9  ;;  %v8229_v15 = vpop.eup %8228  ;;  %v15509_v30 = vmax.f32 %v11915_v27, 0.0  ;;  %v2653_v49 = vmul.f32 0.6931472, %v8223_v25  ;;  %v2627_v40 = vmul.f32 0.6931472, %v8225_v8 }
 0x62d   :  { %v8231_v54 = vpop.eup %8230  ;;  %8240 = vlog2.f32 %v3294_v21  ;;  %v3298_v51 = vadd.f32 1.0, %v8227_v24  ;;  %v12185_v46 = vadd.f32 %v15511_v17, %v11781_v9  ;;  %v3274_v27 = vmul.f32 1.442695, %v3252_v38 }
 0x62e   :  { %v12164_v13 = vpop.permute.xlu0 %5173  ;;  %v12177_v43 = vadd.f32 %v2649_v60, %v15509_v30  ;;  %v8233_v61 = vpop.eup %8232  ;;  %v2573_v60 = vsub.f32 0.0, %v2557_v32  ;;  %v3239_v25 = vand.u32 2147483647, %v12169_v0  ;;  %v12190_v30 = vsel %vm2689_vm9, %v12159_v18, 0.0 }
 0x62f   :  { %15507 = vst [vmem:[#allocation88_spill] sm:$0xff] %v12164_v13  ;;  %v8235_v29 = vpop.eup %8234  ;;  %v2655_v42 = vmul.f32 0.6931472, %v8229_v15  ;;  %8242 = vpow2.f32 %v2596_v63  ;;  %v3243_v8 = vand.u32 2147483647, %v12173_v34  ;;  %v15514_v38 = vmax.f32 %v11937_v53, 0.0 }
 0x630   :  { %15510 = vst [vmem:[#allocation23_spill] sm:$0xff] %v12177_v43  ;;  %v8237_v21 = vpop.eup %8236  ;;  %v2615_v17 = vadd.f32 1.0, %v8231_v54  ;;  %8244 = vlog2.f32 %v3298_v51  ;;  %v3232_v15 = vand.u32 2147483647, %v12185_v46  ;;  %v15518_v51 = vmax.f32 %v11982_v19, 0.0  ;;  %v15520_v19 = vld [vmem:[#allocation26_spill] sm:$0xff] }
 0x631   :  { %5874 = vrot.lane.b32.xlu2 %v11957_v62, %s9040_s22  ;;  %15512 = vst [vmem:[#allocation29_spill] sm:$0xff] %v12190_v30  ;;  %v3282_v62 = vmul.f32 1.442695, %v3256_v59  ;;  %v12199_v32 = vadd.f32 %v2653_v49, %v15514_v38  ;;  %v12203_v30 = vmul.f32 %v11746_v35, %v2667_v52  ;;  %v8239_v63 = vpop.eup %8238  ;;  %v3297_v59 = vadd.f32 1.0, %v8233_v61 }
 0x632   :  { %v12193_v24 = vpop.permute.xlu2 %4522  ;;  %7194 = vrot.lane.b32.xlu0 %v11961_v16, %s9040_s22  ;;  %v12210_v16 = vpop.permute.xlu1 %4526  ;;  %v15517_v49 = vmax.f32 %v11950_v14, 0.0  ;;  %8246 = vpow2.f32 %v3274_v27  ;;  %v2602_v38 = vmul.f32 1.442695, %v2573_v60  ;;  %v3255_v52 = vsub.f32 0.0, %v3239_v25 }
 0x633   :  { %15513 = vst [vmem:[#allocation89_spill] sm:$0xff] %v12193_v24  ;;  %v15515_v24 = vld [vmem:[#allocation19_spill] sm:$0xff]  ;;  %v8241_v43 = vpop.eup %8240  ;;  %v12218_v61 = vadd.f32 %v2655_v42, %v15518_v51  ;;  %v3301_v2 = vadd.f32 1.0, %v8237_v21  ;;  %8248 = vpow2.f32 %v3282_v62  ;;  %v3259_v1 = vsub.f32 0.0, %v3243_v8 }
 0x634   :  { %v12208_v13 = vadd.f32 %v15515_v24, %v11781_v9  ;;  %v2657_v54 = vadd.f32 %v2627_v40, %v15517_v49  ;;  %v3313_v24 = vmul.f32 0.6931472, %v8235_v29  ;;  %v2633_v48 = vmul.f32 0.6931472, %v8239_v63  ;;  %v15521_v29 = vld [vmem:[#allocation30_spill] sm:$0xff] }
 0x635   :  { %15519 = vst [vmem:[#allocation90_spill] sm:$0xff] %v12218_v61  ;;  %8250 = vlog2.f32 %v2615_v17  ;;  %v8243_v14 = vpop.eup %8242  ;;  %v3248_v40 = vsub.f32 0.0, %v3232_v15  ;;  %v12226_v42 = vadd.f32 %v15520_v19, %v11792_v50  ;;  %v3311_v60 = vmul.f32 0.6931472, %v8241_v43 }
 0x636   :  { %v12212_v53 = vpop.permute.xlu0 %5179  ;;  %8252 = vlog2.f32 %v3297_v59  ;;  %v3242_v27 = vand.u32 2147483647, %v12208_v13  ;;  %v3280_v25 = vmul.f32 1.442695, %v3255_v52  ;;  %v12230_v62 = vadd.f32 %v15521_v29, %v11781_v9  ;;  %v8245_v8 = vpop.eup %8244  ;;  %v15527_v29 = vld [vmem:[#allocation32_spill] sm:$0xff] }
 0x637   :  { %15516 = vst [vmem:[#allocation19_spill] sm:$0xff] %v12212_v53  ;;  %8254 = vpow2.f32 %v2602_v38  ;;  %v3288_v21 = vmul.f32 1.442695, %v3259_v1  ;;  %v12239_v63 = vsel %vm2689_vm9, %v12203_v30, 0.0  ;;  %v15524_v59 = vmax.f32 %v12014_v7, 0.0  ;;  %v15558_v53 = vld [vmem:[#allocation40_spill] sm:$0xff] }
 0x638   :  { %8256 = vlog2.f32 %v3301_v2  ;;  %15523 = vst [vmem:[#allocation30_spill] sm:$0xff] %v12239_v63  ;;  %v8247_v43 = vpop.eup %8246  ;;  %v15526_v49 = vmax.f32 %v12022_v20, 0.0  ;;  %v2618_v38 = vadd.f32 1.0, %v8243_v14  ;;  %v3266_v51 = vmul.f32 1.442695, %v3248_v40 }
 0x639   :  { %6517 = vrot.lane.b32.xlu2 %v11965_v36, %s9040_s22  ;;  %v12243_v15 = vadd.f32 %v3313_v24, %v15524_v59  ;;  %v8249_v52 = vpop.eup %8248  ;;  %v3258_v19 = vsub.f32 0.0, %v3242_v27  ;;  %v12251_v36 = vadd.f32 %v15527_v29, %v11781_v9  ;;  %v15529_v24 = vmax.f32 %v12037_v3, 0.0  ;;  %v15531_v27 = vld [vmem:[#allocation39_spill] sm:$0xff] }
 0x63a   :  { %v12233_v17 = vpop.permute.xlu2 %4528  ;;  %7198 = vrot.lane.b32.xlu0 %v11816_v56, %s9040_s22  ;;  %v2660_v2 = vadd.f32 %v2633_v48, %v15526_v49  ;;  %v3906_v56 = vand.u32 2147483647, %v12226_v42  ;;  %8258 = vpow2.f32 %v3280_v25  ;;  %v3235_v48 = vand.u32 2147483647, %v12230_v62  ;;  %v12265_v29 = vpop.permute.xlu1 %5171 }
 0x63b   :  { %15522 = vst [vmem:[#allocation26_spill] sm:$0xff] %v12233_v17  ;;  %v8251_v7 = vpop.eup %8250  ;;  %v12257_v59 = vadd.f32 %v3311_v60, %v15529_v24  ;;  %v3300_v40 = vadd.f32 1.0, %v8247_v43  ;;  %8260 = vpow2.f32 %v3288_v21  ;;  %v12263_v49 = vadd.f32 %v15531_v27, %v11792_v50 }
 0x63c   :  { %15525 = vst [vmem:[#allocation91_spill] sm:$0xff] %v12243_v15  ;;  %v8253_v14 = vpop.eup %8252  ;;  %v12268_v1 = vmul.f32 %v11746_v35, %v2657_v54  ;;  %v3319_v60 = vmul.f32 0.6931472, %v8245_v8  ;;  %8262 = vlog2.f32 %v2618_v38  ;;  %v3304_v24 = vadd.f32 1.0, %v8249_v52 }
 0x63d   :  { %15530 = vst [vmem:[#allocation92_spill] sm:$0xff] %v12257_v59  ;;  %v8255_v3 = vpop.eup %8254  ;;  %v12273_v25 = vmul.f32 %v11746_v35, %v2660_v2  ;;  %8264 = vpow2.f32 %v3266_v51  ;;  %v3286_v43 = vmul.f32 1.442695, %v3258_v19  ;;  %v3922_v27 = vsub.f32 0.0, %v3906_v56 }
 0x63e   :  { %v12253_v5 = vpop.permute.xlu0 %5185  ;;  %v8257_v21 = vpop.eup %8256  ;;  %v3245_v20 = vand.u32 2147483647, %v12251_v36  ;;  %v2639_v61 = vmul.f32 0.6931472, %v8251_v7  ;;  %v3317_v15 = vmul.f32 0.6931472, %v8253_v14  ;;  %8266 = vlog2.f32 %v3300_v40 }
 0x63f   :  { %15528 = vst [vmem:[#allocation32_spill] sm:$0xff] %v12253_v5  ;;  %v3251_v5 = vsub.f32 0.0, %v3235_v48  ;;  %v2621_v8 = vadd.f32 1.0, %v8255_v3  ;;  %v3909_v38 = vand.u32 2147483647, %v12263_v49  ;;  %v15534_v19 = vmax.f32 %v12054_v57, 0.0 }
 0x640   :  { %v8259_v51 = vpop.eup %8258  ;;  %v3325_v7 = vmul.f32 0.6931472, %v8257_v21  ;;  %8268 = vlog2.f32 %v3304_v24  ;;  %v3939_v40 = vmul.f32 1.442695, %v3922_v27  ;;  %v3261_v3 = vsub.f32 0.0, %v3245_v20 }
 0x641   :  { %6523 = vrot.lane.b32.xlu2 %v11969_v26, %s9040_s22  ;;  %v15532_v26 = vld [vmem:[#allocation33_spill] sm:$0xff]  ;;  %v12288_v56 = vadd.f32 %v3319_v60, %v15534_v19  ;;  %v8261_v14 = vpop.eup %8260  ;;  %8270 = vpow2.f32 %v3286_v43  ;;  %v15538_v17 = vmax.f32 %v12064_v11, 0.0  ;;  %v15539_v60 = vmax.f32 %v12073_v58, 0.0  ;;  %v15543_v58 = vld [vmem:[#allocation52_spill] sm:$0xff] }
 0x642   :  { %v12280_v52 = vadd.f32 %v15532_v26, %v11781_v9  ;;  %v12282_v2 = vpop.permute.xlu2 %5175  ;;  %7202 = vrot.lane.b32.xlu0 %v11825_v39, %s9040_s22  ;;  %v15536_v26 = vld [vmem:[#allocation42_spill] sm:$0xff]  ;;  %v8263_v39 = vpop.eup %8262  ;;  %v3272_v43 = vmul.f32 1.442695, %v3251_v5  ;;  %8272 = vlog2.f32 %v2621_v8  ;;  %v3303_v20 = vadd.f32 1.0, %v8259_v51 }
 0x643   :  { %15533 = vst [vmem:[#allocation39_spill] sm:$0xff] %v12282_v2  ;;  %v12293_v54 = vadd.f32 %v15536_v26, %v11792_v50  ;;  %v12299_v57 = vadd.f32 %v2639_v61, %v15538_v17  ;;  %v12303_v24 = vadd.f32 %v3317_v15, %v15539_v60  ;;  %v8265_v27 = vpop.eup %8264  ;;  %v3925_v19 = vsub.f32 0.0, %v3909_v38  ;;  %v15544_v38 = vld [vmem:[#allocation36_spill] sm:$0xff]  ;;  %v12323_v51 = vpop.permute.xlu1 %5177  ;;  %v15547_v61 = vld [vmem:[#allocation46_spill] sm:$0xff] }
 0x644   :  { %15535 = vst [vmem:[#allocation33_spill] sm:$0xff] %v12288_v56  ;;  %v3238_v26 = vand.u32 2147483647, %v12280_v52  ;;  %v15541_v48 = vmax.f32 %v12085_v4, 0.0  ;;  %v3307_v11 = vadd.f32 1.0, %v8261_v14  ;;  %v12314_v17 = vadd.f32 %v15543_v58, %v11792_v50  ;;  %v8267_v5 = vpop.eup %8266 }
 0x645   :  { %15540 = vst [vmem:[#allocation93_spill] sm:$0xff] %v12303_v24  ;;  %8274 = vpow2.f32 %v3939_v40  ;;  %v3292_v15 = vmul.f32 1.442695, %v3261_v3  ;;  %v3905_v8 = vand.u32 2147483647, %v12293_v54  ;;  %v12321_v4 = vadd.f32 %v15544_v38, %v11781_v9 }
 0x646   :  { %v12295_v2 = vpop.permute.xlu0 %5191  ;;  %15545 = vst [vmem:[#allocation52_spill] sm:$0xff] %v12323_v51  ;;  %v3296_v14 = vadd.f32 1.0, %v8265_v27  ;;  %8276 = vpow2.f32 %v3272_v43  ;;  %v3945_v40 = vmul.f32 1.442695, %v3925_v19  ;;  %v3254_v3 = vsub.f32 0.0, %v3238_v26 }
 0x647   :  { %15537 = vst [vmem:[#allocation42_spill] sm:$0xff] %v12295_v2  ;;  %v12309_v2 = vadd.f32 %v3325_v7, %v15541_v48  ;;  %v8269_v7 = vpop.eup %8268  ;;  %v2645_v48 = vmul.f32 0.6931472, %v8263_v39  ;;  %8278 = vlog2.f32 %v3303_v20  ;;  %v12330_v21 = vadd.f32 %v15547_v61, %v11792_v50 }
 0x648   :  { %v12326_v58 = vpop.f32.mrf.mxu2  ;;  %v3323_v39 = vmul.f32 0.6931472, %v8267_v5  ;;  %8280 = vlog2.f32 %v3307_v11  ;;  %v3912_v43 = vand.u32 2147483647, %v12314_v17  ;;  %v3921_v20 = vsub.f32 0.0, %v3905_v8 }
 0x649   :  { %15542 = vst [vmem:[#allocation94_spill] sm:$0xff] %v12309_v2  ;;  %6529 = vrot.lane.b32.xlu2 %v11973_v6, %s9040_s22  ;;  %v8271_v6 = vpop.eup %8270  ;;  %8282 = vpow2.f32 %v3292_v15  ;;  %v3241_v19 = vand.u32 2147483647, %v12321_v4  ;;  %v15550_v61 = vmax.f32 %v12104_v55, 0.0  ;;  %v12347_v11 = vsel %vm2689_vm9, %v12268_v1, 0.0 }
 0x64a   :  { %15546 = vst [vmem:[#allocation36_spill] sm:$0xff] %v12326_v58  ;;  %v12332_v38 = vpop.permute.xlu2 %5181  ;;  %7206 = vrot.lane.b32.xlu0 %v11837_v41, %s9040_s22  ;;  %v8273_v60 = vpop.eup %8272  ;;  %v3331_v58 = vmul.f32 0.6931472, %v8269_v7  ;;  %8284 = vlog2.f32 %v3296_v14  ;;  %v3306_v41 = vadd.f32 1.0, %v8271_v6  ;;  %v3278_v27 = vmul.f32 1.442695, %v3254_v3 }
 0x64b   :  { %15548 = vst [vmem:[#allocation46_spill] sm:$0xff] %v12332_v38  ;;  %v12343_v2 = vadd.f32 %v2645_v48, %v15550_v61  ;;  %v8275_v5 = vpop.eup %8274  ;;  %8286 = vpow2.f32 %v3945_v40  ;;  %v3908_v15 = vand.u32 2147483647, %v12330_v21  ;;  %v12352_v8 = vsel %vm2689_vm9, %v12273_v25, 0.0 }
 0x64c   :  { %15551 = vst [vmem:[#allocation96_spill] sm:$0xff] %v12347_v11  ;;  %v8277_v7 = vpop.eup %8276  ;;  %v15553_v55 = vmax.f32 %v12124_v23, 0.0  ;;  %v2651_v14 = vmul.f32 0.6931472, %v8273_v60  ;;  %v3928_v61 = vsub.f32 0.0, %v3912_v43  ;;  %v15556_v3 = vmax.f32 %v12129_v22, 0.0 }
 0x64d   :  { %15552 = vst [vmem:[#allocation97_spill] sm:$0xff] %v12352_v8  ;;  %v8279_v40 = vpop.eup %8278  ;;  %v3937_v56 = vmul.f32 1.442695, %v3921_v20  ;;  %v3257_v63 = vsub.f32 0.0, %v3241_v19  ;;  %v12367_v8 = vadd.f32 %v15558_v53, %v11792_v50  ;;  %8288 = vlog2.f32 %v3306_v41  ;;  %v15559_v53 = vld [vmem:[#allocation28_spill] sm:$0xff] }
 0x64e   :  { %v12339_v26 = vpop.permute.xlu0 %5197  ;;  %v12356_v48 = vadd.f32 %v3323_v39, %v15553_v55  ;;  %v12363_v38 = vadd.f32 %v3331_v58, %v15556_v3  ;;  %v8281_v23 = vpop.eup %8280  ;;  %v3970_v60 = vadd.f32 1.0, %v8275_v5  ;;  %v12375_v22 = vmul.f32 %v11746_v35, %v12299_v57  ;;  %v15562_v5 = vld [vmem:[#allocation69_spill] sm:$0xff] }
 0x64f   :  { %15549 = vst [vmem:[#allocation95_spill] sm:$0xff] %v12339_v26  ;;  %v15555_v26 = vld [vmem:[#allocation70_spill] sm:$0xff]  ;;  %v8283_v58 = vpop.eup %8282  ;;  %v3299_v20 = vadd.f32 1.0, %v8277_v7  ;;  %8290 = vpow2.f32 %v3278_v27  ;;  %v3924_v19 = vsub.f32 0.0, %v3908_v15  ;;  %v15563_v3 = vmax.f32 %v12148_v47, 0.0 }
 0x650   :  { %15554 = vst [vmem:[#allocation98_spill] sm:$0xff] %v12356_v48  ;;  %2346 = vadd.xlane.f32.xlu1 %v12032_v31  ;;  %v12371_v43 = vpop.f32.mrf.mxu2  ;;  %v12381_v31 = vpop.permute.xlu1 %5183  ;;  %v3951_v15 = vmul.f32 1.442695, %v3928_v61  ;;  %8292 = vpow2.f32 %v3937_v56  ;;  %v3915_v6 = vand.u32 2147483647, %v12367_v8  ;;  %v12398_v47 = vsel %vm2689_vm9, %v12375_v22, 0.0 }
 0x651   :  { %6535 = vrot.lane.b32.xlu2 %v15555_v26, %s9040_s22  ;;  %15557 = vst [vmem:[#allocation70_spill] sm:$0xff] %v12363_v38  ;;  %v12379_v26 = vadd.f32 %v15559_v53, %v11781_v9  ;;  %v8285_v55 = vpop.eup %8284  ;;  %v12389_v57 = vadd.f32 %v2651_v14, %v15563_v3  ;;  %v3329_v9 = vmul.f32 0.6931472, %v8279_v40  ;;  %v3284_v53 = vmul.f32 1.442695, %v3257_v63  ;;  %v15566_v61 = vld [vmem:[#allocation49_spill] sm:$0xff] }
 0x652   :  { %15560 = vst [vmem:[#allocation40_spill] sm:$0xff] %v12381_v31  ;;  %v12383_v41 = vpop.permute.xlu2 %5187  ;;  %7212 = vrot.lane.b32.xlu0 %v15562_v5, %s9040_s22  ;;  %v8287_v39 = vpop.eup %8286  ;;  %v3337_v38 = vmul.f32 0.6931472, %v8281_v23  ;;  %8294 = vlog2.f32 %v3970_v60  ;;  %v3309_v5 = vadd.f32 1.0, %v8283_v58  ;;  %v3943_v14 = vmul.f32 1.442695, %v3924_v19 }
 0x653   :  { %15561 = vst [vmem:[#allocation28_spill] sm:$0xff] %v12383_v41  ;;  %8296 = vlog2.f32 %v3299_v20  ;;  %v3244_v3 = vand.u32 2147483647, %v12379_v26  ;;  %v12403_v40 = vadd.f32 %v15566_v61, %v11792_v50  ;;  %v8289_v63 = vpop.eup %8288  ;;  %v3315_v56 = vmul.f32 0.6931472, %v8285_v55  ;;  %v15567_v19 = vld [vmem:[#allocation47_spill] sm:$0xff] }
 0x654   :  { %15565 = vst [vmem:[#allocation99_spill] sm:$0xff] %v12398_v47  ;;  %v3973_v27 = vadd.f32 1.0, %v8287_v39  ;;  %8298 = vpow2.f32 %v3951_v15  ;;  %v12409_v23 = vmul.f32 %v11746_v35, %v12199_v32  ;;  %v3931_v20 = vsub.f32 0.0, %v3915_v6  ;;  %v15572_v32 = vld [vmem:[#allocation20_spill] sm:$0xff]  ;;  %v15582_v47 = vld [vmem:[#allocation57_spill] sm:$0xff] }
 0x655   :  { %v8291_v60 = vpop.eup %8290  ;;  %8300 = vpow2.f32 %v3284_v53  ;;  %v12414_v61 = vadd.f32 %v15567_v19, %v11792_v50  ;;  %v15568_v55 = vmax.f32 %v12169_v0, 0.0  ;;  %v15570_v15 = vmax.f32 %v12173_v34, 0.0 }
 0x656   :  { %v12394_v41 = vpop.permute.xlu0 %5848  ;;  %8302 = vlog2.f32 %v3309_v5  ;;  %v12426_v7 = vadd.f32 %v15572_v32, %v11792_v50  ;;  %v8293_v6 = vpop.eup %8292  ;;  %v3335_v53 = vmul.f32 0.6931472, %v8289_v63  ;;  %v3260_v19 = vsub.f32 0.0, %v3244_v3 }
 0x657   :  { %15564 = vst [vmem:[#allocation69_spill] sm:$0xff] %v12394_v41  ;;  %v12418_v39 = vadd.f32 %v3329_v9, %v15568_v55  ;;  %8304 = vpow2.f32 %v3943_v14  ;;  %v3911_v41 = vand.u32 2147483647, %v12403_v40  ;;  %v15574_v9 = vld [vmem:[#allocation75_spill] sm:$0xff]  ;;  %v3302_v55 = vadd.f32 1.0, %v8291_v60 }
 0x658   :  { %v12428_v58 = vpop.f32.mrf.mxu2  ;;  %v8295_v34 = vpop.eup %8294  ;;  %8306 = vlog2.f32 %v3973_v27  ;;  %v3957_v63 = vmul.f32 1.442695, %v3931_v20  ;;  %v12458_v20 = vmul.f32 %v11746_v35, %v12343_v2  ;;  %v15580_v3 = vmax.f32 %v12208_v13, 0.0  ;;  %v15584_v2 = vld [vmem:[#allocation63_spill] sm:$0xff] }
 0x659   :  { %6541 = vrot.lane.b32.xlu2 %v11990_v12, %s9040_s22  ;;  %15569 = vst [vmem:[#allocation49_spill] sm:$0xff] %v12418_v39  ;;  %v12422_v12 = vadd.f32 %v3337_v38, %v15570_v15  ;;  %v15575_v38 = vmax.f32 %v12185_v46, 0.0  ;;  %v15576_v15 = vld [vmem:[#allocation45_spill] sm:$0xff]  ;;  %v8297_v14 = vpop.eup %8296  ;;  %v12451_v46 = vsel %vm2689_vm9, %v12409_v23, 0.0  ;;  %v3927_v39 = vsub.f32 0.0, %v3911_v41 }
 0x65a   :  { %v12431_v0 = vpop.permute.xlu2 %5193  ;;  %7216 = vrot.lane.b32.xlu0 %v15574_v9, %s9040_s22  ;;  %v12441_v32 = vadd.f32 %v15576_v15, %v11792_v50  ;;  %15579 = vst [vmem:[#allocation100_spill] sm:$0xff] %v12451_v46  ;;  %v8299_v27 = vpop.eup %8298  ;;  %v15583_v46 = vld [vmem:[#allocation53_spill] sm:$0xff]  ;;  %v3988_v31 = vmul.f32 0.6931472, %v8295_v34  ;;  %8308 = vlog2.f32 %v3302_v55  ;;  %v3969_v60 = vadd.f32 1.0, %v8293_v6  ;;  %v15586_v6 = vld [vmem:[#allocation55_spill] sm:$0xff] }
 0x65b   :  { %15571 = vst [vmem:[#allocation47_spill] sm:$0xff] %v12422_v12  ;;  %v12437_v5 = vadd.f32 %v3315_v56, %v15575_v38  ;;  %v12445_v12 = vpop.permute.xlu1 %5189  ;;  %v3907_v38 = vand.u32 2147483647, %v12426_v7  ;;  %v8301_v15 = vpop.eup %8300  ;;  %v12466_v48 = vadd.f32 %v15583_v46, %v15582_v47  ;;  %v3976_v59 = vadd.f32 1.0, %v8299_v27 }
 0x65c   :  { %15573 = vst [vmem:[#allocation20_spill] sm:$0xff] %v12431_v0  ;;  %v3918_v0 = vand.u32 2147483647, %v12414_v61  ;;  %v8303_v56 = vpop.eup %8302  ;;  %v3914_v24 = vand.u32 2147483647, %v12441_v32  ;;  %8310 = vpow2.f32 %v3957_v63  ;;  %v12478_v55 = vadd.f32 %v15586_v6, %v11792_v50 }
 0x65d   :  { %15577 = vst [vmem:[#allocation75_spill] sm:$0xff] %v12445_v12  ;;  %v12462_v12 = vadd.f32 %v3335_v53, %v15580_v3  ;;  %v8305_v11 = vpop.eup %8304  ;;  %v15585_v53 = vld [vmem:[#allocation31_spill] sm:$0xff]  ;;  %v3305_v3 = vadd.f32 1.0, %v8301_v15  ;;  %v3923_v34 = vsub.f32 0.0, %v3907_v38  ;;  %v3321_v51 = vmul.f32 0.6931472, %v8297_v14 }
 0x65e   :  { %v12447_v9 = vpop.permute.xlu0 %5854  ;;  %v3934_v13 = vsub.f32 0.0, %v3918_v0  ;;  %v12473_v41 = vadd.f32 %v15585_v53, %v11792_v50  ;;  %v4580_v63 = vand.u32 2147483647, %v12466_v48  ;;  %v3341_v27 = vmul.f32 0.6931472, %v8303_v56 }
 0x65f   :  { %15578 = vst [vmem:[#allocation45_spill] sm:$0xff] %v12447_v9  ;;  %v3290_v9 = vmul.f32 1.442695, %v3260_v19  ;;  %v8307_v19 = vpop.eup %8306  ;;  %v3972_v15 = vadd.f32 1.0, %v8305_v11  ;;  %v3930_v53 = vsub.f32 0.0, %v3914_v24 }
 0x660   :  { %15581 = vst [vmem:[#allocation101_spill] sm:$0xff] %v12462_v12  ;;  %v4333_v12 = vpop.f32.mrf.mxu2  ;;  %v3994_v46 = vmul.f32 0.6931472, %v8307_v19  ;;  %v3963_v38 = vmul.f32 1.442695, %v3934_v13  ;;  %v8309_v14 = vpop.eup %8308  ;;  %v4596_v24 = vsub.f32 0.0, %v4580_v63 }
 0x661   :  { %6547 = vrot.lane.b32.xlu2 %v15584_v2, %s9040_s22  ;;  %8312 = vpow2.f32 %v3290_v9  ;;  %v3949_v2 = vmul.f32 1.442695, %v3927_v39  ;;  %v3910_v6 = vand.u32 2147483647, %v12473_v41  ;;  %v15589_v39 = vmax.f32 %v12226_v42, 0.0 }
 0x662   :  { %v12481_v0 = vpop.permute.xlu2 %5199  ;;  %2747 = vperm.xlu0 %8160, %v12078_v28   ;;  %8314 = vlog2.f32 %v3969_v60  ;;  %v3917_v28 = vand.u32 2147483647, %v12478_v55  ;;  %v8311_v56 = vpop.eup %8310  ;;  %v15592_v13 = vmax.f32 %v12230_v62, 0.0  ;;  %v15596_v63 = vmax.f32 %v12263_v49, 0.0 }
 0x663   :  { %15587 = vst [vmem:[#allocation57_spill] sm:$0xff] %v12481_v0  ;;  %8316 = vlog2.f32 %v3976_v59  ;;  %v12489_v9 = vadd.f32 %v3988_v31, %v15589_v39  ;;  %v3941_v0 = vmul.f32 1.442695, %v3923_v34  ;;  %v12495_v59 = vadd.f32 %v12047_v37, %v15582_v47  ;;  %v12497_v60 = vpop.permute.xlu1 %5195  ;;  %v15595_v34 = vld [vmem:[#allocation66_spill] sm:$0xff] }
 0x664   :  { %8318 = vlog2.f32 %v3305_v3  ;;  %15591 = vst [vmem:[#allocation31_spill] sm:$0xff] %v12497_v60  ;;  %v12501_v42 = vadd.f32 %v3321_v51, %v15592_v13  ;;  %v15593_v31 = vmax.f32 %v12251_v36, 0.0  ;;  %v3955_v3 = vmul.f32 1.442695, %v3930_v53 }
 0x665   :  { %15590 = vst [vmem:[#allocation63_spill] sm:$0xff] %v12489_v9  ;;  %8320 = vpow2.f32 %v3949_v2  ;;  %v12511_v37 = vadd.f32 %v3994_v46, %v15596_v63  ;;  %v3926_v39 = vsub.f32 0.0, %v3910_v6  ;;  %v12515_v62 = vsel %vm2689_vm9, %v12458_v20, 0.0  ;;  %v15599_v6 = vld [vmem:[#allocation11_spill] sm:$0xff]  ;;  %v15603_v9 = vld [vmem:[#allocation10_spill] sm:$0xff] }
 0x666   :  { %v12485_v44 = vpop.permute.xlu0 %5860  ;;  %v12505_v19 = vadd.f32 %v3341_v27, %v15593_v31  ;;  %8322 = vlog2.f32 %v3972_v15  ;;  %v3979_v36 = vadd.f32 1.0, %v8311_v56  ;;  %v3933_v27 = vsub.f32 0.0, %v3917_v28  ;;  %v15598_v15 = vld [vmem:[#allocation65_spill] sm:$0xff] }
 0x667   :  { %15588 = vst [vmem:[#allocation53_spill] sm:$0xff] %v12485_v44  ;;  %v8313_v2 = vpop.eup %8312  ;;  %8324 = vpow2.f32 %v3963_v38  ;;  %v12519_v53 = vadd.f32 %v15598_v15, %v11792_v50  ;;  %v4614_v46 = vmul.f32 1.442695, %v4596_v24  ;;  %v4583_v38 = vand.u32 2147483647, %v12495_v59  ;;  %v15602_v24 = vld [vmem:[#allocation67_spill] sm:$0xff] }
 0x668   :  { %15594 = vst [vmem:[#allocation55_spill] sm:$0xff] %v12505_v19  ;;  %v8315_v51 = vpop.eup %8314  ;;  %8326 = vpow2.f32 %v3941_v0  ;;  %v4336_v13 = vpop.f32.mrf.mxu2  ;;  %v4334_v31 = vadd.f32 %v4333_v12, %v15599_v6  ;;  %v3327_v28 = vmul.f32 0.6931472, %v8309_v14  ;;  %v3308_v56 = vadd.f32 1.0, %v8313_v2 }
 0x669   :  { %7192 = vrot.lane.b32.xlu2 %v15595_v34, %s9040_s22  ;;  %15597 = vst [vmem:[#allocation66_spill] sm:$0xff] %v12511_v37  ;;  %2742 = vperm.xlu1 %8161, %v12268_v1   ;;  %v8317_v49 = vpop.eup %8316  ;;  %v15600_v34 = vld [vmem:[#allocation8_spill] sm:$0xff]  ;;  %8328 = vpow2.f32 %v3955_v3  ;;  %v3947_v1 = vmul.f32 1.442695, %v3926_v39  ;;  %v12531_v37 = vadd.f32 %v15602_v24, %v11792_v50  ;;  %v4331_v12 = vadd.f32 %v12428_v58, %v15603_v9  ;;  %v15605_v39 = vld [vmem:[#allocation6_spill] sm:$0xff] }
 0x66a   :  { %v4337_v63 = vadd.f32 %v4336_v13, %v15600_v34  ;;  %v12525_v11 = vpop.permute.xlu2 %5844  ;;  %2762 = vperm.xlu0 %8160, %v12120_v45   ;;  %v8319_v0 = vpop.eup %8318  ;;  %v3986_v45 = vmul.f32 0.6931472, %v8315_v51  ;;  %8330 = vlog2.f32 %v3979_v36  ;;  %v3961_v14 = vmul.f32 1.442695, %v3933_v27  ;;  %v15606_v36 = vld [vmem:[#allocation79_spill] sm:$0xff]  ;;  %v15628_v9 = vld [vmem:[#allocation56_spill] sm:$0xff] }
 0x66b   :  { %15601 = vst [vmem:[#allocation65_spill] sm:$0xff] %v12525_v11  ;;  %v8321_v44 = vpop.eup %8320  ;;  %v3913_v2 = vand.u32 2147483647, %v12519_v53  ;;  %8332 = vpow2.f32 %v4614_v46  ;;  %v4599_v3 = vsub.f32 0.0, %v4583_v38  ;;  %v4328_v11 = vadd.f32 %v12371_v43, %v15605_v39  ;;  %v12548_v38 = vpop.permute.xlu1 %5201 }
 0x66c   :  { %v4342_v13 = vmax.f32 %v4337_v63, 0.0  ;;  %v8323_v34 = vpop.eup %8322  ;;  %v4341_v24 = vmax.f32 %v4334_v31, 0.0  ;;  %v4000_v60 = vmul.f32 0.6931472, %v8317_v49  ;;  %8334 = vlog2.f32 %v3308_v56 }
 0x66d   :  { %v8325_v15 = vpop.eup %8324  ;;  %v12543_v51 = vadd.f32 %v12094_v10, %v15582_v47  ;;  %v3975_v27 = vadd.f32 1.0, %v8321_v44  ;;  %8336 = vpow2.f32 %v3947_v1  ;;  %v3920_v46 = vand.u32 2147483647, %v12531_v37 }
 0x66e   :  { %v12535_v6 = vpop.permute.xlu0 %5866  ;;  %4358 = vmatpush.msra.mxu3 %v4342_v13  ;;  %v8327_v19 = vpop.eup %8326  ;;  %v4340_v43 = vmax.f32 %v4331_v12, 0.0  ;;  %v15607_v49 = vmax.f32 %v12280_v52, 0.0  ;;  %v3982_v56 = vadd.f32 1.0, %v8325_v15  ;;  %8338 = vpow2.f32 %v3961_v14 }
 0x66f   :  { %15604 = vst [vmem:[#allocation67_spill] sm:$0xff] %v12535_v6  ;;  %v8329_v31 = vpop.eup %8328  ;;  %v3929_v10 = vsub.f32 0.0, %v3913_v2  ;;  %v15608_v13 = vmax.f32 %v12293_v54, 0.0  ;;  %v4339_v58 = vmax.f32 %v4328_v11, 0.0  ;;  %v3971_v14 = vadd.f32 1.0, %v8327_v19  ;;  %v15612_v54 = vld [vmem:[#allocation48_spill] sm:$0xff] }
 0x670   :  { %4359 = vmatpush.msra.mxu3 %v4341_v24  ;;  %v12552_v63 = vadd.f32 %v3327_v28, %v15607_v49  ;;  %v8331_v52 = vpop.eup %8330  ;;  %v15610_v28 = vmax.f32 %v12314_v17, 0.0  ;;  %8340 = vlog2.f32 %v3975_v27  ;;  %v3978_v11 = vadd.f32 1.0, %v8329_v31  ;;  %v15613_v24 = vld [vmem:[#allocation72_spill] sm:$0xff] }
 0x671   :  { %7196 = vrot.lane.b32.xlu2 %v15606_v36, %s9040_s22  ;;  %2757 = vperm.xlu1 %8161, %v12273_v25   ;;  %v12557_v44 = vadd.f32 %v3986_v45, %v15608_v13  ;;  %v4620_v36 = vmul.f32 1.442695, %v4599_v3  ;;  %v4586_v25 = vand.u32 2147483647, %v12543_v51  ;;  %v12570_v45 = vmul.f32 %v15612_v54, %v12437_v5  ;;  %v8333_v2 = vpop.eup %8332  ;;  %v15615_v13 = vld [vmem:[#allocation21_spill] sm:$0xff] }
 0x672   :  { %v12560_v12 = vpop.permute.xlu2 %5850  ;;  %2777 = vperm.xlu0 %8160, %v12159_v18   ;;  %4360 = vmatpush.msra.mxu3 %v4340_v43  ;;  %v12565_v15 = vadd.f32 %v4000_v60, %v15610_v28  ;;  %v3936_v3 = vsub.f32 0.0, %v3920_v46  ;;  %v12574_v18 = vadd.f32 %v15613_v24, %v11792_v50  ;;  %v8335_v17 = vpop.eup %8334  ;;  %v3333_v60 = vmul.f32 0.6931472, %v8319_v0  ;;  %v15617_v0 = vld [vmem:[#allocation64_spill] sm:$0xff] }
 0x673   :  { %15609 = vst [vmem:[#allocation79_spill] sm:$0xff] %v12560_v12  ;;  %8342 = vlog2.f32 %v3982_v56  ;;  %v3953_v49 = vmul.f32 1.442695, %v3929_v10  ;;  %v15616_v5 = vrot.slane %v15615_v13, 3  ;;  %v8337_v27 = vpop.eup %8336  ;;  %v3992_v31 = vmul.f32 0.6931472, %v8323_v34 }
 0x674   :  { %15611 = vst [vmem:[#allocation102_spill] sm:$0xff] %v12565_v15  ;;  %4361 = vmatpush.msra.mxu3 %v4339_v58  ;;  %v4006_v46 = vmul.f32 0.6931472, %v8331_v52  ;;  %8344 = vpow2.f32 %v4620_v36  ;;  %v8339_v24 = vpop.eup %8338  ;;  %v4644_v1 = vadd.f32 1.0, %v8333_v2  ;;  %v4602_v58 = vsub.f32 0.0, %v4586_v25  ;;  %v15618_v10 = vld [vmem:[#allocation71_spill] sm:$0xff] }
 0x675   :  { %8026 = vmatmul.msk.f32.vlgmr.msra.gmra.mxu3 %vm1109_vm1, %v15616_v5  ;;  %8346 = vlog2.f32 %v3971_v14  ;;  %v12585_v56 = vadd.f32 %v15617_v0, %v15582_v47  ;;  %v3967_v19 = vmul.f32 1.442695, %v3936_v3  ;;  %v3916_v5 = vand.u32 2147483647, %v12574_v18 }
 0x676   :  { %v12576_v43 = vpop.permute.xlu0 %5872  ;;  %8348 = vlog2.f32 %v3978_v11  ;;  %v12592_v34 = vadd.f32 %v12151_v33, %v15582_v47  ;;  %v15619_v36 = vmax.f32 %v12321_v4, 0.0  ;;  %v3974_v14 = vadd.f32 1.0, %v8337_v27  ;;  %v8341_v2 = vpop.eup %8340 }
 0x677   :  { %15614 = vst [vmem:[#allocation48_spill] sm:$0xff] %v12576_v43  ;;  %8350 = vpow2.f32 %v3953_v49  ;;  %v12601_v25 = vsel %vm2689_vm9, %v12570_v45, 0.0  ;;  %v15620_v11 = vmax.f32 %v12330_v21, 0.0  ;;  %v3339_v0 = vmul.f32 0.6931472, %v8335_v17  ;;  %v12608_v4 = vpop.permute.xlu1 %5846 }
 0x678   :  { %v12596_v52 = vadd.f32 %v3333_v60, %v15619_v36  ;;  %v15622_v27 = vmax.f32 %v12367_v8, 0.0  ;;  %8352 = vlog2.f32 %v4644_v1  ;;  %v4626_v17 = vmul.f32 1.442695, %v4602_v58  ;;  %v8989_v58 = vld [vmem:[%s15217_s12] sm:$0xff] }
 0x679   :  { %7200 = vrot.lane.b32.xlu2 %v15618_v10, %s9040_s22  ;;  %2772 = vperm.xlu1 %8161, %v12375_v22   ;;  %v12605_v3 = vadd.f32 %v3992_v31, %v15620_v11  ;;  %v3981_v10 = vadd.f32 1.0, %v8339_v24  ;;  %v8043_v22 = vld [vmem:[%s15206_s1 + $0x20] sm:$0xff]  ;;  %v8343_v49 = vpop.eup %8342  ;;  %v4579_v31 = vand.u32 2147483647, %v12585_v56  ;;  %8354 = vpow2.f32 %v3967_v19 }
 0x67a   :  { %v12610_v60 = vpop.permute.xlu2 %5856  ;;  %2792 = vperm.xlu0 %8160, %v12203_v30   ;;  %v12618_v21 = vadd.f32 %v4006_v46, %v15622_v27  ;;  %4998 = vmatpush.msrb.mxu3 %v8043_v22  ;;  %v8345_v24 = vpop.eup %8344  ;;  %v3932_v11 = vsub.f32 0.0, %v3916_v5  ;;  %v4589_v30 = vand.u32 2147483647, %v12592_v34  ;;  %8356 = vlog2.f32 %v3974_v14  ;;  %v15625_v46 = vld [vmem:[#allocation78_spill] sm:$0xff] }
 0x67b   :  { %15621 = vst [vmem:[#allocation72_spill] sm:$0xff] %v12610_v60  ;;  %v8347_v28 = vpop.eup %8346  ;;  %v12628_v1 = vadd.f32 %v15625_v46, %v11792_v50  ;;  %v12636_v19 = vmul.f32 %v11746_v35, %v12389_v57  ;;  %v15626_v22 = vmax.f32 %v12379_v26, 0.0  ;;  %v3998_v27 = vmul.f32 0.6931472, %v8341_v2 }
 0x67c   :  { %15623 = vst [vmem:[#allocation64_spill] sm:$0xff] %v12618_v21  ;;  %v8349_v5 = vpop.eup %8348  ;;  %v4012_v8 = vmul.f32 0.6931472, %v8343_v49  ;;  %8358 = vlog2.f32 %v3981_v10  ;;  %v4647_v46 = vadd.f32 1.0, %v8345_v24  ;;  %v4595_v43 = vsub.f32 0.0, %v4579_v31 }
 0x67d   :  { %8044 = vmatmul.msk.f32.vlgmr.msrb.gmra.mxu3 %vm187_vm0, %v8989_v58  ;;  %v12640_v14 = vadd.f32 %v3339_v0, %v15626_v22  ;;  %v8351_v50 = vpop.eup %8350  ;;  %8360 = vpow2.f32 %v4626_v17  ;;  %v15627_v58 = vld [vmem:[#allocation41_spill] sm:$0xff]  ;;  %v3990_v13 = vmul.f32 0.6931472, %v8347_v28  ;;  %v3959_v57 = vmul.f32 1.442695, %v3932_v11 }
 0x67e   :  { %v12623_v33 = vpop.permute.xlu0 %6519  ;;  %v4605_v39 = vsub.f32 0.0, %v4589_v30  ;;  %v12647_v26 = vadd.f32 %v15628_v9, %v15582_v47  ;;  %v8353_v0 = vpop.eup %8352  ;;  %v4004_v2 = vmul.f32 0.6931472, %v8349_v5  ;;  %v3919_v10 = vand.u32 2147483647, %v12628_v1 }
 0x67f   :  { %15624 = vst [vmem:[#allocation71_spill] sm:$0xff] %v12623_v33  ;;  %v12653_v49 = vsel %vm2689_vm9, %v12636_v19, 0.0  ;;  %v12657_v17 = vmul.f32 %v15612_v54, %v12501_v42  ;;  %v8355_v28 = vpop.eup %8354  ;;  %v15629_v31 = vmax.f32 %v12403_v40, 0.0  ;;  %v15631_v9 = vmax.f32 %v12414_v61, 0.0 }
 0x680   :  { %v3977_v30 = vadd.f32 1.0, %v8351_v50  ;;  %v8357_v22 = vpop.eup %8356  ;;  %8362 = vlog2.f32 %v4647_v46  ;;  %v12674_v40 = vadd.f32 %v12210_v16, %v15582_v47  ;;  %v15634_v61 = vmax.f32 %v12426_v7, 0.0  ;;  %v8990_v7 = vld [vmem:[%s15217_s12 + $0x8] sm:$0xff] }
 0x681   :  { %7204 = vrot.lane.b32.xlu2 %v15627_v58, %s9040_s22  ;;  %2787 = vperm.xlu1 %8161, %v12458_v20   ;;  %v12661_v24 = vadd.f32 %v3998_v27, %v15629_v31  ;;  %v12665_v11 = vadd.f32 %v4012_v8, %v15631_v9  ;;  %v4612_v58 = vmul.f32 1.442695, %v4595_v43  ;;  %8364 = vpow2.f32 %v3959_v57  ;;  %v12681_v9 = vpop.permute.xlu1 %5852 }
 0x682   :  { %v12668_v5 = vpop.permute.xlu2 %5862  ;;  %2807 = vperm.xlu0 %8160, %v12409_v23   ;;  %v8359_v27 = vpop.eup %8358  ;;  %v12678_v8 = vadd.f32 %v3990_v13, %v15634_v61  ;;  %v4632_v50 = vmul.f32 1.442695, %v4605_v39  ;;  %v4582_v31 = vand.u32 2147483647, %v12647_v26  ;;  %15635 = vst [vmem:[#allocation103_spill] sm:$0xff] %v12681_v9  ;;  %v15637_v43 = vmax.f32 %v12441_v32, 0.0 }
 0x683   :  { %15630 = vst [vmem:[#allocation78_spill] sm:$0xff] %v12661_v24  ;;  %v8361_v46 = vpop.eup %8360  ;;  %v4663_v16 = vmul.f32 0.6931472, %v8353_v0  ;;  %v3935_v20 = vsub.f32 0.0, %v3919_v10  ;;  %v12695_v39 = vsel %vm2689_vm9, %v12657_v17, 0.0  ;;  %8366 = vlog2.f32 %v3977_v30  ;;  %v15639_v32 = vld [vmem:[#allocation73_spill] sm:$0xff] }
 0x684   :  { %15632 = vst [vmem:[#allocation41_spill] sm:$0xff] %v12665_v11  ;;  %v12687_v42 = vadd.f32 %v4004_v2, %v15637_v43  ;;  %v3984_v13 = vadd.f32 1.0, %v8355_v28  ;;  %v12700_v2 = vadd.f32 %v15639_v32, %v15582_v47  ;;  %v3996_v0 = vmul.f32 0.6931472, %v8357_v22  ;;  %v15640_v43 = vld [vmem:[#allocation76_spill] sm:$0xff] }
 0x685   :  { %15633 = vst [vmem:[#allocation56_spill] sm:$0xff] %v12668_v5  ;;  %8045 = vmatmul.msk.f32.gmra.mxu3 %vm187_vm0, %v8990_v7  ;;  %v4010_v10 = vmul.f32 0.6931472, %v8359_v27  ;;  %8368 = vpow2.f32 %v4612_v58  ;;  %v4592_v61 = vand.u32 2147483647, %v12674_v40  ;;  %v4650_v7 = vadd.f32 1.0, %v8361_v46 }
 0x686   :  { %v12683_v23 = vpop.permute.xlu0 %6525  ;;  %15638 = vst [vmem:[#allocation105_spill] sm:$0xff] %v12687_v42  ;;  %8370 = vpow2.f32 %v4632_v50  ;;  %v4598_v30 = vsub.f32 0.0, %v4582_v31  ;;  %v8363_v28 = vpop.eup %8362  ;;  %v15641_v57 = vmax.f32 %v12466_v48, 0.0  ;;  %v3965_v22 = vmul.f32 1.442695, %v3935_v20  ;;  %v15643_v58 = vld [vmem:[#allocation80_spill] sm:$0xff] }
 0x687   :  { %15636 = vst [vmem:[#allocation104_spill] sm:$0xff] %v12683_v23  ;;  %v12713_v27 = vadd.f32 %v15643_v58, %v15582_v47  ;;  %8372 = vlog2.f32 %v3984_v13  ;;  %v4578_v46 = vand.u32 2147483647, %v12700_v2  ;;  %v15644_v50 = vld [vmem:[#allocation35_spill] sm:$0xff]  ;;  %v4669_v5 = vmul.f32 0.6931472, %v8363_v28 }
 0x688   :  { %v12708_v23 = vadd.f32 %v4663_v16, %v15641_v57  ;;  %v12719_v31 = vadd.f32 %v12265_v29, %v15644_v50  ;;  %v15646_v16 = vld [vmem:[#allocation18_spill] sm:$0xff]  ;;  %v15647_v57 = vmax.f32 %v12473_v41, 0.0  ;;  %v4608_v29 = vsub.f32 0.0, %v4592_v61 }
 0x689   :  { %7208 = vrot.lane.b32.xlu2 %v15640_v43, %s9040_s22  ;;  %2802 = vperm.xlu1 %8161, %v12636_v19   ;;  %v8365_v43 = vpop.eup %8364  ;;  %v12726_v20 = vmul.f32 %v11746_v35, %v15646_v16  ;;  %v15648_v19 = vmax.f32 %v12478_v55, 0.0  ;;  %8374 = vlog2.f32 %v4650_v7  ;;  %v8991_v61 = vld [vmem:[%s15217_s12 + $0x10] sm:$0xff]  ;;  %v15654_v55 = vld [vmem:[#allocation52_spill] sm:$0xff] }
 0x68a   :  { %15642 = vst [vmem:[#allocation73_spill] sm:$0xff] %v12708_v23  ;;  %v12721_v48 = vpop.permute.xlu2 %5868  ;;  %3425 = vperm.xlu0 %8160, %v12570_v45   ;;  %v12730_v58 = vadd.f32 %v3996_v0, %v15647_v57  ;;  %v8367_v36 = vpop.eup %8366  ;;  %v15650_v45 = vld [vmem:[#allocation27_spill] sm:$0xff]  ;;  %v3980_v0 = vadd.f32 1.0, %v8365_v43  ;;  %8376 = vpow2.f32 %v3965_v22  ;;  %v5251_v28 = vand.u32 2147483647, %v12719_v31  ;;  %v15652_v57 = vld [vmem:[#allocation14_spill] sm:$0xff] }
 0x68b   :  { %15645 = vst [vmem:[#allocation76_spill] sm:$0xff] %v12721_v48  ;;  %v12734_v13 = vadd.f32 %v4010_v10, %v15648_v19  ;;  %v4618_v48 = vmul.f32 1.442695, %v4598_v30  ;;  %v12739_v33 = vadd.f32 %v15650_v45, %v15582_v47  ;;  %v8369_v41 = vpop.eup %8368  ;;  %v4585_v10 = vand.u32 2147483647, %v12713_v27  ;;  %v12754_v43 = vpop.permute.xlu1 %5858  ;;  %v15657_v23 = vld [vmem:[#allocation96_spill] sm:$0xff] }
 0x68c   :  { %v8371_v7 = vpop.eup %8370  ;;  %v4594_v30 = vsub.f32 0.0, %v4578_v46  ;;  %v12752_v19 = vadd.f32 %v15652_v57, %v15582_v47  ;;  %15653 = vst [vmem:[#allocation18_spill] sm:$0xff] %v12754_v43  ;;  %v2690_v22 = vsel %vm2689_vm9, %v12726_v20, 0.0  ;;  %v4638_v45 = vmul.f32 1.442695, %v4608_v29  ;;  %v15656_v46 = vld [vmem:[#allocation92_spill] sm:$0xff] }
 0x68d   :  { %15649 = vst [vmem:[#allocation80_spill] sm:$0xff] %v12734_v13  ;;  %8046 = vmatmul.msk.f32.gmra.mxu3 %vm187_vm0, %v8991_v61  ;;  %v12760_v32 = vadd.f32 %v15654_v55, %v15644_v50  ;;  %v15655_v61 = vld [vmem:[#allocation44_spill] sm:$0xff]  ;;  %v2692_v11 = vadd.f32 %v15657_v23, %v2690_v22  ;;  %v8373_v57 = vpop.eup %8372  ;;  %v4002_v60 = vmul.f32 0.6931472, %v8367_v36  ;;  %v4643_v21 = vadd.f32 1.0, %v8369_v41  ;;  %v15661_v36 = vld [vmem:[#allocation22_spill] sm:$0xff] }
 0x68e   :  { %v12741_v16 = vpop.permute.xlu0 %6531  ;;  %8378 = vpow2.f32 %v4618_v48  ;;  %v4581_v6 = vand.u32 2147483647, %v12739_v33  ;;  %v15658_v29 = vmax.f32 %v12495_v59, 0.0  ;;  %v4653_v55 = vadd.f32 1.0, %v8371_v7 }
 0x68f   :  { %15651 = vst [vmem:[#allocation35_spill] sm:$0xff] %v12741_v16  ;;  %v3359_v16 = vmul.f32 %v15612_v54, %v15656_v46  ;;  %8380 = vlog2.f32 %v3980_v0  ;;  %v4601_v15 = vsub.f32 0.0, %v4585_v10  ;;  %v4610_v13 = vmul.f32 1.442695, %v4594_v30  ;;  %v15662_v0 = vld [vmem:[#allocation83_spill] sm:$0xff] }
 0x690   :  { %v12770_v12 = vadd.f32 %v4669_v5, %v15658_v29  ;;  %v5267_v42 = vsub.f32 0.0, %v5251_v28  ;;  %v4588_v46 = vand.u32 2147483647, %v12752_v19  ;;  %v12778_v48 = vmul.f32 %v11746_v35, %v15661_v36 }
 0x691   :  { %7210 = vrot.lane.b32.xlu2 %v15655_v61, %s9040_s22  ;;  %3415 = vperm.xlu1 %8161, %v3359_v16   ;;  %v8375_v61 = vpop.eup %8374  ;;  %8382 = vpow2.f32 %v4638_v45  ;;  %v5254_v41 = vand.u32 2147483647, %v12760_v32  ;;  %v2694_v10 = vadd.f32 %v15662_v0, %v2692_v11  ;;  %v15663_v7 = vmax.f32 %v12519_v53, 0.0  ;;  %v15665_v45 = vld [vmem:[#allocation16_spill] sm:$0xff]  ;;  %v15667_v0 = vld [vmem:[#allocation93_spill] sm:$0xff] }
 0x692   :  { %15659 = vst [vmem:[#allocation27_spill] sm:$0xff] %v12770_v12  ;;  %v12773_v23 = vpop.permute.xlu2 %5874  ;;  %3440 = vperm.xlu0 %8160, %v12657_v17   ;;  %v8377_v59 = vpop.eup %8376  ;;  %v4016_v28 = vmul.f32 0.6931472, %v8373_v57  ;;  %8384 = vlog2.f32 %v4643_v21  ;;  %v4597_v22 = vsub.f32 0.0, %v4581_v6  ;;  %v4675_v29 = vmul.f32 0.6931472, %v8375_v61 }
 0x693   :  { %15660 = vst [vmem:[#allocation14_spill] sm:$0xff] %v12773_v23  ;;  %v12785_v30 = vadd.f32 %v4002_v60, %v15663_v7  ;;  %8386 = vlog2.f32 %v4653_v55  ;;  %v4624_v36 = vmul.f32 1.442695, %v4601_v15  ;;  %v12791_v23 = vadd.f32 %v15665_v45, %v15582_v47  ;;  %v8992_v11 = vld [vmem:[%s15217_s12 + $0x18] sm:$0xff]  ;;  %v15666_v61 = vld [vmem:[#allocation77_spill] sm:$0xff] }
 0x694   :  { %v8379_v53 = vpop.eup %8378  ;;  %8388 = vpow2.f32 %v4610_v13  ;;  %v5283_v60 = vmul.f32 1.442695, %v5267_v42  ;;  %v4604_v21 = vsub.f32 0.0, %v4588_v46  ;;  %v2695_v6 = vsel %vm2689_vm9, %v12778_v48, 0.0  ;;  %v12810_v46 = vpop.permute.xlu1 %5864 }
 0x695   :  { %8047 = vmatmul.msk.f32.gmra.mxu3 %vm187_vm0, %v8992_v11  ;;  %v8381_v57 = vpop.eup %8380  ;;  %v3983_v55 = vadd.f32 1.0, %v8377_v59  ;;  %v5270_v15 = vsub.f32 0.0, %v5254_v41  ;;  %v12803_v7 = vmul.f32 %v15612_v54, %v15667_v0  ;;  %v2696_v45 = vadd.f32 %v2695_v6, %v2694_v10  ;;  %15670 = vst [vmem:[#allocation92_spill] sm:$0xff] %v12810_v46  ;;  %v15671_v10 = vld [vmem:[#allocation97_spill] sm:$0xff] }
 0x696   :  { %v12787_v17 = vpop.permute.xlu0 %6537  ;;  %v15668_v11 = vmax.f32 %v12531_v37, 0.0  ;;  %v4616_v13 = vmul.f32 1.442695, %v4597_v22  ;;  %v12814_v59 = vmul.f32 %v15612_v54, %v12552_v63  ;;  %8390 = vpow2.f32 %v4624_v36  ;;  %v15672_v22 = vld [vmem:[#allocation85_spill] sm:$0xff] }
 0x697   :  { %15664 = vst [vmem:[#allocation52_spill] sm:$0xff] %v12787_v17  ;;  %v8383_v41 = vpop.eup %8382  ;;  %v4584_v0 = vand.u32 2147483647, %v12791_v23  ;;  %v2698_v37 = vadd.f32 %v15671_v10, %v2696_v45  ;;  %8392 = vpow2.f32 %v5283_v60  ;;  %v4630_v6 = vmul.f32 1.442695, %v4604_v21 }
 0x698   :  { %v12807_v5 = vadd.f32 %v4016_v28, %v15668_v11  ;;  %v8385_v28 = vpop.eup %8384  ;;  %v12821_v11 = vadd.f32 %v15672_v22, %v15582_v47  ;;  %v12824_v42 = vsel %vm2689_vm9, %v3359_v16, 0.0  ;;  %8394 = vlog2.f32 %v3983_v55  ;;  %v15676_v22 = vld [vmem:[#allocation40_spill] sm:$0xff]  ;;  %v15679_v55 = vld [vmem:[#allocation86_spill] sm:$0xff] }
 0x699   :  { %7214 = vrot.lane.b32.xlu2 %v15666_v61, %s9040_s22  ;;  %v4646_v61 = vadd.f32 1.0, %v8379_v53  ;;  %3430 = vperm.xlu1 %8161, %v12803_v7   ;;  %v8387_v36 = vpop.eup %8386  ;;  %v15674_v53 = vmax.f32 %v12543_v51, 0.0  ;;  %v5289_v21 = vmul.f32 1.442695, %v5270_v15  ;;  %v4008_v10 = vmul.f32 0.6931472, %v8381_v57 }
 0x69a   :  { %15669 = vst [vmem:[#allocation44_spill] sm:$0xff] %v12807_v5  ;;  %v12826_v63 = vpop.permute.xlu2 %6517  ;;  %3455 = vperm.xlu0 %8160, %v12814_v59   ;;  %v8389_v45 = vpop.eup %8388  ;;  %8396 = vpow2.f32 %v4616_v13  ;;  %v12836_v16 = vadd.f32 %v15676_v22, %v15644_v50  ;;  %v4656_v51 = vadd.f32 1.0, %v8383_v41  ;;  %v4661_v60 = vmul.f32 0.6931472, %v8385_v28  ;;  %v15680_v15 = vld [vmem:[#allocation87_spill] sm:$0xff] }
 0x69b   :  { %15673 = vst [vmem:[#allocation96_spill] sm:$0xff] %v12826_v63  ;;  %v12831_v17 = vadd.f32 %v4675_v29, %v15674_v53  ;;  %v15678_v63 = vld [vmem:[#allocation84_spill] sm:$0xff]  ;;  %8398 = vlog2.f32 %v4646_v61  ;;  %v4600_v29 = vsub.f32 0.0, %v4584_v0  ;;  %v2700_v53 = vadd.f32 %v15679_v55, %v2698_v37 }
 0x69c   :  { %v12842_v5 = vmul.f32 %v11746_v35, %v15678_v63  ;;  %8400 = vpow2.f32 %v4630_v6  ;;  %v4591_v57 = vand.u32 2147483647, %v12821_v11  ;;  %v12848_v13 = vadd.f32 %v15680_v15, %v15582_v47  ;;  %v8391_v22 = vpop.eup %8390  ;;  %v15681_v63 = vld [vmem:[#allocation98_spill] sm:$0xff]  ;;  %v15683_v37 = vld [vmem:[#allocation88_spill] sm:$0xff]  ;;  %v12873_v9 = vpop.permute.xlu1 %5870 }
 0x69d   :  { %15675 = vst [vmem:[#allocation22_spill] sm:$0xff] %v12831_v17  ;;  %v4681_v17 = vmul.f32 0.6931472, %v8387_v36  ;;  %8402 = vpow2.f32 %v5289_v21  ;;  %v12853_v41 = vmul.f32 %v15612_v54, %v15681_v63  ;;  %v8393_v61 = vpop.eup %8392  ;;  %v5257_v0 = vand.u32 2147483647, %v12836_v16 }
 0x69e   :  { %v12838_v12 = vpop.permute.xlu0 %6543  ;;  %v12858_v28 = vadd.f32 %v15683_v37, %v15644_v50  ;;  %v12862_v6 = vmul.f32 %v15612_v54, %v12596_v52  ;;  %v2701_v36 = vsel %vm2689_vm9, %v12842_v5, 0.0  ;;  %v8395_v21 = vpop.eup %8394  ;;  %8404 = vlog2.f32 %v4656_v51  ;;  %15686 = vst [vmem:[#allocation93_spill] sm:$0xff] %v12873_v9 }
 0x69f   :  { %15677 = vst [vmem:[#allocation83_spill] sm:$0xff] %v12838_v12  ;;  %v4642_v12 = vadd.f32 1.0, %v8389_v45  ;;  %v4622_v45 = vmul.f32 1.442695, %v4600_v29  ;;  %v2702_v55 = vadd.f32 %v2701_v36, %v2700_v53  ;;  %v15685_v63 = vmax.f32 %v12574_v18, 0.0 }
 0x6a0   :  { %15682 = vst [vmem:[#allocation16_spill] sm:$0xff] %v12853_v41  ;;  %v8397_v15 = vpop.eup %8396  ;;  %v4649_v46 = vadd.f32 1.0, %v8391_v22  ;;  %v4607_v43 = vsub.f32 0.0, %v4591_v57  ;;  %v4587_v52 = vand.u32 2147483647, %v12848_v13  ;;  %v15688_v29 = vmax.f32 %v12585_v56, 0.0 }
 0x6a1   :  { %2737 = vperm.xlu2 %8164, %v12726_v20   ;;  %15684 = vst [vmem:[#allocation77_spill] sm:$0xff] %v12862_v6  ;;  %3445 = vperm.xlu1 %8161, %v12853_v41   ;;  %v12870_v37 = vadd.f32 %v4008_v10, %v15685_v63  ;;  %v8399_v51 = vpop.eup %8398  ;;  %v5315_v53 = vadd.f32 1.0, %v8393_v61  ;;  %v15690_v10 = vld [vmem:[#allocation99_spill] sm:$0xff]  ;;  %v15691_v57 = vmax.f32 %v12592_v34, 0.0  ;;  %8406 = vlog2.f32 %v4642_v12  ;;  %v15694_v61 = vld [vmem:[#allocation17_spill] sm:$0xff] }
 0x6a2   :  { %v12875_v24 = vpop.permute.xlu2 %6523  ;;  %3470 = vperm.xlu0 %8160, %v12862_v6   ;;  %v12880_v20 = vadd.f32 %v4661_v60, %v15688_v29  ;;  %v2704_v36 = vadd.f32 %v15690_v10, %v2702_v55  ;;  %v8401_v22 = vpop.eup %8400  ;;  %v5273_v9 = vsub.f32 0.0, %v5257_v0  ;;  %v4645_v56 = vadd.f32 1.0, %v8397_v15  ;;  %v15695_v0 = vld [vmem:[#allocation49_spill] sm:$0xff] }
 0x6a3   :  { %15687 = vst [vmem:[#allocation97_spill] sm:$0xff] %v12875_v24  ;;  %v12886_v63 = vadd.f32 %v4681_v17, %v15691_v57  ;;  %v5252_v24 = vand.u32 2147483647, %v12858_v28  ;;  %v8403_v41 = vpop.eup %8402  ;;  %8408 = vpow2.f32 %v4622_v45  ;;  %v12894_v29 = vmul.f32 %v11746_v35, %v15694_v61  ;;  %v15696_v15 = vld [vmem:[#allocation29_spill] sm:$0xff]  ;;  %v15697_v61 = vld [vmem:[#allocation75_spill] sm:$0xff] }
 0x6a4   :  { %15689 = vst [vmem:[#allocation85_spill] sm:$0xff] %v12880_v20  ;;  %v4014_v55 = vmul.f32 0.6931472, %v8395_v21  ;;  %8410 = vlog2.f32 %v4649_v46  ;;  %v4636_v34 = vmul.f32 1.442695, %v4607_v43  ;;  %v4603_v17 = vsub.f32 0.0, %v4587_v52  ;;  %v8405_v10 = vpop.eup %8404 }
 0x6a5   :  { %15692 = vst [vmem:[#allocation40_spill] sm:$0xff] %v12886_v63  ;;  %8412 = vlog2.f32 %v5315_v53  ;;  %v4652_v12 = vadd.f32 1.0, %v8401_v22  ;;  %v12899_v57 = vmul.f32 %v15612_v54, %v15695_v0  ;;  %v2706_v60 = vadd.f32 %v15696_v15, %v2704_v36 }
 0x6a6   :  { %v12889_v6 = vpop.permute.xlu0 %7194  ;;  %v5295_v45 = vmul.f32 1.442695, %v5273_v9  ;;  %v5268_v18 = vsub.f32 0.0, %v5252_v24  ;;  %v12908_v43 = vmul.f32 %v15612_v54, %v12640_v14  ;;  %v4667_v46 = vmul.f32 0.6931472, %v8399_v51 }
 0x6a7   :  { %15693 = vst [vmem:[#allocation84_spill] sm:$0xff] %v12889_v6  ;;  %v12904_v6 = vadd.f32 %v15697_v61, %v15644_v50  ;;  %8414 = vlog2.f32 %v4645_v56  ;;  %v5318_v21 = vadd.f32 1.0, %v8403_v41  ;;  %v8407_v52 = vpop.eup %8406  ;;  %v4687_v53 = vmul.f32 0.6931472, %v8405_v10  ;;  %v15699_v41 = vld [vmem:[#allocation89_spill] sm:$0xff] }
 0x6a8   :  { %8416 = vpow2.f32 %v4636_v34  ;;  %v4628_v24 = vmul.f32 1.442695, %v4603_v17  ;;  %v12919_v51 = vadd.f32 %v15699_v41, %v15582_v47  ;;  %v12923_v56 = vsel %vm2689_vm9, %v12803_v7, 0.0 }
 0x6a9   :  { %2752 = vperm.xlu2 %8164, %v12778_v48   ;;  %3460 = vperm.xlu1 %8161, %v12899_v57   ;;  %v2707_v48 = vsel %vm2689_vm9, %v12894_v29, 0.0  ;;  %v8409_v22 = vpop.eup %8408  ;;  %8418 = vlog2.f32 %v4652_v12  ;;  %v15700_v34 = vmax.f32 %v12628_v1, 0.0  ;;  %v5285_v0 = vmul.f32 1.442695, %v5268_v18  ;;  %v12930_v12 = vpop.permute.xlu1 %6521 }
 0x6aa   :  { %v12913_v9 = vpop.permute.xlu2 %6529  ;;  %3485 = vperm.xlu0 %8160, %v12908_v43   ;;  %v2708_v36 = vadd.f32 %v2707_v48, %v2706_v60  ;;  %v8411_v10 = vpop.eup %8410  ;;  %8420 = vpow2.f32 %v5295_v45  ;;  %v5260_v60 = vand.u32 2147483647, %v12904_v6  ;;  %15701 = vst [vmem:[#allocation87_spill] sm:$0xff] %v12930_v12  ;;  %v15703_v48 = vmax.f32 %v12647_v26, 0.0  ;;  %v15707_v26 = vld [vmem:[#allocation101_spill] sm:$0xff] }
 0x6ab   :  { %15698 = vst [vmem:[#allocation86_spill] sm:$0xff] %v12913_v9  ;;  %v12927_v17 = vadd.f32 %v4014_v55, %v15700_v34  ;;  %v8413_v61 = vpop.eup %8412  ;;  %v4659_v7 = vmul.f32 0.6931472, %v8407_v52  ;;  %8422 = vlog2.f32 %v5318_v21  ;;  %v15705_v1 = vmax.f32 %v12674_v40, 0.0  ;;  %v15708_v52 = vld [vmem:[#allocation23_spill] sm:$0xff] }
 0x6ac   :  { %v12936_v41 = vadd.f32 %v4667_v46, %v15703_v48  ;;  %v4648_v18 = vadd.f32 1.0, %v8409_v22  ;;  %8424 = vpow2.f32 %v4628_v24  ;;  %v12948_v46 = vmul.f32 %v15612_v54, %v15707_v26  ;;  %v15709_v24 = vld [vmem:[#allocation19_spill] sm:$0xff] }
 0x6ad   :  { %v12941_v55 = vadd.f32 %v4687_v53, %v15705_v1  ;;  %v8415_v34 = vpop.eup %8414  ;;  %v2710_v21 = vadd.f32 %v12515_v62, %v2708_v36  ;;  %v12953_v40 = vmul.f32 %v11746_v35, %v15708_v52  ;;  %8426 = vpow2.f32 %v5285_v0  ;;  %v15710_v1 = vld [vmem:[#allocation34_spill] sm:$0xff] }
 0x6ae   :  { %v12932_v15 = vpop.permute.xlu0 %7198  ;;  %15704 = vst [vmem:[#allocation88_spill] sm:$0xff] %v12936_v41  ;;  %v8417_v53 = vpop.eup %8416  ;;  %v5276_v22 = vsub.f32 0.0, %v5260_v60  ;;  %v12957_v48 = vadd.f32 %v15709_v24, %v15644_v50  ;;  %v15712_v26 = vmax.f32 %v12700_v2, 0.0  ;;  %v4673_v62 = vmul.f32 0.6931472, %v8411_v10  ;;  %v15713_v24 = vld [vmem:[#allocation31_spill] sm:$0xff] }
 0x6af   :  { %15702 = vst [vmem:[#allocation98_spill] sm:$0xff] %v12932_v15  ;;  %v4590_v15 = vand.u32 2147483647, %v12919_v51  ;;  %v8419_v45 = vpop.eup %8418  ;;  %v5332_v36 = vmul.f32 0.6931472, %v8413_v61  ;;  %v12971_v9 = vadd.f32 %v15713_v24, %v15644_v50  ;;  %v15715_v2 = vld [vmem:[#allocation30_spill] sm:$0xff]  ;;  %8428 = vlog2.f32 %v4648_v18 }
 0x6b0   :  { %15706 = vst [vmem:[#allocation99_spill] sm:$0xff] %v12941_v55  ;;  %v12965_v14 = vadd.f32 %v4659_v7, %v15712_v26  ;;  %v8421_v0 = vpop.eup %8420  ;;  %v4665_v60 = vmul.f32 0.6931472, %v8415_v34  ;;  %v2712_v10 = vadd.f32 %v15715_v2, %v2710_v21  ;;  %v4655_v7 = vadd.f32 1.0, %v8417_v53 }
 0x6b1   :  { %2767 = vperm.xlu2 %8164, %v12842_v5   ;;  %v12961_v5 = vmul.f32 %v15710_v1, %v12678_v8  ;;  %3475 = vperm.xlu1 %8161, %v12948_v46   ;;  %v12975_v8 = vsel %vm2689_vm9, %v12814_v59, 0.0  ;;  %v8423_v61 = vpop.eup %8422  ;;  %v4606_v52 = vsub.f32 0.0, %v4590_v15  ;;  %v2713_v34 = vsel %vm2689_vm9, %v12953_v40, 0.0 }
 0x6b2   :  { %v12977_v55 = vpop.permute.xlu2 %6535  ;;  %v8425_v24 = vpop.eup %8424  ;;  %v5301_v63 = vmul.f32 1.442695, %v5276_v22  ;;  %v5255_v59 = vand.u32 2147483647, %v12957_v48  ;;  %v15717_v41 = vmax.f32 %v12713_v27, 0.0  ;;  %v15718_v21 = vmax.f32 %v12719_v31, 0.0 }
 0x6b3   :  { %15711 = vst [vmem:[#allocation17_spill] sm:$0xff] %v12961_v5  ;;  %4100 = vperm.xlu0 %8160, %v12961_v5   ;;  %v5321_v15 = vadd.f32 1.0, %v8421_v0  ;;  %v8427_v26 = vpop.eup %8426  ;;  %v15719_v18 = vmax.f32 %v12739_v33, 0.0  ;;  %v15720_v27 = vld [vmem:[#allocation26_spill] sm:$0xff]  ;;  %v4679_v31 = vmul.f32 0.6931472, %v8419_v45  ;;  %8430 = vlog2.f32 %v4655_v7 }
 0x6b4   :  { %15714 = vst [vmem:[#allocation49_spill] sm:$0xff] %v12977_v55  ;;  %v2714_v55 = vadd.f32 %v2713_v34, %v2712_v10  ;;  %v12989_v20 = vadd.f32 %v4673_v62, %v15717_v41  ;;  %v12993_v53 = vadd.f32 %v5332_v36, %v15718_v21  ;;  %v5263_v10 = vand.u32 2147483647, %v12971_v9  ;;  %v13006_v62 = vpop.permute.xlu1 %6527  ;;  %v15722_v0 = vld [vmem:[#allocation55_spill] sm:$0xff] }
 0x6b5   :  { %v12998_v22 = vadd.f32 %v4665_v60, %v15719_v18  ;;  %v13004_v41 = vadd.f32 %v15720_v27, %v15582_v47  ;;  %15721 = vst [vmem:[#allocation75_spill] sm:$0xff] %v13006_v62  ;;  %v4634_v36 = vmul.f32 1.442695, %v4606_v52  ;;  %v13011_v33 = vmul.f32 %v15612_v54, %v15722_v0  ;;  %v8429_v52 = vpop.eup %8428  ;;  %v15723_v27 = vld [vmem:[#allocation32_spill] sm:$0xff] }
 0x6b6   :  { %v12985_v12 = vpop.permute.xlu0 %7202  ;;  %v4651_v60 = vadd.f32 1.0, %v8425_v24  ;;  %8432 = vpow2.f32 %v5301_v63  ;;  %v5271_v34 = vsub.f32 0.0, %v5255_v59  ;;  %v13015_v21 = vmul.f32 %v15710_v1, %v12730_v58  ;;  %v15725_v58 = vld [vmem:[#allocation91_spill] sm:$0xff] }
 0x6b7   :  { %15716 = vst [vmem:[#allocation29_spill] sm:$0xff] %v12985_v12  ;;  %v5338_v47 = vmul.f32 0.6931472, %v8423_v61  ;;  %8434 = vlog2.f32 %v5321_v15  ;;  %v5316_v18 = vadd.f32 1.0, %v8427_v26  ;;  %v2716_v45 = vadd.f32 %v12653_v49, %v2714_v55  ;;  %v15726_v55 = vld [vmem:[#allocation90_spill] sm:$0xff] }
 0x6b8   :  { %v4593_v7 = vand.u32 2147483647, %v13004_v41  ;;  %v13022_v24 = vadd.f32 %v15723_v27, %v15644_v50  ;;  %v13029_v61 = vmul.f32 %v15612_v54, %v15725_v58  ;;  %8436 = vpow2.f32 %v4634_v36  ;;  %v15730_v58 = vld [vmem:[#allocation100_spill] sm:$0xff] }
 0x6b9   :  { %2782 = vperm.xlu2 %8164, %v12894_v29   ;;  %3490 = vperm.xlu1 %8161, %v13011_v33   ;;  %v5279_v29 = vsub.f32 0.0, %v5263_v10  ;;  %v13034_v49 = vadd.f32 %v12548_v38, %v15644_v50  ;;  %v2688_v59 = vmul.f32 %v11746_v35, %v15726_v55  ;;  %v15727_v15 = vmax.f32 %v12752_v19, 0.0  ;;  %v8431_v36 = vpop.eup %8430 }
 0x6ba   :  { %v13024_v63 = vpop.permute.xlu2 %6541  ;;  %8438 = vlog2.f32 %v4651_v60  ;;  %v5291_v0 = vmul.f32 1.442695, %v5271_v34  ;;  %v2718_v5 = vadd.f32 %v15730_v58, %v2716_v45  ;;  %v15731_v26 = vmax.f32 %v12760_v32, 0.0 }
 0x6bb   :  { %15724 = vst [vmem:[#allocation89_spill] sm:$0xff] %v13024_v63  ;;  %4115 = vperm.xlu0 %8160, %v13015_v21   ;;  %v13040_v10 = vadd.f32 %v4679_v31, %v15727_v15  ;;  %v4671_v38 = vmul.f32 0.6931472, %v8429_v52  ;;  %8440 = vlog2.f32 %v5316_v18  ;;  %v5307_v55 = vmul.f32 1.442695, %v5279_v29  ;;  %v15733_v52 = vld [vmem:[#allocation39_spill] sm:$0xff] }
 0x6bc   :  { %v13047_v2 = vadd.f32 %v5338_v47, %v15731_v26  ;;  %v8433_v35 = vpop.eup %8432  ;;  %v4609_v19 = vsub.f32 0.0, %v4593_v7  ;;  %v5258_v31 = vand.u32 2147483647, %v13022_v24  ;;  %v3376_v60 = vsel %vm2689_vm9, %v13029_v61, 0.0  ;;  %v13065_v7 = vpop.permute.xlu1 %6533 }
 0x6bd   :  { %15728 = vst [vmem:[#allocation101_spill] sm:$0xff] %v13040_v10  ;;  %v8435_v34 = vpop.eup %8434  ;;  %v5266_v45 = vand.u32 2147483647, %v13034_v49  ;;  %v13057_v32 = vmul.f32 %v15710_v1, %v12557_v44  ;;  %v2719_v47 = vsel %vm2689_vm9, %v2688_v59, 0.0  ;;  %v3377_v18 = vadd.f32 %v3376_v60, %v12824_v42 }
 0x6be   :  { %v13042_v27 = vpop.permute.xlu0 %7206  ;;  %15732 = vst [vmem:[#allocation19_spill] sm:$0xff] %v13047_v2  ;;  %8442 = vpow2.f32 %v5291_v0  ;;  %v13063_v29 = vadd.f32 %v15733_v52, %v15644_v50  ;;  %v13069_v26 = vmul.f32 %v15710_v1, %v12785_v30  ;;  %v8437_v15 = vpop.eup %8436  ;;  %v4685_v44 = vmul.f32 0.6931472, %v8431_v36  ;;  %v15736_v0 = vld [vmem:[#allocation33_spill] sm:$0xff] }
 0x6bf   :  { %15729 = vst [vmem:[#allocation23_spill] sm:$0xff] %v13042_v27  ;;  %v5324_v58 = vadd.f32 1.0, %v8433_v35  ;;  %v3379_v42 = vadd.f32 %v12601_v25, %v3377_v18  ;;  %v13077_v60 = vmul.f32 %v15612_v54, %v15736_v0  ;;  %v5344_v12 = vmul.f32 0.6931472, %v8435_v34 }
 0x6c0   :  { %15734 = vst [vmem:[#allocation34_spill] sm:$0xff] %v13065_v7  ;;  %v8439_v52 = vpop.eup %8438  ;;  %8444 = vpow2.f32 %v5307_v55  ;;  %v5274_v30 = vsub.f32 0.0, %v5258_v31  ;;  %v15738_v36 = vmax.f32 %v12791_v23, 0.0  ;;  %v4640_v25 = vmul.f32 1.442695, %v4609_v19  ;;  %v15739_v55 = vld [vmem:[#allocation42_spill] sm:$0xff] }
 0x6c1   :  { %2797 = vperm.xlu2 %8164, %v12953_v40   ;;  %v13071_v40 = vadd.f32 %v2719_v47, %v2718_v5  ;;  %4090 = vperm.xlu1 %8161, %v13057_v32   ;;  %v8441_v5 = vpop.eup %8440  ;;  %v5282_v18 = vsub.f32 0.0, %v5266_v45  ;;  %v5253_v0 = vand.u32 2147483647, %v13063_v29  ;;  %v13091_v34 = vadd.f32 %v15739_v55, %v15644_v50  ;;  %v15740_v31 = vld [vmem:[#allocation50_spill] sm:$0xff] }
 0x6c2   :  { %v13080_v63 = vpop.permute.xlu2 %6547  ;;  %v13085_v35 = vadd.f32 %v4671_v38, %v15738_v36  ;;  %v13095_v27 = vadd.f32 %v12608_v4, %v15740_v31  ;;  %v3381_v23 = vadd.f32 %v12923_v56, %v3379_v42  ;;  %v15742_v38 = vmax.f32 %v12821_v11, 0.0 }
 0x6c3   :  { %15735 = vst [vmem:[#allocation31_spill] sm:$0xff] %v13071_v40  ;;  %4130 = vperm.xlu0 %8160, %v13069_v26   ;;  %8446 = vlog2.f32 %v5324_v58  ;;  %v4654_v45 = vadd.f32 1.0, %v8437_v15  ;;  %v3382_v36 = vsel %vm2689_vm9, %v13077_v60, 0.0  ;;  %v15744_v55 = vmax.f32 %v12836_v16, 0.0 }
 0x6c4   :  { %15737 = vst [vmem:[#allocation30_spill] sm:$0xff] %v13080_v63  ;;  %v13102_v19 = vadd.f32 %v4685_v44, %v15742_v38  ;;  %v8443_v47 = vpop.eup %8442  ;;  %v5297_v4 = vmul.f32 1.442695, %v5274_v30  ;;  %v4677_v62 = vmul.f32 0.6931472, %v8439_v52  ;;  %8448 = vpow2.f32 %v4640_v25  ;;  %v15748_v25 = vld [vmem:[#allocation16_spill] sm:$0xff] }
 0x6c5   :  { %v13108_v40 = vadd.f32 %v5344_v12, %v15744_v55  ;;  %v5334_v56 = vmul.f32 0.6931472, %v8441_v5  ;;  %v5313_v11 = vmul.f32 1.442695, %v5282_v18  ;;  %v5269_v58 = vsub.f32 0.0, %v5253_v0  ;;  %v13126_v5 = vpop.permute.xlu1 %6539 }
 0x6c6   :  { %v13097_v63 = vpop.permute.xlu0 %7212  ;;  %15743 = vst [vmem:[#allocation55_spill] sm:$0xff] %v13102_v19  ;;  %v8445_v44 = vpop.eup %8444  ;;  %v5261_v15 = vand.u32 2147483647, %v13091_v34  ;;  %v5925_v42 = vand.u32 2147483647, %v13095_v27  ;;  %8450 = vlog2.f32 %v4654_v45  ;;  %v5319_v16 = vadd.f32 1.0, %v8443_v47 }
 0x6c7   :  { %15741 = vst [vmem:[#allocation26_spill] sm:$0xff] %v13097_v63  ;;  %v3383_v63 = vadd.f32 %v3382_v36, %v3381_v23  ;;  %v13116_v12 = vmul.f32 %v15710_v1, %v12870_v37  ;;  %v13120_v52 = vmul.f32 %v15710_v1, %v12605_v3  ;;  %8452 = vpow2.f32 %v5297_v4  ;;  %v15750_v47 = vld [vmem:[#allocation94_spill] sm:$0xff]  ;;  %v15751_v23 = vld [vmem:[#allocation63_spill] sm:$0xff] }
 0x6c8   :  { %15745 = vst [vmem:[#allocation32_spill] sm:$0xff] %v13108_v40  ;;  %v13134_v37 = vmul.f32 %v15612_v54, %v15750_v47  ;;  %v5327_v0 = vadd.f32 1.0, %v8445_v44  ;;  %8454 = vpow2.f32 %v5313_v11  ;;  %v13140_v45 = vmul.f32 %v15710_v1, %v15751_v23 }
 0x6c9   :  { %2812 = vperm.xlu2 %8164, %v2688_v59   ;;  %v3385_v38 = vadd.f32 %v12695_v39, %v3383_v63  ;;  %v15746_v59 = vld [vmem:[#allocation46_spill] sm:$0xff]  ;;  %15747 = vst [vmem:[#allocation91_spill] sm:$0xff] %v13126_v5  ;;  %v3386_v39 = vsel %vm2689_vm9, %v15748_v25, 0.0  ;;  %v8447_v18 = vpop.eup %8446  ;;  %4105 = vperm.xlu1 %8161, %v13120_v52   ;;  %v5287_v55 = vmul.f32 1.442695, %v5269_v58  ;;  %v5277_v4 = vsub.f32 0.0, %v5261_v15 }
 0x6ca   :  { %v13124_v30 = vadd.f32 %v15746_v59, %v15644_v50  ;;  %v13130_v63 = vpop.permute.xlu2 %7192  ;;  %v5941_v59 = vsub.f32 0.0, %v5925_v42  ;;  %v8449_v47 = vpop.eup %8448  ;;  %v15753_v44 = vmax.f32 %v12848_v13, 0.0  ;;  %v15754_v7 = vmax.f32 %v12858_v28, 0.0  ;;  %v15756_v15 = vld [vmem:[#allocation95_spill] sm:$0xff] }
 0x6cb   :  { %15749 = vst [vmem:[#allocation90_spill] sm:$0xff] %v13130_v63  ;;  %4145 = vperm.xlu0 %8160, %v13116_v12   ;;  %v3387_v3 = vadd.f32 %v3386_v39, %v3385_v38  ;;  %8456 = vlog2.f32 %v5319_v16  ;;  %v4050_v38 = vsel %vm2689_vm9, %v13057_v32, 0.0  ;;  %v5350_v39 = vmul.f32 0.6931472, %v8447_v18 }
 0x6cc   :  { %v13147_v11 = vadd.f32 %v4677_v62, %v15753_v44  ;;  %v13151_v63 = vadd.f32 %v5334_v56, %v15754_v7  ;;  %v5256_v58 = vand.u32 2147483647, %v13124_v30  ;;  %v13158_v42 = vadd.f32 %v15756_v15, %v15644_v50  ;;  %v8451_v62 = vpop.eup %8450 }
 0x6cd   :  { %v3388_v13 = vsel %vm2689_vm9, %v13134_v37, 0.0  ;;  %8458 = vlog2.f32 %v5327_v0  ;;  %v4051_v32 = vsel %vm2689_vm9, %v13140_v45, 0.0  ;;  %v8453_v56 = vpop.eup %8452  ;;  %v5303_v16 = vmul.f32 1.442695, %v5277_v4  ;;  %v15757_v0 = vld [vmem:[#allocation78_spill] sm:$0xff] }
 0x6ce   :  { %v13143_v25 = vpop.permute.xlu0 %7216  ;;  %15755 = vst [vmem:[#allocation39_spill] sm:$0xff] %v13151_v63  ;;  %v3389_v7 = vadd.f32 %v3388_v13, %v3387_v3  ;;  %8460 = vpow2.f32 %v5287_v55  ;;  %v5958_v18 = vmul.f32 1.442695, %v5941_v59  ;;  %v13166_v23 = vadd.f32 %v4051_v32, %v4050_v38  ;;  %v8455_v44 = vpop.eup %8454  ;;  %v15758_v3 = vld [vmem:[#allocation70_spill] sm:$0xff]  ;;  %v15759_v38 = vld [vmem:[#allocation103_spill] sm:$0xff] }
 0x6cf   :  { %15752 = vst [vmem:[#allocation100_spill] sm:$0xff] %v13143_v25  ;;  %v13170_v15 = vmul.f32 %v15710_v1, %v12927_v17  ;;  %v13174_v28 = vmul.f32 %v15710_v1, %v15757_v0  ;;  %v13179_v13 = vmul.f32 %v15612_v54, %v15758_v3  ;;  %v5272_v4 = vsub.f32 0.0, %v5256_v58 }
 0x6d0   :  { %v5264_v59 = vand.u32 2147483647, %v13158_v42  ;;  %v13185_v32 = vadd.f32 %v15759_v38, %v15740_v31  ;;  %v15761_v0 = vmax.f32 %v12904_v6, 0.0  ;;  %v3392_v3 = vsel %vm2689_vm9, %v12899_v57, 0.0  ;;  %v13197_v38 = vpop.permute.xlu1 %6545 }
 0x6d1   :  { %3420 = vperm.xlu2 %8164, %v13029_v61   ;;  %v3391_v61 = vadd.f32 %v12975_v8, %v3389_v7  ;;  %v8457_v36 = vpop.eup %8456  ;;  %v4683_v8 = vmul.f32 0.6931472, %v8451_v62  ;;  %v4657_v7 = vadd.f32 1.0, %v8449_v47  ;;  %4120 = vperm.xlu1 %8161, %v13174_v28   ;;  %v5322_v58 = vadd.f32 1.0, %v8453_v56  ;;  %15763 = vst [vmem:[#allocation50_spill] sm:$0xff] %v13197_v38  ;;  %v15765_v62 = vld [vmem:[#allocation77_spill] sm:$0xff] }
 0x6d2   :  { %v13187_v17 = vpop.permute.xlu2 %7196  ;;  %v13191_v25 = vadd.f32 %v5350_v39, %v15761_v0  ;;  %v5330_v55 = vadd.f32 1.0, %v8455_v44  ;;  %8462 = vpow2.f32 %v5303_v16  ;;  %v15764_v39 = vld [vmem:[#allocation28_spill] sm:$0xff]  ;;  %v3396_v57 = vsel %vm2689_vm9, %v15765_v62, 0.0  ;;  %v15769_v62 = vld [vmem:[#allocation47_spill] sm:$0xff] }
 0x6d3   :  { %15760 = vst [vmem:[#allocation33_spill] sm:$0xff] %v13187_v17  ;;  %4160 = vperm.xlu0 %8160, %v13170_v15   ;;  %v3393_v5 = vadd.f32 %v3392_v3, %v3391_v61  ;;  %v8459_v6 = vpop.eup %8458  ;;  %8464 = vpow2.f32 %v5958_v18  ;;  %v13203_v47 = vadd.f32 %v15764_v39, %v15644_v50  ;;  %v3394_v0 = vsel %vm2689_vm9, %v13179_v13, 0.0  ;;  %v15767_v18 = vld [vmem:[#allocation69_spill] sm:$0xff] }
 0x6d4   :  { %15762 = vst [vmem:[#allocation42_spill] sm:$0xff] %v13191_v25  ;;  %v8461_v56 = vpop.eup %8460  ;;  %v5293_v44 = vmul.f32 1.442695, %v5272_v4  ;;  %v5280_v16 = vsub.f32 0.0, %v5264_v59  ;;  %v5928_v38 = vand.u32 2147483647, %v13185_v32  ;;  %8466 = vlog2.f32 %v4657_v7 }
 0x6d5   :  { %v3395_v63 = vadd.f32 %v3394_v0, %v3393_v5  ;;  %v15766_v61 = vmax.f32 %v12919_v51, 0.0  ;;  %v13216_v39 = vadd.f32 %v15767_v18, %v15740_v31  ;;  %v13221_v25 = vmul.f32 %v15612_v54, %v15769_v62 }
 0x6d6   :  { %v13199_v17 = vpop.permute.xlu0 %2747  ;;  %v5340_v4 = vmul.f32 0.6931472, %v8457_v36  ;;  %v5356_v59 = vmul.f32 0.6931472, %v8459_v6  ;;  %8468 = vlog2.f32 %v5322_v58  ;;  %v5317_v5 = vadd.f32 1.0, %v8461_v56  ;;  %v15771_v58 = vld [vmem:[#allocation18_spill] sm:$0xff] }
 0x6d7   :  { %v13212_v3 = vadd.f32 %v4683_v8, %v15766_v61  ;;  %15768 = vst [vmem:[#allocation46_spill] sm:$0xff] %v13216_v39  ;;  %v3397_v40 = vadd.f32 %v3396_v57, %v3395_v63  ;;  %8470 = vlog2.f32 %v5330_v55  ;;  %v5259_v51 = vand.u32 2147483647, %v13203_v47  ;;  %v15773_v55 = vld [vmem:[#allocation51_spill] sm:$0xff]  ;;  %v15774_v57 = vld [vmem:[#allocation20_spill] sm:$0xff]  ;;  %v15775_v56 = vld [vmem:[#allocation105_spill] sm:$0xff] }
 0x6d8   :  { %v3398_v8 = vsel %vm2689_vm9, %v12948_v46, 0.0  ;;  %v8463_v7 = vpop.eup %8462  ;;  %8472 = vpow2.f32 %v5293_v44  ;;  %v5309_v0 = vmul.f32 1.442695, %v5280_v16  ;;  %v5944_v61 = vsub.f32 0.0, %v5928_v38 }
 0x6d9   :  { %3435 = vperm.xlu2 %8164, %v13077_v60   ;;  %v3399_v18 = vadd.f32 %v3398_v8, %v3397_v40  ;;  %v8465_v54 = vpop.eup %8464  ;;  %v5926_v36 = vand.u32 2147483647, %v13216_v39  ;;  %v13231_v63 = vadd.f32 %v15771_v58, %v15740_v31  ;;  %v13235_v6 = vmul.f32 %v15773_v55, %v12965_v14 }
 0x6da   :  { %v13226_v60 = vpop.permute.xlu2 %7200  ;;  %v3400_v46 = vsel %vm2689_vm9, %v13221_v25, 0.0  ;;  %v13241_v38 = vadd.f32 %v15774_v57, %v15644_v50  ;;  %v3402_v40 = vsel %vm2689_vm9, %v12908_v43, 0.0  ;;  %v13247_v44 = vmul.f32 %v15710_v1, %v15775_v56  ;;  %v8467_v8 = vpop.eup %8466 }
 0x6db   :  { %15770 = vst [vmem:[#allocation16_spill] sm:$0xff] %v13226_v60  ;;  %v3401_v62 = vadd.f32 %v3400_v46, %v3399_v18  ;;  %8474 = vlog2.f32 %v5317_v5  ;;  %v5325_v14 = vadd.f32 1.0, %v8463_v7  ;;  %v5275_v60 = vsub.f32 0.0, %v5259_v51  ;;  %4763 = vperm.xlu0 %8160, %v13235_v6   ;;  %v13262_v46 = vpop.permute.xlu1 %7190 }
 0x6dc   :  { %15772 = vst [vmem:[#allocation94_spill] sm:$0xff] %v13231_v63  ;;  %v8469_v57 = vpop.eup %8468  ;;  %v15776_v19 = vmax.f32 %v12957_v48, 0.0  ;;  %v15778_v43 = vmax.f32 %v12971_v9, 0.0  ;;  %v5989_v10 = vadd.f32 1.0, %v8465_v54  ;;  %4135 = vperm.xlu1 %8161, %v13247_v44   ;;  %v5964_v51 = vmul.f32 1.442695, %v5944_v61 }
 0x6dd   :  { %15779 = vst [vmem:[#allocation95_spill] sm:$0xff] %v13262_v46  ;;  %v8471_v5 = vpop.eup %8470  ;;  %v5942_v7 = vsub.f32 0.0, %v5926_v36  ;;  %v5931_v58 = vand.u32 2147483647, %v13231_v63  ;;  %v3403_v48 = vadd.f32 %v3402_v40, %v3401_v62  ;;  %8476 = vpow2.f32 %v5309_v0  ;;  %v15784_v9 = vld [vmem:[#allocation17_spill] sm:$0xff] }
 0x6de   :  { %v13249_v16 = vpop.permute.xlu0 %2762  ;;  %v13255_v2 = vadd.f32 %v5340_v4, %v15776_v19  ;;  %v13259_v56 = vadd.f32 %v5356_v59, %v15778_v43  ;;  %v8473_v19 = vpop.eup %8472  ;;  %v4689_v4 = vmul.f32 0.6931472, %v8467_v8  ;;  %v5262_v59 = vand.u32 2147483647, %v13241_v38  ;;  %v15780_v43 = vld [vmem:[#allocation45_spill] sm:$0xff] }
 0x6df   :  { %8478 = vlog2.f32 %v5325_v14  ;;  %v5299_v54 = vmul.f32 1.442695, %v5275_v60  ;;  %v13271_v18 = vadd.f32 %v15780_v43, %v15740_v31  ;;  %v3404_v61 = vsel %vm2689_vm9, %v13011_v33, 0.0 }
 0x6e0   :  { %15777 = vst [vmem:[#allocation63_spill] sm:$0xff] %v13255_v2  ;;  %v5346_v36 = vmul.f32 0.6931472, %v8469_v57  ;;  %v5362_v46 = vmul.f32 0.6931472, %v8471_v5  ;;  %8480 = vlog2.f32 %v5989_v10  ;;  %v13277_v40 = vadd.f32 %v3404_v61, %v3403_v48  ;;  %v15785_v57 = vld [vmem:[#allocation80_spill] sm:$0xff] }
 0x6e1   :  { %3450 = vperm.xlu2 %8164, %v13134_v37   ;;  %15781 = vst [vmem:[#allocation78_spill] sm:$0xff] %v13271_v18  ;;  %v8475_v0 = vpop.eup %8474  ;;  %8482 = vpow2.f32 %v5964_v51  ;;  %v5960_v62 = vmul.f32 1.442695, %v5942_v7  ;;  %v5947_v8 = vsub.f32 0.0, %v5931_v58  ;;  %v13281_v60 = vmul.f32 %v15773_v55, %v12998_v22  ;;  %v15786_v51 = vld [vmem:[#allocation57_spill] sm:$0xff] }
 0x6e2   :  { %v13275_v37 = vpop.permute.xlu2 %7204  ;;  %15783 = vst [vmem:[#allocation103_spill] sm:$0xff] %v13277_v40  ;;  %v5320_v14 = vadd.f32 1.0, %v8473_v19  ;;  %v5278_v43 = vsub.f32 0.0, %v5262_v59  ;;  %v4053_v33 = vsel %vm2689_vm9, %v15784_v9, 0.0  ;;  %v13287_v10 = vmul.f32 %v15710_v1, %v15785_v57 }
 0x6e3   :  { %15782 = vst [vmem:[#allocation70_spill] sm:$0xff] %v13275_v37  ;;  %8484 = vpow2.f32 %v5299_v54  ;;  %v5929_v58 = vand.u32 2147483647, %v13271_v18  ;;  %v13295_v22 = vadd.f32 %v15786_v51, %v15644_v50  ;;  %4778 = vperm.xlu0 %8160, %v13281_v60   ;;  %v8477_v7 = vpop.eup %8476  ;;  %v15787_v19 = vmax.f32 %v13004_v41, 0.0  ;;  %v2347_v48 = vpop.xlane.xlu1 %2346  ;;  %v15790_v51 = vld [vmem:[#allocation92_spill] sm:$0xff] }
 0x6e4   :  { %v15788_v59 = vmax.f32 %v13022_v24, 0.0  ;;  %v5336_v57 = vmul.f32 0.6931472, %v8475_v0  ;;  %4150 = vperm.xlu1 %8161, %v13287_v10   ;;  %8486 = vpow2.f32 %v5960_v62  ;;  %v5970_v50 = vmul.f32 1.442695, %v5947_v8 }
 0x6e5   :  { %v13300_v9 = vadd.f32 %v4689_v4, %v15787_v19  ;;  %v8479_v37 = vpop.eup %8478  ;;  %v13310_v40 = vadd.f32 %v15790_v51, %v15740_v31  ;;  %v4054_v41 = vadd.f32 %v4053_v33, %v13166_v23  ;;  %v15792_v4 = vmax.f32 %v13034_v49, 0.0  ;;  %v15795_v49 = vld [vmem:[#allocation65_spill] sm:$0xff] }
 0x6e6   :  { %v13289_v5 = vpop.permute.xlu0 %2777  ;;  %v13304_v61 = vadd.f32 %v5346_v36, %v15788_v59  ;;  %v8481_v24 = vpop.eup %8480  ;;  %8488 = vlog2.f32 %v5320_v14  ;;  %v5305_v0 = vmul.f32 1.442695, %v5278_v43  ;;  %v4055_v19 = vsel %vm2689_vm9, %v13120_v52, 0.0  ;;  %v15797_v43 = vld [vmem:[#allocation66_spill] sm:$0xff] }
 0x6e7   :  { %15791 = vst [vmem:[#allocation77_spill] sm:$0xff] %v13310_v40  ;;  %v13316_v36 = vadd.f32 %v5362_v46, %v15792_v4  ;;  %v8483_v62 = vpop.eup %8482  ;;  %v5945_v59 = vsub.f32 0.0, %v5929_v58  ;;  %v5265_v51 = vand.u32 2147483647, %v13295_v22  ;;  %v4056_v54 = vadd.f32 %v4055_v19, %v4054_v41  ;;  %v15798_v19 = vld [vmem:[#allocation44_spill] sm:$0xff] }
 0x6e8   :  { %15789 = vst [vmem:[#allocation28_spill] sm:$0xff] %v13304_v61  ;;  %v5328_v33 = vadd.f32 1.0, %v8477_v7  ;;  %v13328_v46 = vadd.f32 %v15795_v49, %v15740_v31  ;;  %v13334_v52 = vmul.f32 %v15710_v1, %v15797_v43  ;;  %8490 = vpow2.f32 %v5970_v50 }
 0x6e9   :  { %3465 = vperm.xlu2 %8164, %v13179_v13   ;;  %15793 = vst [vmem:[#allocation69_spill] sm:$0xff] %v13316_v36  ;;  %v15794_v13 = vmax.f32 %v13063_v29, 0.0  ;;  %v8485_v4 = vpop.eup %8484  ;;  %v5934_v41 = vand.u32 2147483647, %v13310_v40  ;;  %v13340_v29 = vmul.f32 %v15773_v55, %v13085_v35  ;;  %v5352_v7 = vmul.f32 0.6931472, %v8479_v37 }
 0x6ea   :  { %v13330_v14 = vpop.permute.xlu2 %7208  ;;  %8492 = vpow2.f32 %v5305_v0  ;;  %v8487_v43 = vpop.eup %8486  ;;  %v6007_v8 = vmul.f32 0.6931472, %v8481_v24  ;;  %v5966_v50 = vmul.f32 1.442695, %v5945_v59  ;;  %v5323_v35 = vadd.f32 1.0, %v8485_v4  ;;  %v15799_v24 = vld [vmem:[#allocation53_spill] sm:$0xff] }
 0x6eb   :  { %v13324_v23 = vadd.f32 %v5336_v57, %v15794_v13  ;;  %15796 = vst [vmem:[#allocation47_spill] sm:$0xff] %v13330_v14  ;;  %v5992_v57 = vadd.f32 1.0, %v8483_v62  ;;  %v13344_v13 = vmul.f32 %v15710_v1, %v15798_v19  ;;  %v5281_v14 = vsub.f32 0.0, %v5265_v51  ;;  %4793 = vperm.xlu0 %8160, %v13340_v29   ;;  %v13350_v62 = vpop.permute.xlu1 %2742 }
 0x6ec   :  { %8494 = vrcp.f32 %v2347_v48  ;;  %v8489_v58 = vpop.eup %8488  ;;  %v5924_v37 = vand.u32 2147483647, %v13328_v46  ;;  %v4057_v0 = vsel %vm2689_vm9, %v13334_v52, 0.0  ;;  %v5950_v19 = vsub.f32 0.0, %v5934_v41 }
 0x6ed   :  { %8496 = vlog2.f32 %v5328_v33  ;;  %4165 = vperm.xlu1 %8161, %v13344_v13   ;;  %v13357_v59 = vadd.f32 %v15799_v24, %v15740_v31  ;;  %v4059_v48 = vsel %vm2689_vm9, %v13015_v21, 0.0  ;;  %v4058_v51 = vadd.f32 %v4057_v0, %v4056_v54 }
 0x6ee   :  { %v13346_v49 = vpop.permute.xlu0 %2792  ;;  %v15801_v33 = vmax.f32 %v13091_v34, 0.0  ;;  %8498 = vlog2.f32 %v5992_v57  ;;  %v5990_v63 = vadd.f32 1.0, %v8487_v43  ;;  %v8491_v61 = vpop.eup %8490  ;;  %v15803_v41 = vmax.f32 %v13095_v27, 0.0  ;;  %v15805_v34 = vld [vmem:[#allocation85_spill] sm:$0xff] }
 0x6ef   :  { %15800 = vst [vmem:[#allocation18_spill] sm:$0xff] %v13357_v59  ;;  %v5342_v24 = vmul.f32 0.6931472, %v8489_v58  ;;  %8500 = vpow2.f32 %v5966_v50  ;;  %v5311_v2 = vmul.f32 1.442695, %v5281_v14  ;;  %v4060_v57 = vadd.f32 %v4059_v48, %v4058_v51  ;;  %v15806_v50 = vld [vmem:[#allocation93_spill] sm:$0xff] }
 0x6f0   :  { %v13364_v4 = vadd.f32 %v5352_v7, %v15801_v33  ;;  %v13369_v36 = vadd.f32 %v6007_v8, %v15803_v41  ;;  %v8493_v21 = vpop.eup %8492  ;;  %8502 = vlog2.f32 %v5323_v35  ;;  %v4708_v7 = vmul.f32 %v15773_v55, %v15805_v34  ;;  %v15808_v48 = vld [vmem:[#allocation102_spill] sm:$0xff]  ;;  %v15809_v41 = vld [vmem:[#allocation59_spill] sm:$0xff] }
 0x6f1   :  { %3480 = vperm.xlu2 %8164, %v13221_v25   ;;  %v5940_v25 = vsub.f32 0.0, %v5924_v37  ;;  %v5976_v0 = vmul.f32 1.442695, %v5950_v19  ;;  %v5932_v33 = vand.u32 2147483647, %v13357_v59  ;;  %v4723_v27 = vsel %vm2689_vm9, %v13235_v6, 0.0 }
 0x6f2   :  { %15802 = vst [vmem:[#allocation51_spill] sm:$0xff] %v13364_v4  ;;  %v13371_v54 = vpop.permute.xlu2 %7210  ;;  %v8495_v43 = vpop.eup %8494  ;;  %v13380_v8 = vmul.f32 %v15773_v55, %v13147_v11  ;;  %8504 = vlog2.f32 %v5990_v63  ;;  %v5995_v58 = vadd.f32 1.0, %v8491_v61  ;;  %v13384_v35 = vadd.f32 %v15806_v50, %v15740_v31 }
 0x6f3   :  { %15804 = vst [vmem:[#allocation20_spill] sm:$0xff] %v13371_v54  ;;  %v8497_v14 = vpop.eup %8496  ;;  %v13390_v19 = vmul.f32 %v15710_v1, %v15808_v48  ;;  %v5326_v51 = vadd.f32 1.0, %v8493_v21  ;;  %8506 = vpow2.f32 %v5311_v2  ;;  %v4724_v11 = vsel %vm2689_vm9, %v4708_v7, 0.0 }
 0x6f4   :  { %15807 = vst [vmem:[#allocation105_spill] sm:$0xff] %v13384_v35  ;;  %4808 = vperm.xlu0 %8160, %v13380_v8   ;;  %v8499_v63 = vpop.eup %8498  ;;  %v5956_v61 = vmul.f32 1.442695, %v5940_v25  ;;  %v13396_v34 = vmul.f32 %v8495_v43, %v15809_v41  ;;  %v4061_v50 = vsel %vm2689_vm9, %v13174_v28, 0.0  ;;  %v13400_v39 = vadd.f32 %v4724_v11, %v4723_v27  ;;  %v13408_v41 = vpop.permute.xlu1 %2757 }
 0x6f5   :  { %4768 = vperm.xlu1 %8161, %v4708_v7   ;;  %v8501_v48 = vpop.eup %8500  ;;  %v5358_v21 = vmul.f32 0.6931472, %v8497_v14  ;;  %8508 = vpow2.f32 %v5976_v0  ;;  %v5948_v6 = vsub.f32 0.0, %v5932_v33  ;;  %v4062_v2 = vadd.f32 %v4061_v50, %v4060_v57  ;;  %v15823_v50 = vld [vmem:[#allocation38_spill] sm:$0xff] }
 0x6f6   :  { %v13386_v37 = vpop.permute.xlu0 %2807  ;;  %15810 = vst [vmem:[#allocation45_spill] sm:$0xff] %v13396_v34  ;;  %v8503_v54 = vpop.eup %8502  ;;  %v15811_v40 = vmax.f32 %v13124_v30, 0.0  ;;  %8510 = vlog2.f32 %v5995_v58  ;;  %v5937_v43 = vand.u32 2147483647, %v13384_v35  ;;  %v4063_v7 = vsel %vm2689_vm9, %v13390_v19, 0.0  ;;  %v15813_v30 = vld [vmem:[#allocation79_spill] sm:$0xff] }
 0x6f7   :  { %v6013_v0 = vmul.f32 0.6931472, %v8499_v63  ;;  %8512 = vlog2.f32 %v5326_v51  ;;  %v4064_v57 = vadd.f32 %v4063_v7, %v4062_v2  ;;  %v5993_v27 = vadd.f32 1.0, %v8501_v48 }
 0x6f8   :  { %v13405_v25 = vadd.f32 %v5342_v24, %v15811_v40  ;;  %v13410_v28 = vpop.f32.mrf.mxu3  ;;  %v8505_v33 = vpop.eup %8504  ;;  %8514 = vpow2.f32 %v5956_v61  ;;  %v13417_v40 = vadd.f32 %v15813_v30, %v15740_v31  ;;  %v13420_v24 = vperm.slane %v13396_v34, 0 }
 0x6f9   :  { %4095 = vperm.xlu2 %8164, %v13140_v45   ;;  %15812 = vst [vmem:[#allocation17_spill] sm:$0xff] %v13410_v28  ;;  %v8507_v58 = vpop.eup %8506  ;;  %v15816_v11 = vmax.f32 %v13158_v42, 0.0  ;;  %v5348_v51 = vmul.f32 0.6931472, %v8503_v54  ;;  %v5972_v2 = vmul.f32 1.442695, %v5948_v6  ;;  %v13434_v30 = vmul.f32 %v15773_v55, %v13212_v3 }
 0x6fa   :  { %15814 = vst [vmem:[#allocation80_spill] sm:$0xff] %v13417_v40  ;;  %v13422_v14 = vpop.permute.xlu2 %7214  ;;  %v5953_v48 = vsub.f32 0.0, %v5937_v43  ;;  %v2817_v7 = vmul.f32 %v13420_v24, %v13350_v62  ;;  %v15820_v54 = vld [vmem:[#allocation67_spill] sm:$0xff]  ;;  %v4065_v6 = vsel %vm2689_vm9, %v13069_v26, 0.0  ;;  %v15821_v43 = vld [vmem:[#allocation88_spill] sm:$0xff]  ;;  %8516 = vlog2.f32 %v5993_v27 }
 0x6fb   :  { %15815 = vst [vmem:[#allocation57_spill] sm:$0xff] %v13422_v14  ;;  %v13426_v63 = vadd.f32 %v5358_v21, %v15816_v11  ;;  %v8509_v45 = vpop.eup %8508  ;;  %v15818_v14 = vmax.f32 %v13185_v32, 0.0  ;;  %v13442_v21 = vadd.f32 %v15820_v54, %v15740_v31  ;;  %v13448_v11 = vmul.f32 %v15773_v55, %v15821_v43  ;;  %v15824_v32 = vld [vmem:[#allocation87_spill] sm:$0xff]  ;;  %v15826_v28 = vld [vmem:[#allocation24_spill] sm:$0xff] }
 0x6fc   :  { %v8511_v3 = vpop.eup %8510  ;;  %v5329_v61 = vadd.f32 1.0, %v8507_v58  ;;  %4823 = vperm.xlu0 %8160, %v13434_v30   ;;  %v15825_v26 = vmax.f32 %v13203_v47, 0.0  ;;  %v13462_v43 = vmul.f32 0.6931472, %v8505_v33  ;;  %8518 = vpow2.f32 %v5972_v2 }
 0x6fd   :  { %15817 = vst [vmem:[#allocation92_spill] sm:$0xff] %v13426_v63  ;;  %v13438_v42 = vadd.f32 %v6013_v0, %v15818_v14  ;;  %v13454_v0 = vadd.f32 %v15824_v32, %v15823_v50  ;;  %v5927_v14 = vand.u32 2147483647, %v13417_v40  ;;  %v8513_v54 = vpop.eup %8512  ;;  %4783 = vperm.xlu1 %8161, %v13448_v11   ;;  %v13467_v58 = vadd.f32 1.0, %v8509_v45 }
 0x6fe   :  { %v13450_v62 = vpop.permute.xlu0 %3425  ;;  %v13460_v34 = vadd.f32 %v5348_v51, %v15825_v26  ;;  %v8515_v27 = vpop.eup %8514  ;;  %v13469_v32 = vmul.f32 1.442695, %v5953_v48  ;;  %v2839_v35 = vadd.f32 %v15826_v28, %v2817_v7  ;;  %v4066_v47 = vadd.f32 %v4065_v6, %v4064_v57  ;;  %v15828_v26 = vld [vmem:[#allocation64_spill] sm:$0xff] }
 0x6ff   :  { %15819 = vst [vmem:[#allocation65_spill] sm:$0xff] %v13438_v42  ;;  %v13474_v51 = vmul.f32 0.6931472, %v8511_v3  ;;  %v2818_v2 = vmul.f32 %v13420_v24, %v13199_v17  ;;  %v5354_v45 = vmul.f32 0.6931472, %v8513_v54  ;;  %8520 = vlog2.f32 %v5329_v61  ;;  %v2773_v7 = vpop.permute.xlu1 %2772  ;;  %v15839_v42 = vld [vmem:[#allocation96_spill] sm:$0xff] }
 0x700   :  { %15822 = vst [vmem:[#allocation66_spill] sm:$0xff] %v13450_v62  ;;  %v13472_v59 = vpop.f32.mrf.mxu3  ;;  %v5943_v62 = vsub.f32 0.0, %v5927_v14  ;;  %v5988_v18 = vadd.f32 1.0, %v8515_v27  ;;  %v4071_v57 = vsel %vm2689_vm9, %v13116_v12, 0.0  ;;  %v4067_v6 = vsel %vm2689_vm9, %v13247_v44, 0.0  ;;  %v13489_v3 = vpop.eup %8516 }
 0x701   :  { %4110 = vperm.xlu2 %8164, %v13334_v52   ;;  %15827 = vst [vmem:[#allocation44_spill] sm:$0xff] %v13474_v51  ;;  %v13481_v52 = vmul.f32 %v15710_v1, %v15828_v26  ;;  %v2855_v26 = vmax.f32 %v2839_v35, 1e-30  ;;  %v2820_v61 = vmul.f32 %v13420_v24, %v13408_v41  ;;  %v13495_v14 = vmul.f32 %v15773_v55, %v13300_v9 }
 0x702   :  { %v2738_v63 = vpop.permute.xlu2 %2737  ;;  %15829 = vst [vmem:[#allocation53_spill] sm:$0xff] %v13489_v3  ;;  %v4068_v54 = vadd.f32 %v4067_v6, %v4066_v47  ;;  %v13497_v27 = vpop.eup %8518  ;;  %v2840_v12 = vadd.f32 %v15826_v28, %v2818_v2  ;;  %v13503_v44 = vmul.f32 %v15773_v55, %v12989_v20  ;;  %v15831_v41 = vmax.f32 %v13241_v38, 0.0  ;;  %v15832_v20 = vld [vmem:[#allocation72_spill] sm:$0xff]  ;;  %v15849_v3 = vld [vmem:[#allocation11_spill] sm:$0xff] }
 0x703   :  { %v2816_v17 = vmul.f32 %v13420_v24, %v2738_v63  ;;  %15830 = vst [vmem:[#allocation85_spill] sm:$0xff] %v13497_v27  ;;  %v4069_v35 = vsel %vm2689_vm9, %v13481_v52, 0.0  ;;  %v2821_v9 = vmul.f32 %v13420_v24, %v13249_v16  ;;  %v2824_v47 = vmul.f32 %v13420_v24, %v13289_v5 }
 0x704   :  { %v13509_v63 = vadd.f32 %v5354_v45, %v15831_v41  ;;  %4838 = vperm.xlu0 %8160, %v13495_v14   ;;  %v4070_v2 = vadd.f32 %v4069_v35, %v4068_v54  ;;  %8522 = vlog2.f32 %v5988_v18  ;;  %v13518_v6 = vadd.f32 %v15832_v20, %v15740_v31  ;;  %v15835_v45 = vld [vmem:[#allocation41_spill] sm:$0xff] }
 0x705   :  { %v2838_v48 = vadd.f32 %v15826_v28, %v2816_v17  ;;  %4798 = vperm.xlu1 %8161, %v13503_v44   ;;  %v13526_v16 = vmul.f32 %v15710_v1, %v15835_v45  ;;  %v13528_v5 = vpop.eup %8520  ;;  %8524 = vlog2.f32 %v2855_v26  ;;  %v2842_v18 = vadd.f32 %v15826_v28, %v2820_v61  ;;  %v15836_v41 = vld [vmem:[#allocation73_spill] sm:$0xff] }
 0x706   :  { %15833 = vst [vmem:[#allocation93_spill] sm:$0xff] %v13518_v6  ;;  %v13521_v38 = vpop.permute.xlu0 %3440  ;;  %v4072_v35 = vadd.f32 %v4071_v57, %v4070_v2  ;;  %v13537_v20 = vmul.f32 1.442695, %v5943_v62  ;;  %v2856_v33 = vmax.f32 %v2840_v12, 1e-30  ;;  %v4077_v1 = vsel %vm2689_vm9, %v13170_v15, 0.0 }
 0x707   :  { %v2854_v17 = vmax.f32 %v2838_v48, 1e-30  ;;  %15834 = vst [vmem:[#allocation102_spill] sm:$0xff] %v13521_v38  ;;  %v13535_v48 = vmul.f32 %v15773_v55, %v15836_v41  ;;  %v2843_v26 = vadd.f32 %v15826_v28, %v2821_v9  ;;  %v2846_v61 = vadd.f32 %v15826_v28, %v2824_v47  ;;  %v2788_v41 = vpop.permute.xlu1 %2787  ;;  %v15837_v15 = vld [vmem:[#allocation58_spill] sm:$0xff] }
 0x708   :  { %v13531_v54 = vpop.f32.mrf.mxu3  ;;  %v4728_v2 = vsel %vm2689_vm9, %v13281_v60, 0.0  ;;  %v2823_v62 = vmul.f32 %v13420_v24, %v2773_v7  ;;  %v13553_v38 = vmul.f32 %v15837_v15, %v12993_v53  ;;  %v15838_v7 = vld [vmem:[#allocation101_spill] sm:$0xff]  ;;  %v13565_v40 = vadd.f32 %v15839_v42, %v15823_v50 }
 0x709   :  { %4125 = vperm.xlu2 %8164, %v13390_v19   ;;  %v4073_v19 = vsel %vm2689_vm9, %v13287_v10, 0.0  ;;  %8526 = vlog2.f32 %v2854_v17  ;;  %v4075_v10 = vsel %vm2689_vm9, %v13526_v16, 0.0  ;;  %v2858_v17 = vmax.f32 %v2842_v18, 1e-30 }
 0x70a   :  { %v2753_v45 = vpop.permute.xlu2 %2752  ;;  %v4074_v57 = vadd.f32 %v4073_v19, %v4072_v35  ;;  %v4726_v47 = vsel %vm2689_vm9, %v13535_v48, 0.0  ;;  %v8523_v35 = vpop.eup %8522  ;;  %8528 = vlog2.f32 %v2856_v33  ;;  %v13560_v19 = vmul.f32 %v15773_v55, %v15838_v7  ;;  %15840 = vst [vmem:[#allocation59_spill] sm:$0xff] %v13565_v40 }
 0x70b   :  { %v2819_v12 = vmul.f32 %v13420_v24, %v2753_v45  ;;  %v4727_v45 = vadd.f32 %v4726_v47, %v13400_v39  ;;  %v8525_v18 = vpop.eup %8524  ;;  %v2859_v53 = vmax.f32 %v2843_v26, 1e-30  ;;  %v4079_v33 = vsel %vm2689_vm9, %v13344_v13, 0.0 }
 0x70c   :  { %v4076_v9 = vadd.f32 %v4075_v10, %v4074_v57  ;;  %v2862_v57 = vmax.f32 %v2846_v61, 1e-30  ;;  %5436 = vperm.xlu0 %8160, %v13553_v38   ;;  %8530 = vlog2.f32 %v2858_v17  ;;  %v2826_v42 = vmul.f32 %v13420_v24, %v2788_v41 }
 0x70d   :  { %v2841_v60 = vadd.f32 %v15826_v28, %v2819_v12  ;;  %v2845_v12 = vadd.f32 %v15826_v28, %v2823_v62  ;;  %4813 = vperm.xlu1 %8161, %v13560_v19   ;;  %v4729_v39 = vadd.f32 %v4728_v2, %v4727_v45  ;;  %v6005_v2 = vmul.f32 0.6931472, %v8523_v35 }
 0x70e   :  { %v4078_v10 = vadd.f32 %v4077_v1, %v4076_v9  ;;  %v5930_v1 = vand.u32 2147483647, %v13518_v6  ;;  %v15842_v9 = vld [vmem:[#allocation71_spill] sm:$0xff]  ;;  %v13581_v62 = vpop.permute.xlu0 %3455  ;;  %v6597_v17 = vand.u32 2147483647, %v13565_v40 }
 0x70f   :  { %v8527_v4 = vpop.eup %8526  ;;  %v2857_v7 = vmax.f32 %v2841_v60, 1e-30  ;;  %v13579_v13 = vadd.f32 %v15842_v9, %v15823_v50  ;;  %15843 = vst [vmem:[#allocation67_spill] sm:$0xff] %v13581_v62  ;;  %v15844_v60 = vld [vmem:[#allocation27_spill] sm:$0xff]  ;;  %v2848_v9 = vadd.f32 %v15826_v28, %v2826_v42 }
 0x710   :  { %v2871_v26 = vmul.f32 0.6931472, %v8527_v4  ;;  %v5006_v61 = vpop.f32.mrf.mxu3  ;;  %v13574_v47 = vadd.f32 %v4079_v33, %v4078_v10  ;;  %v2873_v4 = vmul.f32 0.6931472, %v8525_v18  ;;  %v8529_v45 = vpop.eup %8528  ;;  %v2861_v10 = vmax.f32 %v2845_v12, 1e-30 }
 0x711   :  { %4140 = vperm.xlu2 %8164, %v13481_v52   ;;  %8532 = vlog2.f32 %v2857_v7  ;;  %v13585_v52 = vmul.f32 %v15773_v55, %v15844_v60  ;;  %v4730_v33 = vsel %vm2689_vm9, %v13448_v11, 0.0  ;;  %v4734_v18 = vsel %vm2689_vm9, %v13340_v29, 0.0 }
 0x712   :  { %15841 = vst [vmem:[#allocation79_spill] sm:$0xff] %v13574_v47  ;;  %8534 = vlog2.f32 %v2859_v53  ;;  %v2768_v41 = vpop.permute.xlu2 %2767  ;;  %v2902_v62 = vadd.f32 %v2873_v4, %v2871_v26  ;;  %v15845_v47 = vld [vmem:[#allocation19_spill] sm:$0xff]  ;;  %v4731_v35 = vadd.f32 %v4730_v33, %v4729_v39  ;;  %v13605_v42 = vsub.f32 0.0, %v5930_v1  ;;  %v2803_v39 = vpop.permute.xlu1 %2802 }
 0x713   :  { %8536 = vlog2.f32 %v2862_v57  ;;  %v2822_v7 = vmul.f32 %v13420_v24, %v2768_v41  ;;  %v13594_v60 = vmul.f32 %v15837_v15, %v15845_v47  ;;  %v15846_v57 = vld [vmem:[#allocation55_spill] sm:$0xff]  ;;  %v4732_v11 = vsel %vm2689_vm9, %v13585_v52, 0.0  ;;  %v8531_v41 = vpop.eup %8530 }
 0x714   :  { %v13601_v12 = vmul.f32 %v15773_v55, %v15846_v57  ;;  %v2875_v26 = vmul.f32 0.6931472, %v8529_v45  ;;  %v2827_v47 = vmul.f32 %v13420_v24, %v13346_v49  ;;  %v4733_v29 = vadd.f32 %v4732_v11, %v4731_v35 }
 0x715   :  { %v2844_v53 = vadd.f32 %v15826_v28, %v2822_v7  ;;  %5451 = vperm.xlu0 %8160, %v13594_v60   ;;  %v15847_v33 = vmax.f32 %v13328_v46, 0.0  ;;  %8538 = vlog2.f32 %v2861_v10  ;;  %v2864_v45 = vmax.f32 %v2848_v9, 1e-30 }
 0x716   :  { %4828 = vperm.xlu1 %8161, %v13601_v12   ;;  %v2903_v6 = vadd.f32 %v2902_v62, %v2875_v26  ;;  %v4735_v27 = vadd.f32 %v4734_v18, %v4733_v29  ;;  %v13617_v11 = vsub.f32 0.0, %v6597_v17  ;;  %v2829_v46 = vmul.f32 %v13420_v24, %v2803_v39  ;;  %v13625_v18 = vpop.permute.xlu0 %3470  ;;  %v15852_v39 = vld [vmem:[#allocation32_spill] sm:$0xff] }
 0x717   :  { %v8533_v4 = vpop.eup %8532  ;;  %v13612_v7 = vadd.f32 %v6005_v2, %v15847_v33  ;;  %v2860_v40 = vmax.f32 %v2844_v53, 1e-30  ;;  %v15848_v2 = vld [vmem:[#allocation8_spill] sm:$0xff]  ;;  %v2879_v10 = vmul.f32 0.6931472, %v8531_v41  ;;  %v2849_v53 = vadd.f32 %v15826_v28, %v2827_v47  ;;  %15850 = vst [vmem:[#allocation88_spill] sm:$0xff] %v13625_v18 }
 0x718   :  { %v8535_v1 = vpop.eup %8534  ;;  %v2877_v49 = vmul.f32 0.6931472, %v8533_v4  ;;  %v5009_v50 = vpop.f32.mrf.mxu3  ;;  %v2830_v62 = vmul.f32 %v13420_v24, %v13386_v37  ;;  %v2851_v47 = vadd.f32 %v15826_v28, %v2829_v46  ;;  %v5382_v37 = vmul.f32 %v15837_v15, %v13324_v23  ;;  %v15853_v4 = vld [vmem:[#allocation22_spill] sm:$0xff] }
 0x719   :  { %4155 = vperm.xlu2 %8164, %v13526_v16   ;;  %v8537_v35 = vpop.eup %8536  ;;  %8540 = vlog2.f32 %v2860_v40  ;;  %v5010_v33 = vadd.f32 %v5009_v50, %v15848_v2  ;;  %v5007_v16 = vadd.f32 %v5006_v61, %v15849_v3  ;;  %v2881_v9 = vmul.f32 0.6931472, %v8535_v1  ;;  %v15851_v40 = vld [vmem:[#allocation10_spill] sm:$0xff] }
 0x71a   :  { %v2904_v57 = vadd.f32 %v2903_v6, %v2877_v49  ;;  %v2783_v51 = vpop.permute.xlu2 %2782  ;;  %8542 = vlog2.f32 %v2864_v45  ;;  %v5004_v50 = vadd.f32 %v13531_v54, %v15851_v40  ;;  %v13632_v6 = vmul.f32 %v15837_v15, %v15852_v39 }
 0x71b   :  { %v5015_v17 = vmax.f32 %v5010_v33, 0.0  ;;  %v2825_v26 = vmul.f32 %v13420_v24, %v2783_v51  ;;  %v8539_v61 = vpop.eup %8538  ;;  %v13640_v51 = vmul.f32 %v15773_v55, %v15853_v4  ;;  %v2887_v1 = vmul.f32 0.6931472, %v8537_v35 }
 0x71c   :  { %v2905_v41 = vadd.f32 %v2904_v57, %v2879_v10  ;;  %v2865_v54 = vmax.f32 %v2849_v53, 1e-30  ;;  %v15854_v57 = vld [vmem:[#allocation6_spill] sm:$0xff]  ;;  %v5014_v49 = vmax.f32 %v5007_v16, 0.0  ;;  %v4740_v46 = vsel %vm2689_vm9, %v13380_v8, 0.0 }
 0x71d   :  { %v2847_v29 = vadd.f32 %v15826_v28, %v2825_v26  ;;  %5031 = vmatpush.msra.mxu2 %v5015_v17  ;;  %v5001_v45 = vadd.f32 %v13472_v59, %v15854_v57  ;;  %5466 = vperm.xlu0 %8160, %v13632_v6   ;;  %v13648_v10 = vadd.f32 %v15826_v28, %v2830_v62  ;;  %v4736_v23 = vsel %vm2689_vm9, %v13503_v44, 0.0  ;;  %v15855_v57 = vld [vmem:[#allocation40_spill] sm:$0xff] }
 0x71e   :  { %5446 = vperm.xlu1 %8161, %v5382_v37   ;;  %v5013_v35 = vmax.f32 %v5004_v50, 0.0  ;;  %v2906_v59 = vadd.f32 %v2905_v41, %v2881_v9  ;;  %v4737_v16 = vadd.f32 %v4736_v23, %v4735_v27  ;;  %v2885_v26 = vmul.f32 0.6931472, %v8539_v61  ;;  %v8065_v41 = vld [vmem:[%s15206_s1 + $0x28] sm:$0xff] }
 0x71f   :  { %v8541_v33 = vpop.eup %8540  ;;  %v2863_v17 = vmax.f32 %v2847_v29, 1e-30  ;;  %5032 = vmatpush.msra.mxu2 %v5014_v49  ;;  %v2867_v39 = vmax.f32 %v2851_v47, 1e-30  ;;  %v4738_v8 = vsel %vm2689_vm9, %v13640_v51, 0.0  ;;  %v5012_v4 = vmax.f32 %v5001_v45, 0.0 }
 0x720   :  { %v2883_v53 = vmul.f32 0.6931472, %v8541_v33  ;;  %v8543_v62 = vpop.eup %8542  ;;  %v4739_v29 = vadd.f32 %v4738_v8, %v4737_v16  ;;  %v2868_v9 = vmax.f32 %v13648_v10, 1e-30  ;;  %v4746_v27 = vsel %vm2689_vm9, %v13434_v30, 0.0  ;;  %v15856_v45 = vld [vmem:[#allocation42_spill] sm:$0xff]  ;;  %v13674_v30 = vpop.permute.xlu0 %3485 }
 0x721   :  { %4773 = vperm.xlu2 %8164, %v13535_v48   ;;  %8544 = vlog2.f32 %v2863_v17  ;;  %5033 = vmatpush.msra.mxu2 %v5013_v35  ;;  %v13657_v48 = vmul.f32 %v15773_v55, %v15855_v57  ;;  %v5396_v61 = vsel %vm2689_vm9, %v13553_v38, 0.0  ;;  %v13670_v57 = vmul.f32 %v15837_v15, %v15856_v45  ;;  %15857 = vst [vmem:[#allocation87_spill] sm:$0xff] %v13674_v30  ;;  %v15858_v23 = vld [vmem:[#allocation21_spill] sm:$0xff]  ;;  %v15861_v16 = vld [vmem:[#allocation39_spill] sm:$0xff] }
 0x722   :  { %v2907_v18 = vadd.f32 %v2906_v59, %v2883_v53  ;;  %v2798_v44 = vpop.permute.xlu2 %2797  ;;  %8546 = vlog2.f32 %v2865_v54  ;;  %v4741_v54 = vadd.f32 %v4740_v46, %v4739_v29  ;;  %v4742_v49 = vsel %vm2689_vm9, %v13560_v19, 0.0 }
 0x723   :  { %v2828_v50 = vmul.f32 %v13420_v24, %v2798_v44  ;;  %5034 = vmatpush.msra.mxu2 %v5012_v4  ;;  %v13679_v10 = vmul.f32 %v15837_v15, %v13405_v25  ;;  %v15859_v38 = vrot.slane %v15858_v23, 4  ;;  %v2891_v46 = vmul.f32 0.6931472, %v8543_v62  ;;  %v15862_v4 = vld [vmem:[#allocation99_spill] sm:$0xff] }
 0x724   :  { %v2908_v47 = vadd.f32 %v2907_v18, %v2885_v26  ;;  %v15860_v18 = vld [vmem:[#allocation37_spill] sm:$0xff]  ;;  %8548 = vlog2.f32 %v2867_v39  ;;  %v4744_v19 = vsel %vm2689_vm9, %v13657_v48, 0.0  ;;  %v4743_v35 = vadd.f32 %v4742_v49, %v4741_v54 }
 0x725   :  { %v2850_v33 = vadd.f32 %v15826_v28, %v2828_v50  ;;  %8048 = vmatmul.msk.f32.vlgmr.msra.gmra.mxu2 %vm1109_vm1, %v15859_v38  ;;  %v13686_v17 = vmul.f32 %v15860_v18, %v13369_v36  ;;  %5481 = vperm.xlu0 %8160, %v13670_v57   ;;  %v5399_v25 = vsel %vm2689_vm9, %v5382_v37, 0.0  ;;  %v13696_v36 = vmul.f32 %v15860_v18, %v13612_v7 }
 0x726   :  { %5671 = vmatpush.msrb.mxu2 %v8065_v41  ;;  %5461 = vperm.xlu1 %8161, %v13679_v10   ;;  %v13700_v26 = vmul.f32 %v15837_v15, %v15861_v16  ;;  %v2909_v8 = vadd.f32 %v2908_v47, %v2887_v1  ;;  %v4745_v62 = vadd.f32 %v4744_v19, %v4743_v35  ;;  %v4748_v54 = vsel %vm2689_vm9, %v13601_v12, 0.0  ;;  %v15863_v12 = vld [vmem:[#allocation63_spill] sm:$0xff] }
 0x727   :  { %v8545_v53 = vpop.eup %8544  ;;  %v2866_v59 = vmax.f32 %v2850_v33, 1e-30  ;;  %v13704_v44 = vmul.f32 %v15773_v55, %v15862_v4  ;;  %v6069_v7 = vsel %vm2689_vm9, %v13696_v36, 0.0  ;;  %v4752_v55 = vsel %vm2689_vm9, %v13495_v14, 0.0  ;;  %v8993_v14 = vld [vmem:[%s15217_s12] sm:$0xff] }
 0x728   :  { %v2889_v39 = vmul.f32 0.6931472, %v8545_v53  ;;  %v8547_v37 = vpop.eup %8546  ;;  %v5397_v29 = vsel %vm2689_vm9, %v13700_v26, 0.0  ;;  %v4747_v45 = vadd.f32 %v4746_v27, %v4745_v62  ;;  %v13721_v19 = vmul.f32 %v15837_v15, %v13259_v56  ;;  %v13749_v62 = vpop.permute.xlu0 %4100 }
 0x729   :  { %4788 = vperm.xlu2 %8164, %v13585_v52   ;;  %8550 = vlog2.f32 %v2866_v59  ;;  %v6070_v52 = vsel %vm2689_vm9, %v13686_v17, 0.0  ;;  %v5398_v47 = vadd.f32 %v5397_v29, %v5396_v61  ;;  %v13736_v56 = vmul.f32 %v15837_v15, %v15863_v12  ;;  %15866 = vst [vmem:[#allocation24_spill] sm:$0xff] %v13749_v62  ;;  %v8994_v12 = vld [vmem:[%s15217_s12 + $0x8] sm:$0xff] }
 0x72a   :  { %v2910_v50 = vadd.f32 %v2909_v8, %v2889_v39  ;;  %v2813_v41 = vpop.permute.xlu2 %2812  ;;  %v13712_v1 = vadd.f32 %v6070_v52, %v6069_v7  ;;  %8552 = vlog2.f32 %v2868_v9  ;;  %v8549_v33 = vpop.eup %8548  ;;  %v4749_v35 = vadd.f32 %v4748_v54, %v4747_v45 }
 0x72b   :  { %v2831_v49 = vmul.f32 %v13420_v24, %v2813_v41  ;;  %v5400_v27 = vadd.f32 %v5399_v25, %v5398_v47  ;;  %v13726_v9 = vmul.f32 %v15837_v15, %v13460_v34  ;;  %v4750_v24 = vsel %vm2689_vm9, %v13704_v44, 0.0 }
 0x72c   :  { %v2911_v38 = vadd.f32 %v2910_v50, %v2891_v46  ;;  %8554 = vpow2.f32 %v13537_v20  ;;  %v2893_v34 = vmul.f32 0.6931472, %v8547_v37  ;;  %v4751_v46 = vadd.f32 %v4750_v24, %v4749_v35 }
 0x72d   :  { %v2853_v53 = vadd.f32 %v15826_v28, %v2831_v49  ;;  %8066 = vmatmul.msk.f32.vlgmr.msrb.gmra.mxu2 %vm187_vm0, %v8993_v14  ;;  %v15864_v28 = vld [vmem:[#allocation56_spill] sm:$0xff]  ;;  %5496 = vperm.xlu0 %8160, %v13721_v19   ;;  %v15865_v59 = vand.u32 2147483647, %v13579_v13  ;;  %v6629_v39 = vmul.f32 1.442695, %v13617_v11  ;;  %v5401_v8 = vsel %vm2689_vm9, %v13594_v60, 0.0 }
 0x72e   :  { %v13741_v61 = vadd.f32 %v15864_v28, %v15740_v31  ;;  %5476 = vperm.xlu1 %8161, %v13726_v9   ;;  %v2912_v37 = vadd.f32 %v2911_v38, %v2893_v34  ;;  %v13753_v52 = vadd.f32 %v4752_v55, %v4751_v46  ;;  %v5402_v7 = vadd.f32 %v5401_v8, %v5400_v27  ;;  %v15871_v28 = vld [vmem:[#allocation28_spill] sm:$0xff] }
 0x72f   :  { %v8551_v25 = vpop.eup %8550  ;;  %v6614_v16 = vsub.f32 0.0, %v15865_v59  ;;  %v2869_v20 = vmax.f32 %v2853_v53, 1e-30  ;;  %v5968_v50 = vmul.f32 1.442695, %v13605_v42  ;;  %v5405_v11 = vsel %vm2689_vm9, %v13679_v10, 0.0 }
 0x730   :  { %v2895_v4 = vmul.f32 0.6931472, %v8551_v25  ;;  %v8553_v29 = vpop.eup %8552  ;;  %v5403_v60 = vsel %vm2689_vm9, %v13736_v56, 0.0  ;;  %v5933_v41 = vand.u32 2147483647, %v13741_v61  ;;  %v15870_v53 = vld [vmem:[#allocation69_spill] sm:$0xff]  ;;  %v13783_v34 = vmul.f32 %v15837_v15, %v15871_v28 }
 0x731   :  { %4803 = vperm.xlu2 %8164, %v13640_v51   ;;  %8556 = vlog2.f32 %v2869_v20  ;;  %v2897_v45 = vmul.f32 0.6931472, %v8549_v33  ;;  %v5404_v54 = vadd.f32 %v5403_v60, %v5402_v7  ;;  %v15868_v55 = vand.u32 2147483647, %v13442_v21  ;;  %v15872_v46 = vld [vmem:[#allocation48_spill] sm:$0xff] }
 0x732   :  { %v2913_v47 = vadd.f32 %v2912_v37, %v2895_v4  ;;  %v13761_v51 = vpop.permute.xlu2 %3420  ;;  %8558 = vpow2.f32 %v13469_v32  ;;  %v15869_v42 = vand.u32 2147483647, %v13454_v0  ;;  %v6631_v10 = vmul.f32 1.442695, %v6614_v16  ;;  %v8555_v35 = vpop.eup %8554  ;;  %v15873_v8 = vld [vmem:[#allocation76_spill] sm:$0xff] }
 0x733   :  { %15867 = vst [vmem:[#allocation64_spill] sm:$0xff] %v13761_v51  ;;  %v5951_v49 = vsub.f32 0.0, %v15868_v55  ;;  %8560 = vpow2.f32 %v6629_v39  ;;  %v13770_v14 = vmul.f32 %v15837_v15, %v15870_v53  ;;  %v5406_v33 = vadd.f32 %v5405_v11, %v5404_v54  ;;  %v15876_v54 = vld [vmem:[#allocation46_spill] sm:$0xff]  ;;  %v15916_v51 = vld [vmem:[#allocation91_spill] sm:$0xff] }
 0x734   :  { %v6615_v38 = vsub.f32 0.0, %v15869_v42  ;;  %v2914_v27 = vadd.f32 %v2913_v47, %v2897_v45  ;;  %v5360_v24 = vmul.f32 0.6931472, %v13528_v5  ;;  %8562 = vpow2.f32 %v5968_v50  ;;  %v13803_v45 = vpop.permute.xlu0 %4115 }
 0x735   :  { %v13775_v32 = vmul.f32 %v15837_v15, %v13509_v63  ;;  %8067 = vmatmul.msk.f32.gmra.mxu2 %vm187_vm0, %v8994_v12  ;;  %8564 = vlog2.f32 %v13467_v58  ;;  %v13788_v5 = vadd.f32 %v15872_v46, %v15740_v31  ;;  %v5949_v25 = vsub.f32 0.0, %v5933_v41  ;;  %5511 = vperm.xlu0 %8160, %v13770_v14   ;;  %15875 = vst [vmem:[#allocation72_spill] sm:$0xff] %v13803_v45 }
 0x736   :  { %v2899_v59 = vmul.f32 0.6931472, %v8553_v29  ;;  %v5978_v16 = vmul.f32 1.442695, %v5951_v49  ;;  %v5991_v39 = vadd.f32 1.0, %v8555_v35  ;;  %v13793_v20 = vadd.f32 %v15873_v8, %v15740_v31  ;;  %v15880_v35 = vld [vmem:[#allocation94_spill] sm:$0xff] }
 0x737   :  { %v8557_v63 = vpop.eup %8556  ;;  %v5407_v4 = vsel %vm2689_vm9, %v13632_v6, 0.0  ;;  %5491 = vperm.xlu1 %8161, %v13775_v32   ;;  %8566 = vpow2.f32 %v6631_v10  ;;  %v15874_v50 = vmax.f32 %v13295_v22, 0.0  ;;  %v6633_v60 = vmul.f32 1.442695, %v6615_v38 }
 0x738   :  { %v2901_v58 = vmul.f32 0.6931472, %v8557_v63  ;;  %v2915_v37 = vadd.f32 %v2914_v27, %v2899_v59  ;;  %v5408_v7 = vadd.f32 %v5407_v4, %v5406_v33  ;;  %v8559_v29 = vpop.eup %8558  ;;  %v5411_v41 = vsel %vm2689_vm9, %v13726_v9, 0.0  ;;  %v15882_v27 = vld [vmem:[#allocation44_spill] sm:$0xff]  ;;  %v15883_v33 = vld [vmem:[#allocation53_spill] sm:$0xff]  ;;  %v13831_v4 = vld [vmem:[%s15217_s12 + $0x10] sm:$0xff] }
 0x739   :  { %4818 = vperm.xlu2 %8164, %v13657_v48   ;;  %v5377_v11 = vadd.f32 %v5360_v24, %v15874_v50  ;;  %v5409_v6 = vsel %vm2689_vm9, %v13783_v34, 0.0  ;;  %v8561_v47 = vpop.eup %8560  ;;  %v15877_v48 = vmax.f32 %v15876_v54, 0.0  ;;  %v5974_v49 = vmul.f32 1.442695, %v5949_v25  ;;  %v15889_v54 = vld [vmem:[#allocation14_spill] sm:$0xff] }
 0x73a   :  { %v13812_v42 = vadd.f32 %v2915_v37, %v2901_v58  ;;  %v13814_v22 = vpop.permute.xlu2 %3435  ;;  %v5410_v38 = vadd.f32 %v5409_v6, %v5408_v7  ;;  %v8563_v10 = vpop.eup %8562  ;;  %v15881_v9 = vmax.f32 %v15880_v35, 0.0  ;;  %v6015_v24 = vmul.f32 0.6931472, %v15883_v33  ;;  %v15886_v37 = vld [vmem:[#allocation38_spill] sm:$0xff]  ;;  %v15887_v7 = vld [vmem:[#allocation75_spill] sm:$0xff] }
 0x73b   :  { %v13810_v55 = vadd.f32 %v13462_v43, %v15877_v48  ;;  %15879 = vst [vmem:[#allocation73_spill] sm:$0xff] %v13814_v22  ;;  %8568 = vlog2.f32 %v5991_v39  ;;  %v5936_v12 = vand.u32 2147483647, %v13793_v20  ;;  %v8565_v28 = vpop.eup %8564  ;;  %v15884_v43 = vld [vmem:[#allocation85_spill] sm:$0xff]  ;;  %v5938_v25 = vand.u32 2147483647, %v13788_v5 }
 0x73c   :  { %15878 = vst [vmem:[#allocation41_spill] sm:$0xff] %v13812_v42  ;;  %v13819_v53 = vadd.f32 %v15882_v27, %v15881_v9  ;;  %v5996_v46 = vadd.f32 1.0, %v15884_v43  ;;  %8570 = vpow2.f32 %v5978_v16  ;;  %v5412_v59 = vadd.f32 %v5411_v41, %v5410_v38  ;;  %v15885_v39 = vld [vmem:[#allocation51_spill] sm:$0xff]  ;;  %v15891_v43 = vld [vmem:[#allocation80_spill] sm:$0xff] }
 0x73d   :  { %8572 = vpow2.f32 %v6633_v60  ;;  %v6661_v63 = vadd.f32 1.0, %v8561_v47  ;;  %v13826_v8 = vmul.f32 %v15837_v15, %v5377_v11  ;;  %8068 = vmatmul.msk.f32.gmra.mxu2 %vm187_vm0, %v13831_v4  ;;  %v13837_v58 = vmul.f32 %v15837_v15, %v15885_v39  ;;  %v8567_v16 = vpop.eup %8566  ;;  %v15888_v11 = vld [vmem:[#allocation97_spill] sm:$0xff]  ;;  %6114 = vperm.xlu0 %8160, %v13686_v17  }
 0x73e   :  { %v13841_v50 = vadd.f32 %v15887_v7, %v15886_v37  ;;  %v5994_v60 = vadd.f32 1.0, %v8563_v10  ;;  %8574 = vpow2.f32 %v5974_v49  ;;  %v13845_v41 = vadd.f32 %v15888_v11, %v15886_v37  ;;  %v15893_v7 = vld [vmem:[#allocation65_spill] sm:$0xff] }
 0x73f   :  { %v6001_v6 = vadd.f32 1.0, %v8559_v29  ;;  %v5952_v47 = vsub.f32 0.0, %v5936_v12  ;;  %v13850_v48 = vadd.f32 %v15889_v54, %v15740_v31  ;;  %v5413_v38 = vsel %vm2689_vm9, %v13670_v57, 0.0  ;;  %5506 = vperm.xlu1 %8161, %v13826_v8   ;;  %v15894_v54 = vld [vmem:[#allocation78_spill] sm:$0xff] }
 0x740   :  { %v6025_v49 = vmul.f32 0.6931472, %v8565_v28  ;;  %8576 = vlog2.f32 %v5996_v46  ;;  %v5954_v10 = vsub.f32 0.0, %v5938_v25  ;;  %v5414_v35 = vadd.f32 %v5413_v38, %v5412_v59 }
 0x741   :  { %4833 = vperm.xlu2 %8164, %v13704_v44   ;;  %v8569_v9 = vpop.eup %8568  ;;  %v6662_v27 = vadd.f32 1.0, %v8567_v16  ;;  %8578 = vlog2.f32 %v6661_v63  ;;  %v5417_v17 = vsel %vm2689_vm9, %v13775_v32, 0.0  ;;  %v5415_v31 = vsel %vm2689_vm9, %v13837_v58, 0.0  ;;  %v13866_v32 = vpop.permute.xlu0 %4130 }
 0x742   :  { %v8571_v29 = vpop.eup %8570  ;;  %v6602_v57 = vand.u32 2147483647, %v13841_v50  ;;  %8580 = vlog2.f32 %v5994_v60  ;;  %v6600_v33 = vand.u32 2147483647, %v13845_v41  ;;  %v13862_v44 = vpop.permute.xlu2 %3450  ;;  %v5416_v12 = vadd.f32 %v5415_v31, %v5414_v35  ;;  %15892 = vst [vmem:[#allocation101_spill] sm:$0xff] %v13866_v32  ;;  %v13883_v31 = vld [vmem:[%s15217_s12 + $0x18] sm:$0xff] }
 0x743   :  { %15890 = vst [vmem:[#allocation58_spill] sm:$0xff] %v13862_v44  ;;  %v8573_v28 = vpop.eup %8572  ;;  %8582 = vlog2.f32 %v6001_v6  ;;  %v5911_v46 = vmax.f32 %v15891_v43, 0.0  ;;  %v5980_v25 = vmul.f32 1.442695, %v5952_v47  ;;  %v5939_v59 = vand.u32 2147483647, %v13850_v48 }
 0x744   :  { %v8575_v63 = vpop.eup %8574  ;;  %v6011_v39 = vmul.f32 0.6931472, %v8569_v9  ;;  %v5984_v16 = vmul.f32 1.442695, %v5954_v10  ;;  %v13870_v60 = vmul.f32 %v15860_v18, %v15893_v7  ;;  %v5418_v11 = vadd.f32 %v5417_v17, %v5416_v12  ;;  %v15896_v6 = vld [vmem:[#allocation86_spill] sm:$0xff]  ;;  %v15897_v10 = vld [vmem:[#allocation92_spill] sm:$0xff] }
 0x745   :  { %v15895_v38 = vmax.f32 %v15894_v54, 0.0  ;;  %8584 = vlog2.f32 %v6662_v27  ;;  %v13878_v47 = vadd.f32 %v15896_v6, %v15886_v37  ;;  %8069 = vmatmul.msk.f32.gmra.mxu2 %vm187_vm0, %v13883_v31  ;;  %v13889_v9 = vmul.f32 %v15837_v15, %v15897_v10  ;;  %v15900_v7 = vld [vmem:[#allocation93_spill] sm:$0xff] }
 0x746   :  { %v8577_v17 = vpop.eup %8576  ;;  %v6618_v43 = vsub.f32 0.0, %v6602_v57  ;;  %v5914_v54 = vmax.f32 %v15900_v7, 0.0  ;;  %6129 = vperm.xlu0 %8160, %v13870_v60   ;;  %v5997_v32 = vadd.f32 1.0, %v8575_v63  ;;  %8586 = vpow2.f32 %v5980_v25 }
 0x747   :  { %v13874_v35 = vadd.f32 %v6015_v24, %v15895_v38  ;;  %v15898_v24 = vld [vmem:[#allocation77_spill] sm:$0xff]  ;;  %v6616_v38 = vsub.f32 0.0, %v6600_v33  ;;  %v8579_v6 = vpop.eup %8578  ;;  %v5955_v45 = vsub.f32 0.0, %v5939_v59  ;;  %v5419_v62 = vsel %vm2689_vm9, %v13721_v19, 0.0  ;;  %6109 = vperm.xlu1 %8161, %v13696_v36  }
 0x748   :  { %v15899_v12 = vmax.f32 %v15898_v24, 0.0  ;;  %v8581_v15 = vpop.eup %8580  ;;  %v6039_v10 = vadd.f32 %v6011_v39, %v5911_v46  ;;  %8588 = vpow2.f32 %v5984_v16  ;;  %v5420_v57 = vadd.f32 %v5419_v62, %v5418_v11  ;;  %v15902_v62 = vld [vmem:[#allocation104_spill] sm:$0xff]  ;;  %v15903_v11 = vld [vmem:[#allocation59_spill] sm:$0xff] }
 0x749   :  { %5441 = vperm.xlu2 %8164, %v13700_v26   ;;  %v8583_v24 = vpop.eup %8582  ;;  %v13901_v33 = vadd.f32 1.0, %v8573_v28  ;;  %v5423_v25 = vsel %vm2689_vm9, %v13826_v8, 0.0  ;;  %v5421_v19 = vsel %vm2689_vm9, %v13889_v9, 0.0  ;;  %v6021_v59 = vmul.f32 0.6931472, %v8577_v17 }
 0x74a   :  { %v13893_v27 = vadd.f32 %v6025_v49, %v15899_v12  ;;  %v5999_v49 = vadd.f32 1.0, %v8571_v29  ;;  %v6603_v12 = vand.u32 2147483647, %v13878_v47  ;;  %v6678_v36 = vmul.f32 0.6931472, %v8579_v6  ;;  %v13908_v26 = vpop.permute.xlu2 %3465 }
 0x74b   :  { %v6635_v63 = vmul.f32 1.442695, %v6616_v38  ;;  %15901 = vst [vmem:[#allocation96_spill] sm:$0xff] %v13908_v26  ;;  %v5422_v29 = vadd.f32 %v5421_v19, %v5420_v57  ;;  %v8585_v46 = vpop.eup %8584  ;;  %v6017_v39 = vmul.f32 0.6931472, %v8581_v15  ;;  %8590 = vlog2.f32 %v5997_v32  ;;  %v15904_v57 = vld [vmem:[#allocation49_spill] sm:$0xff]  ;;  %v13926_v19 = vpop.permute.xlu0 %4145 }
 0x74c   :  { %v13912_v28 = vadd.f32 %v15902_v62, %v15886_v37  ;;  %v5986_v16 = vmul.f32 1.442695, %v5955_v45  ;;  %v6581_v7 = vmax.f32 %v15903_v11, 0.0  ;;  %v13917_v8 = vmul.f32 %v15860_v18, %v13819_v53  ;;  %v8587_v6 = vpop.eup %8586  ;;  %15905 = vst [vmem:[#allocation71_spill] sm:$0xff] %v13926_v19 }
 0x74d   :  { %v6056_v17 = vmul.f32 %v15860_v18, %v6039_v10  ;;  %v5424_v38 = vadd.f32 %v5423_v25, %v5422_v29  ;;  %v6619_v30 = vsub.f32 0.0, %v6603_v12  ;;  %v13922_v15 = vadd.f32 %v15904_v57, %v15886_v37  ;;  %v15906_v29 = vld [vmem:[#allocation34_spill] sm:$0xff] }
 0x74e   :  { %v5425_v32 = vsel %vm2689_vm9, %v13770_v14, 0.0  ;;  %v13930_v45 = vmul.f32 %v15860_v18, %v13810_v55  ;;  %v8589_v53 = vpop.eup %8588  ;;  %v6680_v62 = vmul.f32 0.6931472, %v8585_v46  ;;  %v6709_v11 = vadd.f32 %v6678_v36, %v6581_v7  ;;  %6144 = vperm.xlu0 %8160, %v13917_v8  }
 0x74f   :  { %8592 = vpow2.f32 %v6635_v63  ;;  %v13933_v10 = vadd.f32 %v5425_v32, %v5424_v38  ;;  %v6639_v12 = vmul.f32 1.442695, %v6618_v43  ;;  %v6582_v25 = vmax.f32 %v13579_v13, 0.0  ;;  %6124 = vperm.xlu1 %8161, %v6056_v17   ;;  %v15907_v32 = vld [vmem:[#allocation18_spill] sm:$0xff] }
 0x750   :  { %v13938_v14 = vadd.f32 %v15906_v29, %v15886_v37  ;;  %8594 = vpow2.f32 %v5986_v16  ;;  %v6601_v55 = vand.u32 2147483647, %v13912_v28  ;;  %v6000_v46 = vadd.f32 1.0, %v8587_v6  ;;  %v15910_v6 = vld [vmem:[#allocation54_spill] sm:$0xff] }
 0x751   :  { %5456 = vperm.xlu2 %8164, %v13736_v56   ;;  %v6074_v36 = vsel %vm2689_vm9, %v6056_v17, 0.0  ;;  %v6072_v63 = vsel %vm2689_vm9, %v13930_v45, 0.0  ;;  %v8591_v7 = vpop.eup %8590  ;;  %v6042_v43 = vadd.f32 %v6017_v39, %v5914_v54  ;;  %v6641_v38 = vmul.f32 1.442695, %v6619_v30 }
 0x752   :  { %v6606_v13 = vand.u32 2147483647, %v13922_v15  ;;  %v6073_v57 = vadd.f32 %v6072_v63, %v13712_v1  ;;  %v15908_v16 = vmax.f32 %v15907_v32, 0.0  ;;  %8596 = vlog2.f32 %v5999_v49  ;;  %v13951_v19 = vpop.permute.xlu2 %3480  ;;  %v15911_v1 = vld [vmem:[#allocation35_spill] sm:$0xff] }
 0x753   :  { %v6710_v56 = vadd.f32 %v6680_v62, %v6582_v25  ;;  %15909 = vst [vmem:[#allocation27_spill] sm:$0xff] %v13951_v19  ;;  %v13954_v17 = vmul.f32 %v15910_v6, %v6709_v11  ;;  %v6031_v26 = vmul.f32 0.6931472, %v8583_v24  ;;  %8598 = vpow2.f32 %v6639_v12  ;;  %v15912_v12 = vld [vmem:[#allocation89_spill] sm:$0xff]  ;;  %v13983_v32 = vpop.permute.xlu0 %4160 }
 0x754   :  { %v13949_v29 = vadd.f32 %v6021_v59, %v15908_v16  ;;  %v6605_v54 = vand.u32 2147483647, %v13938_v14  ;;  %v6075_v30 = vadd.f32 %v6074_v36, %v6073_v57  ;;  %v6617_v44 = vsub.f32 0.0, %v6601_v55  ;;  %v15913_v36 = vld [vmem:[#allocation105_spill] sm:$0xff]  ;;  %15915 = vst [vmem:[#allocation19_spill] sm:$0xff] %v13983_v32 }
 0x755   :  { %v8593_v39 = vpop.eup %8592  ;;  %8600 = vlog2.f32 %v6000_v46  ;;  %v13959_v63 = vadd.f32 %v15911_v1, %v15886_v37  ;;  %v13963_v49 = vmul.f32 %v15860_v18, %v13893_v27  ;;  %v6023_v62 = vmul.f32 0.6931472, %v8591_v7 }
 0x756   :  { %v8595_v59 = vpop.eup %8594  ;;  %8602 = vpow2.f32 %v6641_v38  ;;  %v6622_v11 = vsub.f32 0.0, %v6606_v13  ;;  %v6059_v24 = vmul.f32 %v15860_v18, %v6042_v43  ;;  %v13968_v25 = vadd.f32 %v15912_v12, %v15886_v37 }
 0x757   :  { %6159 = vperm.xlu0 %8160, %v13963_v49   ;;  %v6742_v55 = vsel %vm2689_vm9, %v13954_v17, 0.0  ;;  %v13974_v46 = vmul.f32 %v15910_v6, %v6710_v56  ;;  %v13978_v27 = vmul.f32 %v15860_v18, %v13874_v35  ;;  %v15914_v7 = vmax.f32 %v15913_v36, 0.0 }
 0x758   :  { %v6002_v43 = vadd.f32 1.0, %v8589_v53  ;;  %v5917_v13 = vmax.f32 %v13741_v61, 0.0  ;;  %v6664_v57 = vadd.f32 1.0, %v8593_v39  ;;  %6139 = vperm.xlu1 %8161, %v6059_v24   ;;  %v8597_v16 = vpop.eup %8596  ;;  %v6604_v56 = vand.u32 2147483647, %v13959_v63 }
 0x759   :  { %v6049_v38 = vadd.f32 %v6031_v26, %v15914_v7  ;;  %5471 = vperm.xlu2 %8164, %v13783_v34   ;;  %v6003_v1 = vadd.f32 1.0, %v8595_v59  ;;  %v6076_v35 = vsel %vm2689_vm9, %v13870_v60, 0.0  ;;  %v6743_v12 = vsel %vm2689_vm9, %v13974_v46, 0.0  ;;  %v13991_v26 = vpop.eup %8598 }
 0x75a   :  { %v6045_v53 = vadd.f32 %v6023_v62, %v5917_v13  ;;  %v6637_v61 = vmul.f32 1.442695, %v6617_v44  ;;  %v13993_v39 = vadd.f32 %v6743_v12, %v6742_v55  ;;  %v6077_v36 = vadd.f32 %v6076_v35, %v6075_v30  ;;  %v14003_v44 = vpop.permute.xlu2 %4095 }
 0x75b   :  { %v8601_v7 = vpop.eup %8600  ;;  %v6647_v32 = vmul.f32 1.442695, %v6622_v11  ;;  %v6609_v34 = vand.u32 2147483647, %v13968_v25  ;;  %v6080_v19 = vsel %vm2689_vm9, %v6059_v24, 0.0  ;;  %v6078_v59 = vsel %vm2689_vm9, %v13978_v27, 0.0 }
 0x75c   :  { %v8603_v60 = vpop.eup %8602  ;;  %v6621_v22 = vsub.f32 0.0, %v6605_v54  ;;  %v14001_v42 = vadd.f32 %v15916_v51, %v15886_v37  ;;  %8604 = vlog2.f32 %v6664_v57  ;;  %v6079_v62 = vadd.f32 %v6078_v59, %v6077_v36  ;;  %v15917_v11 = vld [vmem:[#allocation52_spill] sm:$0xff] }
 0x75d   :  { %v6620_v30 = vsub.f32 0.0, %v6604_v56  ;;  %8606 = vlog2.f32 %v6003_v1  ;;  %v14007_v55 = vadd.f32 %v15917_v11, %v15886_v37  ;;  %v14010_v24 = vmul.f32 %v15860_v18, %v6049_v38 }
 0x75e   :  { %8608 = vpow2.f32 %v6637_v61  ;;  %v6029_v13 = vmul.f32 0.6931472, %v8601_v7  ;;  %v6062_v54 = vmul.f32 %v15860_v18, %v6045_v53  ;;  %v6081_v35 = vadd.f32 %v6080_v19, %v6079_v62 }
 0x75f   :  { %v6027_v51 = vmul.f32 0.6931472, %v8597_v16  ;;  %8610 = vpow2.f32 %v6647_v32  ;;  %v6625_v57 = vsub.f32 0.0, %v6609_v34  ;;  %6174 = vperm.xlu0 %8160, %v14010_v24   ;;  %v14016_v56 = vmul.f32 %v15860_v18, %v13949_v29 }
 0x760   :  { %8612 = vlog2.f32 %v6002_v43  ;;  %v6608_v1 = vand.u32 2147483647, %v14001_v42  ;;  %v5920_v38 = vmax.f32 %v13793_v20, 0.0  ;;  %v6667_v12 = vadd.f32 1.0, %v8603_v60  ;;  %6154 = vperm.xlu1 %8161, %v6062_v54   ;;  %v14026_v43 = vpop.permute.xlu0 %4763 }
 0x761   :  { %5486 = vperm.xlu2 %8164, %v13837_v58   ;;  %v5919_v19 = vmax.f32 %v13442_v21, 0.0  ;;  %v6643_v16 = vmul.f32 1.442695, %v6620_v30  ;;  %v6607_v32 = vand.u32 2147483647, %v14007_v55  ;;  %v6082_v53 = vsel %vm2689_vm9, %v13917_v8, 0.0 }
 0x762   :  { %v8605_v61 = vpop.eup %8604  ;;  %8614 = vlog2.f32 %v13901_v33  ;;  %v6048_v29 = vadd.f32 %v6029_v13, %v5920_v38  ;;  %v6083_v36 = vadd.f32 %v6082_v53, %v6081_v35  ;;  %v6653_v34 = vmul.f32 1.442695, %v6625_v57 }
 0x763   :  { %v8607_v20 = vpop.eup %8606  ;;  %v6047_v7 = vadd.f32 %v6027_v51, %v5919_v19  ;;  %v6086_v58 = vsel %vm2689_vm9, %v6062_v54, 0.0  ;;  %v6084_v21 = vsel %vm2689_vm9, %v14016_v56, 0.0  ;;  %v5922_v60 = vmax.f32 %v13788_v5, 0.0  ;;  %v15918_v51 = vld [vmem:[#allocation83_spill] sm:$0xff]  ;;  %v14036_v54 = vpop.permute.xlu2 %4110 }
 0x764   :  { %v8609_v59 = vpop.eup %8608  ;;  %v6645_v62 = vmul.f32 1.442695, %v6621_v22  ;;  %8616 = vlog2.f32 %v6667_v12  ;;  %v6085_v8 = vadd.f32 %v6084_v21, %v6083_v36  ;;  %v6624_v33 = vsub.f32 0.0, %v6608_v1 }
 0x765   :  { %v8611_v30 = vpop.eup %8610  ;;  %8618 = vpow2.f32 %v6643_v16  ;;  %v6623_v11 = vsub.f32 0.0, %v6607_v32  ;;  %v6684_v13 = vmul.f32 0.6931472, %v8605_v61  ;;  %v6035_v38 = vmul.f32 0.6931472, %v8607_v20  ;;  %v15919_v32 = vld [vmem:[#allocation50_spill] sm:$0xff] }
 0x766   :  { %v8613_v35 = vpop.eup %8612  ;;  %v14034_v57 = vadd.f32 %v15918_v51, %v15886_v37  ;;  %v6065_v19 = vmul.f32 %v15860_v18, %v6048_v29  ;;  %v6087_v53 = vadd.f32 %v6086_v58, %v6085_v8  ;;  %v6665_v5 = vadd.f32 1.0, %v8609_v59 }
 0x767   :  { %v6584_v22 = vmax.f32 %v13845_v41, 0.0  ;;  %8620 = vpow2.f32 %v6653_v34  ;;  %6782 = vperm.xlu0 %8160, %v13954_v17   ;;  %v14042_v1 = vmul.f32 %v15860_v18, %v6047_v7  ;;  %v6666_v16 = vadd.f32 1.0, %v13991_v26 }
 0x768   :  { %v8615_v12 = vpop.eup %8614  ;;  %v14047_v61 = vadd.f32 %v15919_v32, %v15886_v37  ;;  %v5923_v36 = vmax.f32 %v13850_v48, 0.0  ;;  %v6670_v29 = vadd.f32 1.0, %v8611_v30  ;;  %6169 = vperm.xlu1 %8161, %v6065_v19   ;;  %v6033_v41 = vmul.f32 0.6931472, %v8613_v35 }
 0x769   :  { %5501 = vperm.xlu2 %8164, %v13889_v9   ;;  %v6649_v20 = vmul.f32 1.442695, %v6623_v11  ;;  %v6712_v34 = vadd.f32 %v6684_v13, %v6584_v22  ;;  %v6088_v17 = vsel %vm2689_vm9, %v13963_v49, 0.0  ;;  %8622 = vpow2.f32 %v6645_v62  ;;  %v14058_v11 = vpop.permute.xlu0 %4778 }
 0x76a   :  { %v8617_v7 = vpop.eup %8616  ;;  %v6051_v58 = vadd.f32 %v6035_v38, %v5923_v36  ;;  %v6610_v26 = vand.u32 2147483647, %v14034_v57  ;;  %v6089_v21 = vadd.f32 %v6088_v17, %v6087_v53  ;;  %8624 = vlog2.f32 %v6665_v5 }
 0x76b   :  { %v8619_v59 = vpop.eup %8618  ;;  %v6651_v8 = vmul.f32 1.442695, %v6624_v33  ;;  %v6092_v48 = vsel %vm2689_vm9, %v6065_v19, 0.0  ;;  %v6090_v9 = vsel %vm2689_vm9, %v14042_v1, 0.0  ;;  %v6611_v30 = vand.u32 2147483647, %v14047_v61 }
 0x76c   :  { %8626 = vlog2.f32 %v6670_v29  ;;  %v6091_v49 = vadd.f32 %v6090_v9, %v6089_v21  ;;  %v6050_v62 = vadd.f32 %v6033_v41, %v5922_v60  ;;  %v6690_v35 = vmul.f32 0.6931472, %v8617_v7  ;;  %v14066_v29 = vpop.permute.xlu2 %4125 }
 0x76d   :  { %v8621_v13 = vpop.eup %8620  ;;  %8628 = vpow2.f32 %v6649_v20  ;;  %v14061_v38 = vmul.f32 %v15910_v6, %v6712_v34  ;;  %v6668_v51 = vadd.f32 1.0, %v8619_v59  ;;  %v6626_v33 = vsub.f32 0.0, %v6610_v26 }
 0x76e   :  { %v6068_v19 = vmul.f32 %v15860_v18, %v6051_v58  ;;  %v6093_v53 = vadd.f32 %v6092_v48, %v6091_v49  ;;  %v6587_v5 = vmax.f32 %v13878_v47, 0.0  ;;  %v9041_v22 = vmov 128.0   ;;  %v15920_v48 = vld [vmem:[#allocation31_spill] sm:$0xff] }
 0x76f   :  { %6797 = vperm.xlu0 %8160, %v14061_v38   ;;  %8630 = vrcp.f32 %v9041_v22  ;;  %v8623_v32 = vpop.eup %8622  ;;  %v6627_v36 = vsub.f32 0.0, %v6611_v30  ;;  %v6673_v60 = vadd.f32 1.0, %v8621_v13  ;;  %v6682_v20 = vmul.f32 0.6931472, %v8615_v12 }
 0x770   :  { %8632 = vlog2.f32 %v6666_v16  ;;  %6184 = vperm.xlu1 %8161, %v6068_v19   ;;  %v8625_v41 = vpop.eup %8624  ;;  %v6715_v34 = vadd.f32 %v6690_v35, %v6587_v5  ;;  %v6094_v47 = vsel %vm2689_vm9, %v14010_v24, 0.0  ;;  %v6655_v7 = vmul.f32 1.442695, %v6626_v33 }
 0x771   :  { %6119 = vperm.xlu2 %8164, %v13930_v45   ;;  %8634 = vpow2.f32 %v6651_v8  ;;  %v14072_v58 = vmul.f32 %v15860_v18, %v6050_v62  ;;  %v6095_v16 = vadd.f32 %v6094_v47, %v6093_v53  ;;  %v6583_v21 = vmax.f32 %v13454_v0, 0.0 }
 0x772   :  { %v8627_v17 = vpop.eup %8626  ;;  %8636 = vlog2.f32 %v6668_v51  ;;  %v6669_v59 = vadd.f32 1.0, %v8623_v32  ;;  %v2721_v45 = vrot.slane %v15920_v48, 4  ;;  %v6657_v9 = vmul.f32 1.442695, %v6627_v36  ;;  %v14084_v51 = vpop.permute.xlu0 %4793 }
 0x773   :  { %v8629_v26 = vpop.eup %8628  ;;  %8638 = vlog2.f32 %v6673_v60  ;;  %v6098_v12 = vsel %vm2689_vm9, %v6068_v19, 0.0  ;;  %v6096_v24 = vsel %vm2689_vm9, %v14072_v58, 0.0  ;;  %v6686_v30 = vmul.f32 0.6931472, %v8625_v41  ;;  %15921 = vst [vmem:[#allocation55_spill] sm:$0xff] %v14084_v51 }
 0x774   :  { %v6696_v49 = vmul.f32 0.6931472, %v8627_v17  ;;  %v14082_v18 = vmul.f32 %v15910_v6, %v6715_v34  ;;  %v6097_v13 = vadd.f32 %v6096_v24, %v6095_v16  ;;  %v6711_v0 = vadd.f32 %v6682_v20, %v6583_v21  ;;  %v15922_v21 = vld [vmem:[#allocation103_spill] sm:$0xff] }
 0x775   :  { %v14079_v8 = vpop.eup %8630  ;;  %v6671_v35 = vadd.f32 1.0, %v8629_v26  ;;  %8640 = vpow2.f32 %v6655_v7  ;;  %v6585_v19 = vmax.f32 %v13912_v28, 0.0  ;;  %v6590_v53 = vmax.f32 %v13922_v15, 0.0  ;;  %v14095_v15 = vpop.permute.xlu2 %4140 }
 0x776   :  { %v8633_v62 = vpop.eup %8632  ;;  %v2722_v5 = vadd.f32 %v2721_v45, %v15920_v48  ;;  %v14090_v22 = vadd.f32 %v6098_v12, %v6097_v13  ;;  %8642 = vlog2.f32 %v6669_v59  ;;  %v2728_v36 = vmul.f32 128.0, %v14079_v8 }
 0x777   :  { %v8635_v33 = vpop.eup %8634  ;;  %6812 = vperm.xlu0 %8160, %v14082_v18   ;;  %v6713_v60 = vadd.f32 %v6686_v30, %v6585_v19  ;;  %8644 = vpow2.f32 %v6657_v9  ;;  %v6718_v41 = vadd.f32 %v6696_v49, %v6590_v53  ;;  %v6688_v20 = vmul.f32 0.6931472, %v8633_v62 }
 0x778   :  { %v8637_v32 = vpop.eup %8636  ;;  %6787 = vperm.xlu1 %8161, %v13974_v46   ;;  %8646 = vlog2.f32 %v6671_v35  ;;  %v14098_v34 = vmul.f32 %v15910_v6, %v6711_v0  ;;  %v6586_v47 = vmax.f32 %v13841_v50, 0.0  ;;  %v6672_v17 = vadd.f32 1.0, %v8635_v33 }
 0x779   :  { %6134 = vperm.xlu2 %8164, %v13978_v27   ;;  %v8639_v28 = vpop.eup %8638  ;;  %v6692_v7 = vmul.f32 0.6931472, %v8637_v32  ;;  %v2723_v46 = vrot.slane %v2722_v5, 2  ;;  %v6747_v27 = vsel %vm2689_vm9, %v14061_v38, 0.0  ;;  %v2729_v26 = vsub.f32 1.0, %v2728_v36 }
 0x77a   :  { %v3406_v59 = vrot.slane %v15922_v21, 4  ;;  %v6745_v48 = vsel %vm2689_vm9, %v14098_v34, 0.0  ;;  %v6702_v45 = vmul.f32 0.6931472, %v8639_v28  ;;  %v14107_v9 = vmul.f32 %v15910_v6, %v6718_v41  ;;  %v14114_v19 = vpop.permute.xlu0 %4808 }
 0x77b   :  { %v8641_v16 = vpop.eup %8640  ;;  %v6730_v12 = vmul.f32 %v15910_v6, %v6713_v60  ;;  %v6746_v50 = vadd.f32 %v6745_v48, %v13993_v39  ;;  %v6714_v30 = vadd.f32 %v6688_v20, %v6586_v47  ;;  %v6588_v49 = vmax.f32 %v13959_v63, 0.0  ;;  %15923 = vst [vmem:[#allocation8_spill] sm:$0xff] %v14114_v19 }
 0x77c   :  { %v8643_v24 = vpop.eup %8642  ;;  %v6674_v38 = vadd.f32 1.0, %v8641_v16  ;;  %v6593_v62 = vmax.f32 %v13968_v25, 0.0  ;;  %v2724_v0 = vadd.f32 %v2723_v46, %v2722_v5  ;;  %v2730_v39 = vmul.f32 %v14079_v8, %v2729_v26  ;;  %v15924_v26 = vld [vmem:[#allocation79_spill] sm:$0xff] }
 0x77d   :  { %v8645_v13 = vpop.eup %8644  ;;  %v6748_v35 = vadd.f32 %v6747_v27, %v6746_v50  ;;  %v3407_v53 = vadd.f32 %v3406_v59, %v15922_v21  ;;  %8648 = vlog2.f32 %v6672_v17  ;;  %v6716_v63 = vadd.f32 %v6692_v7, %v6588_v49  ;;  %v14126_v46 = vpop.permute.xlu2 %4155 }
 0x77e   :  { %v8647_v33 = vpop.eup %8646  ;;  %v6721_v32 = vadd.f32 %v6702_v45, %v6593_v62  ;;  %v6749_v36 = vsel %vm2689_vm9, %v6730_v12, 0.0  ;;  %v6589_v25 = vmax.f32 %v13938_v14, 0.0  ;;  %v6694_v60 = vmul.f32 0.6931472, %v8643_v24 }
 0x77f   :  { %6827 = vperm.xlu0 %8160, %v14107_v9   ;;  %v14122_v5 = vmul.f32 %v15910_v6, %v6714_v30  ;;  %v6750_v41 = vadd.f32 %v6749_v36, %v6748_v35  ;;  %v6675_v28 = vadd.f32 1.0, %v8645_v13  ;;  %v6698_v20 = vmul.f32 0.6931472, %v8647_v33 }
 0x780   :  { %6802 = vperm.xlu1 %8161, %v6730_v12   ;;  %8650 = vlog2.f32 %v6674_v38  ;;  %v6753_v47 = vsel %vm2689_vm9, %v14082_v18, 0.0  ;;  %v2731_v17 = vadd.f32 %v14079_v8, %v2730_v39  ;;  %v3408_v7 = vrot.slane %v3407_v53, 2 }
 0x781   :  { %6149 = vperm.xlu2 %8164, %v14016_v56   ;;  %v2725_v56 = vrot.slane %v2724_v0, 1  ;;  %v6751_v14 = vsel %vm2689_vm9, %v14122_v5, 0.0  ;;  %v6738_v16 = vmul.f32 %v15910_v6, %v6721_v32  ;;  %v6733_v27 = vmul.f32 %v15910_v6, %v6716_v63 }
 0x782   :  { %v4081_v21 = vrot.slane %v15924_v26, 4  ;;  %v6752_v59 = vadd.f32 %v6751_v14, %v6750_v41  ;;  %v6717_v48 = vadd.f32 %v6694_v60, %v6589_v25  ;;  %v6591_v45 = vmax.f32 %v14007_v55, 0.0  ;;  %v14143_v33 = vpop.permute.xlu0 %4823 }
 0x783   :  { %vm2732_vm10 = vweird.f32 %v14079_v8  ;;  %v5427_v18 = vrot.slane %v13933_v10, 4  ;;  %v8649_v12 = vpop.eup %8648  ;;  %8652 = vlog2.f32 %v6675_v28  ;;  %v2726_v30 = vadd.f32 %v2725_v56, %v2724_v0  ;;  %15925 = vst [vmem:[#allocation11_spill] sm:$0xff] %v14143_v33 }
 0x784   :  { %v6754_v50 = vadd.f32 %v6753_v47, %v6752_v59  ;;  %v6719_v24 = vadd.f32 %v6698_v20, %v6591_v45  ;;  %v6755_v13 = vsel %vm2689_vm9, %v6733_v27, 0.0  ;;  %v14140_v38 = vsel %vm2732_vm10, %v14079_v8, %v2731_v17 }
 0x785   :  { %v3409_v55 = vadd.f32 %v3408_v7, %v3407_v53  ;;  %v4082_v62 = vadd.f32 %v4081_v21, %v15924_v26  ;;  %v6700_v35 = vmul.f32 0.6931472, %v8649_v12  ;;  %v5428_v39 = vadd.f32 %v5427_v18, %v13933_v10  ;;  %v14153_v56 = vpop.permute.xlu2 %4773 }
 0x786   :  { %v8651_v49 = vpop.eup %8650  ;;  %v6734_v63 = vmul.f32 %v15910_v6, %v6717_v48  ;;  %v6756_v32 = vadd.f32 %v6755_v13, %v6754_v50  ;;  %v6759_v36 = vsel %vm2689_vm9, %v14107_v9, 0.0  ;;  %v2734_v8 = vmul.f32 %v14140_v38, %v2726_v30 }
 0x787   :  { %6842 = vperm.xlu0 %8160, %v6738_v16   ;;  %v6704_v0 = vmul.f32 0.6931472, %v8651_v49  ;;  %v6736_v25 = vmul.f32 %v15910_v6, %v6719_v24  ;;  %v3410_v60 = vrot.slane %v3409_v55, 1  ;;  %v4083_v41 = vrot.slane %v4082_v62, 2 }
 0x788   :  { %6817 = vperm.xlu1 %8161, %v6733_v27   ;;  %v6757_v53 = vsel %vm2689_vm9, %v6734_v63, 0.0  ;;  %v5429_v47 = vrot.slane %v5428_v39, 2  ;;  %v6595_v45 = vmax.f32 %v14047_v61, 0.0 }
 0x789   :  { %6164 = vperm.xlu2 %8164, %v14042_v1   ;;  %v6592_v1 = vmax.f32 %v14001_v42, 0.0  ;;  %v6758_v28 = vadd.f32 %v6757_v53, %v6756_v32  ;;  %v8653_v20 = vpop.eup %8652  ;;  %v6594_v42 = vmax.f32 %v14034_v57, 0.0  ;;  %v6761_v7 = vsel %vm2689_vm9, %v6736_v25, 0.0 }
 0x78a   :  { %v3411_v14 = vadd.f32 %v3410_v60, %v3409_v55  ;;  %v4084_v27 = vadd.f32 %v4083_v41, %v4082_v62  ;;  %v6706_v26 = vmul.f32 0.6931472, %v8653_v20  ;;  %v5430_v21 = vadd.f32 %v5429_v47, %v5428_v39  ;;  %v14160_v18 = vpop.permute.xlu0 %4838 }
 0x78b   :  { %v6720_v10 = vadd.f32 %v6700_v35, %v6592_v1  ;;  %v6760_v17 = vadd.f32 %v6759_v36, %v6758_v28  ;;  %v6722_v9 = vadd.f32 %v6704_v0, %v6594_v42  ;;  %15926 = vst [vmem:[#allocation10_spill] sm:$0xff] %v14160_v18  ;;  %v6765_v57 = vsel %vm2689_vm9, %v6738_v16, 0.0 }
 0x78c   :  { %v4085_v24 = vrot.slane %v4084_v27, 1  ;;  %v6723_v49 = vadd.f32 %v6706_v26, %v6595_v45  ;;  %v5431_v13 = vrot.slane %v5430_v21, 1 }
 0x78d   :  { %v6737_v59 = vmul.f32 %v15910_v6, %v6720_v10  ;;  %v6762_v48 = vadd.f32 %v6761_v7, %v6760_v17  ;;  %v6739_v50 = vmul.f32 %v15910_v6, %v6722_v9  ;;  %v14166_v62 = vpop.permute.xlu2 %4788 }
 0x78e   :  { %15927 = vst [vmem:[#allocation32_spill] sm:$0xff] %v14166_v62  ;;  %v4086_v16 = vadd.f32 %v4085_v24, %v4084_v27  ;;  %v5432_v35 = vadd.f32 %v5431_v13, %v5430_v21  ;;  %v6740_v39 = vmul.f32 %v15910_v6, %v6723_v49 }
 0x78f   :  { %2927 = vperm.xlu0 %8160, %v2734_v8   ;;  %v6763_v12 = vsel %vm2689_vm9, %v6737_v59, 0.0  ;;  %v6767_v61 = vsel %vm2689_vm9, %v6739_v50, 0.0 }
 0x790   :  { %6832 = vperm.xlu1 %8161, %v6736_v25   ;;  %v6764_v30 = vadd.f32 %v6763_v12, %v6762_v48  ;;  %v6769_v1 = vsel %vm2689_vm9, %v6740_v39, 0.0  ;;  %v4087_v0 = vmul.f32 %v4086_v16, %v14140_v38  ;;  %v5433_v53 = vmul.f32 %v5432_v35, %v14140_v38  ;;  %v14181_v25 = vpop.permute.xlu1 %3415  ;;  %v15942_v16 = vld [vmem:[#allocation6_spill] sm:$0xff] }
 0x791   :  { %6179 = vperm.xlu2 %8164, %v14072_v58   ;;  %v3412_v58 = vmul.f32 %v3411_v14, %v14140_v38 }
 0x792   :  { %v6766_v55 = vadd.f32 %v6765_v57, %v6764_v30  ;;  %v14175_v8 = vpop.permute.xlu0 %5436  ;;  %v15940_v57 = vld [vmem:[#allocation17_spill] sm:$0xff] }
 0x793   :  { %15929 = vst [vmem:[#allocation40_spill] sm:$0xff] %v14175_v8  ;;  %v4367_v12 = vrot.slane %v15940_v57, 5 }
 0x794   :  { %v6768_v32 = vadd.f32 %v6767_v61, %v6766_v55 }
 0x795   :  { %v14222_v61 = vsel %vm2335_vm8, %v4367_v12, -1e+30 }
 0x796   :  { %v14173_v36 = vadd.f32 %v6769_v1, %v6768_v32 }
 0x797   :  { %3605 = vperm.xlu0 %8160, %v3412_v58  }
 0x798   :  { %6847 = vperm.xlu1 %8161, %v6739_v50   ;;  %15928 = vst [vmem:[#allocation22_spill] sm:$0xff] %v14173_v36  ;;  %v14189_v20 = vpop.permute.xlu1 %3430 }
 0x799   :  { %6792 = vperm.xlu2 %8164, %v14098_v34   ;;  %v14179_v34 = vpop.permute.xlu2 %4803 }
 0x79a   :  { %15930 = vst [vmem:[#allocation42_spill] sm:$0xff] %v14179_v34  ;;  %v14183_v60 = vpop.permute.xlu0 %5451 }
 0x79b   :  { %15931 = vst [vmem:[#allocation21_spill] sm:$0xff] %v14183_v60  ;;  %v15975_v60 = vld [vmem:[#allocation45_spill] sm:$0xff] }
 0x79f   :  { %4280 = vperm.xlu0 %8160, %v4087_v0   ;;  %v4371_v0 = vsel %vm4370_vm5, %v14222_v61, -inf }
 0x7a0   :  { %5626 = vperm.xlu1 %8161, %v5433_v53  }
 0x7a1   :  { %6807 = vperm.xlu2 %8164, %v14122_v5   ;;  %v14187_v28 = vpop.permute.xlu2 %4818  ;;  %v14195_v5 = vpop.permute.xlu1 %3445 }
 0x7a2   :  { %15932 = vst [vmem:[#allocation37_spill] sm:$0xff] %v14187_v28  ;;  %v14191_v47 = vpop.permute.xlu0 %5466 }
 0x7a3   :  { %15933 = vst [vmem:[#allocation39_spill] sm:$0xff] %v14191_v47 }
 0x7a8   :  { %v14185_v41 = vpop.f32.mrf.mxu2 }
 0x7a9   :  { %6822 = vperm.xlu2 %8164, %v6734_v63   ;;  %v14193_v42 = vpop.permute.xlu2 %4833  ;;  %v15937_v63 = vld [vmem:[#allocation36_spill] sm:$0xff]  ;;  %v14202_v27 = vpop.permute.xlu1 %3460 }
 0x7aa   :  { %15934 = vst [vmem:[#allocation99_spill] sm:$0xff] %v14193_v42  ;;  %v14197_v9 = vpop.permute.xlu0 %5481  ;;  %v3694_v14 = vrot.slane %v15937_v63, 6  ;;  %v8087_v63 = vld [vmem:[%s15206_s1 + $0x30] sm:$0xff] }
 0x7ab   :  { %15935 = vst [vmem:[#allocation63_spill] sm:$0xff] %v14197_v9 }
 0x7b0   :  { %v5673_v10 = vpop.f32.mrf.mxu2 }
 0x7b1   :  { %6837 = vperm.xlu2 %8164, %v6737_v59   ;;  %v14199_v7 = vpop.permute.xlu2 %5441  ;;  %v14206_v59 = vsel %vm2335_vm8, %v3694_v14, -1e+30  ;;  %v14217_v49 = vpop.permute.xlu1 %3475  ;;  %v5674_v35 = vadd.f32 %v5673_v10, %v15942_v16 }
 0x7b2   :  { %15936 = vst [vmem:[#allocation56_spill] sm:$0xff] %v14199_v7  ;;  %v14208_v48 = vpop.permute.xlu0 %5496  ;;  %v3698_v45 = vsel %vm3697_vm4, %v14206_v59, -inf }
 0x7b3   :  { %15939 = vst [vmem:[#allocation69_spill] sm:$0xff] %v14208_v48  ;;  %v5685_v53 = vmax.f32 %v5674_v35, 0.0 }
 0x7b8   :  { %v5676_v17 = vpop.f32.mrf.mxu2 }
 0x7b9   :  { %6852 = vperm.xlu2 %8164, %v6740_v39   ;;  %v14213_v50 = vpop.permute.xlu2 %5456  ;;  %v5677_v13 = vadd.f32 %v5676_v17, %v15851_v40  ;;  %v5689_v17 = vrot.slane %v15858_v23, 5  ;;  %v14235_v10 = vpop.permute.xlu1 %3490 }
 0x7ba   :  { %15941 = vst [vmem:[#allocation28_spill] sm:$0xff] %v14213_v50  ;;  %v14225_v32 = vpop.permute.xlu0 %5511 }
 0x7bb   :  { %15943 = vst [vmem:[#allocation48_spill] sm:$0xff] %v14225_v32  ;;  %v5686_v1 = vmax.f32 %v5677_v13, 0.0  ;;  %v4754_v13 = vrot.slane %v13753_v52, 4 }
 0x7bd   :  { %v4755_v35 = vadd.f32 %v4754_v13, %v13753_v52 }
 0x7c0   :  { %v5679_v26 = vpop.f32.mrf.mxu2 }
 0x7c1   :  { %v5680_v24 = vadd.f32 %v5679_v26, %v15849_v3  ;;  %v14233_v14 = vpop.permute.xlu2 %5471  ;;  %v15945_v26 = vld [vmem:[#allocation13_spill] sm:$0xff] }
 0x7c2   :  { %15944 = vst [vmem:[#allocation76_spill] sm:$0xff] %v14233_v14  ;;  %v14239_v57 = vpop.permute.xlu0 %6114 }
 0x7c3   :  { %v5687_v39 = vmax.f32 %v5680_v24, 0.0  ;;  %15946 = vst [vmem:[#allocation46_spill] sm:$0xff] %v14239_v57 }
 0x7c8   :  { %v5682_v58 = vpop.f32.mrf.mxu2 }
 0x7c9   :  { %3699 = vmax.xlane.f32.xlu0 %v3698_v45  ;;  %v5683_v30 = vadd.f32 %v5682_v58, %v15848_v2  ;;  %v3019_v45 = vrot.slane %v15945_v26, 7  ;;  %v14248_v58 = vld [vmem:[%s15217_s12] sm:$0xff]  ;;  %v14252_v24 = vpop.permute.xlu2 %5486 }
 0x7ca   :  { %15947 = vst [vmem:[#allocation94_spill] sm:$0xff] %v14252_v24 }
 0x7cb   :  { %v5688_v55 = vmax.f32 %v5683_v30, 0.0  ;;  %v14243_v12 = vsel %vm2335_vm8, %v3019_v45, -1e+30  ;;  %v14254_v30 = vpop.permute.xlu1 %4090 }
 0x7cd   :  { %5704 = vmatpush.msra.mxu3 %v5688_v55  ;;  %v3023_v55 = vsel %vm3022_vm3, %v14243_v12, -inf }
 0x7cf   :  { %5705 = vmatpush.msra.mxu3 %v5687_v39  ;;  %v14260_v39 = vpop.permute.xlu0 %6129 }
 0x7d0   :  { %15948 = vst [vmem:[#allocation44_spill] sm:$0xff] %v14260_v39 }
 0x7d1   :  { %4372 = vmax.xlane.f32.xlu0 %v4371_v0  ;;  %5706 = vmatpush.msra.mxu3 %v5686_v1  ;;  %v14265_v1 = vld [vmem:[%s15217_s12 + $0x8] sm:$0xff]  ;;  %v6100_v0 = vrot.slane %v14090_v22, 4 }
 0x7d3   :  { %5707 = vmatpush.msra.mxu3 %v5685_v53  ;;  %v4756_v53 = vrot.slane %v4755_v35, 2  ;;  %v6101_v52 = vadd.f32 %v6100_v0, %v14090_v22 }
 0x7d4   :  { %8070 = vmatmul.msk.f32.vlgmr.msra.gmra.mxu3 %vm1109_vm1, %v5689_v17  ;;  %v14270_v17 = vpop.permute.xlu2 %5501 }
 0x7d5   :  { %6344 = vmatpush.msrb.mxu3 %v8087_v63  ;;  %15949 = vst [vmem:[#allocation53_spill] sm:$0xff] %v14270_v17  ;;  %v14272_v63 = vpop.permute.xlu1 %4105  ;;  %v4757_v26 = vadd.f32 %v4756_v53, %v4755_v35 }
 0x7d7   :  { %v14277_v45 = vpop.permute.xlu0 %6144  ;;  %v4758_v13 = vrot.slane %v4757_v26, 1 }
 0x7d8   :  { %15950 = vst [vmem:[#allocation85_spill] sm:$0xff] %v14277_v45 }
 0x7d9   :  { %v4759_v37 = vadd.f32 %v4758_v13, %v4757_v26 }
 0x7db   :  { %v4760_v35 = vmul.f32 %v4759_v37, %v14140_v38 }
 0x7dc   :  { %8088 = vmatmul.msk.f32.vlgmr.msrb.gmra.mxu3 %vm187_vm0, %v14248_v58  ;;  %v14279_v36 = vpop.permute.xlu2 %6119 }
 0x7dd   :  { %15951 = vst [vmem:[#allocation51_spill] sm:$0xff] %v14279_v36  ;;  %v14281_v6 = vpop.permute.xlu1 %4120 }
 0x7df   :  { %v14286_v22 = vpop.permute.xlu0 %6159 }
 0x7e0   :  { %15952 = vst [vmem:[#allocation75_spill] sm:$0xff] %v14286_v22 }
 0x7e2   :  { %3024 = vmax.xlane.f32.xlu2 %v3023_v55  ;;  %v6102_v55 = vrot.slane %v6101_v52, 2 }
 0x7e4   :  { %8089 = vmatmul.msk.f32.gmra.mxu3 %vm187_vm0, %v14265_v1  ;;  %v6103_v39 = vadd.f32 %v6102_v55, %v6101_v52  ;;  %v14288_v0 = vpop.permute.xlu2 %6134 }
 0x7e5   :  { %15953 = vst [vmem:[#allocation97_spill] sm:$0xff] %v14288_v0  ;;  %v14290_v45 = vpop.permute.xlu1 %4135  ;;  %v15969_v0 = vld [vmem:[#allocation41_spill] sm:$0xff] }
 0x7e6   :  { %v6104_v53 = vrot.slane %v6103_v39, 1 }
 0x7e7   :  { %v14293_v57 = vpop.permute.xlu0 %6174 }
 0x7e8   :  { %15954 = vst [vmem:[#allocation14_spill] sm:$0xff] %v14293_v57 }
 0x7ec   :  { %8090 = vmatmul.msk.f32.gmra.mxu3 %vm187_vm0, %v13831_v4  ;;  %v6105_v4 = vadd.f32 %v6104_v53, %v6103_v39  ;;  %v14295_v26 = vpop.permute.xlu2 %6149 }
 0x7ed   :  { %15955 = vst [vmem:[#allocation80_spill] sm:$0xff] %v14295_v26  ;;  %v14297_v52 = vpop.permute.xlu1 %4150 }
 0x7ee   :  { %v6106_v36 = vmul.f32 %v6105_v4, %v14140_v38 }
 0x7f4   :  { %8091 = vmatmul.msk.f32.gmra.mxu3 %vm187_vm0, %v13883_v31  ;;  %v14299_v31 = vpop.permute.xlu0 %6782  ;;  %v14301_v37 = vpop.permute.xlu2 %6164 }
 0x7f5   :  { %15956 = vst [vmem:[#allocation65_spill] sm:$0xff] %v14299_v31  ;;  %v14303_v13 = vpop.permute.xlu1 %4165 }
 0x7f6   :  { %15957 = vst [vmem:[#allocation78_spill] sm:$0xff] %v14301_v37 }
 0x7fa   :  { %4953 = vperm.xlu2 %8164, %v4760_v35  }
 0x7fc   :  { %v14305_v39 = vpop.permute.xlu0 %6797  ;;  %v14307_v55 = vpop.permute.xlu2 %6179 }
 0x7fd   :  { %15958 = vst [vmem:[#allocation86_spill] sm:$0xff] %v14305_v39  ;;  %v14309_v35 = vpop.permute.xlu1 %4768 }
 0x7fe   :  { %15959 = vst [vmem:[#allocation92_spill] sm:$0xff] %v14307_v55 }
 0x802   :  { %6299 = vperm.xlu2 %8164, %v6106_v36   ;;  %v5040_v36 = vrot.slane %v14185_v41, 4 }
 0x804   :  { %v14311_v53 = vpop.permute.xlu0 %6812  ;;  %v14314_v4 = vpop.permute.xlu2 %6792  ;;  %v14320_v31 = vsel %vm2335_vm8, %v5040_v36, -1e+30  ;;  %v2917_v36 = vrot.slane %v15969_v0, 4 }
 0x805   :  { %15960 = vst [vmem:[#allocation77_spill] sm:$0xff] %v14311_v53  ;;  %v14316_v57 = vpop.permute.xlu1 %4783  ;;  %v5044_v37 = vsel %vm5043_vm6, %v14320_v31, -inf }
 0x806   :  { %15961 = vst [vmem:[#allocation93_spill] sm:$0xff] %v14314_v4 }
 0x807   :  { %15962 = vst [vmem:[#allocation104_spill] sm:$0xff] %v14316_v57 }
 0x80c   :  { %v14324_v39 = vpop.permute.xlu0 %6827  ;;  %v14326_v55 = vpop.permute.xlu2 %6807 }
 0x80d   :  { %15963 = vst [vmem:[#allocation59_spill] sm:$0xff] %v14324_v39  ;;  %v14328_v22 = vpop.permute.xlu1 %4798  ;;  %v2918_v39 = vadd.f32 %v2917_v36, %v15969_v0 }
 0x80e   :  { %15964 = vst [vmem:[#allocation49_spill] sm:$0xff] %v14326_v55 }
 0x80f   :  { %15965 = vst [vmem:[#allocation34_spill] sm:$0xff] %v14328_v22  ;;  %v2919_v55 = vrot.slane %v2918_v39, 2 }
 0x811   :  { %v2920_v24 = vadd.f32 %v2919_v55, %v2918_v39  ;;  %v14360_v39 = vld [vmem:[%s15207_s2] sm:$0xff] }
 0x814   :  { %v14330_v53 = vpop.permute.xlu0 %6842  ;;  %v14332_v41 = vpop.permute.xlu2 %6822 }
 0x815   :  { %15966 = vst [vmem:[#allocation18_spill] sm:$0xff] %v14330_v53  ;;  %v14334_v4 = vpop.permute.xlu1 %4813 }
 0x816   :  { %15967 = vst [vmem:[#allocation35_spill] sm:$0xff] %v14332_v41  ;;  %v2921_v41 = vrot.slane %v2920_v24, 1 }
 0x817   :  { %15968 = vst [vmem:[#allocation89_spill] sm:$0xff] %v14334_v4 }
 0x818   :  { %v2922_v47 = vadd.f32 %v2921_v41, %v2920_v24 }
 0x81a   :  { %v2923_v8 = vmul.f32 %v2922_v47, %v14140_v38  ;;  %v14368_v47 = vld [vmem:[%s15208_s3] sm:$0xff] }
 0x81c   :  { %v2928_v26 = vpop.permute.xlu0 %2927  ;;  %v14337_v32 = vpop.permute.xlu2 %6837 }
 0x81d   :  { %15970 = vst [vmem:[#allocation105_spill] sm:$0xff] %v14337_v32  ;;  %v14339_v17 = vpop.permute.xlu1 %4828  ;;  %v2930_v7 = vmul.f32 %v2928_v26, %v15975_v60 }
 0x81e   :  { %15971 = vst [vmem:[#allocation91_spill] sm:$0xff] %v14339_v17 }
 0x824   :  { %v14344_v48 = vpop.permute.xlu2 %6852 }
 0x825   :  { %15972 = vst [vmem:[#allocation52_spill] sm:$0xff] %v14344_v48  ;;  %v14346_v53 = vpop.permute.xlu1 %5446  ;;  %v15976_v48 = vld [vmem:[#allocation15_spill] sm:$0xff] }
 0x826   :  { %15973 = vst [vmem:[#allocation83_spill] sm:$0xff] %v14346_v53  ;;  %v2935_v24 = vadd.f32 %v15976_v48, %v2930_v7 }
 0x82b   :  { %5045 = vmax.xlane.f32.xlu2 %v5044_v37  ;;  %v14342_v37 = vpop.permute.xlu0 %3605 }
 0x82d   :  { %v14351_v32 = vpop.permute.xlu1 %5461 }
 0x82e   :  { %15974 = vst [vmem:[#allocation50_spill] sm:$0xff] %v14351_v32 }
 0x833   :  { %v14348_v9 = vpop.permute.xlu0 %4280 }
 0x835   :  { %v14378_v7 = vpop.permute.xlu1 %5476 }
 0x836   :  { %15977 = vst [vmem:[#allocation31_spill] sm:$0xff] %v14378_v7 }
 0x83c   :  { %v3700_v55 = vpop.xlane.xlu0 %3699 }
 0x83d   :  { %v14386_v53 = vpop.permute.xlu1 %5491 }
 0x83e   :  { %15978 = vst [vmem:[#allocation103_spill] sm:$0xff] %v14386_v53 }
 0x855   :  { %v3025_v14 = vpop.xlane.xlu2 %3024 }
 0x856   :  { %v3026_v50 = vsub.f32 %v14243_v12, %v3025_v14  ;;  %v2924_v14 = vmul.f32 %v2923_v8, %v14360_v39  ;;  %v3701_v12 = vsub.f32 %v14206_v59, %v3700_v55 }
 0x857   :  { %v14354_v36 = vpop.f32.mrf.mxu3 }
 0x858   :  { %v3027_v0 = vmul.f32 1.442695, %v3026_v50  ;;  %v2936_v60 = vsub.f32 %v2924_v14, %v2935_v24  ;;  %v3702_v8 = vmul.f32 1.442695, %v3701_v12 }
 0x85a   :  { %8654 = vpow2.f32 %v3027_v0  ;;  %v14376_v0 = vld [vmem:[%s15211_s6] sm:$0xff] }
 0x85b   :  { %v2937_v55 = vsub.f32 %v2936_v60, %v14376_v0  ;;  %8656 = vpow2.f32 %v3702_v8  ;;  %v14393_v60 = vpop.permute.xlu1 %5506 }
 0x85c   :  { %15979 = vst [vmem:[#allocation79_spill] sm:$0xff] %v14393_v60 }
 0x85d   :  { %v2938_v24 = vsel %vm2335_vm8, %v2937_v55, 0.0 }
 0x85f   :  { %v6346_v50 = vpop.f32.mrf.mxu3 }
 0x860   :  { %v8655_v41 = vpop.eup %8654 }
 0x861   :  { %v14371_v26 = vmul.f32 %v14368_v47, %v8655_v41  ;;  %v2939_v41 = vsel %vm2337_vm2, %v2938_v24, 0.0  ;;  %v8657_v32 = vpop.eup %8656 }
 0x862   :  { %v14389_v7 = vmul.f32 %v14368_v47, %v8657_v32 }
 0x863   :  { %v3030_v59 = vsel %vm3022_vm3, %v14371_v26, 0.0  ;;  %v14399_v32 = vpop.permute.xlu1 %6109 }
 0x864   :  { %3031 = vadd.xlane.f32.xlu1 %v3030_v59  ;;  %v3705_v59 = vsel %vm3697_vm4, %v14389_v7, 0.0  ;;  %15980 = vst [vmem:[#allocation36_spill] sm:$0xff] %v14399_v32 }
 0x867   :  { %v6349_v14 = vpop.f32.mrf.mxu3 }
 0x868   :  { %v6350_v24 = vadd.f32 %v6349_v14, %v15851_v40 }
 0x86a   :  { %v6359_v17 = vmax.f32 %v6350_v24, 0.0 }
 0x86c   :  { %2940 = vadd.xlane.f32.xlu1 %v2939_v41  ;;  %v6347_v41 = vadd.f32 %v6346_v50, %v15942_v16  ;;  %v14408_v50 = vpop.permute.xlu2 %4953 }
 0x86d   :  { %15982 = vst [vmem:[#allocation17_spill] sm:$0xff] %v14408_v50  ;;  %v15999_v50 = vld [vmem:[#allocation58_spill] sm:$0xff] }
 0x86e   :  { %v6358_v33 = vmax.f32 %v6347_v41, 0.0 }
 0x86f   :  { %v6352_v12 = vpop.f32.mrf.mxu3 }
 0x870   :  { %v6353_v55 = vadd.f32 %v6352_v12, %v15849_v3  ;;  %v8109_v12 = vld [vmem:[%s15206_s1 + $0x38] sm:$0xff] }
 0x872   :  { %v6360_v53 = vmax.f32 %v6353_v55, 0.0 }
 0x874   :  { %3706 = vadd.xlane.f32.xlu1 %v3705_v59  ;;  %v6362_v59 = vrot.slane %v15858_v23, 6 }
 0x877   :  { %v6355_v8 = vpop.f32.mrf.mxu3 }
 0x878   :  { %v6356_v18 = vadd.f32 %v6355_v8, %v15848_v2 }
 0x87a   :  { %v6361_v42 = vmax.f32 %v6356_v18, 0.0  ;;  %v14406_v18 = vpop.permute.xlu1 %6124 }
 0x87b   :  { %15981 = vst [vmem:[#allocation5_spill] sm:$0xff] %v14406_v18  ;;  %v15998_v18 = vld [vmem:[#allocation102_spill] sm:$0xff] }
 0x87c   :  { %6377 = vmatpush.msra.mxu2 %v6361_v42 }
 0x87e   :  { %6378 = vmatpush.msra.mxu2 %v6360_v53 }
 0x880   :  { %6379 = vmatpush.msra.mxu2 %v6359_v17  ;;  %v14416_v17 = vpop.permute.xlu2 %6299 }
 0x881   :  { %15984 = vst [vmem:[#allocation13_spill] sm:$0xff] %v14416_v17 }
 0x882   :  { %6380 = vmatpush.msra.mxu2 %v6358_v33  ;;  %v14412_v42 = vpop.permute.xlu1 %6139  ;;  %v9000_v33 = vld [vmem:[%s15217_s12 + $0x10] sm:$0xff] }
 0x883   :  { %8092 = vmatmul.msk.f32.vlgmr.msra.gmra.mxu2 %vm1109_vm1, %v6362_v59  ;;  %15983 = vst [vmem:[#allocation6_spill] sm:$0xff] %v14412_v42 }
 0x884   :  { %7017 = vmatpush.msrb.mxu2 %v8109_v12 }
 0x88a   :  { %v14422_v53 = vpop.permute.xlu1 %6154 }
 0x88b   :  { %8110 = vmatmul.msk.f32.vlgmr.msrb.gmra.mxu2 %vm187_vm0, %v14248_v58  ;;  %15985 = vst [vmem:[#allocation41_spill] sm:$0xff] %v14422_v53  ;;  %v9001_v58 = vld [vmem:[%s15217_s12 + $0x18] sm:$0xff]  ;;  %s8139_s12 = spop %8138 }
 0x88c   :  { %v14470_v53 = vstv %s8139_s12  ;;  %s8141_s30 = spop %8140 }
 0x88d   :  { %s8143_s0 = spop %8142 }
 0x88e   :  { %s8145_s17 = spop %8144 }
 0x893   :  { %8111 = vmatmul.msk.f32.gmra.mxu2 %vm187_vm0, %v14265_v1  ;;  %v14429_v1 = vpop.permute.xlu1 %6169 }
 0x894   :  { %15986 = vst [vmem:[#allocation45_spill] sm:$0xff] %v14429_v1 }
 0x89b   :  { %8112 = vmatmul.msk.f32.gmra.mxu2 %vm187_vm0, %v9000_v33  ;;  %v14436_v12 = vpop.permute.xlu1 %6184 }
 0x89c   :  { %15988 = vst [vmem:[#allocation106_spill] sm:$0xff] %v14436_v12 }
 0x89e   :  { %v5046_v14 = vpop.xlane.xlu2 %5045 }
 0x89f   :  { %v5047_v8 = vsub.f32 %v14320_v31, %v5046_v14 }
 0x8a1   :  { %v5048_v55 = vmul.f32 1.442695, %v5047_v8 }
 0x8a3   :  { %8658 = vpow2.f32 %v5048_v55  ;;  %8113 = vmatmul.msk.f32.gmra.mxu2 %vm187_vm0, %v9001_v58  ;;  %v14438_v31 = vpop.permute.xlu1 %6787 }
 0x8a4   :  { %15989 = vst [vmem:[#allocation107_spill] sm:$0xff] %v14438_v31 }
 0x8a9   :  { %v8659_v24 = vpop.eup %8658 }
 0x8aa   :  { %v14432_v41 = vmul.f32 %v14368_v47, %v8659_v24 }
 0x8ab   :  { %v14440_v33 = vpop.permute.xlu1 %6802 }
 0x8ac   :  { %15987 = vst [vmem:[#allocation15_spill] sm:$0xff] %v14432_v41  ;;  %v5051_v59 = vsel %vm5043_vm6, %v14432_v41, 0.0 }
 0x8ad   :  { %5052 = vadd.xlane.f32.xlu0 %v5051_v59  ;;  %15990 = vst [vmem:[#allocation108_spill] sm:$0xff] %v14440_v33  ;;  %v15996_v33 = vld [vmem:[#allocation66_spill] sm:$0xff] }
 0x8b3   :  { %v14442_v14 = vpop.permute.xlu1 %6817 }
 0x8b4   :  { %15991 = vst [vmem:[#allocation109_spill] sm:$0xff] %v14442_v14  ;;  %v15995_v14 = vld [vmem:[#allocation64_spill] sm:$0xff] }
 0x8bb   :  { %v14444_v8 = vpop.permute.xlu1 %6832 }
 0x8bc   :  { %15992 = vst [vmem:[#allocation110_spill] sm:$0xff] %v14444_v8 }
 0x8c3   :  { %v14446_v55 = vpop.permute.xlu1 %6847 }
 0x8c4   :  { %15993 = vst [vmem:[#allocation111_spill] sm:$0xff] %v14446_v55 }
 0x8cb   :  { %v14448_v58 = vpop.permute.xlu1 %5626 }
 0x8cc   :  { %15994 = vst [vmem:[#allocation112_spill] sm:$0xff] %v14448_v58 }
 0x8d7   :  { %v3032_v24 = vpop.xlane.xlu1 %3031 }
 0x8d8   :  { %8660 = vrcp.f32 %v3032_v24 }
 0x8de   :  { %v8661_v17 = vpop.eup %8660 }
 0x8df   :  { %v14451_v1 = vmul.f32 %v8661_v17, %v14371_v26  ;;  %v14500_v19 = vpop.xlane.xlu1 %2940 }
 0x8e0   :  { %16003 = vst [vmem:[#allocation64_spill] sm:$0xff] %v14500_v19 }
 0x8e1   :  { %v14454_v59 = vperm.slane %v14451_v1, 1 }
 0x8e3   :  { %v3494_v8 = vmul.f32 %v14454_v59, %v14181_v25  ;;  %v3495_v24 = vmul.f32 %v14454_v59, %v15995_v14  ;;  %v3496_v26 = vmul.f32 %v14454_v59, %v15996_v33  ;;  %v15997_v25 = vld [vmem:[#allocation73_spill] sm:$0xff]  ;;  %v3499_v14 = vmul.f32 %v14454_v59, %v15998_v18 }
 0x8e4   :  { %v3498_v42 = vmul.f32 %v14454_v59, %v15997_v25  ;;  %v3501_v25 = vmul.f32 %v14454_v59, %v15999_v50 }
 0x8e5   :  { %v3517_v32 = vadd.f32 %v14470_v53, %v3495_v24  ;;  %v3518_v33 = vadd.f32 %v14470_v53, %v3496_v26  ;;  %v16000_v26 = vld [vmem:[#allocation67_spill] sm:$0xff] }
 0x8e6   :  { %v3520_v60 = vadd.f32 %v14470_v53, %v3498_v42  ;;  %v3503_v42 = vmul.f32 %v14454_v59, %v14202_v27  ;;  %v3523_v50 = vadd.f32 %v14470_v53, %v3501_v25 }
 0x8e7   :  { %v3533_v41 = vmax.f32 %v3517_v32, 1e-30  ;;  %v3534_v28 = vmax.f32 %v3518_v33, 1e-30  ;;  %v16001_v32 = vld [vmem:[#allocation96_spill] sm:$0xff] }
 0x906   :  { %v6382_v31 = vpop.f32.mrf.mxu2 }
 0x907   :  { %v6386_v12 = vrot.slane %v6382_v31, 2  ;;  %v3497_v31 = vmul.f32 %v14454_v59, %v14189_v20  ;;  %v3500_v20 = vmul.f32 %v14454_v59, %v14195_v5  ;;  %v3536_v5 = vmax.f32 %v3520_v60, 1e-30 }
 0x909   :  { %v14460_v55 = vsel %vm2335_vm8, %v6386_v12, -1e+30  ;;  %v3516_v12 = vadd.f32 %v14470_v53, %v3494_v8  ;;  %v3519_v58 = vadd.f32 %v14470_v53, %v3497_v31  ;;  %v3521_v8 = vadd.f32 %v14470_v53, %v3499_v14 }
 0x90a   :  { %v6390_v17 = vsel %vm6389_vm11, %v14460_v55, -inf  ;;  %v3502_v31 = vmul.f32 %v14454_v59, %v16000_v26  ;;  %v3522_v4 = vadd.f32 %v14470_v53, %v3500_v20  ;;  %v3504_v14 = vmul.f32 %v14454_v59, %v16001_v32  ;;  %v16002_v26 = vld [vmem:[#allocation88_spill] sm:$0xff] }
 0x90b   :  { %6391 = vmax.xlane.f32.xlu2 %v6390_v17  ;;  %v3532_v17 = vmax.f32 %v3516_v12, 1e-30  ;;  %v3535_v24 = vmax.f32 %v3519_v58, 1e-30  ;;  %v3537_v12 = vmax.f32 %v3521_v8, 1e-30  ;;  %v3505_v60 = vmul.f32 %v14454_v59, %v16002_v26 }
 0x90c   :  { %v3524_v58 = vadd.f32 %v14470_v53, %v3502_v31  ;;  %v3538_v33 = vmax.f32 %v3522_v4, 1e-30  ;;  %v3539_v20 = vmax.f32 %v3523_v50, 1e-30  ;;  %v3506_v31 = vmul.f32 %v14454_v59, %v14217_v49  ;;  %v16004_v50 = vld [vmem:[#allocation27_spill] sm:$0xff] }
 0x90d   :  { %8662 = vlog2.f32 %v3532_v17  ;;  %v3526_v4 = vadd.f32 %v14470_v53, %v3504_v14  ;;  %v16005_v49 = vld [vmem:[#allocation87_spill] sm:$0xff] }
 0x90e   :  { %v14486_v18 = vpop.f32.mrf.mxu2  ;;  %8664 = vlog2.f32 %v3533_v41  ;;  %v3508_v14 = vmul.f32 %v14454_v59, %v16005_v49 }
 0x90f   :  { %8666 = vlog2.f32 %v3534_v28  ;;  %v3525_v28 = vadd.f32 %v14470_v53, %v3503_v42 }
 0x910   :  { %8668 = vlog2.f32 %v3535_v24 }
 0x911   :  { %8670 = vlog2.f32 %v3536_v5  ;;  %v3540_v5 = vmax.f32 %v3524_v58, 1e-30  ;;  %v3528_v58 = vadd.f32 %v14470_v53, %v3506_v31  ;;  %v3530_v31 = vadd.f32 %v14470_v53, %v3508_v14 }
 0x912   :  { %8672 = vlog2.f32 %v3537_v12  ;;  %v3507_v12 = vmul.f32 %v14454_v59, %v16004_v50 }
 0x913   :  { %v8663_v17 = vpop.eup %8662  ;;  %8674 = vlog2.f32 %v3538_v33  ;;  %v3542_v33 = vmax.f32 %v3526_v4, 1e-30  ;;  %v3544_v4 = vmax.f32 %v3528_v58, 1e-30 }
 0x914   :  { %v8665_v41 = vpop.eup %8664  ;;  %v3549_v27 = vmul.f32 0.6931472, %v8663_v17  ;;  %v3527_v17 = vadd.f32 %v14470_v53, %v3505_v60  ;;  %8676 = vlog2.f32 %v3539_v20  ;;  %v3509_v60 = vmul.f32 %v14454_v59, %v14235_v10 }
 0x915   :  { %v8667_v25 = vpop.eup %8666  ;;  %v3551_v8 = vmul.f32 0.6931472, %v8665_v41  ;;  %v3541_v41 = vmax.f32 %v3525_v28, 1e-30  ;;  %8678 = vlog2.f32 %v3540_v5  ;;  %v3529_v28 = vadd.f32 %v14470_v53, %v3507_v12 }
 0x916   :  { %v8669_v24 = vpop.eup %8668  ;;  %v14505_v32 = vpop.f32.mrf.mxu2  ;;  %v3553_v26 = vmul.f32 0.6931472, %v8667_v25  ;;  %v16006_v25 = vld [vmem:[#allocation60_spill] sm:$0xff]  ;;  %v3531_v49 = vadd.f32 %v14470_v53, %v3509_v60 }
 0x917   :  { %v3580_v34 = vadd.f32 %v3551_v8, %v3549_v27  ;;  %v8671_v42 = vpop.eup %8670  ;;  %v3555_v19 = vmul.f32 0.6931472, %v8669_v24  ;;  %v16007_v27 = vld [vmem:[#allocation81_spill] sm:$0xff]  ;;  %8680 = vlog2.f32 %v3541_v41  ;;  %v3545_v10 = vmax.f32 %v3529_v28, 1e-30 }
 0x918   :  { %v8673_v51 = vpop.eup %8672  ;;  %v7171_v8 = vmul.f32 %v16007_v27, %v16006_v25  ;;  %v3557_v62 = vmul.f32 0.6931472, %v8671_v42  ;;  %8682 = vlog2.f32 %v3542_v33  ;;  %v3547_v58 = vmax.f32 %v3531_v49, 1e-30 }
 0x919   :  { %v3581_v22 = vadd.f32 %v3580_v34, %v3553_v26  ;;  %v8675_v50 = vpop.eup %8674  ;;  %v3543_v34 = vmax.f32 %v3527_v17, 1e-30  ;;  %v3559_v20 = vmul.f32 0.6931472, %v8673_v51 }
 0x91a   :  { %v8677_v26 = vpop.eup %8676  ;;  %v3561_v5 = vmul.f32 0.6931472, %v8675_v50 }
 0x91b   :  { %v3582_v57 = vadd.f32 %v3581_v22, %v3555_v19  ;;  %v8679_v19 = vpop.eup %8678  ;;  %v3707_v22 = vpop.xlane.xlu1 %3706  ;;  %8684 = vlog2.f32 %v3543_v34  ;;  %v3563_v12 = vmul.f32 0.6931472, %v8677_v26 }
 0x91c   :  { %8686 = vlog2.f32 %v3544_v4 }
 0x91d   :  { %v3583_v24 = vadd.f32 %v3582_v57, %v3557_v62  ;;  %v8681_v51 = vpop.eup %8680  ;;  %v3546_v62 = vmax.f32 %v3530_v31, 1e-30  ;;  %8688 = vrcp.f32 %v3707_v22  ;;  %v3565_v57 = vmul.f32 0.6931472, %v8679_v19 }
 0x91e   :  { %v7025_v59 = vpop.f32.mrf.mxu2  ;;  %v8683_v14 = vpop.eup %8682  ;;  %8690 = vlog2.f32 %v3545_v10  ;;  %v3567_v33 = vmul.f32 0.6931472, %v8681_v51 }
 0x91f   :  { %v3584_v42 = vadd.f32 %v3583_v24, %v3559_v20  ;;  %8692 = vlog2.f32 %v3546_v62  ;;  %v3569_v50 = vmul.f32 0.6931472, %v8683_v14  ;;  %v7026_v19 = vadd.f32 %v7025_v59, %v15849_v3 }
 0x920   :  { %8694 = vlog2.f32 %v3547_v58 }
 0x921   :  { %v3585_v17 = vadd.f32 %v3584_v42, %v3561_v5  ;;  %v7033_v14 = vmax.f32 %v7026_v19, 0.0 }
 0x923   :  { %7218 = vrot.lane.b32.xlu2 %v7171_v8, %s9040_s22  ;;  %v3586_v41 = vadd.f32 %v3585_v17, %v3563_v12  ;;  %v8685_v8 = vpop.eup %8684  ;;  %v7023_v17 = vadd.f32 %v14505_v32, %v15851_v40 }
 0x924   :  { %v8687_v60 = vpop.eup %8686  ;;  %v3571_v34 = vmul.f32 0.6931472, %v8685_v8  ;;  %v7035_v8 = vrot.slane %v15858_v23, 7 }
 0x925   :  { %v3587_v27 = vadd.f32 %v3586_v41, %v3565_v57  ;;  %v8689_v28 = vpop.eup %8688  ;;  %v3573_v26 = vmul.f32 0.6931472, %v8687_v60 }
 0x926   :  { %v8691_v24 = vpop.eup %8690  ;;  %v7028_v4 = vpop.f32.mrf.mxu2  ;;  %v14522_v42 = vmul.f32 %v8689_v28, %v14389_v7  ;;  %v7020_v7 = vadd.f32 %v14486_v18, %v15942_v16  ;;  %v16008_v16 = vld [vmem:[#allocation24_spill] sm:$0xff] }
 0x927   :  { %v3588_v53 = vadd.f32 %v3587_v27, %v3567_v33  ;;  %v8693_v5 = vpop.eup %8692  ;;  %v7029_v22 = vadd.f32 %v7028_v4, %v15848_v2  ;;  %v3575_v49 = vmul.f32 0.6931472, %v8691_v24  ;;  %v7032_v2 = vmax.f32 %v7023_v17, 0.0  ;;  %v4373_v28 = vpop.xlane.xlu0 %4372  ;;  %v16009_v24 = vld [vmem:[#allocation72_spill] sm:$0xff] }
 0x928   :  { %v8695_v12 = vpop.eup %8694  ;;  %v3577_v62 = vmul.f32 0.6931472, %v8693_v5  ;;  %v14529_v41 = vperm.slane %v14522_v42, 2  ;;  %v7031_v33 = vmax.f32 %v7020_v7, 0.0  ;;  %v16010_v7 = vld [vmem:[#allocation101_spill] sm:$0xff] }
 0x929   :  { %v3589_v20 = vadd.f32 %v3588_v53, %v3569_v50  ;;  %v7034_v51 = vmax.f32 %v7029_v22, 0.0  ;;  %v3579_v3 = vmul.f32 0.6931472, %v8695_v12  ;;  %v14542_v53 = vstv %s8141_s30 }
 0x92a   :  { %v4169_v40 = vmul.f32 %v14529_v41, %v14254_v30  ;;  %v4170_v32 = vmul.f32 %v14529_v41, %v14003_v44  ;;  %v4171_v18 = vmul.f32 %v14529_v41, %v16008_v16  ;;  %v4172_v50 = vmul.f32 %v14529_v41, %v14272_v63 }
 0x92b   :  { %v3590_v31 = vadd.f32 %v3589_v20, %v3571_v34  ;;  %7050 = vmatpush.msra.mxu3 %v7034_v51  ;;  %v4173_v30 = vmul.f32 %v14529_v41, %v14036_v54  ;;  %v4175_v5 = vmul.f32 %v14529_v41, %v14281_v6  ;;  %v4176_v12 = vmul.f32 %v14529_v41, %v14066_v29 }
 0x92c   :  { %v4191_v44 = vadd.f32 %v14542_v53, %v4169_v40  ;;  %v4192_v23 = vadd.f32 %v14542_v53, %v4170_v32  ;;  %v4193_v20 = vadd.f32 %v14542_v53, %v4171_v18  ;;  %v4194_v63 = vadd.f32 %v14542_v53, %v4172_v50  ;;  %v16011_v18 = vld [vmem:[#allocation71_spill] sm:$0xff] }
 0x92d   :  { %v3591_v10 = vadd.f32 %v3590_v31, %v3573_v26  ;;  %7051 = vmatpush.msra.mxu3 %v7033_v14  ;;  %v4174_v26 = vmul.f32 %v14529_v41, %v16009_v24  ;;  %v4374_v31 = vsub.f32 %v14222_v61, %v4373_v28  ;;  %v4195_v54 = vadd.f32 %v14542_v53, %v4173_v30 }
 0x92e   :  { %v4207_v19 = vmax.f32 %v4191_v44, 1e-30  ;;  %v4208_v22 = vmax.f32 %v4192_v23, 1e-30  ;;  %v4210_v51 = vmax.f32 %v4194_v63, 1e-30  ;;  %v3608_v61 = vmul.f32 %v14342_v37, %v14451_v1 }
 0x92f   :  { %v3592_v57 = vadd.f32 %v3591_v10, %v3575_v49  ;;  %7052 = vmatpush.msra.mxu3 %v7032_v2  ;;  %v4209_v10 = vmax.f32 %v4193_v20, 1e-30  ;;  %v4196_v17 = vadd.f32 %v14542_v53, %v4174_v26  ;;  %v4177_v6 = vmul.f32 %v14529_v41, %v16010_v7 }
 0x930   :  { %8696 = vlog2.f32 %v4207_v19  ;;  %v4197_v14 = vadd.f32 %v14542_v53, %v4175_v5  ;;  %v4178_v29 = vmul.f32 %v14529_v41, %v14290_v45  ;;  %v4198_v2 = vadd.f32 %v14542_v53, %v4176_v12 }
 0x931   :  { %v3593_v59 = vadd.f32 %v3592_v57, %v3577_v62  ;;  %7053 = vmatpush.msra.mxu3 %v7031_v33  ;;  %v4375_v62 = vmul.f32 1.442695, %v4374_v31  ;;  %8698 = vlog2.f32 %v4208_v22  ;;  %v3609_v1 = vadd.f32 %v3608_v61, %v15976_v48 }
 0x932   :  { %8114 = vmatmul.msk.f32.vlgmr.msra.gmra.mxu3 %vm1109_vm1, %v7035_v8  ;;  %8700 = vlog2.f32 %v4209_v10  ;;  %v4179_v40 = vmul.f32 %v14529_v41, %v14095_v15  ;;  %v4199_v32 = vadd.f32 %v14542_v53, %v4177_v6  ;;  %v4180_v50 = vmul.f32 %v14529_v41, %v16011_v18 }
 0x933   :  { %v3594_v58 = vadd.f32 %v3593_v59, %v3579_v3  ;;  %v4211_v3 = vmax.f32 %v4195_v54, 1e-30  ;;  %8702 = vlog2.f32 %v4210_v51  ;;  %v4214_v28 = vmax.f32 %v4198_v2, 1e-30 }
 0x934   :  { %8704 = vpow2.f32 %v4375_v62  ;;  %v4181_v15 = vmul.f32 %v14529_v41, %v14297_v52  ;;  %v4201_v20 = vadd.f32 %v14542_v53, %v4179_v40  ;;  %v4215_v24 = vmax.f32 %v4199_v32, 1e-30 }
 0x935   :  { %v3595_v27 = vrot.slane %v3594_v58, 4  ;;  %8706 = vlog2.f32 %v4211_v3  ;;  %v4182_v31 = vmul.f32 %v14529_v41, %v14126_v46  ;;  %v4202_v22 = vadd.f32 %v14542_v53, %v4180_v50 }
 0x936   :  { %v8697_v33 = vpop.eup %8696  ;;  %v4203_v62 = vadd.f32 %v14542_v53, %v4181_v15  ;;  %v4217_v61 = vmax.f32 %v4201_v20, 1e-30  ;;  %vm7696_vm1 = vcmask 0  }
 0x937   :  { %v3596_v60 = vadd.f32 %v3595_v27, %v3594_v58  ;;  %v4212_v58 = vmax.f32 %v4196_v17, 1e-30  ;;  %v4213_v27 = vmax.f32 %v4197_v14, 1e-30  ;;  %v4224_v16 = vmul.f32 0.6931472, %v8697_v33  ;;  %v8699_v45 = vpop.eup %8698 }
 0x938   :  { %v8701_v30 = vpop.eup %8700  ;;  %v4226_v23 = vmul.f32 0.6931472, %v8699_v45  ;;  %v16012_v17 = vld [vmem:[#allocation19_spill] sm:$0xff]  ;;  %v4184_v14 = vmul.f32 %v14529_v41, %v14303_v13  ;;  %v4204_v3 = vadd.f32 %v14542_v53, %v4182_v31 }
 0x939   :  { %v3597_v34 = vrot.slane %v3596_v60, 2  ;;  %8708 = vlog2.f32 %v4212_v58  ;;  %v4183_v51 = vmul.f32 %v14529_v41, %v16012_v17 }
 0x93a   :  { %8710 = vlog2.f32 %v4213_v27  ;;  %v4255_v5 = vadd.f32 %v4226_v23, %v4224_v16  ;;  %v4220_v13 = vmax.f32 %v4204_v3, 1e-30 }
 0x93b   :  { %v3598_v4 = vadd.f32 %v3597_v34, %v3596_v60  ;;  %v4200_v60 = vadd.f32 %v14542_v53, %v4178_v29  ;;  %v8703_v34 = vpop.eup %8702  ;;  %8712 = vlog2.f32 %v4214_v28 }
 0x93c   :  { %v8705_v26 = vpop.eup %8704  ;;  %v4230_v52 = vmul.f32 0.6931472, %v8703_v34  ;;  %8714 = vlog2.f32 %v4215_v24 }
 0x93d   :  { %v3599_v49 = vrot.slane %v3598_v4, 1  ;;  %v8707_v54 = vpop.eup %8706  ;;  %v14591_v46 = vmul.f32 %v14368_v47, %v8705_v26 }
 0x93f   :  { %v3600_v57 = vadd.f32 %v3599_v49, %v3598_v4  ;;  %v4228_v4 = vmul.f32 0.6931472, %v8701_v30  ;;  %v4216_v49 = vmax.f32 %v4200_v60, 1e-30  ;;  %v8709_v12 = vpop.eup %8708  ;;  %v4378_v27 = vsel %vm4370_vm5, %v14591_v46, 0.0 }
 0x940   :  { %v8711_v6 = vpop.eup %8710  ;;  %v4234_v29 = vmul.f32 0.6931472, %v8709_v12 }
 0x941   :  { %v3601_v59 = vmul.f32 %v3600_v57, %v14140_v38  ;;  %v4256_v10 = vadd.f32 %v4255_v5, %v4228_v4  ;;  %v4232_v57 = vmul.f32 0.6931472, %v8707_v54  ;;  %8716 = vlog2.f32 %v4216_v49  ;;  %v8713_v58 = vpop.eup %8712 }
 0x942   :  { %8718 = vlog2.f32 %v4217_v61  ;;  %v4236_v33 = vmul.f32 0.6931472, %v8711_v6  ;;  %v8715_v32 = vpop.eup %8714  ;;  %v4238_v41 = vmul.f32 0.6931472, %v8713_v58  ;;  %v4283_v6 = vmul.f32 %v14348_v9, %v14522_v42 }
 0x943   :  { %v3602_v37 = vmul.f32 %v3601_v59, %v14360_v39  ;;  %v4257_v7 = vadd.f32 %v4256_v10, %v4230_v52  ;;  %v4218_v59 = vmax.f32 %v4202_v22, 1e-30  ;;  %v4240_v50 = vmul.f32 0.6931472, %v8715_v32 }
 0x944   :  { %v5713_v9 = vrot.slane %v14354_v36, 3 }
 0x945   :  { %v3610_v8 = vsub.f32 %v3602_v37, %v3609_v1  ;;  %v4258_v2 = vadd.f32 %v4257_v7, %v4232_v57  ;;  %v4205_v37 = vadd.f32 %v14542_v53, %v4183_v51  ;;  %v4219_v1 = vmax.f32 %v4203_v62, 1e-30 }
 0x946   :  { %8720 = vlog2.f32 %v4218_v59 }
 0x947   :  { %v3611_v44 = vsub.f32 %v3610_v8, %v14376_v0  ;;  %v4259_v40 = vadd.f32 %v4258_v2, %v4234_v29  ;;  %v4206_v8 = vadd.f32 %v14542_v53, %v4184_v14  ;;  %v8717_v45 = vpop.eup %8716  ;;  %v4221_v18 = vmax.f32 %v4205_v37, 1e-30 }
 0x948   :  { %8722 = vlog2.f32 %v4219_v1  ;;  %v8719_v28 = vpop.eup %8718  ;;  %v4284_v29 = vadd.f32 %v4283_v6, %v15976_v48  ;;  %v16020_v6 = vld [vmem:[#allocation37_spill] sm:$0xff] }
 0x949   :  { %v3612_v63 = vsel %vm2335_vm8, %v3611_v44, 0.0  ;;  %v4260_v16 = vadd.f32 %v4259_v40, %v4236_v33  ;;  %v4222_v30 = vmax.f32 %v4206_v8, 1e-30  ;;  %8724 = vlog2.f32 %v4220_v13 }
 0x94a   :  { %v3613_v19 = vsel %vm3022_vm3, %v3612_v63, 0.0  ;;  %v4242_v44 = vmul.f32 0.6931472, %v8717_v45  ;;  %8726 = vlog2.f32 %v4221_v18  ;;  %v4244_v15 = vmul.f32 0.6931472, %v8719_v28 }
 0x94b   :  { %3614 = vadd.xlane.f32.xlu1 %v3613_v19  ;;  %v4261_v60 = vadd.f32 %v4260_v16, %v4238_v41  ;;  %8728 = vlog2.f32 %v4222_v30 }
 0x94c   :  { %v8721_v34 = vpop.eup %8720 }
 0x94d   :  { %v4262_v23 = vadd.f32 %v4261_v60, %v4240_v50  ;;  %v4246_v24 = vmul.f32 0.6931472, %v8721_v34  ;;  %v14636_v60 = vstv %s8143_s0 }
 0x94e   :  { %v8723_v53 = vpop.eup %8722 }
 0x94f   :  { %v4263_v20 = vadd.f32 %v4262_v23, %v4242_v44  ;;  %v8725_v63 = vpop.eup %8724  ;;  %v4248_v31 = vmul.f32 0.6931472, %v8723_v53  ;;  %v16014_v23 = vld [vmem:[#allocation32_spill] sm:$0xff] }
 0x950   :  { %v8727_v5 = vpop.eup %8726  ;;  %v4250_v54 = vmul.f32 0.6931472, %v8725_v63 }
 0x951   :  { %v4264_v26 = vadd.f32 %v4263_v20, %v4244_v15  ;;  %v8729_v22 = vpop.eup %8728  ;;  %v4252_v49 = vmul.f32 0.6931472, %v8727_v5  ;;  %v16017_v5 = vld [vmem:[#allocation42_spill] sm:$0xff] }
 0x952   :  { %v4254_v10 = vmul.f32 0.6931472, %v8729_v22 }
 0x953   :  { %4379 = vadd.xlane.f32.xlu1 %v4378_v27  ;;  %v4265_v4 = vadd.f32 %v4264_v26, %v4246_v24  ;;  %v16016_v24 = vld [vmem:[#allocation34_spill] sm:$0xff] }
 0x955   :  { %v4266_v19 = vadd.f32 %v4265_v4, %v4248_v31 }
 0x957   :  { %v4267_v52 = vadd.f32 %v4266_v19, %v4250_v54 }
 0x959   :  { %v4268_v12 = vadd.f32 %v4267_v52, %v4252_v49  ;;  %v16018_v49 = vld [vmem:[#allocation8_spill] sm:$0xff] }
 0x95b   :  { %v4269_v17 = vadd.f32 %v4268_v12, %v4254_v10 }
 0x95d   :  { %v4270_v51 = vrot.slane %v4269_v17, 4 }
 0x95f   :  { %v4271_v62 = vadd.f32 %v4270_v51, %v4269_v17  ;;  %v16019_v17 = vld [vmem:[#allocation89_spill] sm:$0xff] }
 0x961   :  { %v4272_v61 = vrot.slane %v4271_v62, 2 }
 0x963   :  { %v4273_v57 = vadd.f32 %v4272_v61, %v4271_v62 }
 0x965   :  { %v4274_v7 = vrot.slane %v4273_v57, 1 }
 0x967   :  { %v4275_v14 = vadd.f32 %v4274_v7, %v4273_v57 }
 0x969   :  { %v4276_v3 = vmul.f32 %v4275_v14, %v14140_v38 }
 0x96b   :  { %v4277_v59 = vmul.f32 %v4276_v3, %v14360_v39  ;;  %v14613_v39 = vsel %vm2335_vm8, %v5713_v9, -1e+30 }
 0x96d   :  { %v4285_v2 = vsub.f32 %v4277_v59, %v4284_v29 }
 0x96f   :  { %v4286_v58 = vsub.f32 %v4285_v2, %v14376_v0  ;;  %v5717_v0 = vsel %vm5716_vm7, %v14613_v39, -inf }
 0x971   :  { %v4287_v33 = vsel %vm2335_vm8, %v4286_v58, 0.0 }
 0x972   :  { %v4288_v40 = vsel %vm3697_vm4, %v4287_v33, 0.0 }
 0x973   :  { %4289 = vadd.xlane.f32.xlu1 %v4288_v40  ;;  %v16021_v40 = vld [vmem:[#allocation11_spill] sm:$0xff] }
 0x97b   :  { %5718 = vmax.xlane.f32.xlu1 %v5717_v0  ;;  %v16022_v0 = vld [vmem:[#allocation64_spill] sm:$0xff] }
 0x97e   :  { %v6392_v37 = vpop.xlane.xlu2 %6391 }
 0x97f   :  { %v6393_v1 = vsub.f32 %v14460_v55, %v6392_v37 }
 0x981   :  { %v6394_v32 = vmul.f32 1.442695, %v6393_v1 }
 0x983   :  { %8730 = vpow2.f32 %v6394_v32 }
 0x989   :  { %v8731_v42 = vpop.eup %8730 }
 0x98a   :  { %v14618_v55 = vmul.f32 %v14368_v47, %v8731_v42 }
 0x98c   :  { %v6397_v27 = vsel %vm6389_vm11, %v14618_v55, 0.0 }
 0x98d   :  { %6398 = vadd.xlane.f32.xlu1 %v6397_v27 }
 0x9be   :  { %v3615_v8 = vpop.xlane.xlu1 %3614 }
 0x9bf   :  { %v3617_v7 = vrot.slane %v3615_v8, 1 }
 0x9c1   :  { %v3619_v27 = vadd.f32 %v3617_v7, %v16022_v0  ;;  %v16026_v0 = vld [vmem:[#allocation15_spill] sm:$0xff] }
 0x9c6   :  { %v4380_v36 = vpop.xlane.xlu1 %4379 }
 0x9c7   :  { %8732 = vrcp.f32 %v4380_v36 }
 0x9cd   :  { %v8733_v13 = vpop.eup %8732 }
 0x9ce   :  { %v14623_v41 = vmul.f32 %v8733_v13, %v14591_v46  ;;  %v16013_v46 = vld [vmem:[#allocation104_spill] sm:$0xff] }
 0x9d0   :  { %v14626_v16 = vperm.slane %v14623_v41, 3 }
 0x9d2   :  { %v4842_v45 = vmul.f32 %v14626_v16, %v14026_v43  ;;  %v4843_v47 = vmul.f32 %v14626_v16, %v14309_v35  ;;  %v4844_v18 = vmul.f32 %v14626_v16, %v14153_v56  ;;  %v4845_v50 = vmul.f32 %v14626_v16, %v14058_v11  ;;  %v16015_v56 = vld [vmem:[#allocation55_spill] sm:$0xff] }
 0x9d3   :  { %v4846_v28 = vmul.f32 %v14626_v16, %v16013_v46  ;;  %v4847_v43 = vmul.f32 %v14626_v16, %v16014_v23  ;;  %v4848_v15 = vmul.f32 %v14626_v16, %v16015_v56  ;;  %v4849_v26 = vmul.f32 %v14626_v16, %v16016_v24 }
 0x9d4   :  { %v4864_v30 = vadd.f32 %v14636_v60, %v4842_v45  ;;  %v4865_v44 = vadd.f32 %v14636_v60, %v4843_v47  ;;  %v4866_v35 = vadd.f32 %v14636_v60, %v4844_v18  ;;  %v4867_v34 = vadd.f32 %v14636_v60, %v4845_v50  ;;  %v16023_v47 = vld [vmem:[#allocation91_spill] sm:$0xff] }
 0x9d5   :  { %v4868_v11 = vadd.f32 %v14636_v60, %v4846_v28  ;;  %v4869_v63 = vadd.f32 %v14636_v60, %v4847_v43  ;;  %v4850_v54 = vmul.f32 %v14626_v16, %v16017_v5  ;;  %v4870_v19 = vadd.f32 %v14636_v60, %v4848_v15  ;;  %v16024_v43 = vld [vmem:[#allocation99_spill] sm:$0xff] }
 0x9d6   :  { %v4880_v20 = vmax.f32 %v4864_v30, 1e-30  ;;  %v4881_v53 = vmax.f32 %v4865_v44, 1e-30  ;;  %v4882_v31 = vmax.f32 %v4866_v35, 1e-30  ;;  %v4851_v52 = vmul.f32 %v14626_v16, %v16018_v49 }
 0x9d7   :  { %v4883_v4 = vmax.f32 %v4867_v34, 1e-30  ;;  %v4884_v22 = vmax.f32 %v4868_v11, 1e-30  ;;  %v4871_v10 = vadd.f32 %v14636_v60, %v4849_v26  ;;  %v4885_v12 = vmax.f32 %v4869_v63, 1e-30 }
 0x9d8   :  { %8734 = vlog2.f32 %v4880_v20  ;;  %v4852_v51 = vmul.f32 %v14626_v16, %v16019_v17  ;;  %v4872_v62 = vadd.f32 %v14636_v60, %v4850_v54  ;;  %v4886_v61 = vmax.f32 %v4870_v19, 1e-30 }
 0x9d9   :  { %8736 = vlog2.f32 %v4881_v53  ;;  %v4853_v14 = vmul.f32 %v14626_v16, %v16020_v6  ;;  %v4873_v59 = vadd.f32 %v14636_v60, %v4851_v52  ;;  %v4887_v29 = vmax.f32 %v4871_v10, 1e-30  ;;  %v16025_v53 = vld [vmem:[#allocation10_spill] sm:$0xff]  ;;  %v5053_v10 = vpop.xlane.xlu0 %5052 }
 0x9da   :  { %8738 = vlog2.f32 %v4882_v31  ;;  %v4854_v32 = vmul.f32 %v14626_v16, %v16021_v40  ;;  %v4874_v9 = vadd.f32 %v14636_v60, %v4852_v51  ;;  %v4888_v42 = vmax.f32 %v4872_v62, 1e-30 }
 0x9db   :  { %8740 = vlog2.f32 %v4883_v4  ;;  %v4855_v18 = vmul.f32 %v14626_v16, %v16023_v47  ;;  %v4875_v50 = vadd.f32 %v14636_v60, %v4853_v14  ;;  %v4889_v46 = vmax.f32 %v4873_v59, 1e-30 }
 0x9dc   :  { %8742 = vlog2.f32 %v4884_v22  ;;  %v4856_v35 = vmul.f32 %v14626_v16, %v16024_v43  ;;  %v4876_v34 = vadd.f32 %v14636_v60, %v4854_v32  ;;  %v4890_v56 = vmax.f32 %v4874_v9, 1e-30  ;;  %v16028_v43 = vld [vmem:[#allocation56_spill] sm:$0xff] }
 0x9dd   :  { %8744 = vlog2.f32 %v4885_v12  ;;  %v4857_v24 = vmul.f32 %v14626_v16, %v16025_v53  ;;  %v4877_v26 = vadd.f32 %v14636_v60, %v4855_v18  ;;  %v4891_v63 = vmax.f32 %v4875_v50, 1e-30 }
 0x9de   :  { %v8735_v57 = vpop.eup %8734  ;;  %8746 = vlog2.f32 %v4886_v61  ;;  %v4878_v54 = vadd.f32 %v14636_v60, %v4856_v35  ;;  %v4892_v19 = vmax.f32 %v4876_v34, 1e-30  ;;  %v14695_v53 = vstv %s8145_s17 }
 0x9df   :  { %v8737_v3 = vpop.eup %8736  ;;  %v4897_v2 = vmul.f32 0.6931472, %v8735_v57  ;;  %8748 = vlog2.f32 %v4887_v29  ;;  %v4879_v12 = vadd.f32 %v14636_v60, %v4857_v24  ;;  %v4893_v17 = vmax.f32 %v4877_v26, 1e-30 }
 0x9e0   :  { %v8739_v58 = vpop.eup %8738  ;;  %v4899_v37 = vmul.f32 0.6931472, %v8737_v3  ;;  %8750 = vlog2.f32 %v4888_v42  ;;  %v4894_v61 = vmax.f32 %v4878_v54, 1e-30 }
 0x9e1   :  { %v8741_v1 = vpop.eup %8740  ;;  %v4901_v36 = vmul.f32 0.6931472, %v8739_v58  ;;  %8752 = vlog2.f32 %v4889_v46  ;;  %v4895_v14 = vmax.f32 %v4879_v12, 1e-30 }
 0x9e2   :  { %v4928_v13 = vadd.f32 %v4899_v37, %v4897_v2  ;;  %v8743_v45 = vpop.eup %8742  ;;  %v4903_v30 = vmul.f32 0.6931472, %v8741_v1  ;;  %8754 = vlog2.f32 %v4890_v56  ;;  %v16029_v56 = vld [vmem:[#allocation83_spill] sm:$0xff] }
 0x9e3   :  { %v8745_v23 = vpop.eup %8744  ;;  %v4905_v15 = vmul.f32 0.6931472, %v8743_v45  ;;  %8756 = vlog2.f32 %v4891_v63  ;;  %v16031_v63 = vld [vmem:[#allocation28_spill] sm:$0xff] }
 0x9e4   :  { %v4929_v44 = vadd.f32 %v4928_v13, %v4901_v36  ;;  %v8747_v20 = vpop.eup %8746  ;;  %v4907_v31 = vmul.f32 0.6931472, %v8745_v23  ;;  %8758 = vlog2.f32 %v4892_v19 }
 0x9e5   :  { %v8749_v5 = vpop.eup %8748  ;;  %v4909_v22 = vmul.f32 0.6931472, %v8747_v20  ;;  %8760 = vrcp.f32 %v5053_v10 }
 0x9e6   :  { %v4290_v33 = vpop.xlane.xlu1 %4289  ;;  %v4930_v11 = vadd.f32 %v4929_v44, %v4903_v30  ;;  %v8751_v52 = vpop.eup %8750  ;;  %v4911_v16 = vmul.f32 0.6931472, %v8749_v5  ;;  %8762 = vlog2.f32 %v4893_v17  ;;  %v16027_v44 = vld [vmem:[#allocation40_spill] sm:$0xff]  ;;  %v16033_v17 = vld [vmem:[#allocation39_spill] sm:$0xff] }
 0x9e7   :  { %v4292_v8 = vrot.slane %v4290_v33, 2  ;;  %v8753_v62 = vpop.eup %8752  ;;  %v4913_v57 = vmul.f32 0.6931472, %v8751_v52  ;;  %8764 = vlog2.f32 %v4894_v61 }
 0x9e8   :  { %v4931_v4 = vadd.f32 %v4930_v11, %v4905_v15  ;;  %v8755_v6 = vpop.eup %8754  ;;  %v4915_v3 = vmul.f32 0.6931472, %v8753_v62  ;;  %8766 = vlog2.f32 %v4895_v14  ;;  %v16030_v11 = vld [vmem:[#allocation21_spill] sm:$0xff] }
 0x9e9   :  { %v14671_v28 = vadd.f32 %v4292_v8, %v3619_v27  ;;  %v8757_v29 = vpop.eup %8756  ;;  %v4917_v2 = vmul.f32 0.6931472, %v8755_v6  ;;  %v16034_v6 = vld [vmem:[#allocation76_spill] sm:$0xff] }
 0x9ea   :  { %v4932_v49 = vadd.f32 %v4931_v4, %v4907_v31  ;;  %v8759_v60 = vpop.eup %8758  ;;  %v4919_v1 = vmul.f32 0.6931472, %v8757_v29  ;;  %v16035_v29 = vld [vmem:[#allocation17_spill] sm:$0xff] }
 0x9eb   :  { %v8761_v37 = vpop.eup %8760  ;;  %v4921_v32 = vmul.f32 0.6931472, %v8759_v60  ;;  %v16036_v60 = vld [vmem:[#allocation31_spill] sm:$0xff] }
 0x9ec   :  { %v4933_v51 = vadd.f32 %v4932_v49, %v4909_v22  ;;  %v8763_v40 = vpop.eup %8762  ;;  %v14682_v27 = vmul.f32 %v8761_v37, %v16026_v0  ;;  %v16032_v22 = vld [vmem:[#allocation50_spill] sm:$0xff] }
 0x9ed   :  { %v8765_v42 = vpop.eup %8764  ;;  %v4923_v8 = vmul.f32 0.6931472, %v8763_v40 }
 0x9ee   :  { %v4934_v7 = vadd.f32 %v4933_v51, %v4911_v16  ;;  %v8767_v13 = vpop.eup %8766  ;;  %v4925_v45 = vmul.f32 0.6931472, %v8765_v42  ;;  %v14685_v18 = vperm.slane %v14682_v27, 4  ;;  %v5719_v26 = vpop.xlane.xlu1 %5718 }
 0x9ef   :  { %v4927_v50 = vmul.f32 0.6931472, %v8767_v13  ;;  %v5720_v10 = vsub.f32 %v14613_v39, %v5719_v26  ;;  %v4956_v39 = vmul.f32 %v16035_v29, %v14623_v41  ;;  %v14724_v41 = vld [vmem:[%s15207_s2] sm:$0xff] }
 0x9f0   :  { %v4935_v59 = vadd.f32 %v4934_v7, %v4913_v57  ;;  %v5515_v23 = vmul.f32 %v14685_v18, %v16027_v44  ;;  %v5516_v35 = vmul.f32 %v14685_v18, %v16028_v43  ;;  %v5517_v15 = vmul.f32 %v14685_v18, %v16029_v56  ;;  %v16039_v43 = vld [vmem:[#allocation103_spill] sm:$0xff] }
 0x9f1   :  { %v5518_v20 = vmul.f32 %v14685_v18, %v16030_v11  ;;  %v5519_v31 = vmul.f32 %v14685_v18, %v16031_v63  ;;  %v5520_v49 = vmul.f32 %v14685_v18, %v16032_v22  ;;  %v5521_v16 = vmul.f32 %v14685_v18, %v16033_v17  ;;  %v14737_v11 = vld [vmem:[%s15211_s6] sm:$0xff] }
 0x9f2   :  { %v4936_v58 = vadd.f32 %v4935_v59, %v4915_v3  ;;  %v5537_v4 = vadd.f32 %v14695_v53, %v5515_v23  ;;  %v5538_v5 = vadd.f32 %v14695_v53, %v5516_v35  ;;  %v5539_v19 = vadd.f32 %v14695_v53, %v5517_v15  ;;  %v16040_v63 = vld [vmem:[#allocation69_spill] sm:$0xff] }
 0x9f3   :  { %v5540_v52 = vadd.f32 %v14695_v53, %v5518_v20  ;;  %v5541_v51 = vadd.f32 %v14695_v53, %v5519_v31  ;;  %v5522_v14 = vmul.f32 %v14685_v18, %v16034_v6  ;;  %v5542_v3 = vadd.f32 %v14695_v53, %v5520_v49  ;;  %v16041_v22 = vld [vmem:[#allocation53_spill] sm:$0xff] }
 0x9f4   :  { %v4937_v33 = vadd.f32 %v4936_v58, %v4917_v2  ;;  %v5553_v62 = vmax.f32 %v5537_v4, 1e-30  ;;  %v5554_v61 = vmax.f32 %v5538_v5, 1e-30  ;;  %v5555_v7 = vmax.f32 %v5539_v19, 1e-30 }
 0x9f5   :  { %v5556_v59 = vmax.f32 %v5540_v52, 1e-30  ;;  %v5721_v2 = vmul.f32 1.442695, %v5720_v10  ;;  %v5523_v37 = vmul.f32 %v14685_v18, %v16036_v60  ;;  %v5544_v42 = vadd.f32 %v14695_v53, %v5522_v14  ;;  %v16043_v60 = vld [vmem:[#allocation48_spill] sm:$0xff] }
 0x9f6   :  { %v4938_v9 = vadd.f32 %v4937_v33, %v4919_v1  ;;  %8768 = vlog2.f32 %v5553_v62  ;;  %v5543_v1 = vadd.f32 %v14695_v53, %v5521_v16  ;;  %v5557_v33 = vmax.f32 %v5541_v51, 1e-30 }
 0x9f7   :  { %8770 = vlog2.f32 %v5554_v61  ;;  %v5558_v0 = vmax.f32 %v5542_v3, 1e-30  ;;  %v5526_v35 = vmul.f32 %v14685_v18, %v16039_v43  ;;  %v5560_v56 = vmax.f32 %v5544_v42, 1e-30 }
 0x9f8   :  { %v4939_v36 = vadd.f32 %v4938_v9, %v4921_v32  ;;  %8772 = vlog2.f32 %v5555_v7  ;;  %v16037_v32 = vld [vmem:[#allocation63_spill] sm:$0xff]  ;;  %v5527_v31 = vmul.f32 %v14685_v18, %v16040_v63  ;;  %v5528_v49 = vmul.f32 %v14685_v18, %v16041_v22 }
 0x9f9   :  { %v5524_v9 = vmul.f32 %v14685_v18, %v16037_v32  ;;  %8774 = vlog2.f32 %v5556_v59  ;;  %v5548_v16 = vadd.f32 %v14695_v53, %v5526_v35  ;;  %v16042_v7 = vld [vmem:[#allocation79_spill] sm:$0xff]  ;;  %v9004_v59 = vld [vmem:[%s15208_s3] sm:$0xff] }
 0x9fa   :  { %v4940_v47 = vadd.f32 %v4939_v36, %v4923_v8  ;;  %8776 = vpow2.f32 %v5721_v2  ;;  %v4957_v36 = vadd.f32 %v4956_v39, %v15976_v48  ;;  %v5529_v6 = vmul.f32 %v14685_v18, %v16042_v7  ;;  %v16045_v7 = vld [vmem:[#allocation95_spill] sm:$0xff] }
 0x9fb   :  { %8778 = vlog2.f32 %v5557_v33  ;;  %v5549_v14 = vadd.f32 %v14695_v53, %v5527_v31  ;;  %v5564_v33 = vmax.f32 %v5548_v16, 1e-30 }
 0x9fc   :  { %v4941_v46 = vadd.f32 %v4940_v47, %v4925_v45  ;;  %v8769_v13 = vpop.eup %8768  ;;  %v16038_v45 = vld [vmem:[#allocation94_spill] sm:$0xff]  ;;  %8780 = vlog2.f32 %v5558_v0  ;;  %v5551_v42 = vadd.f32 %v14695_v53, %v5529_v6 }
 0x9fd   :  { %v5525_v47 = vmul.f32 %v14685_v18, %v16038_v45  ;;  %v5570_v44 = vmul.f32 0.6931472, %v8769_v13  ;;  %v8771_v23 = vpop.eup %8770  ;;  %v5565_v0 = vmax.f32 %v5549_v14, 1e-30 }
 0x9fe   :  { %v4942_v30 = vadd.f32 %v4941_v46, %v4927_v50  ;;  %v5545_v50 = vadd.f32 %v14695_v53, %v5523_v37  ;;  %v5559_v46 = vmax.f32 %v5543_v1, 1e-30  ;;  %v8773_v15 = vpop.eup %8772  ;;  %v5530_v37 = vmul.f32 %v14685_v18, %v16043_v60  ;;  %v16046_v60 = vld [vmem:[#allocation84_spill] sm:$0xff] }
 0x9ff   :  { %v8775_v26 = vpop.eup %8774  ;;  %v5547_v4 = vadd.f32 %v14695_v53, %v5525_v47  ;;  %v5574_v52 = vmul.f32 0.6931472, %v8773_v15  ;;  %v5550_v1 = vadd.f32 %v14695_v53, %v5528_v49 }
 0xa00   :  { %v4943_v34 = vrot.slane %v4942_v30, 4  ;;  %v5561_v5 = vmax.f32 %v5545_v50, 1e-30  ;;  %8782 = vlog2.f32 %v5559_v46  ;;  %v5576_v62 = vmul.f32 0.6931472, %v8775_v26 }
 0xa01   :  { %8784 = vlog2.f32 %v5560_v56  ;;  %v5563_v3 = vmax.f32 %v5547_v4, 1e-30  ;;  %v5552_v47 = vadd.f32 %v14695_v53, %v5530_v37  ;;  %v5566_v18 = vmax.f32 %v5550_v1, 1e-30  ;;  %v16047_v1 = vld [vmem:[#allocation112_spill] sm:$0xff] }
 0xa02   :  { %v4944_v24 = vadd.f32 %v4943_v34, %v4942_v30  ;;  %v5546_v34 = vadd.f32 %v14695_v53, %v5524_v9  ;;  %8786 = vlog2.f32 %v5561_v5 }
 0xa04   :  { %v4945_v54 = vrot.slane %v4944_v24, 2  ;;  %v5562_v51 = vmax.f32 %v5546_v34, 1e-30  ;;  %v5568_v34 = vmax.f32 %v5552_v47, 1e-30 }
 0xa06   :  { %v4946_v12 = vadd.f32 %v4945_v54, %v4944_v24  ;;  %v5572_v24 = vmul.f32 0.6931472, %v8771_v23  ;;  %v8777_v54 = vpop.eup %8776  ;;  %8788 = vlog2.f32 %v5562_v51 }
 0xa07   :  { %v14755_v29 = vmul.f32 %v9004_v59, %v8777_v54  ;;  %8790 = vlog2.f32 %v5563_v3 }
 0xa08   :  { %v4947_v57 = vrot.slane %v4946_v12, 1  ;;  %v5601_v10 = vadd.f32 %v5572_v24, %v5570_v44  ;;  %8792 = vlog2.f32 %v5564_v33  ;;  %v5567_v44 = vmax.f32 %v5551_v42, 1e-30 }
 0xa09   :  { %v5724_v45 = vsel %vm5716_vm7, %v14755_v29, 0.0  ;;  %8794 = vlog2.f32 %v5565_v0  ;;  %v5629_v33 = vmul.f32 %v16047_v1, %v14682_v27 }
 0xa0a   :  { %v4948_v58 = vadd.f32 %v4947_v57, %v4946_v12  ;;  %v8779_v12 = vpop.eup %8778  ;;  %v5602_v61 = vadd.f32 %v5601_v10, %v5574_v52  ;;  %8796 = vlog2.f32 %v5566_v18 }
 0xa0b   :  { %v8781_v57 = vpop.eup %8780  ;;  %v5578_v39 = vmul.f32 0.6931472, %v8779_v12  ;;  %8798 = vlog2.f32 %v5567_v44 }
 0xa0c   :  { %v4949_v40 = vmul.f32 %v4948_v58, %v14140_v38  ;;  %v5603_v2 = vadd.f32 %v5602_v61, %v5576_v62  ;;  %v8783_v58 = vpop.eup %8782  ;;  %8800 = vlog2.f32 %v5568_v34  ;;  %v16044_v62 = vld [vmem:[#allocation62_spill] sm:$0xff] }
 0xa0d   :  { %v8785_v9 = vpop.eup %8784  ;;  %v14765_v61 = vperm.slane %v16044_v62, 7 }
 0xa0e   :  { %v4950_v8 = vmul.f32 %v14724_v41, %v4949_v40  ;;  %v5580_v40 = vmul.f32 0.6931472, %v8781_v57  ;;  %v5604_v32 = vadd.f32 %v5603_v2, %v5578_v39  ;;  %v8787_v13 = vpop.eup %8786  ;;  %v5584_v50 = vmul.f32 0.6931472, %v8785_v9 }
 0xa0f   :  { %v5586_v23 = vmul.f32 0.6931472, %v8787_v13  ;;  %v7238_v6 = vadd.f32 %v16045_v7, %v14765_v61  ;;  %v7240_v37 = vadd.f32 %v16046_v60, %v14765_v61 }
 0xa10   :  { %v4958_v30 = vsub.f32 %v4950_v8, %v4957_v36  ;;  %v5582_v8 = vmul.f32 0.6931472, %v8783_v58  ;;  %v5605_v36 = vadd.f32 %v5604_v32, %v5580_v40 }
 0xa11   :  { %v7270_v59 = vand.u32 2147483647, %v7238_v6  ;;  %v7272_v42 = vand.u32 2147483647, %v7240_v37 }
 0xa12   :  { %v4959_v20 = vsub.f32 %v4958_v30, %v14737_v11  ;;  %v5606_v46 = vadd.f32 %v5605_v36, %v5582_v8  ;;  %v8789_v30 = vpop.eup %8788  ;;  %v5630_v8 = vadd.f32 %v5629_v33, %v15976_v48 }
 0xa13   :  { %v8791_v35 = vpop.eup %8790  ;;  %v5588_v56 = vmul.f32 0.6931472, %v8789_v30  ;;  %v7286_v58 = vsub.f32 0.0, %v7270_v59  ;;  %v7288_v13 = vsub.f32 0.0, %v7272_v42  ;;  %v7219_v42 = vpop.permute.xlu2 %7218 }
 0xa14   :  { %v4960_v19 = vsel %vm2335_vm8, %v4959_v20, 0.0  ;;  %v5607_v43 = vadd.f32 %v5606_v46, %v5584_v50  ;;  %v8793_v20 = vpop.eup %8792  ;;  %v5590_v24 = vmul.f32 0.6931472, %v8791_v35 }
 0xa15   :  { %v4961_v17 = vsel %vm4370_vm5, %v4960_v19, 0.0  ;;  %v8795_v53 = vpop.eup %8794  ;;  %v5592_v63 = vmul.f32 0.6931472, %v8793_v20  ;;  %v7302_v9 = vmul.f32 1.442695, %v7286_v58  ;;  %v16053_v58 = vld [vmem:[#allocation100_spill] sm:$0xff] }
 0xa16   :  { %4962 = vadd.xlane.f32.xlu0 %v4961_v17  ;;  %v5608_v15 = vadd.f32 %v5607_v43, %v5586_v23  ;;  %v8797_v4 = vpop.eup %8796  ;;  %v5594_v5 = vmul.f32 0.6931472, %v8795_v53  ;;  %v7306_v46 = vmul.f32 1.442695, %v7288_v13  ;;  %v16049_v43 = vld [vmem:[#allocation29_spill] sm:$0xff]  ;;  %v7251_v60 = vadd.f32 %v16053_v58, %v14765_v61 }
 0xa17   :  { %v8799_v19 = vpop.eup %8798  ;;  %v5596_v22 = vmul.f32 0.6931472, %v8797_v4  ;;  %8802 = vpow2.f32 %v7302_v9  ;;  %v14787_v35 = vadd.f32 %v16049_v43, %v14765_v61 }
 0xa18   :  { %v5609_v26 = vadd.f32 %v5608_v15, %v5588_v56  ;;  %v8801_v52 = vpop.eup %8800  ;;  %v5598_v10 = vmul.f32 0.6931472, %v8799_v19  ;;  %8804 = vpow2.f32 %v7306_v46  ;;  %v16051_v19 = vld [vmem:[#allocation7_spill] sm:$0xff]  ;;  %v7283_v9 = vand.u32 2147483647, %v7251_v60 }
 0xa19   :  { %v5600_v17 = vmul.f32 0.6931472, %v8801_v52  ;;  %v7276_v15 = vand.u32 2147483647, %v14787_v35  ;;  %v7254_v52 = vmax.f32 %v7238_v6, 0.0 }
 0xa1a   :  { %v5610_v31 = vadd.f32 %v5609_v26, %v5590_v24  ;;  %v16050_v26 = vld [vmem:[#allocation23_spill] sm:$0xff]  ;;  %v7299_v13 = vsub.f32 0.0, %v7283_v9 }
 0xa1b   :  { %v7292_v24 = vsub.f32 0.0, %v7276_v15  ;;  %v14792_v53 = vadd.f32 %v16050_v26, %v14765_v61 }
 0xa1c   :  { %v5611_v54 = vadd.f32 %v5610_v31, %v5592_v63  ;;  %v7328_v46 = vmul.f32 1.442695, %v7299_v13 }
 0xa1d   :  { %v8803_v44 = vpop.eup %8802  ;;  %v7314_v4 = vmul.f32 1.442695, %v7292_v24 }
 0xa1e   :  { %5725 = vadd.xlane.f32.xlu0 %v5724_v45  ;;  %v5612_v49 = vadd.f32 %v5611_v54, %v5594_v5  ;;  %v16048_v45 = vld [vmem:[#allocation98_spill] sm:$0xff]  ;;  %v7334_v34 = vadd.f32 1.0, %v8803_v44  ;;  %v8805_v20 = vpop.eup %8804  ;;  %v7278_v5 = vand.u32 2147483647, %v14792_v53 }
 0xa1f   :  { %v14778_v47 = vadd.f32 %v16048_v45, %v14765_v61  ;;  %v7336_v63 = vadd.f32 1.0, %v8805_v20  ;;  %v7252_v45 = vadd.f32 %v7219_v42, %v14765_v61 }
 0xa20   :  { %v5613_v12 = vadd.f32 %v5612_v49, %v5596_v22  ;;  %8806 = vlog2.f32 %v7334_v34  ;;  %v7172_v22 = vmul.f32 %v16051_v19, %v16006_v25  ;;  %v7260_v34 = vmax.f32 %v14787_v35, 0.0 }
 0xa21   :  { %v7274_v30 = vand.u32 2147483647, %v14778_v47 }
 0xa22   :  { %v5614_v16 = vadd.f32 %v5613_v12, %v5598_v10  ;;  %v7294_v10 = vsub.f32 0.0, %v7278_v5  ;;  %v16052_v12 = vld [vmem:[#allocation26_spill] sm:$0xff] }
 0xa23   :  { %v7290_v23 = vsub.f32 0.0, %v7274_v30  ;;  %v7284_v30 = vand.u32 2147483647, %v7252_v45 }
 0xa24   :  { %v5615_v51 = vadd.f32 %v5614_v16, %v5600_v17  ;;  %v14799_v17 = vadd.f32 %v16052_v12, %v14765_v61  ;;  %v7318_v25 = vmul.f32 1.442695, %v7294_v10 }
 0xa25   :  { %v7310_v56 = vmul.f32 1.442695, %v7290_v23 }
 0xa26   :  { %v5616_v57 = vrot.slane %v5615_v51, 4  ;;  %v8807_v31 = vpop.eup %8806  ;;  %v7281_v6 = vand.u32 2147483647, %v14799_v17 }
 0xa27   :  { %8808 = vpow2.f32 %v7310_v56  ;;  %v7351_v49 = vmul.f32 0.6931472, %v8807_v31 }
 0xa28   :  { %v5617_v14 = vadd.f32 %v5616_v57, %v5615_v51  ;;  %8810 = vlog2.f32 %v7336_v63  ;;  %v9005_v51 = vld [vmem:[%s15209_s4] sm:$0xff]  ;;  %s8147_s4 = spop %8146 }
 0xa29   :  { %8812 = vpow2.f32 %v7314_v4  ;;  %v14805_v62 = vperm.slane %v9005_v51, 7  ;;  %v7382_v57 = vadd.f32 %v7351_v49, %v7254_v52  ;;  %v7262_v4 = vmax.f32 %v14792_v53, 0.0 }
 0xa2a   :  { %v5618_v3 = vrot.slane %v5617_v14, 2  ;;  %v7265_v52 = vmax.f32 %v14799_v17, 0.0 }
 0xa2b   :  { %v14809_v59 = vmul.f32 %v14805_v62, %v7382_v57 }
 0xa2c   :  { %v5619_v39 = vadd.f32 %v5618_v3, %v5617_v14 }
 0xa2d   :  { %v8809_v54 = vpop.eup %8808 }
 0xa2e   :  { %v5620_v2 = vrot.slane %v5619_v39, 1  ;;  %v7338_v16 = vadd.f32 1.0, %v8809_v54  ;;  %v8811_v7 = vpop.eup %8810 }
 0xa2f   :  { %v8813_v14 = vpop.eup %8812  ;;  %v7355_v3 = vmul.f32 0.6931472, %v8811_v7 }
 0xa30   :  { %v5621_v40 = vadd.f32 %v5620_v2, %v5619_v39  ;;  %8814 = vlog2.f32 %v7338_v16  ;;  %v7256_v39 = vmax.f32 %v7240_v37, 0.0  ;;  %v7297_v2 = vsub.f32 0.0, %v7281_v6 }
 0xa31   :  { %8816 = vpow2.f32 %v7318_v25  ;;  %v7340_v1 = vadd.f32 1.0, %v8813_v14  ;;  %v7258_v37 = vmax.f32 %v14778_v47, 0.0  ;;  %v7300_v47 = vsub.f32 0.0, %v7284_v30 }
 0xa32   :  { %v5622_v32 = vmul.f32 %v5621_v40, %v14140_v38  ;;  %v7384_v33 = vadd.f32 %v7355_v3, %v7256_v39  ;;  %v7267_v25 = vmax.f32 %v7251_v60, 0.0  ;;  %v16054_v3 = vld [vmem:[#allocation90_spill] sm:$0xff]  ;;  %v16055_v60 = vld [vmem:[#allocation33_spill] sm:$0xff] }
 0xa33   :  { %8818 = vlog2.f32 %v7340_v1  ;;  %v7330_v24 = vmul.f32 1.442695, %v7300_v47  ;;  %v7239_v39 = vadd.f32 %v16054_v3, %v14765_v61 }
 0xa34   :  { %v5623_v0 = vmul.f32 %v14724_v41, %v5622_v32  ;;  %v7324_v32 = vmul.f32 1.442695, %v7297_v2 }
 0xa35   :  { %v7271_v1 = vand.u32 2147483647, %v7239_v39 }
 0xa36   :  { %v5631_v36 = vsub.f32 %v5623_v0, %v5630_v8  ;;  %v8815_v40 = vpop.eup %8814  ;;  %8820 = vpow2.f32 %v7324_v32 }
 0xa37   :  { %v8817_v0 = vpop.eup %8816  ;;  %v7359_v8 = vmul.f32 0.6931472, %v8815_v40  ;;  %v14850_v40 = vadd.f32 %v16055_v60, %v14765_v61 }
 0xa38   :  { %v5632_v18 = vsub.f32 %v5631_v36, %v14737_v11  ;;  %v14815_v36 = vmul.f32 %v14805_v62, %v7384_v33  ;;  %v7268_v33 = vmax.f32 %v7252_v45, 0.0 }
 0xa39   :  { %v7273_v9 = vand.u32 2147483647, %v14850_v40 }
 0xa3a   :  { %v5633_v27 = vsel %vm2335_vm8, %v5632_v18, 0.0  ;;  %v7342_v18 = vadd.f32 1.0, %v8817_v0 }
 0xa3b   :  { %v5634_v50 = vsel %vm5043_vm6, %v5633_v27, 0.0  ;;  %v7386_v27 = vadd.f32 %v7359_v8, %v7258_v37  ;;  %v16056_v8 = vld [vmem:[#allocation16_spill] sm:$0xff]  ;;  %v7289_v13 = vsub.f32 0.0, %v7273_v9 }
 0xa3c   :  { %5635 = vadd.xlane.f32.xlu0 %v5634_v50  ;;  %v8819_v50 = vpop.eup %8818  ;;  %8822 = vlog2.f32 %v7342_v18  ;;  %v14858_v37 = vadd.f32 %v16056_v8, %v14765_v61  ;;  %v16057_v18 = vld [vmem:[#allocation70_spill] sm:$0xff] }
 0xa3d   :  { %v8821_v44 = vpop.eup %8820  ;;  %v7363_v23 = vmul.f32 0.6931472, %v8819_v50  ;;  %v14821_v43 = vmul.f32 %v14805_v62, %v7386_v27  ;;  %8824 = vpow2.f32 %v7328_v46  ;;  %v14864_v27 = vadd.f32 %v16057_v18, %v14765_v61 }
 0xa3e   :  { %v7345_v56 = vadd.f32 1.0, %v8821_v44  ;;  %v7275_v45 = vand.u32 2147483647, %v14858_v37  ;;  %v7308_v50 = vmul.f32 1.442695, %v7289_v13 }
 0xa3f   :  { %v7388_v15 = vadd.f32 %v7363_v23, %v7260_v34  ;;  %v7277_v30 = vand.u32 2147483647, %v14864_v27  ;;  %v16058_v34 = vld [vmem:[#allocation47_spill] sm:$0xff] }
 0xa40   :  { %8826 = vlog2.f32 %v7345_v56  ;;  %v7291_v46 = vsub.f32 0.0, %v7275_v45  ;;  %v14869_v47 = vadd.f32 %v16058_v34, %v14765_v61  ;;  %v7257_v45 = vmax.f32 %v14850_v40, 0.0 }
 0xa41   :  { %v14826_v31 = vmul.f32 %v14805_v62, %v7388_v15  ;;  %8828 = vpow2.f32 %v7330_v24  ;;  %v7293_v15 = vsub.f32 0.0, %v7277_v30  ;;  %v7259_v40 = vmax.f32 %v14858_v37, 0.0 }
 0xa42   :  { %v8823_v20 = vpop.eup %8822  ;;  %v7312_v23 = vmul.f32 1.442695, %v7291_v46  ;;  %v7261_v37 = vmax.f32 %v14864_v27, 0.0 }
 0xa43   :  { %v8825_v26 = vpop.eup %8824  ;;  %v7367_v63 = vmul.f32 0.6931472, %v8823_v20  ;;  %v16059_v20 = vld [vmem:[#allocation20_spill] sm:$0xff] }
 0xa44   :  { %v7347_v35 = vadd.f32 1.0, %v8825_v26  ;;  %v14873_v24 = vadd.f32 %v16059_v20, %v14765_v61 }
 0xa45   :  { %v7390_v5 = vadd.f32 %v7367_v63, %v7262_v4  ;;  %v7279_v63 = vand.u32 2147483647, %v14869_v47  ;;  %v7316_v4 = vmul.f32 1.442695, %v7293_v15 }
 0xa46   :  { %v8827_v54 = vpop.eup %8826  ;;  %8830 = vlog2.f32 %v7347_v35  ;;  %v7280_v35 = vand.u32 2147483647, %v14873_v24 }
 0xa47   :  { %v8829_v19 = vpop.eup %8828  ;;  %v14831_v49 = vmul.f32 %v14805_v62, %v7390_v5 }
 0xa48   :  { %v7348_v10 = vadd.f32 1.0, %v8829_v19 }
 0xa4a   :  { %8832 = vlog2.f32 %v7348_v10 }
 0xa4c   :  { %v8831_v16 = vpop.eup %8830 }
 0xa4d   :  { %v7377_v51 = vmul.f32 0.6931472, %v8831_v16 }
 0xa4f   :  { %v7395_v14 = vadd.f32 %v7377_v51, %v7267_v25 }
 0xa50   :  { %7220 = vrot.lane.b32.xlu0 %v7172_v22, %s9040_s22  ;;  %v7373_v22 = vmul.f32 0.6931472, %v8827_v54  ;;  %v8833_v17 = vpop.eup %8832  ;;  %v16060_v54 = vld [vmem:[#allocation57_spill] sm:$0xff] }
 0xa51   :  { %v7379_v2 = vmul.f32 0.6931472, %v8833_v17  ;;  %v14845_v58 = vmul.f32 %v14805_v62, %v7395_v14  ;;  %v14879_v19 = vadd.f32 %v16060_v54, %v14765_v61  ;;  %v7418_v54 = vsel %vm2689_vm9, %v14815_v36, 0.0 }
 0xa52   :  { %v7393_v12 = vadd.f32 %v7373_v22, %v7265_v52  ;;  %v7295_v22 = vsub.f32 0.0, %v7279_v63 }
 0xa53   :  { %v7396_v32 = vadd.f32 %v7379_v2, %v7268_v33  ;;  %v7255_v2 = vmax.f32 %v7239_v39, 0.0 }
 0xa54   :  { %v14836_v57 = vmul.f32 %v14805_v62, %v7393_v12  ;;  %v7296_v12 = vsub.f32 0.0, %v7280_v35  ;;  %v7320_v51 = vmul.f32 1.442695, %v7295_v22 }
 0xa55   :  { %v14854_v42 = vmul.f32 %v14805_v62, %v7396_v32 }
 0xa56   :  { %v7322_v14 = vmul.f32 1.442695, %v7296_v12 }
 0xa58   :  { %7455 = vperm.xlu0 %8160, %v14809_v59  }
 0xa60   :  { %7465 = vperm.xlu0 %8160, %v14815_v36  }
 0xa68   :  { %7475 = vperm.xlu0 %8160, %v14821_v43  }
 0xa70   :  { %7485 = vperm.xlu0 %8160, %v14826_v31  }
 0xa78   :  { %7495 = vperm.xlu0 %8160, %v14831_v49  }
 0xa80   :  { %7510 = vperm.xlu0 %8160, %v14836_v57  }
 0xa88   :  { %7520 = vperm.xlu0 %8160, %v14845_v58  }
 0xa89   :  { %v4963_v53 = vpop.xlane.xlu0 %4962 }
 0xa8a   :  { %v4965_v7 = vrot.slane %v4963_v53, 3  ;;  %v7282_v53 = vand.u32 2147483647, %v14879_v19 }
 0xa8c   :  { %v14840_v6 = vadd.f32 %v4965_v7, %v14671_v28  ;;  %v7287_v28 = vsub.f32 0.0, %v7271_v1  ;;  %v7298_v3 = vsub.f32 0.0, %v7282_v53 }
 0xa8e   :  { %v7304_v0 = vmul.f32 1.442695, %v7287_v28  ;;  %v7326_v32 = vmul.f32 1.442695, %v7298_v3  ;;  %v7263_v3 = vmax.f32 %v14869_v47, 0.0 }
 0xa90   :  { %7525 = vperm.xlu0 %8160, %v14854_v42   ;;  %8834 = vpow2.f32 %v7304_v0 }
 0xa91   :  { %8836 = vpow2.f32 %v7308_v50  ;;  %v5726_v52 = vpop.xlane.xlu0 %5725 }
 0xa92   :  { %8838 = vpow2.f32 %v7312_v23 }
 0xa96   :  { %v8835_v44 = vpop.eup %8834 }
 0xa97   :  { %v7335_v56 = vadd.f32 1.0, %v8835_v44  ;;  %v8837_v26 = vpop.eup %8836 }
 0xa98   :  { %v7337_v5 = vadd.f32 1.0, %v8837_v26  ;;  %v8839_v10 = vpop.eup %8838 }
 0xa99   :  { %8840 = vlog2.f32 %v7335_v56  ;;  %v7339_v7 = vadd.f32 1.0, %v8839_v10 }
 0xa9a   :  { %8842 = vpow2.f32 %v7316_v4 }
 0xa9b   :  { %8844 = vlog2.f32 %v7337_v5 }
 0xa9c   :  { %8846 = vpow2.f32 %v7320_v51 }
 0xa9d   :  { %8848 = vlog2.f32 %v7339_v7 }
 0xa9e   :  { %8850 = vpow2.f32 %v7322_v14 }
 0xa9f   :  { %v8841_v16 = vpop.eup %8840 }
 0xaa0   :  { %v7353_v25 = vmul.f32 0.6931472, %v8841_v16  ;;  %v8843_v17 = vpop.eup %8842 }
 0xaa1   :  { %v8845_v1 = vpop.eup %8844  ;;  %v7341_v60 = vadd.f32 1.0, %v8843_v17 }
 0xaa2   :  { %v7383_v33 = vadd.f32 %v7353_v25, %v7255_v2  ;;  %v7357_v9 = vmul.f32 0.6931472, %v8845_v1  ;;  %v8847_v8 = vpop.eup %8846  ;;  %v7422_v25 = vsel %vm2689_vm9, %v14821_v43, 0.0 }
 0xaa3   :  { %8852 = vlog2.f32 %v7341_v60  ;;  %v8849_v39 = vpop.eup %8848  ;;  %v7343_v30 = vadd.f32 1.0, %v8847_v8 }
 0xaa4   :  { %v14883_v13 = vmul.f32 %v14805_v62, %v7383_v33  ;;  %8854 = vpow2.f32 %v7326_v32  ;;  %v8851_v50 = vpop.eup %8850  ;;  %v7385_v46 = vadd.f32 %v7357_v9, %v7257_v45  ;;  %v7361_v23 = vmul.f32 0.6931472, %v8849_v39 }
 0xaa5   :  { %v7344_v34 = vadd.f32 1.0, %v8851_v50  ;;  %8856 = vlog2.f32 %v7343_v30  ;;  %v7264_v32 = vmax.f32 %v14873_v24, 0.0  ;;  %v7266_v24 = vmax.f32 %v14879_v19, 0.0 }
 0xaa6   :  { %v7416_v44 = vsel %vm2689_vm9, %v14883_v13, 0.0  ;;  %v14892_v15 = vmul.f32 %v14805_v62, %v7385_v46  ;;  %v7387_v63 = vadd.f32 %v7361_v23, %v7259_v40  ;;  %v7430_v23 = vsel %vm2689_vm9, %v14831_v49, 0.0 }
 0xaa7   :  { %8858 = vlog2.f32 %v7344_v34 }
 0xaa8   :  { %v7420_v4 = vsel %vm2689_vm9, %v14892_v15, 0.0  ;;  %v14902_v10 = vmul.f32 %v14805_v62, %v7387_v63 }
 0xaa9   :  { %v8853_v56 = vpop.eup %8852 }
 0xaaa   :  { %v8855_v20 = vpop.eup %8854  ;;  %v7365_v35 = vmul.f32 0.6931472, %v8853_v56  ;;  %v7424_v51 = vsel %vm2689_vm9, %v14902_v10, 0.0 }
 0xaab   :  { %v7346_v5 = vadd.f32 1.0, %v8855_v20 }
 0xaac   :  { %v7389_v16 = vadd.f32 %v7365_v35, %v7261_v37 }
 0xaad   :  { %8860 = vlog2.f32 %v7346_v5  ;;  %v16063_v5 = vld [vmem:[#allocation51_spill] sm:$0xff] }
 0xaae   :  { %8862 = vrcp.f32 %v5726_v52  ;;  %v14913_v27 = vmul.f32 %v14805_v62, %v7389_v16  ;;  %v7436_v16 = vsel %vm2689_vm9, %v14836_v57, 0.0 }
 0xaaf   :  { %v5636_v28 = vpop.xlane.xlu0 %5635 }
 0xab0   :  { %v5638_v0 = vrot.slane %v5636_v28, 4  ;;  %v7428_v9 = vsel %vm2689_vm9, %v14913_v27, 0.0 }
 0xab2   :  { %v14887_v18 = vadd.f32 %v5638_v0, %v14840_v6  ;;  %v7415_v6 = vsel %vm2689_vm9, %v14809_v59, 0.0  ;;  %v8857_v59 = vpop.eup %8856  ;;  %v7426_v0 = vsel %vm2689_vm9, %v14826_v31, 0.0 }
 0xab3   :  { %v7417_v26 = vadd.f32 %v7416_v44, %v7415_v6  ;;  %v8859_v53 = vpop.eup %8858  ;;  %v7369_v7 = vmul.f32 0.6931472, %v8857_v59  ;;  %v16064_v59 = vld [vmem:[#allocation5_spill] sm:$0xff] }
 0xab4   :  { %v7371_v2 = vmul.f32 0.6931472, %v8859_v53  ;;  %v8861_v33 = vpop.eup %8860  ;;  %v16065_v53 = vld [vmem:[#allocation44_spill] sm:$0xff] }
 0xab5   :  { %v7419_v22 = vadd.f32 %v7418_v54, %v7417_v26  ;;  %v7391_v60 = vadd.f32 %v7369_v7, %v7263_v3  ;;  %v8863_v28 = vpop.eup %8862  ;;  %v7375_v8 = vmul.f32 0.6931472, %v8861_v33  ;;  %v16061_v26 = vld [vmem:[#allocation36_spill] sm:$0xff] }
 0xab6   :  { %v14926_v50 = vmul.f32 %v8863_v28, %v14755_v29 }
 0xab7   :  { %v7421_v12 = vadd.f32 %v7420_v4, %v7419_v22  ;;  %v14923_v39 = vmul.f32 %v14805_v62, %v7391_v60  ;;  %v7394_v44 = vadd.f32 %v7375_v8, %v7266_v24  ;;  %v16062_v4 = vld [vmem:[#allocation46_spill] sm:$0xff]  ;;  %v14950_v22 = vstv %s8147_s4 }
 0xab8   :  { %v14937_v34 = vperm.slane %v14926_v50, 5  ;;  %v16067_v60 = vld [vmem:[#allocation6_spill] sm:$0xff] }
 0xab9   :  { %v7423_v14 = vadd.f32 %v7422_v25, %v7421_v12  ;;  %v7432_v31 = vsel %vm2689_vm9, %v14923_v39, 0.0  ;;  %v14942_v40 = vmul.f32 %v14805_v62, %v7394_v44 }
 0xaba   :  { %v6188_v63 = vmul.f32 %v14937_v34, %v16061_v26  ;;  %v6189_v49 = vmul.f32 %v14937_v34, %v16062_v4  ;;  %v6190_v54 = vmul.f32 %v14937_v34, %v16063_v5  ;;  %v6191_v12 = vmul.f32 %v14937_v34, %v16064_v59  ;;  %v16072_v59 = vld [vmem:[#allocation78_spill] sm:$0xff] }
 0xabb   :  { %v7425_v1 = vadd.f32 %v7424_v51, %v7423_v14  ;;  %v7438_v37 = vsel %vm2689_vm9, %v14942_v40, 0.0  ;;  %v6192_v51 = vmul.f32 %v14937_v34, %v16065_v53  ;;  %v16066_v14 = vld [vmem:[#allocation97_spill] sm:$0xff]  ;;  %v6194_v57 = vmul.f32 %v14937_v34, %v16067_v60 }
 0xabc   :  { %v6210_v7 = vadd.f32 %v14950_v22, %v6188_v63  ;;  %v6211_v25 = vadd.f32 %v14950_v22, %v6189_v49  ;;  %v6193_v3 = vmul.f32 %v14937_v34, %v16066_v14  ;;  %v16071_v49 = vld [vmem:[#allocation75_spill] sm:$0xff] }
 0xabd   :  { %v7427_v45 = vadd.f32 %v7426_v0, %v7425_v1 }
 0xabe   :  { %v6226_v28 = vmax.f32 %v6210_v7, 1e-30  ;;  %v6215_v24 = vadd.f32 %v14950_v22, %v6193_v3 }
 0xabf   :  { %v7429_v46 = vadd.f32 %v7428_v9, %v7427_v45  ;;  %v7442_v9 = vsel %vm2689_vm9, %v14854_v42, 0.0  ;;  %v16068_v45 = vld [vmem:[#allocation85_spill] sm:$0xff]  ;;  %v6216_v42 = vadd.f32 %v14950_v22, %v6194_v57  ;;  %v16074_v57 = vld [vmem:[#allocation14_spill] sm:$0xff] }
 0xac0   :  { %v6231_v63 = vmax.f32 %v6215_v24, 1e-30 }
 0xac1   :  { %v7431_v56 = vadd.f32 %v7430_v23, %v7429_v46 }
 0xac2   :  { %v7221_v36 = vpop.permute.xlu0 %7220 }
 0xac3   :  { %v14910_v17 = vadd.f32 %v7221_v36, %v14765_v61  ;;  %v7392_v61 = vadd.f32 %v7371_v2, %v7264_v32  ;;  %v7433_v6 = vadd.f32 %v7432_v31, %v7431_v56  ;;  %v6212_v2 = vadd.f32 %v14950_v22, %v6190_v54  ;;  %v16069_v56 = vld [vmem:[#allocation80_spill] sm:$0xff] }
 0xac4   :  { %v6214_v32 = vadd.f32 %v14950_v22, %v6192_v51 }
 0xac5   :  { %v7285_v52 = vand.u32 2147483647, %v14910_v17  ;;  %v14930_v30 = vmul.f32 %v14805_v62, %v7392_v61  ;;  %v7440_v61 = vsel %vm2689_vm9, %v14845_v58, 0.0  ;;  %v7269_v0 = vmax.f32 %v14910_v17, 0.0 }
 0xac6   :  { %v6228_v46 = vmax.f32 %v6212_v2, 1e-30 }
 0xac7   :  { %v7301_v43 = vsub.f32 0.0, %v7285_v52  ;;  %v7434_v29 = vsel %vm2689_vm9, %v14930_v30, 0.0  ;;  %v6213_v52 = vadd.f32 %v14950_v22, %v6191_v12  ;;  %v6199_v12 = vmul.f32 %v14937_v34, %v16072_v59 }
 0xac8   :  { %v7435_v35 = vadd.f32 %v7434_v29, %v7433_v6  ;;  %v6196_v29 = vmul.f32 %v14937_v34, %v16069_v56  ;;  %v16070_v6 = vld [vmem:[#allocation41_spill] sm:$0xff] }
 0xac9   :  { %v7332_v47 = vmul.f32 1.442695, %v7301_v43  ;;  %v6227_v43 = vmax.f32 %v6211_v25, 1e-30  ;;  %v6229_v23 = vmax.f32 %v6213_v52, 1e-30 }
 0xaca   :  { %v7437_v36 = vadd.f32 %v7436_v16, %v7435_v35  ;;  %v6198_v35 = vmul.f32 %v14937_v34, %v16071_v49 }
 0xacb   :  { %8864 = vpow2.f32 %v7332_v47  ;;  %v6195_v47 = vmul.f32 %v14937_v34, %v16068_v45  ;;  %v16075_v45 = vld [vmem:[#allocation92_spill] sm:$0xff] }
 0xacc   :  { %v7439_v1 = vadd.f32 %v7438_v37, %v7437_v36  ;;  %v6218_v37 = vadd.f32 %v14950_v22, %v6196_v29  ;;  %v16073_v36 = vld [vmem:[#allocation45_spill] sm:$0xff]  ;;  %v6220_v52 = vadd.f32 %v14950_v22, %v6198_v35  ;;  %v16076_v29 = vld [vmem:[#allocation106_spill] sm:$0xff] }
 0xacd   :  { %v6217_v26 = vadd.f32 %v14950_v22, %v6195_v47  ;;  %v6200_v14 = vmul.f32 %v14937_v34, %v16073_v36  ;;  %v6202_v47 = vmul.f32 %v14937_v34, %v16075_v45 }
 0xace   :  { %v7441_v44 = vadd.f32 %v7440_v61, %v7439_v1  ;;  %v6236_v56 = vmax.f32 %v6220_v52, 1e-30 }
 0xacf   :  { %v6233_v25 = vmax.f32 %v6217_v26, 1e-30 }
 0xad0   :  { %v7443_v58 = vadd.f32 %v7442_v9, %v7441_v44 }
 0xad1   :  { %v8865_v19 = vpop.eup %8864 }
 0xad2   :  { %v7349_v20 = vadd.f32 1.0, %v8865_v19  ;;  %v6230_v19 = vmax.f32 %v6214_v32, 1e-30  ;;  %v6201_v32 = vmul.f32 %v14937_v34, %v16074_v57 }
 0xad4   :  { %8866 = vlog2.f32 %v7349_v20  ;;  %v6197_v20 = vmul.f32 %v14937_v34, %v16070_v6  ;;  %v6223_v26 = vadd.f32 %v14950_v22, %v6201_v32 }
 0xad5   :  { %8868 = vlog2.f32 %v6226_v28 }
 0xad6   :  { %8870 = vlog2.f32 %v6227_v43  ;;  %v6219_v7 = vadd.f32 %v14950_v22, %v6197_v20 }
 0xad7   :  { %8872 = vlog2.f32 %v6228_v46 }
 0xad8   :  { %8874 = vlog2.f32 %v6229_v23  ;;  %v6222_v23 = vadd.f32 %v14950_v22, %v6200_v14 }
 0xad9   :  { %8876 = vlog2.f32 %v6230_v19 }
 0xada   :  { %v8867_v33 = vpop.eup %8866  ;;  %8878 = vlog2.f32 %v6231_v63 }
 0xadb   :  { %v7381_v8 = vmul.f32 0.6931472, %v8867_v33  ;;  %v8869_v5 = vpop.eup %8868  ;;  %v6234_v33 = vmax.f32 %v6218_v37, 1e-30  ;;  %v6238_v37 = vmax.f32 %v6222_v23, 1e-30 }
 0xadc   :  { %v6243_v16 = vmul.f32 0.6931472, %v8869_v5  ;;  %v8871_v53 = vpop.eup %8870 }
 0xadd   :  { %v7397_v31 = vadd.f32 %v7381_v8, %v7269_v0  ;;  %v6245_v3 = vmul.f32 0.6931472, %v8871_v53  ;;  %v8873_v2 = vpop.eup %8872  ;;  %v6221_v0 = vadd.f32 %v14950_v22, %v6199_v12  ;;  %v6235_v8 = vmax.f32 %v6219_v7, 1e-30 }
 0xade   :  { %v8875_v60 = vpop.eup %8874  ;;  %v6247_v28 = vmul.f32 0.6931472, %v8873_v2  ;;  %v6239_v53 = vmax.f32 %v6223_v26, 1e-30 }
 0xadf   :  { %v14981_v17 = vmul.f32 %v14805_v62, %v7397_v31  ;;  %v6232_v62 = vmax.f32 %v6216_v42, 1e-30  ;;  %v6274_v43 = vadd.f32 %v6245_v3, %v6243_v16  ;;  %v8877_v9 = vpop.eup %8876  ;;  %v6249_v24 = vmul.f32 0.6931472, %v8875_v60 }
 0xae0   :  { %v8879_v44 = vpop.eup %8878  ;;  %v6203_v42 = vmul.f32 %v14937_v34, %v16076_v29  ;;  %v6251_v19 = vmul.f32 0.6931472, %v8877_v9  ;;  %v6237_v63 = vmax.f32 %v6221_v0, 1e-30 }
 0xae1   :  { %v7444_v4 = vsel %vm2689_vm9, %v14981_v17, 0.0  ;;  %8880 = vlog2.f32 %v6232_v62  ;;  %v6275_v46 = vadd.f32 %v6274_v43, %v6247_v28 }
 0xae2   :  { %v7445_v54 = vadd.f32 %v7444_v4, %v7443_v58  ;;  %8882 = vlog2.f32 %v6233_v25  ;;  %v6253_v4 = vmul.f32 0.6931472, %v8879_v44  ;;  %v6225_v16 = vadd.f32 %v14950_v22, %v6203_v42 }
 0xae3   :  { %8884 = vlog2.f32 %v6234_v33  ;;  %v6276_v58 = vadd.f32 %v6275_v46, %v6249_v24 }
 0xae4   :  { %v7446_v51 = vrot.slane %v7445_v54, 4  ;;  %8886 = vlog2.f32 %v6235_v8 }
 0xae5   :  { %v6277_v49 = vadd.f32 %v6276_v58, %v6251_v19  ;;  %8888 = vlog2.f32 %v6236_v56 }
 0xae6   :  { %v7447_v1 = vadd.f32 %v7446_v51, %v7445_v54  ;;  %v6224_v54 = vadd.f32 %v14950_v22, %v6202_v47  ;;  %8890 = vlog2.f32 %v6237_v63 }
 0xae7   :  { %v8881_v6 = vpop.eup %8880  ;;  %v6278_v59 = vadd.f32 %v6277_v49, %v6253_v4  ;;  %8892 = vlog2.f32 %v6238_v37  ;;  %v7055_v37 = vpop.f32.mrf.mxu3 }
 0xae8   :  { %v7448_v61 = vrot.slane %v7447_v1, 2  ;;  %v8883_v35 = vpop.eup %8882  ;;  %v6255_v62 = vmul.f32 0.6931472, %v8881_v6  ;;  %v6240_v36 = vmax.f32 %v6224_v54, 1e-30  ;;  %8894 = vlog2.f32 %v6239_v53 }
 0xae9   :  { %v8885_v12 = vpop.eup %8884  ;;  %v6257_v51 = vmul.f32 0.6931472, %v8883_v35 }
 0xaea   :  { %v7449_v31 = vadd.f32 %v7448_v61, %v7447_v1  ;;  %v6279_v7 = vadd.f32 %v6278_v59, %v6255_v62  ;;  %v8887_v25 = vpop.eup %8886  ;;  %v6259_v14 = vmul.f32 0.6931472, %v8885_v12  ;;  %v6241_v1 = vmax.f32 %v6225_v16, 1e-30  ;;  %v16079_v16 = vld [vmem:[#allocation30_spill] sm:$0xff] }
 0xaeb   :  { %v8889_v2 = vpop.eup %8888  ;;  %v6261_v52 = vmul.f32 0.6931472, %v8887_v25  ;;  %8896 = vlog2.f32 %v6240_v36  ;;  %v7059_v12 = vrot.slane %v7055_v37, 1 }
 0xaec   :  { %v7450_v20 = vrot.slane %v7449_v31, 1  ;;  %v6280_v3 = vadd.f32 %v6279_v7, %v6257_v51  ;;  %v8891_v60 = vpop.eup %8890  ;;  %v6263_v57 = vmul.f32 0.6931472, %v8889_v2  ;;  %8898 = vlog2.f32 %v6241_v1  ;;  %v16080_v1 = vld [vmem:[#allocation54_spill] sm:$0xff] }
 0xaed   :  { %v8893_v22 = vpop.eup %8892  ;;  %v6265_v28 = vmul.f32 0.6931472, %v8891_v60 }
 0xaee   :  { %v7451_v5 = vadd.f32 %v7450_v20, %v7449_v31  ;;  %v6281_v33 = vadd.f32 %v6280_v3, %v6259_v14  ;;  %v8895_v9 = vpop.eup %8894  ;;  %v6267_v61 = vmul.f32 0.6931472, %v8893_v22  ;;  %v16077_v20 = vld [vmem:[#allocation13_spill] sm:$0xff] }
 0xaef   :  { %v6269_v45 = vmul.f32 0.6931472, %v8895_v9  ;;  %v6302_v26 = vmul.f32 %v16077_v20, %v14926_v50  ;;  %v7061_v50 = vsel %vm2335_vm8, %v7059_v12, -1e+30 }
 0xaf0   :  { %v7452_v34 = vmul.f32 %v7451_v5, %v14140_v38  ;;  %v6282_v32 = vadd.f32 %v6281_v33, %v6261_v52 }
 0xaf1   :  { %v8897_v8 = vpop.eup %8896  ;;  %v6303_v35 = vadd.f32 %v6302_v26, %v15976_v48 }
 0xaf2   :  { %7645 = vperm.xlu0 %8160, %v7452_v34   ;;  %v6283_v43 = vadd.f32 %v6282_v32, %v6263_v57  ;;  %v8899_v24 = vpop.eup %8898  ;;  %v6271_v46 = vmul.f32 0.6931472, %v8897_v8  ;;  %v7063_v34 = vsel %vm7062_vm12, %v7061_v50, -inf  ;;  %v6399_v8 = vpop.xlane.xlu1 %6398 }
 0xaf3   :  { %v6273_v31 = vmul.f32 0.6931472, %v8899_v24 }
 0xaf4   :  { %v6284_v0 = vadd.f32 %v6283_v43, %v6265_v28 }
 0xaf6   :  { %v6285_v47 = vadd.f32 %v6284_v0, %v6267_v61 }
 0xaf8   :  { %v6286_v44 = vadd.f32 %v6285_v47, %v6269_v45 }
 0xafa   :  { %v6287_v23 = vadd.f32 %v6286_v44, %v6271_v46 }
 0xafc   :  { %v6288_v56 = vadd.f32 %v6287_v23, %v6273_v31 }
 0xafe   :  { %v6289_v29 = vrot.slane %v6288_v56, 4 }
 0xb00   :  { %v6290_v42 = vadd.f32 %v6289_v29, %v6288_v56 }
 0xb02   :  { %v6291_v19 = vrot.slane %v6290_v42, 2 }
 0xb04   :  { %v6292_v58 = vadd.f32 %v6291_v19, %v6290_v42 }
 0xb06   :  { %v6293_v6 = vrot.slane %v6292_v58, 1 }
 0xb08   :  { %v6294_v63 = vadd.f32 %v6293_v6, %v6292_v58 }
 0xb0a   :  { %v6295_v4 = vmul.f32 %v6294_v63, %v14140_v38  ;;  %v15041_v63 = vld [vmem:[%s15208_s3] sm:$0xff]  ;;  %s8149_s3 = spop %8148 }
 0xb0c   :  { %v6296_v49 = vmul.f32 %v14724_v41, %v6295_v4  ;;  %v16078_v41 = vld [vmem:[#allocation38_spill] sm:$0xff]  ;;  %v6987_v4 = vsel %vm6389_vm11, %v15041_v63, 0.0 }
 0xb0d   :  { %v6580_v53 = vadd.f32 %v16079_v16, %v16078_v41 }
 0xb0e   :  { %v6304_v5 = vsub.f32 %v6296_v49, %v6303_v35 }
 0xb0f   :  { %v6596_v2 = vmax.f32 %v6580_v53, 0.0 }
 0xb10   :  { %v6305_v54 = vsub.f32 %v6304_v5, %v14737_v11  ;;  %v6612_v11 = vand.u32 2147483647, %v6580_v53 }
 0xb12   :  { %v6306_v62 = vsel %vm2335_vm8, %v6305_v54, 0.0  ;;  %v6628_v51 = vsub.f32 0.0, %v6612_v11 }
 0xb13   :  { %v6307_v59 = vsel %vm5716_vm7, %v6306_v62, 0.0 }
 0xb14   :  { %6308 = vadd.xlane.f32.xlu1 %v6307_v59  ;;  %v6659_v7 = vmul.f32 1.442695, %v6628_v51 }
 0xb16   :  { %8900 = vpow2.f32 %v6659_v7 }
 0xb1c   :  { %7064 = vmax.xlane.f32.xlu1 %v7063_v34  ;;  %v8901_v25 = vpop.eup %8900  ;;  %v16083_v34 = vld [vmem:[#allocation22_spill] sm:$0xff] }
 0xb1d   :  { %v6676_v36 = vadd.f32 1.0, %v8901_v25 }
 0xb1f   :  { %8902 = vlog2.f32 %v6676_v36 }
 0xb25   :  { %v8903_v14 = vpop.eup %8902 }
 0xb26   :  { %v6708_v3 = vmul.f32 0.6931472, %v8903_v14 }
 0xb35   :  { %7460 = vperm.xlu1 %8161, %v14883_v13   ;;  %v6724_v13 = vadd.f32 %v6708_v3, %v6596_v2 }
 0xb37   :  { %v6741_v52 = vmul.f32 %v16080_v1, %v6724_v13 }
 0xb39   :  { %v6771_v59 = vsel %vm2689_vm9, %v6741_v52, 0.0 }
 0xb3a   :  { %v6772_v41 = vadd.f32 %v6771_v59, %v16083_v34  ;;  %v16091_v59 = vld [vmem:[#allocation109_spill] sm:$0xff] }
 0xb3c   :  { %v6773_v11 = vrot.slane %v6772_v41, 4 }
 0xb3d   :  { %7470 = vperm.xlu1 %8161, %v14892_v15   ;;  %v16081_v15 = vld [vmem:[#allocation74_spill] sm:$0xff] }
 0xb3e   :  { %v2947_v33 = vmul.f32 %v16081_v15, %v16081_v15  ;;  %8904 = vlog2.f32 %v16081_v15  ;;  %v6774_v25 = vadd.f32 %v6773_v11, %v6772_v41 }
 0xb40   :  { %v6775_v3 = vrot.slane %v6774_v25, 2 }
 0xb42   :  { %v6776_v13 = vadd.f32 %v6775_v3, %v6774_v25 }
 0xb44   :  { %v8905_v57 = vpop.eup %8904  ;;  %v6777_v1 = vrot.slane %v6776_v13, 1 }
 0xb45   :  { %7480 = vperm.xlu1 %8161, %v14902_v10   ;;  %v16082_v10 = vld [vmem:[#allocation82_spill] sm:$0xff]  ;;  %v2958_v32 = vmul.f32 0.6931472, %v8905_v57  ;;  %v16084_v57 = vld [vmem:[#allocation65_spill] sm:$0xff] }
 0xb46   :  { %v2953_v60 = vadd.f32 %v16082_v10, %v2947_v33 }
 0xb47   :  { %v3632_v43 = vrot.slane %v2958_v32, 1  ;;  %v4305_v45 = vrot.slane %v2958_v32, 2  ;;  %v4978_v23 = vrot.slane %v2958_v32, 3  ;;  %v5651_v6 = vrot.slane %v2958_v32, 4 }
 0xb48   :  { %v6324_v35 = vrot.slane %v2958_v32, 5  ;;  %v6997_v16 = vrot.slane %v2958_v32, 6  ;;  %v7670_v36 = vrot.slane %v2958_v32, 7 }
 0xb4d   :  { %7490 = vperm.xlu1 %8161, %v14913_v27   ;;  %v7976_v27 = vadd.f32 -1.0, %v2953_v60 }
 0xb55   :  { %7500 = vperm.xlu1 %8161, %v14923_v39   ;;  %v2955_v39 = vmul.f32 0.5, %v7976_v27 }
 0xb57   :  { %v2959_v22 = vsub.f32 %v2955_v39, %v2958_v32  ;;  %v3628_v28 = vrot.slane %v2955_v39, 1  ;;  %v4302_v61 = vrot.slane %v2955_v39, 2  ;;  %v4975_v24 = vrot.slane %v2955_v39, 3  ;;  %v16085_v32 = vld [vmem:[#allocation107_spill] sm:$0xff] }
 0xb58   :  { %v5648_v29 = vrot.slane %v2955_v39, 4  ;;  %v6321_v49 = vrot.slane %v2955_v39, 5  ;;  %v6994_v62 = vrot.slane %v2955_v39, 6  ;;  %v7667_v51 = vrot.slane %v2955_v39, 7 }
 0xb5d   :  { %7515 = vperm.xlu1 %8161, %v14942_v40   ;;  %v3630_v40 = vadd.f32 %v3628_v28, %v2959_v22  ;;  %v15069_v28 = vstv %s8149_s3 }
 0xb5f   :  { %v3634_v9 = vsub.f32 %v3630_v40, %v3632_v43  ;;  %v16086_v43 = vld [vmem:[#allocation93_spill] sm:$0xff] }
 0xb61   :  { %v4304_v0 = vadd.f32 %v4302_v61, %v3634_v9 }
 0xb63   :  { %v4307_v47 = vsub.f32 %v4304_v0, %v4305_v45 }
 0xb65   :  { %6857 = vperm.xlu1 %8161, %v6741_v52   ;;  %v4977_v46 = vadd.f32 %v4975_v24, %v4307_v47  ;;  %v6778_v52 = vadd.f32 %v6777_v1, %v6776_v13  ;;  %v16093_v1 = vld [vmem:[#allocation59_spill] sm:$0xff] }
 0xb67   :  { %v6779_v15 = vmul.f32 %v6778_v52, %v14140_v38 }
 0xb6d   :  { %7530 = vperm.xlu1 %8161, %v14981_v17   ;;  %v4980_v17 = vsub.f32 %v4977_v46, %v4978_v23  ;;  %v16088_v46 = vld [vmem:[#allocation108_spill] sm:$0xff] }
 0xb6f   :  { %v5650_v42 = vadd.f32 %v5648_v29, %v4980_v17 }
 0xb71   :  { %v5653_v26 = vsub.f32 %v5650_v42, %v5651_v6  ;;  %v16089_v42 = vld [vmem:[#allocation49_spill] sm:$0xff] }
 0xb87   :  { %v6309_v44 = vpop.xlane.xlu1 %6308 }
 0xb88   :  { %v6311_v31 = vrot.slane %v6309_v44, 5 }
 0xb8a   :  { %v15036_v56 = vadd.f32 %v6311_v31, %v14887_v18  ;;  %v6323_v18 = vadd.f32 %v6321_v49, %v5653_v26  ;;  %v16090_v49 = vld [vmem:[#allocation77_spill] sm:$0xff] }
 0xb8c   :  { %v6326_v54 = vsub.f32 %v6323_v18, %v6324_v35 }
 0xb8f   :  { %v7065_v19 = vpop.xlane.xlu1 %7064 }
 0xb90   :  { %v7066_v58 = vsub.f32 %v7061_v50, %v7065_v19  ;;  %v6996_v50 = vadd.f32 %v6994_v62, %v6326_v54 }
 0xb92   :  { %v7067_v20 = vmul.f32 1.442695, %v7066_v58  ;;  %v6999_v53 = vsub.f32 %v6996_v50, %v6997_v16  ;;  %v7660_v16 = vsel %vm7062_vm12, %v15041_v63, 0.0 }
 0xb94   :  { %8906 = vpow2.f32 %v7067_v20  ;;  %v7669_v7 = vadd.f32 %v7667_v51, %v6999_v53  ;;  %v16092_v51 = vld [vmem:[#allocation35_spill] sm:$0xff] }
 0xb95   :  { %8908 = vrcp.f32 %v6399_v8  ;;  %v16087_v8 = vld [vmem:[#allocation86_spill] sm:$0xff] }
 0xb96   :  { %v7672_v14 = vsub.f32 %v7669_v7, %v7670_v36 }
 0xb97   :  { %6988 = vadd.xlane.f32.xlu1 %v6987_v4 }
 0xb98   :  { %v7690_v2 = vmul.f32 0.125, %v7672_v14 }
 0xb9a   :  { %v8907_v5 = vpop.eup %8906 }
 0xb9b   :  { %v15046_v37 = vmul.f32 %v15041_v63, %v8907_v5  ;;  %v8909_v33 = vpop.eup %8908 }
 0xb9c   :  { %v15056_v10 = vmul.f32 %v8909_v33, %v14618_v55 }
 0xb9d   :  { %v7070_v12 = vsel %vm7062_vm12, %v15046_v37, 0.0 }
 0xb9e   :  { %7071 = vadd.xlane.f32.xlu2 %v7070_v12  ;;  %v15061_v27 = vperm.slane %v15056_v10, 6 }
 0xba0   :  { %v6861_v39 = vmul.f32 %v15061_v27, %v16084_v57  ;;  %v6863_v9 = vmul.f32 %v15061_v27, %v16086_v43  ;;  %v6864_v45 = vmul.f32 %v15061_v27, %v16087_v8  ;;  %v6865_v44 = vmul.f32 %v15061_v27, %v16088_v46 }
 0xba1   :  { %v6866_v19 = vmul.f32 %v15061_v27, %v16089_v42  ;;  %v6867_v18 = vmul.f32 %v15061_v27, %v16090_v49  ;;  %v6868_v12 = vmul.f32 %v15061_v27, %v16091_v59  ;;  %v6869_v7 = vmul.f32 %v15061_v27, %v16092_v51  ;;  %v16096_v42 = vld [vmem:[#allocation18_spill] sm:$0xff] }
 0xba2   :  { %v6883_v40 = vadd.f32 %v15069_v28, %v6861_v39  ;;  %v6885_v47 = vadd.f32 %v15069_v28, %v6863_v9  ;;  %v6886_v31 = vadd.f32 %v15069_v28, %v6864_v45  ;;  %v6887_v58 = vadd.f32 %v15069_v28, %v6865_v44  ;;  %v15104_v39 = vpop.permute.xlu0 %7455  ;;  %v16095_v45 = vld [vmem:[#allocation105_spill] sm:$0xff] }
 0xba3   :  { %v6888_v35 = vadd.f32 %v15069_v28, %v6866_v19  ;;  %v6889_v50 = vadd.f32 %v15069_v28, %v6867_v18  ;;  %v6890_v25 = vadd.f32 %v15069_v28, %v6868_v12  ;;  %v6870_v52 = vmul.f32 %v15061_v27, %v16093_v1  ;;  %v16097_v18 = vld [vmem:[#allocation111_spill] sm:$0xff] }
 0xba4   :  { %v6899_v61 = vmax.f32 %v6883_v40, 1e-30  ;;  %v6901_v23 = vmax.f32 %v6885_v47, 1e-30  ;;  %v6902_v6 = vmax.f32 %v6886_v31, 1e-30  ;;  %v6891_v63 = vadd.f32 %v15069_v28, %v6869_v7 }
 0xba5   :  { %v6903_v5 = vmax.f32 %v6887_v58, 1e-30  ;;  %v6904_v34 = vmax.f32 %v6888_v35, 1e-30  ;;  %v6905_v36 = vmax.f32 %v6889_v50, 1e-30  ;;  %v6872_v47 = vmul.f32 %v15061_v27, %v16095_v45 }
 0xba6   :  { %8910 = vlog2.f32 %v6899_v61  ;;  %v6907_v43 = vmax.f32 %v6891_v63, 1e-30  ;;  %v6873_v19 = vmul.f32 %v15061_v27, %v16096_v42  ;;  %v6874_v35 = vmul.f32 %v15061_v27, %v16097_v18  ;;  %v16098_v50 = vld [vmem:[#allocation52_spill] sm:$0xff] }
 0xba7   :  { %v15058_v60 = vpop.permute.xlu1 %7460  ;;  %v6894_v58 = vadd.f32 %v15069_v28, %v6872_v47 }
 0xbac   :  { %v8911_v17 = vpop.eup %8910 }
 0xbad   :  { %v6916_v26 = vmul.f32 0.6931472, %v8911_v17 }
 0xbaf   :  { %v15067_v22 = vpop.permute.xlu1 %7470 }
 0xbb0   :  { %7692 = vrot.lane.b32.xlu1 %v7690_v2, %s9040_s22  ;;  %s8151_s22 = spop %8150 }
 0xbb6   :  { %7505 = vperm.xlu2 %8164, %v14930_v30   ;;  %v6862_v30 = vmul.f32 %v15061_v27, %v16085_v32 }
 0xbb7   :  { %v15078_v24 = vpop.permute.xlu1 %7480 }
 0xbb8   :  { %v6884_v55 = vadd.f32 %v15069_v28, %v6862_v30  ;;  %v16094_v30 = vld [vmem:[#allocation110_spill] sm:$0xff] }
 0xbb9   :  { %v6871_v40 = vmul.f32 %v15061_v27, %v16094_v30 }
 0xbba   :  { %v6900_v0 = vmax.f32 %v6884_v55, 1e-30  ;;  %v6892_v55 = vadd.f32 %v15069_v28, %v6870_v52 }
 0xbbb   :  { %v6893_v46 = vadd.f32 %v15069_v28, %v6871_v40 }
 0xbbc   :  { %8912 = vlog2.f32 %v6900_v0  ;;  %v6908_v44 = vmax.f32 %v6892_v55, 1e-30 }
 0xbbd   :  { %8914 = vlog2.f32 %v6901_v23 }
 0xbbe   :  { %6972 = vperm.xlu2 %8164, %v6779_v15   ;;  %8916 = vlog2.f32 %v6902_v6  ;;  %v6906_v15 = vmax.f32 %v6890_v25, 1e-30  ;;  %v6909_v6 = vmax.f32 %v6893_v46, 1e-30 }
 0xbbf   :  { %v15086_v20 = vpop.permute.xlu1 %7490  ;;  %8918 = vlog2.f32 %v6903_v5  ;;  %v6895_v5 = vadd.f32 %v15069_v28, %v6873_v19 }
 0xbc0   :  { %8920 = vlog2.f32 %v6904_v34  ;;  %v6875_v34 = vmul.f32 %v15061_v27, %v16098_v50 }
 0xbc1   :  { %8922 = vlog2.f32 %v6905_v36 }
 0xbc2   :  { %v8913_v29 = vpop.eup %8912  ;;  %8924 = vlog2.f32 %v6906_v15  ;;  %v6897_v36 = vadd.f32 %v15069_v28, %v6875_v34 }
 0xbc3   :  { %v6918_v4 = vmul.f32 0.6931472, %v8913_v29  ;;  %v8915_v54 = vpop.eup %8914  ;;  %8926 = vlog2.f32 %v6907_v43  ;;  %v7466_v29 = vpop.permute.xlu0 %7465 }
 0xbc4   :  { %v6920_v41 = vmul.f32 0.6931472, %v8915_v54  ;;  %v8917_v53 = vpop.eup %8916  ;;  %8928 = vlog2.f32 %v6908_v44  ;;  %v6910_v54 = vmax.f32 %v6894_v58, 1e-30  ;;  %v6913_v63 = vmax.f32 %v6897_v36, 1e-30 }
 0xbc5   :  { %v6947_v62 = vadd.f32 %v6918_v4, %v6916_v26  ;;  %v6922_v3 = vmul.f32 0.6931472, %v8917_v53  ;;  %v8919_v2 = vpop.eup %8918  ;;  %8930 = vlog2.f32 %v6909_v6  ;;  %v6911_v53 = vmax.f32 %v6895_v5, 1e-30 }
 0xbc6   :  { %v6924_v33 = vmul.f32 0.6931472, %v8919_v2  ;;  %v8921_v57 = vpop.eup %8920  ;;  %8932 = vlog2.f32 %v6910_v54 }
 0xbc7   :  { %v6948_v11 = vadd.f32 %v6947_v62, %v6920_v41  ;;  %v15099_v14 = vpop.permute.xlu1 %7500  ;;  %v6926_v9 = vmul.f32 0.6931472, %v8921_v57  ;;  %v8923_v61 = vpop.eup %8922  ;;  %8934 = vlog2.f32 %v6911_v53 }
 0xbc8   :  { %v6928_v31 = vmul.f32 0.6931472, %v8923_v61  ;;  %v8925_v23 = vpop.eup %8924 }
 0xbc9   :  { %v6949_v13 = vadd.f32 %v6948_v11, %v6922_v3  ;;  %v6930_v26 = vmul.f32 0.6931472, %v8925_v23  ;;  %v8927_v4 = vpop.eup %8926 }
 0xbca   :  { %v6932_v62 = vmul.f32 0.6931472, %v8927_v4  ;;  %v8929_v12 = vpop.eup %8928 }
 0xbcb   :  { %v6950_v32 = vadd.f32 %v6949_v13, %v6924_v33  ;;  %v6934_v51 = vmul.f32 0.6931472, %v8929_v12  ;;  %v8931_v7 = vpop.eup %8930  ;;  %v7476_v25 = vpop.permute.xlu0 %7475 }
 0xbcc   :  { %v6936_v1 = vmul.f32 0.6931472, %v8931_v7  ;;  %v8933_v52 = vpop.eup %8932 }
 0xbcd   :  { %v6951_v8 = vadd.f32 %v6950_v32, %v6926_v9  ;;  %v6938_v57 = vmul.f32 0.6931472, %v8933_v52  ;;  %v8935_v32 = vpop.eup %8934 }
 0xbce   :  { %v6940_v40 = vmul.f32 0.6931472, %v8935_v32 }
 0xbcf   :  { %v15109_v0 = vpop.permute.xlu1 %7515  ;;  %v6952_v17 = vadd.f32 %v6951_v8, %v6928_v31 }
 0xbd1   :  { %v6953_v49 = vadd.f32 %v6952_v17, %v6930_v26 }
 0xbd3   :  { %v6954_v41 = vadd.f32 %v6953_v49, %v6932_v62  ;;  %v7486_v30 = vpop.permute.xlu0 %7485 }
 0xbd5   :  { %v6955_v3 = vadd.f32 %v6954_v41, %v6934_v51 }
 0xbd7   :  { %v6858_v59 = vpop.permute.xlu1 %6857  ;;  %v6956_v15 = vadd.f32 %v6955_v3, %v6936_v1 }
 0xbd8   :  { %v6876_v11 = vmul.f32 %v15061_v27, %v6858_v59 }
 0xbd9   :  { %v6957_v27 = vadd.f32 %v6956_v15, %v6938_v57 }
 0xbda   :  { %v6898_v13 = vadd.f32 %v15069_v28, %v6876_v11 }
 0xbdb   :  { %v6958_v43 = vadd.f32 %v6957_v27, %v6940_v40  ;;  %v7496_v44 = vpop.permute.xlu0 %7495 }
 0xbdc   :  { %v6914_v33 = vmax.f32 %v6898_v13, 1e-30 }
 0xbe3   :  { %v7511_v18 = vpop.permute.xlu0 %7510 }
 0xbe7   :  { %7661 = vadd.xlane.f32.xlu2 %v7660_v16  ;;  %v6896_v16 = vadd.f32 %v15069_v28, %v6874_v35  ;;  %v15139_v35 = vstv %s8151_s22 }
 0xbe9   :  { %v6912_v2 = vmax.f32 %v6896_v16, 1e-30 }
 0xbeb   :  { %8936 = vlog2.f32 %v6912_v2  ;;  %v7521_v36 = vpop.permute.xlu0 %7520 }
 0xbec   :  { %8938 = vlog2.f32 %v6913_v63 }
 0xbed   :  { %8940 = vlog2.f32 %v6914_v33 }
 0xbf1   :  { %v8937_v55 = vpop.eup %8936 }
 0xbf2   :  { %v8939_v9 = vpop.eup %8938  ;;  %v6942_v61 = vmul.f32 0.6931472, %v8937_v55 }
 0xbf3   :  { %v8941_v8 = vpop.eup %8940  ;;  %v6944_v47 = vmul.f32 0.6931472, %v8939_v9 }
 0xbf4   :  { %v6959_v28 = vadd.f32 %v6958_v43, %v6942_v61  ;;  %v6946_v46 = vmul.f32 0.6931472, %v8941_v8 }
 0xbf6   :  { %v6960_v31 = vadd.f32 %v6959_v28, %v6944_v47 }
 0xbf8   :  { %v6961_v17 = vadd.f32 %v6960_v31, %v6946_v46 }
 0xbfa   :  { %v6962_v58 = vrot.slane %v6961_v17, 4 }
 0xc11   :  { %v7072_v45 = vpop.xlane.xlu2 %7071 }
 0xc12   :  { %8942 = vrcp.f32 %v7072_v45 }
 0xc18   :  { %v8943_v23 = vpop.eup %8942 }
 0xc19   :  { %v15127_v42 = vmul.f32 %v8943_v23, %v15046_v37  ;;  %v6963_v37 = vadd.f32 %v6962_v58, %v6961_v17  ;;  %v7506_v59 = vpop.permute.xlu2 %7505 }
 0xc1b   :  { %v15130_v19 = vperm.slane %v15127_v42, 7  ;;  %v6964_v12 = vrot.slane %v6963_v37, 2 }
 0xc1d   :  { %v7534_v6 = vmul.f32 %v15130_v19, %v15104_v39  ;;  %v7535_v26 = vmul.f32 %v15130_v19, %v15058_v60  ;;  %v7536_v4 = vmul.f32 %v15130_v19, %v7466_v29  ;;  %v7537_v49 = vmul.f32 %v15130_v19, %v15067_v22 }
 0xc1e   :  { %v7538_v5 = vmul.f32 %v15130_v19, %v7476_v25  ;;  %v7539_v60 = vmul.f32 %v15130_v19, %v15078_v24  ;;  %v7540_v22 = vmul.f32 %v15130_v19, %v7486_v30  ;;  %v7541_v53 = vmul.f32 %v15130_v19, %v15086_v20 }
 0xc1f   :  { %v7556_v54 = vadd.f32 %v15139_v35, %v7534_v6  ;;  %v7557_v62 = vadd.f32 %v15139_v35, %v7535_v26  ;;  %v7558_v39 = vadd.f32 %v15139_v35, %v7536_v4  ;;  %v7559_v29 = vadd.f32 %v15139_v35, %v7537_v49  ;;  %v7526_v26 = vpop.permute.xlu0 %7525  ;;  %v15173_v49 = vld [vmem:[%s15207_s2] sm:$0xff] }
 0xc20   :  { %v7560_v50 = vadd.f32 %v15139_v35, %v7538_v5  ;;  %v7561_v11 = vadd.f32 %v15139_v35, %v7539_v60  ;;  %v7542_v24 = vmul.f32 %v15130_v19, %v7496_v44  ;;  %v7562_v7 = vadd.f32 %v15139_v35, %v7540_v22 }
 0xc21   :  { %v7572_v34 = vmax.f32 %v7556_v54, 1e-30  ;;  %v7573_v41 = vmax.f32 %v7557_v62, 1e-30  ;;  %v7574_v16 = vmax.f32 %v7558_v39, 1e-30  ;;  %v6965_v3 = vadd.f32 %v6964_v12, %v6963_v37  ;;  %v6973_v32 = vpop.permute.xlu2 %6972  ;;  %v7531_v39 = vpop.permute.xlu1 %7530 }
 0xc22   :  { %v7575_v51 = vmax.f32 %v7559_v29, 1e-30  ;;  %v7576_v25 = vmax.f32 %v7560_v50, 1e-30  ;;  %v7543_v2 = vmul.f32 %v15130_v19, %v15099_v14  ;;  %v7563_v13 = vadd.f32 %v15139_v35, %v7541_v53  ;;  %v9008_v53 = vld [vmem:[%s15211_s6] sm:$0xff]  ;;  %s9042_s6 = smov [#allocation2]  }
 0xc23   :  { %8944 = vlog2.f32 %v7572_v34  ;;  %v7577_v1 = vmax.f32 %v7561_v11, 1e-30  ;;  %v7544_v20 = vmul.f32 %v15130_v19, %v7506_v59  ;;  %v7564_v52 = vadd.f32 %v15139_v35, %v7542_v24  ;;  %s7703_s26 = sshll.u32 %s9042_s6, 4  ;;  %s7704_s26 = int_to_ptr.vmem [resolvable:$true] %s7703_s26 }
 0xc24   :  { %8946 = vlog2.f32 %v7573_v41  ;;  %v7578_v63 = vmax.f32 %v7562_v7, 1e-30  ;;  %v7545_v33 = vmul.f32 %v15130_v19, %v7511_v18  ;;  %v7565_v57 = vadd.f32 %v15139_v35, %v7543_v2 }
 0xc25   :  { %8948 = vlog2.f32 %v7574_v16  ;;  %v6966_v27 = vrot.slane %v6965_v3, 1  ;;  %v7579_v14 = vmax.f32 %v7563_v13, 1e-30  ;;  %v6975_v55 = vmul.f32 %v6973_v32, %v15056_v10 }
 0xc26   :  { %8950 = vlog2.f32 %v7575_v51  ;;  %v7546_v45 = vmul.f32 %v15130_v19, %v15109_v0  ;;  %v7566_v28 = vadd.f32 %v15139_v35, %v7544_v20  ;;  %v7580_v47 = vmax.f32 %v7564_v52, 1e-30 }
 0xc27   :  { %8952 = vlog2.f32 %v7576_v25  ;;  %v6967_v61 = vadd.f32 %v6966_v27, %v6965_v3  ;;  %v6976_v23 = vadd.f32 %v6975_v55, %v15976_v48  ;;  %v7547_v10 = vmul.f32 %v15130_v19, %v7521_v36 }
 0xc28   :  { %8954 = vlog2.f32 %v7577_v1  ;;  %v7567_v58 = vadd.f32 %v15139_v35, %v7545_v33  ;;  %v7581_v6 = vmax.f32 %v7565_v57, 1e-30  ;;  %v7548_v5 = vmul.f32 %v15130_v19, %v7526_v26 }
 0xc29   :  { %v8945_v15 = vpop.eup %8944  ;;  %8956 = vlog2.f32 %v7578_v63  ;;  %v6968_v31 = vmul.f32 %v6967_v61, %v14140_v38  ;;  %v7568_v54 = vadd.f32 %v15139_v35, %v7546_v45  ;;  %v7582_v62 = vmax.f32 %v7566_v28, 1e-30 }
 0xc2a   :  { %v8947_v30 = vpop.eup %8946  ;;  %v7589_v40 = vmul.f32 0.6931472, %v8945_v15  ;;  %8958 = vlog2.f32 %v7579_v14  ;;  %v7549_v22 = vmul.f32 %v15130_v19, %v7531_v39  ;;  %v7569_v50 = vadd.f32 %v15139_v35, %v7547_v10 }
 0xc2b   :  { %v8949_v43 = vpop.eup %8948  ;;  %v7591_v9 = vmul.f32 0.6931472, %v8947_v30  ;;  %v6969_v18 = vmul.f32 %v15173_v49, %v6968_v31  ;;  %8960 = vlog2.f32 %v7580_v47  ;;  %v7583_v34 = vmax.f32 %v7567_v58, 1e-30 }
 0xc2c   :  { %v8951_v8 = vpop.eup %8950  ;;  %v7593_v46 = vmul.f32 0.6931472, %v8949_v43  ;;  %8962 = vlog2.f32 %v7581_v6  ;;  %v7570_v24 = vadd.f32 %v15139_v35, %v7548_v5  ;;  %v7584_v7 = vmax.f32 %v7568_v54, 1e-30  ;;  %v7646_v5 = vpop.permute.xlu0 %7645 }
 0xc2d   :  { %v7620_v44 = vadd.f32 %v7591_v9, %v7589_v40  ;;  %v8953_v17 = vpop.eup %8952  ;;  %v7595_v4 = vmul.f32 0.6931472, %v8951_v8  ;;  %v6977_v59 = vsub.f32 %v6969_v18, %v6976_v23  ;;  %8964 = vlog2.f32 %v7582_v62 }
 0xc2e   :  { %v8955_v37 = vpop.eup %8954  ;;  %v7597_v60 = vmul.f32 0.6931472, %v8953_v17  ;;  %v7571_v2 = vadd.f32 %v15139_v35, %v7549_v22  ;;  %v7585_v13 = vmax.f32 %v7569_v50, 1e-30  ;;  %8966 = vlog2.f32 %v7583_v34  ;;  %v16099_v34 = vld [vmem:[#allocation12_spill] sm:$0xff] }
 0xc2f   :  { %v7621_v0 = vadd.f32 %v7620_v44, %v7593_v46  ;;  %v8957_v12 = vpop.eup %8956  ;;  %v7599_v41 = vmul.f32 0.6931472, %v8955_v37  ;;  %v6978_v11 = vsub.f32 %v6977_v59, %v9008_v53  ;;  %v7586_v15 = vmax.f32 %v7570_v24, 1e-30 }
 0xc30   :  { %v8959_v51 = vpop.eup %8958  ;;  %v7601_v25 = vmul.f32 0.6931472, %v8957_v12  ;;  %8968 = vlog2.f32 %v7584_v7  ;;  %v7587_v27 = vmax.f32 %v7571_v2, 1e-30  ;;  %v7648_v54 = vmul.f32 %v7646_v5, %v15127_v42  ;;  %v16101_v42 = vld [vmem:[#allocation25_spill] sm:$0xff] }
 0xc31   :  { %v7622_v29 = vadd.f32 %v7621_v0, %v7595_v4  ;;  %v6979_v19 = vsel %vm2335_vm8, %v6978_v11, 0.0  ;;  %v8961_v3 = vpop.eup %8960  ;;  %v7603_v20 = vmul.f32 0.6931472, %v8959_v51  ;;  %8970 = vlog2.f32 %v7585_v13 }
 0xc32   :  { %v6980_v1 = vsel %vm6389_vm11, %v6979_v19, 0.0  ;;  %v8963_v63 = vpop.eup %8962  ;;  %v7605_v33 = vmul.f32 0.6931472, %v8961_v3  ;;  %8972 = vlog2.f32 %v7586_v15  ;;  %v4299_v51 = vrot.slane %v16101_v42, 2  ;;  %v16104_v19 = vld [vmem:[#allocation68_spill] sm:$0xff] }
 0xc33   :  { %v7623_v16 = vadd.f32 %v7622_v29, %v7597_v60  ;;  %6981 = vadd.xlane.f32.xlu0 %v6980_v1  ;;  %v8965_v32 = vpop.eup %8964  ;;  %v7607_v30 = vmul.f32 0.6931472, %v8963_v63  ;;  %8974 = vlog2.f32 %v7587_v27  ;;  %v7649_v29 = vadd.f32 %v7648_v54, %v15976_v48 }
 0xc34   :  { %v8967_v40 = vpop.eup %8966  ;;  %v7609_v35 = vmul.f32 0.6931472, %v8965_v32  ;;  %v6318_v21 = vrot.slane %v16104_v19, 5 }
 0xc35   :  { %v7624_v36 = vadd.f32 %v7623_v16, %v7599_v41  ;;  %v7611_v9 = vmul.f32 0.6931472, %v8967_v40  ;;  %v3624_v41 = vrot.slane %v16099_v34, 1  ;;  %v16100_v16 = vld [vmem:[#allocation9_spill] sm:$0xff] }
 0xc36   :  { %v8969_v43 = vpop.eup %8968 }
 0xc37   :  { %v7625_v52 = vadd.f32 %v7624_v36, %v7601_v25  ;;  %v8971_v8 = vpop.eup %8970  ;;  %v7613_v45 = vmul.f32 0.6931472, %v8969_v43  ;;  %v3626_v11 = vadd.f32 %v3624_v41, %v16100_v16  ;;  %v16103_v25 = vld [vmem:[#allocation61_spill] sm:$0xff]  ;;  %v6989_v36 = vpop.xlane.xlu1 %6988 }
 0xc38   :  { %v8973_v47 = vpop.eup %8972  ;;  %v7615_v46 = vmul.f32 0.6931472, %v8971_v8  ;;  %v5645_v48 = vrot.slane %v16103_v25, 4  ;;  %v6991_v2 = vrot.slane %v6989_v36, 6 }
 0xc39   :  { %v7626_v57 = vadd.f32 %v7625_v52, %v7603_v20  ;;  %v8975_v31 = vpop.eup %8974  ;;  %v7617_v23 = vmul.f32 0.6931472, %v8973_v47  ;;  %v4301_v24 = vadd.f32 %v4299_v51, %v3626_v11 }
 0xc3a   :  { %v7619_v10 = vmul.f32 0.6931472, %v8975_v31 }
 0xc3b   :  { %v7627_v14 = vadd.f32 %v7626_v57, %v7605_v33 }
 0xc3d   :  { %v7628_v55 = vadd.f32 %v7627_v14, %v7607_v30 }
 0xc3f   :  { %v7629_v61 = vadd.f32 %v7628_v55, %v7609_v35 }
 0xc41   :  { %v7630_v28 = vadd.f32 %v7629_v61, %v7611_v9 }
 0xc43   :  { %v7631_v44 = vadd.f32 %v7630_v28, %v7613_v45 }
 0xc45   :  { %v7632_v17 = vadd.f32 %v7631_v44, %v7615_v46  ;;  %v7693_v44 = vpop.permute.xlu1 %7692 }
 0xc47   :  { %v7633_v58 = vadd.f32 %v7632_v17, %v7617_v23 }
 0xc49   :  { %v7634_v6 = vadd.f32 %v7633_v58, %v7619_v10 }
 0xc4b   :  { %v7635_v26 = vrot.slane %v7634_v6, 4 }
 0xc4d   :  { %v7636_v4 = vadd.f32 %v7635_v26, %v7634_v6 }
 0xc4f   :  { %v7637_v0 = vrot.slane %v7636_v4, 2 }
 0xc51   :  { %v7638_v18 = vadd.f32 %v7637_v0, %v7636_v4 }
 0xc53   :  { %v7639_v37 = vrot.slane %v7638_v18, 1 }
 0xc55   :  { %v7640_v62 = vadd.f32 %v7639_v37, %v7638_v18 }
 0xc57   :  { %v7641_v39 = vmul.f32 %v7640_v62, %v14140_v38  ;;  %v16102_v38 = vld [vmem:[#allocation43_spill] sm:$0xff] }
 0xc58   :  { %v4972_v7 = vrot.slane %v16102_v38, 3 }
 0xc59   :  { %v7642_v60 = vmul.f32 %v15173_v49, %v7641_v39 }
 0xc5a   :  { %v4974_v49 = vadd.f32 %v4972_v7, %v4301_v24  ;;  %v7662_v3 = vpop.xlane.xlu2 %7661 }
 0xc5b   :  { %v7650_v59 = vsub.f32 %v7642_v60, %v7649_v29  ;;  %v7664_v1 = vrot.slane %v7662_v3, 7 }
 0xc5d   :  { %v7651_v12 = vsub.f32 %v7650_v59, %v9008_v53  ;;  %v5647_v53 = vadd.f32 %v5645_v48, %v4974_v49 }
 0xc5f   :  { %v7652_v22 = vsel %vm2335_vm8, %v7651_v12, 0.0  ;;  %v6320_v13 = vadd.f32 %v6318_v21, %v5647_v53 }
 0xc60   :  { %v7653_v50 = vsel %vm7062_vm12, %v7652_v22, 0.0 }
 0xc61   :  { %7654 = vadd.xlane.f32.xlu2 %v7653_v50  ;;  %v6993_v20 = vadd.f32 %v6991_v2, %v6320_v13 }
 0xc63   :  { %v7666_v52 = vadd.f32 %v7664_v1, %v6993_v20 }
 0xc65   :  { %v7674_v63 = vmax.f32 %v7666_v52, 1.0 }
 0xc67   :  { %8976 = vrcp.f32 %v7674_v63  ;;  %v7686_v40 = vand.u32 2147483648, %v7674_v63  ;;  %vm7680_vm14 = vweird.f32 %v7674_v63  ;;  %v7684_v43 = vand.u32 2147483647, %v7674_v63 }
 0xc69   :  { %v7687_v45 = vor.u32 1.1754944e-38, %v7686_v40  ;;  %vm7685_vm0 = vcmp.eq.f32.partialorder %v7684_v43, 8.507059e+37 }
 0xc6d   :  { %v8977_v15 = vpop.eup %8976 }
 0xc6e   :  { %v7676_v33 = vmul.f32 %v8977_v15, %v7674_v63  ;;  %vm7681_vm13 = vweird.f32 %v8977_v15 }
 0xc6f   :  { %vm7682_vm15 = vmor %vm7680_vm14, %vm7681_vm13 }
 0xc70   :  { %v7677_v57 = vsub.f32 1.0, %v7676_v33 }
 0xc72   :  { %v7678_v27 = vmul.f32 %v8977_v15, %v7677_v57 }
 0xc74   :  { %v7679_v14 = vadd.f32 %v8977_v15, %v7678_v27 }
 0xc76   :  { %v7683_v61 = vsel %vm7682_vm15, %v8977_v15, %v7679_v14 }
 0xc77   :  { %v7688_v47 = vsel %vm7685_vm0, %v7687_v45, %v7683_v61 }
 0xca6   :  { %v6982_v32 = vpop.xlane.xlu0 %6981 }
 0xca7   :  { %v6984_v30 = vrot.slane %v6982_v32, 6 }
 0xca9   :  { %v6986_v55 = vadd.f32 %v6984_v30, %v15036_v56 }
 0xcd4   :  { %v7655_v35 = vpop.xlane.xlu2 %7654 }
 0xcd5   :  { %v7657_v9 = vrot.slane %v7655_v35, 7 }
 0xcd7   :  { %v7659_v8 = vadd.f32 %v7657_v9, %v6986_v55 }
 0xcd9   :  { %v7673_v28 = vsub.f32 0.0, %v7659_v8 }
 0xcdb   :  { %v7689_v46 = vmul.f32 %v7688_v47, %v7673_v28 }
 0xcdd   :  { %v7695_v56 = vadd.f32 %v7693_v44, %v7689_v46 }
 0xcdf   :  { %7697 = vst.msk [vmem:[#allocation2] sm:$0x1] %vm7696_vm1, %v7695_v56 }
 0xce0   :  { %7708 = dma.vmem_to_hbm [thread:$0]  %s7704_s26, 16, %s7706_s28, [#allocation3]  }
 0xce1   :  { %9033 = dma.done.wait [#allocation3], 16  }
 0xce2   :  { %9034 = vsyncadd [#allocation3], 4294967280 }
 0xce3   :  { %7713 = vsyncpa [#allocation3], 1 }

</bundles_post_ra>
